<compile_context>
chip_gen: v7x
topology: tpu7x:2x2x1
jax: 0.10.0
libtpu: 0.0.40
codegen_flags: <defaults>
</compile_context>

<pallas_src>
import jax
import jax.numpy as jnp
from jax.experimental import pallas as pl
from jax.experimental.pallas import tpu as pltpu

IN_FEATURES = 3 * 32 * 32   # 3072 (already a multiple of 128)
H1 = 1000
H2 = 500
NUM_CLASSES = 10

# Lane-aligned (padded) dims used inside the kernel.
H1P = 1024
H2P = 512
CP = 128

NEG_INF = -1e30  # f32 mask value for padded class lanes (kept in f32 bias)


def _round_up(x, m):
    return ((x + m - 1) // m) * m


def _pad2(a, rows, cols, value=0.0):
    """Pad a 2D array up to (rows, cols) with a constant."""
    r, c = a.shape
    return jnp.pad(a, ((0, rows - r), (0, cols - c)), constant_values=value)


def _relu6(x):
    return jnp.clip(x, 0.0, 6.0)


def fcquantnet_kernel(x_ref, w1_ref, b1_ref, w2_ref, b2_ref, w3_ref, b3_ref,
                      out_ref):
    """One batch tile of the forward pass (weights resident in VMEM).

    x_ref : (TB, 3072)  bf16
    w1_ref: (3072, 1024) bf16, b1_ref: (1, 1024) f32
    w2_ref: (1024, 512)  bf16, b2_ref: (1, 512)  f32
    w3_ref: (512, 128)   bf16, b3_ref: (1, 128)  f32 (padded lanes = -1e30)
    out_ref: (TB, 128) f32 softmax probabilities (only first 10 lanes valid)
    """
    x = x_ref[...]  # already bf16 — no in-kernel cast of the input tile

    # fc1 + ReLU6 (dropout / quant stubs are identity in eval).
    h1 = jnp.dot(x, w1_ref[...], preferred_element_type=jnp.float32)
    h1 = _relu6(h1 + b1_ref[...])

    # fc2 + ReLU6
    h2 = jnp.dot(h1.astype(jnp.bfloat16), w2_ref[...],
                 preferred_element_type=jnp.float32)
    h2 = _relu6(h2 + b2_ref[...])

    # fc3 — padded class lanes already carry the -1e30 bias, so no mask needed.
    logits = jnp.dot(h2.astype(jnp.bfloat16), w3_ref[...],
                     preferred_element_type=jnp.float32)
    logits = logits + b3_ref[...]

    # Numerically stable softmax over the (padded) class dim; exact divide so
    # rows sum to 1 within f32 rounding.
    m = jnp.max(logits, axis=-1, keepdims=True)
    e = jnp.exp(logits - m)
    denom = jnp.sum(e, axis=-1, keepdims=True)
    out_ref[...] = e / denom


def prepare_params(params):
    """One-time padding + bf16 cast of the weights (hoisted out of forward).

    Zero-padded weight columns give ReLU6(0 + 0-bias) = 0 activations, and
    zero-padded weight rows of the next layer contribute nothing, so results
    are unchanged.  b3's padded lanes are -1e30 so padded logits are already
    masked for the softmax.
    """
    w1, b1, w2, b2, w3, b3 = params  # f32, weights stored as (in, out)
    w1p = _pad2(w1, IN_FEATURES, H1P).astype(jnp.bfloat16)
    b1p = _pad2(b1.reshape(1, -1), 1, H1P).astype(jnp.float32)
    w2p = _pad2(w2, H1P, H2P).astype(jnp.bfloat16)
    b2p = _pad2(b2.reshape(1, -1), 1, H2P).astype(jnp.float32)
    w3p = _pad2(w3, H2P, CP).astype(jnp.bfloat16)
    b3p = _pad2(b3.reshape(1, -1), 1, CP, value=NEG_INF).astype(jnp.float32)
    return (w1p, b1p, w2p, b2p, w3p, b3p)


def fcquantnet_forward(x_nchw, prepared_params):
    """x_nchw: (B, 3, 32, 32) float32. Returns (B, 10) softmax probs."""
    w1p, b1p, w2p, b2p, w3p, b3p = prepared_params
    B = x_nchw.shape[0]

    # Stream activations as bf16 (MXU input dtype); accumulation stays f32.
    x = x_nchw.reshape(B, IN_FEATURES).astype(jnp.bfloat16)

    # Batch tiling: TB rows per grid step (bf16 sublane-aligned -> multiple of
    # 16), weights VMEM-resident.  TB capped at 512 so the footprint fits
    # v7x's 64 MiB VMEM with headroom; for big B this also keeps num_tiles >= 2
    # so the "parallel" grid axis can span both v7x TensorCores.
    TB = min(512, _round_up(B, 16))
    B_pad = _round_up(B, TB)
    if B_pad != B:
        x = jnp.pad(x, ((0, B_pad - B), (0, 0)))
    num_tiles = B_pad // TB

    resident = pl.Buffered(1)  # constant index_map -> never re-fetched

    out_padded = pl.pallas_call(
        fcquantnet_kernel,
        out_shape=jax.ShapeDtypeStruct((B_pad, CP), jnp.float32),
        grid_spec=pltpu.PrefetchScalarGridSpec(
            num_scalar_prefetch=0,
            grid=(num_tiles,),
            in_specs=[
                # activations: one batch tile per grid step (double-buffered)
                pl.BlockSpec((TB, IN_FEATURES), lambda i: (i, 0)),
                # weights / biases: constant block index, single-buffered
                pl.BlockSpec((IN_FEATURES, H1P), lambda i: (0, 0),
                             pipeline_mode=resident),
                pl.BlockSpec((1, H1P), lambda i: (0, 0), pipeline_mode=resident),
                pl.BlockSpec((H1P, H2P), lambda i: (0, 0), pipeline_mode=resident),
                pl.BlockSpec((1, H2P), lambda i: (0, 0), pipeline_mode=resident),
                pl.BlockSpec((H2P, CP), lambda i: (0, 0), pipeline_mode=resident),
                pl.BlockSpec((1, CP), lambda i: (0, 0), pipeline_mode=resident),
            ],
            out_specs=pl.BlockSpec((TB, CP), lambda i: (i, 0)),
        ),
        compiler_params=pltpu.CompilerParams(
            # batch tiles are independent -> shard across cores where possible
            dimension_semantics=("parallel",),
            # bf16 weights (~7 MiB, single-buffered) + double-buffered bf16 x
            # tiles (2 x 3 MiB at TB=512) + f32 intermediates fit comfortably;
            # 48 MiB is valid on v7x's 64 MiB VMEM and overrides v5e's 16 MiB
            # default scoped limit.
            vmem_limit_bytes=48 * 1024 * 1024,
        ),
    )(x, w1p, b1p, w2p, b2p, w3p, b3p)

    return out_padded[:B, :NUM_CLASSES]


def init_params(key):
    """Deterministic init mimicking nn.Linear default (U[-1/sqrt(fan_in), +])."""
    ks = jax.random.split(key, 6)

    def linear(kw, kb, fan_in, fan_out):
        bound = 1.0 / jnp.sqrt(jnp.float32(fan_in))
        # stored as (in, out) so the kernel computes x @ W
        w = jax.random.uniform(kw, (fan_in, fan_out), jnp.float32, -bound, bound)
        b = jax.random.uniform(kb, (1, fan_out), jnp.float32, -bound, bound)
        return w, b

    w1, b1 = linear(ks[0], ks[1], IN_FEATURES, H1)
    w2, b2 = linear(ks[2], ks[3], H1, H2)
    w3, b3 = linear(ks[4], ks[5], H2, NUM_CLASSES)
    return (w1, b1, w2, b2, w3, b3)


def _reference_forward(x_nchw, params):
    """Pure-JAX f32 reference of the PyTorch forward (eval mode)."""
    w1, b1, w2, b2, w3, b3 = params
    x = x_nchw.reshape(x_nchw.shape[0], IN_FEATURES).astype(jnp.float32)
    h1 = _relu6(x @ w1 + b1)
    h2 = _relu6(h1 @ w2 + b2)
    logits = h2 @ w3 + b3
    return jax.nn.softmax(logits, axis=-1)


if __name__ == "__main__":
    key = jax.random.PRNGKey(0)
    k_params, k_x = jax.random.split(key)

    params = init_params(k_params)
    # Pad/cast the weights once, outside the forward path.
    prepared = prepare_params(params)
    prepared = jax.block_until_ready(prepared)

    # Small batch; feature dims are fixed by the module (3*32*32 input).
    x = jax.random.normal(k_x, (2, 3, 32, 32), dtype=jnp.float32)

    probs = fcquantnet_forward(x, prepared)
    probs = jax.block_until_ready(probs)

    assert probs.shape == (2, NUM_CLASSES)
    # softmax rows must sum to ~1 (exact divide in the kernel)
    row_sums = jnp.sum(probs, axis=-1)
    assert bool(jnp.all(jnp.abs(row_sums - 1.0) < 1e-3))
    # loose check vs f32 reference (bf16 weight/activation streaming is
    # intentional; f32 MXU accumulation keeps the error well inside 2e-2)
    ref = _reference_forward(x, params)
    assert bool(jnp.all(jnp.abs(probs - ref) < 2e-2))

    print("KERNEL_OK")
</pallas_src>

<mosaic_0001>
module attributes {stable_mosaic.version = 11 : i64} {
  func.func @fcquantnet_kernel(%arg0: i32, %arg1: memref<16x3072xbf16, #tpu.memory_space<vmem>>, %arg2: memref<3072x1024xbf16, #tpu.memory_space<vmem>>, %arg3: memref<1x1024xf32, #tpu.memory_space<vmem>>, %arg4: memref<1024x512xbf16, #tpu.memory_space<vmem>>, %arg5: memref<1x512xf32, #tpu.memory_space<vmem>>, %arg6: memref<512x128xbf16, #tpu.memory_space<vmem>>, %arg7: memref<1x128xf32, #tpu.memory_space<vmem>>, %arg8: memref<16x128xf32, #tpu.memory_space<vmem>>) attributes {dimension_semantics = [#tpu.dimension_semantics<parallel>], iteration_bounds = array<i64: 1>, scalar_prefetch = 0 : i64, scratch_operands = 0 : i64, tpu.core_type = #tpu.core_type<tc>, window_params = [{transform_indices = @transform_0, window_bounds = array<i64: 16, 3072>}, {pipeline_mode = #tpu.pipeline_mode<synchronous>, transform_indices = @transform_1, window_bounds = array<i64: 3072, 1024>}, {pipeline_mode = #tpu.pipeline_mode<synchronous>, transform_indices = @transform_2, window_bounds = array<i64: 1, 1024>}, {pipeline_mode = #tpu.pipeline_mode<synchronous>, transform_indices = @transform_3, window_bounds = array<i64: 1024, 512>}, {pipeline_mode = #tpu.pipeline_mode<synchronous>, transform_indices = @transform_4, window_bounds = array<i64: 1, 512>}, {pipeline_mode = #tpu.pipeline_mode<synchronous>, transform_indices = @transform_5, window_bounds = array<i64: 512, 128>}, {pipeline_mode = #tpu.pipeline_mode<synchronous>, transform_indices = @transform_6, window_bounds = array<i64: 1, 128>}, {transform_indices = @transform_7, window_bounds = array<i64: 16, 128>}]} {
    %c0 = arith.constant 0 : index
    %c0_0 = arith.constant 0 : index
    %0 = vector.load %arg1[%c0, %c0_0] : memref<16x3072xbf16, #tpu.memory_space<vmem>>, vector<16x3072xbf16>
    %c0_1 = arith.constant 0 : index
    %c0_2 = arith.constant 0 : index
    %1 = vector.load %arg2[%c0_1, %c0_2] : memref<3072x1024xbf16, #tpu.memory_space<vmem>>, vector<3072x1024xbf16>
    %cst = arith.constant dense<0.000000e+00> : vector<16x1024xf32>
    %2 = tpu.matmul %0, %1, %cst {dimension_numbers = #tpu.dot_dimension_numbers<[1], [0], [0], [1], [0, 0, 1, 1], [], []>} : vector<16x3072xbf16>, vector<3072x1024xbf16>, vector<16x1024xf32> -> vector<16x1024xf32>
    %c0_3 = arith.constant 0 : index
    %c0_4 = arith.constant 0 : index
    %3 = vector.load %arg3[%c0_3, %c0_4] : memref<1x1024xf32, #tpu.memory_space<vmem>>, vector<1x1024xf32>
    %4 = vector.broadcast %3 : vector<1x1024xf32> to vector<16x1024xf32>
    %5 = arith.addf %2, %4 : vector<16x1024xf32>
    %cst_5 = arith.constant 0.000000e+00 : f32
    %cst_6 = arith.constant 6.000000e+00 : f32
    %6 = vector.broadcast %cst_5 : f32 to vector<16x1024xf32>
    %7 = arith.maximumf %6, %5 : vector<16x1024xf32>
    %8 = vector.broadcast %cst_6 : f32 to vector<16x1024xf32>
    %9 = arith.minimumf %8, %7 : vector<16x1024xf32>
    %10 = arith.truncf %9 : vector<16x1024xf32> to vector<16x1024xbf16>
    %c0_7 = arith.constant 0 : index
    %c0_8 = arith.constant 0 : index
    %11 = vector.load %arg4[%c0_7, %c0_8] : memref<1024x512xbf16, #tpu.memory_space<vmem>>, vector<1024x512xbf16>
    %cst_9 = arith.constant dense<0.000000e+00> : vector<16x512xf32>
    %12 = tpu.matmul %10, %11, %cst_9 {dimension_numbers = #tpu.dot_dimension_numbers<[1], [0], [0], [1], [0, 0, 1, 1], [], []>} : vector<16x1024xbf16>, vector<1024x512xbf16>, vector<16x512xf32> -> vector<16x512xf32>
    %c0_10 = arith.constant 0 : index
    %c0_11 = arith.constant 0 : index
    %13 = vector.load %arg5[%c0_10, %c0_11] : memref<1x512xf32, #tpu.memory_space<vmem>>, vector<1x512xf32>
    %14 = vector.broadcast %13 : vector<1x512xf32> to vector<16x512xf32>
    %15 = arith.addf %12, %14 : vector<16x512xf32>
    %cst_12 = arith.constant 0.000000e+00 : f32
    %cst_13 = arith.constant 6.000000e+00 : f32
    %16 = vector.broadcast %cst_12 : f32 to vector<16x512xf32>
    %17 = arith.maximumf %16, %15 : vector<16x512xf32>
    %18 = vector.broadcast %cst_13 : f32 to vector<16x512xf32>
    %19 = arith.minimumf %18, %17 : vector<16x512xf32>
    %20 = arith.truncf %19 : vector<16x512xf32> to vector<16x512xbf16>
    %c0_14 = arith.constant 0 : index
    %c0_15 = arith.constant 0 : index
    %21 = vector.load %arg6[%c0_14, %c0_15] : memref<512x128xbf16, #tpu.memory_space<vmem>>, vector<512x128xbf16>
    %cst_16 = arith.constant dense<0.000000e+00> : vector<16x128xf32>
    %22 = tpu.matmul %20, %21, %cst_16 {dimension_numbers = #tpu.dot_dimension_numbers<[1], [0], [0], [1], [0, 0, 1, 1], [], []>} : vector<16x512xbf16>, vector<512x128xbf16>, vector<16x128xf32> -> vector<16x128xf32>
    %c0_17 = arith.constant 0 : index
    %c0_18 = arith.constant 0 : index
    %23 = vector.load %arg7[%c0_17, %c0_18] : memref<1x128xf32, #tpu.memory_space<vmem>>, vector<1x128xf32>
    %24 = vector.broadcast %23 : vector<1x128xf32> to vector<16x128xf32>
    %25 = arith.addf %22, %24 : vector<16x128xf32>
    %cst_19 = arith.constant dense<0xFF800000> : vector<16xf32>
    %26 = vector.multi_reduction <maximumf>, %25, %cst_19 [1] : vector<16x128xf32> to vector<16xf32>
    %27 = vector.shape_cast %26 : vector<16xf32> to vector<16x1xf32>
    %28 = vector.broadcast %27 : vector<16x1xf32> to vector<16x128xf32>
    %29 = arith.subf %25, %28 : vector<16x128xf32>
    %30 = math.exp %29 : vector<16x128xf32>
    %cst_20 = arith.constant dense<0.000000e+00> : vector<16xf32>
    %31 = vector.multi_reduction <add>, %30, %cst_20 [1] : vector<16x128xf32> to vector<16xf32>
    %32 = vector.shape_cast %31 : vector<16xf32> to vector<16x1xf32>
    %33 = vector.broadcast %32 : vector<16x1xf32> to vector<16x128xf32>
    %34 = arith.divf %30, %33 : vector<16x128xf32>
    %c0_21 = arith.constant 0 : index
    %c0_22 = arith.constant 0 : index
    %35 = vector.load %arg8[%c0_21, %c0_22] : memref<16x128xf32, #tpu.memory_space<vmem>>, vector<16x128xf32>
    tpu.vector_store %arg8[%c0_21, %c0_22], %34 {strides = array<i32>} : memref<16x128xf32, #tpu.memory_space<vmem>>, vector<16x128xf32>,
    return
  }
  func.func @transform_0(%arg0: i32) -> (i32, i32) {
    %c0_i32 = arith.constant 0 : i32
    %c0_i32_0 = arith.constant 0 : i32
    return %arg0, %c0_i32 : i32, i32
  }
  func.func @transform_1(%arg0: i32) -> (i32, i32) {
    %c0_i32 = arith.constant 0 : i32
    %c0_i32_0 = arith.constant 0 : i32
    %c0_i32_1 = arith.constant 0 : i32
    return %c0_i32, %c0_i32_0 : i32, i32
  }
  func.func @transform_2(%arg0: i32) -> (i32, i32) {
    %c0_i32 = arith.constant 0 : i32
    %c0_i32_0 = arith.constant 0 : i32
    %c0_i32_1 = arith.constant 0 : i32
    return %c0_i32, %c0_i32_0 : i32, i32
  }
  func.func @transform_3(%arg0: i32) -> (i32, i32) {
    %c0_i32 = arith.constant 0 : i32
    %c0_i32_0 = arith.constant 0 : i32
    %c0_i32_1 = arith.constant 0 : i32
    return %c0_i32, %c0_i32_0 : i32, i32
  }
  func.func @transform_4(%arg0: i32) -> (i32, i32) {
    %c0_i32 = arith.constant 0 : i32
    %c0_i32_0 = arith.constant 0 : i32
    %c0_i32_1 = arith.constant 0 : i32
    return %c0_i32, %c0_i32_0 : i32, i32
  }
  func.func @transform_5(%arg0: i32) -> (i32, i32) {
    %c0_i32 = arith.constant 0 : i32
    %c0_i32_0 = arith.constant 0 : i32
    %c0_i32_1 = arith.constant 0 : i32
    return %c0_i32, %c0_i32_0 : i32, i32
  }
  func.func @transform_6(%arg0: i32) -> (i32, i32) {
    %c0_i32 = arith.constant 0 : i32
    %c0_i32_0 = arith.constant 0 : i32
    %c0_i32_1 = arith.constant 0 : i32
    return %c0_i32, %c0_i32_0 : i32, i32
  }
  func.func @transform_7(%arg0: i32) -> (i32, i32) {
    %c0_i32 = arith.constant 0 : i32
    %c0_i32_0 = arith.constant 0 : i32
    return %arg0, %c0_i32 : i32, i32
  }
}

</mosaic_0001>

<bundles_post_ra>
// kernel: tpu_custom_call.1
= control target key start
LH: loop header
LB: loop body
LE: loop exit
PB: predicated region body
PF: predicated region fallthrough
CT: control target
= control target key end

     0   :  { %12 = vsyncpa [#allocation3], 0  ;;  %s17128_s0 = inlined_call_operand.hbm [shape: bf16[16,3072], index: 0, kind: input, shape index: {}]   ;;  %s17129_s1 = inlined_call_operand.hbm [shape: bf16[3072,1024], index: 1, kind: input, shape index: {}]   ;;  %s17130_s2 = inlined_call_operand.hbm [shape: f32[1,1024], index: 2, kind: input, shape index: {}]   ;;  %s17131_s3 = inlined_call_operand.hbm [shape: bf16[1024,512], index: 3, kind: input, shape index: {}]   ;;  %s17132_s4 = inlined_call_operand.hbm [shape: f32[1,512], index: 4, kind: input, shape index: {}]   ;;  %s17133_s5 = inlined_call_operand.hbm [shape: bf16[512,128], index: 5, kind: input, shape index: {}]   ;;  %s17134_s6 = inlined_call_operand.hbm [shape: f32[1,128], index: 6, kind: input, shape index: {}]   ;;  %s17135_s7 = inlined_call_operand.hbm [shape: f32[16,128], index: 7, kind: output, shape index: {}]  }
   0x1   :  { %13 = vsyncpa [#allocation6], 0 }
   0x2   :  { %14 = vsyncpa [#allocation9], 0 }
   0x3   :  { %15 = vsyncpa [#allocation12], 0 }
   0x4   :  { %16 = vsyncpa [#allocation4], 0  ;;  %s16676_s24 = smov [#allocation5]   ;;  %s16490_s28 = scalar_lea.hbm %s17129_s1, 196608 }
   0x5   :  { %s34_s25 = sshll.u32 %s16676_s24, 4  ;;  %p16491_p0 = scmp.ne.s32.totalorder %s17129_s1, %s16490_s28  ;;  %s35_s25 = int_to_ptr.vmem [resolvable:$true] %s34_s25 }
   0x6   :  { %p16494_p1 = scmp.lt.u32.totalorder %s16490_s28, %s17129_s1 }
   0x8   :  { %p16496_p2 = pnand %p16494_p1, %p16491_p0 }
   0xa   :  { %16499 = shalt.err (!%p16496_p2)
}
   0xb   :  { %s16500_s10 = scalar_lea.vmem %s35_s25, 196608  ;;  %p16505_p4 = scmp.lt.s32.totalorder %s35_s25, %s35_s25 }
   0xc   :  { %p16501_p3 = scmp.ne.s32.totalorder %s35_s25, %s16500_s10  ;;  %p16506_p5 = scmp.lt.s32.totalorder %s16500_s10, %s16500_s10 }
   0xe   :  { %p16507_p6 = por %p16506_p5, %p16505_p4 }
  0x10   :  { %p16508_p7 = pnand %p16507_p6, %p16501_p3 }
  0x12   :  { %16511 = shalt.err (!%p16508_p7)
}
  0x13   :  { %s16677_s11 = smov 512   ;;  %s16678_s12 = smov 32  }
  0x14   :  { %40 = dma.hbm_to_vmem [thread:$0]  %s17129_s1, 196608, %s35_s25, [#allocation6], %s16677_s11, %s16677_s11, %s16678_s12  }
  0x15   :  { %s16679_s15 = smov [#allocation8]   ;;  %s16512_s19 = scalar_lea.hbm %s17131_s3, 32768 }
  0x16   :  { %s56_s16 = sshll.u32 %s16679_s15, 4  ;;  %p16513_p8 = scmp.ne.s32.totalorder %s17131_s3, %s16512_s19  ;;  %s57_s16 = int_to_ptr.vmem [resolvable:$true] %s56_s16 }
  0x17   :  { %p16516_p9 = scmp.lt.u32.totalorder %s16512_s19, %s17131_s3 }
  0x19   :  { %p16518_p10 = pnand %p16516_p9, %p16513_p8 }
  0x1b   :  { %16521 = shalt.err (!%p16518_p10)
}
  0x1c   :  { %s16522_s24 = scalar_lea.vmem %s57_s16, 32768  ;;  %p16527_p12 = scmp.lt.s32.totalorder %s57_s16, %s57_s16 }
  0x1d   :  { %p16523_p11 = scmp.ne.s32.totalorder %s57_s16, %s16522_s24  ;;  %p16528_p13 = scmp.lt.s32.totalorder %s16522_s24, %s16522_s24 }
  0x1f   :  { %p16529_p0 = por %p16528_p13, %p16527_p12 }
  0x21   :  { %p16530_p1 = pnand %p16529_p0, %p16523_p11 }
  0x23   :  { %16533 = shalt.err (!%p16530_p1)
}
  0x24   :  { %s16680_s1 = smov 256   ;;  %s16681_s25 = smov 16  }
  0x25   :  { %62 = dma.hbm_to_vmem [thread:$0]  %s17131_s3, 32768, %s57_s16, [#allocation9], %s16680_s1, %s16680_s1, %s16681_s25  }
  0x26   :  { %s16682_s28 = smov [#allocation11]   ;;  %s16534_s9 = scalar_lea.hbm %s17133_s5, 4096 }
  0x27   :  { %s78_s29 = sshll.u32 %s16682_s28, 4  ;;  %p16535_p2 = scmp.ne.s32.totalorder %s17133_s5, %s16534_s9  ;;  %s79_s29 = int_to_ptr.vmem [resolvable:$true] %s78_s29 }
  0x28   :  { %p16538_p3 = scmp.lt.u32.totalorder %s16534_s9, %s17133_s5 }
  0x2a   :  { %p16540_p4 = pnand %p16538_p3, %p16535_p2 }
  0x2c   :  { %16543 = shalt.err (!%p16540_p4)
}
  0x2d   :  { %s16544_s14 = scalar_lea.vmem %s79_s29, 4096  ;;  %p16549_p6 = scmp.lt.s32.totalorder %s79_s29, %s79_s29 }
  0x2e   :  { %p16545_p5 = scmp.ne.s32.totalorder %s79_s29, %s16544_s14  ;;  %p16550_p7 = scmp.lt.s32.totalorder %s16544_s14, %s16544_s14 }
  0x30   :  { %p16551_p8 = por %p16550_p7, %p16549_p6 }
  0x32   :  { %p16552_p9 = pnand %p16551_p8, %p16545_p5 }
  0x34   :  { %16555 = shalt.err (!%p16552_p9)
}
  0x35   :  { %s16683_s3 = smov 64   ;;  %s16684_s15 = smov 4  }
  0x36   :  { %84 = dma.hbm_to_vmem [thread:$0]  %s17133_s5, 4096, %s79_s29, [#allocation12], %s16683_s3, %s16683_s3, %s16684_s15  }
  0x37   :  { %s16685_s18 = smov [#allocation2]   ;;  %s16556_s22 = scalar_lea.hbm %s17128_s0, 3072 }
  0x38   :  { %s22_s19 = sshll.u32 %s16685_s18, 4  ;;  %p16557_p10 = scmp.ne.s32.totalorder %s17128_s0, %s16556_s22  ;;  %s23_s19 = int_to_ptr.vmem [resolvable:$true] %s22_s19 }
  0x39   :  { %p16560_p11 = scmp.lt.u32.totalorder %s16556_s22, %s17128_s0 }
  0x3b   :  { %p16562_p12 = pnand %p16560_p11, %p16557_p10 }
  0x3d   :  { %16565 = shalt.err (!%p16562_p12)
}
  0x3e   :  { %s16566_s26 = scalar_lea.vmem %s23_s19, 3072  ;;  %p16571_p0 = scmp.lt.s32.totalorder %s23_s19, %s23_s19 }
  0x3f   :  { %p16567_p13 = scmp.ne.s32.totalorder %s23_s19, %s16566_s26  ;;  %p16572_p1 = scmp.lt.s32.totalorder %s16566_s26, %s16566_s26 }
  0x41   :  { %p16573_p2 = por %p16572_p1, %p16571_p0 }
  0x43   :  { %p16574_p3 = pnand %p16573_p2, %p16567_p13 }
  0x45   :  { %16577 = shalt.err (!%p16574_p3)
}
  0x46   :  { %s16686_s5 = smov 1536   ;;  %s16687_s27 = smov 96  }
  0x47   :  { %28 = dma.hbm_to_vmem [thread:$0]  %s17128_s0, 3072, %s23_s19, [#allocation3], %s16686_s5, %s16686_s5, %s16687_s27  }
  0x48   :  { %s16688_s30 = smov [#allocation7]   ;;  %s16689_s9 = smov [#allocation10]  }
  0x49   :  { %s47_s8 = sshll.u32 %s16688_s30, 4  ;;  %s69_s10 = sshll.u32 %s16689_s9, 4  ;;  %s48_s8 = int_to_ptr.vmem [resolvable:$true] %s47_s8  ;;  %s70_s10 = int_to_ptr.vmem [resolvable:$true] %s69_s10 }
  0x4a   :  { %s16578_s13 = scalar_lea.hbm %s17130_s2, 128 }
  0x4b   :  { %p16579_p4 = scmp.ne.s32.totalorder %s17130_s2, %s16578_s13  ;;  %p16582_p5 = scmp.lt.u32.totalorder %s16578_s13, %s17130_s2 }
  0x4d   :  { %p16584_p6 = pnand %p16582_p5, %p16579_p4 }
  0x4f   :  { %16587 = shalt.err (!%p16584_p6)
}
  0x50   :  { %s16588_s0 = scalar_lea.vmem %s48_s8, 128  ;;  %p16593_p8 = scmp.lt.s32.totalorder %s48_s8, %s48_s8 }
  0x51   :  { %p16589_p7 = scmp.ne.s32.totalorder %s48_s8, %s16588_s0  ;;  %p16594_p9 = scmp.lt.s32.totalorder %s16588_s0, %s16588_s0 }
  0x53   :  { %p16595_p10 = por %p16594_p9, %p16593_p8 }
  0x55   :  { %p16596_p11 = pnand %p16595_p10, %p16589_p7 }
  0x57   :  { %16599 = shalt.err (!%p16596_p11)
}
  0x58   :  { %50 = dma.hbm_to_vmem [thread:$0]  %s17130_s2, 128, %s48_s8, [#allocation6]  }
  0x59   :  { %s16600_s21 = scalar_lea.hbm %s17132_s4, 64 }
  0x5a   :  { %p16601_p12 = scmp.ne.s32.totalorder %s17132_s4, %s16600_s21  ;;  %p16604_p13 = scmp.lt.u32.totalorder %s16600_s21, %s17132_s4 }
  0x5c   :  { %p16606_p0 = pnand %p16604_p13, %p16601_p12 }
  0x5e   :  { %16609 = shalt.err (!%p16606_p0)
}
  0x5f   :  { %s16610_s25 = scalar_lea.vmem %s70_s10, 64  ;;  %p16615_p2 = scmp.lt.s32.totalorder %s70_s10, %s70_s10 }
  0x60   :  { %p16611_p1 = scmp.ne.s32.totalorder %s70_s10, %s16610_s25  ;;  %p16616_p3 = scmp.lt.s32.totalorder %s16610_s25, %s16610_s25 }
  0x62   :  { %p16617_p4 = por %p16616_p3, %p16615_p2 }
  0x64   :  { %p16618_p5 = pnand %p16617_p4, %p16611_p1 }
  0x66   :  { %16621 = shalt.err (!%p16618_p5)
}
  0x67   :  { %72 = dma.hbm_to_vmem [thread:$0]  %s17132_s4, 64, %s70_s10, [#allocation9]  }
  0x68   :  { %s16690_s5 = smov [#allocation13]   ;;  %s16622_s30 = scalar_lea.hbm %s17134_s6, 16 }
  0x69   :  { %s91_s27 = sshll.u32 %s16690_s5, 4  ;;  %p16623_p6 = scmp.ne.s32.totalorder %s17134_s6, %s16622_s30  ;;  %s92_s27 = int_to_ptr.vmem [resolvable:$true] %s91_s27 }
  0x6a   :  { %p16626_p7 = scmp.lt.u32.totalorder %s16622_s30, %s17134_s6 }
  0x6c   :  { %p16628_p8 = pnand %p16626_p7, %p16623_p6 }
  0x6e   :  { %16631 = shalt.err (!%p16628_p8)
}
  0x6f   :  { %s16632_s13 = scalar_lea.vmem %s92_s27, 16  ;;  %s16636_s4 = scalar_lea.vmem %s92_s27, 32 }
  0x70   :  { %p16633_p9 = scmp.ne.s32.totalorder %s92_s27, %s16632_s13  ;;  %p16637_p10 = scmp.lt.s32.totalorder %s92_s27, %s92_s27 }
  0x71   :  { %p16638_p11 = scmp.lt.s32.totalorder %s16636_s4, %s16632_s13 }
  0x73   :  { %p16639_p12 = por %p16638_p11, %p16637_p10 }
  0x75   :  { %p16640_p13 = pnand %p16639_p12, %p16633_p9 }
  0x77   :  { %16643 = shalt.err (!%p16640_p13)
}
  0x78   :  { %94 = dma.hbm_to_vmem [thread:$0]  %s17134_s6, 16, %s92_s27, [#allocation12]  }
  0x79   :  { %16666 = dma.done.wait [#allocation3], 3072  }
  0x7a   :  { %16667 = vsyncadd [#allocation3], 4294964224 }
  0x7b   :  { %16668 = dma.done.wait [#allocation6], 196736  }
  0x7c   :  { %16669 = vsyncadd [#allocation6], 4294770560 }
  0x7d   :  { %16670 = dma.done.wait [#allocation9], 32832  }
  0x7e   :  { %16671 = vsyncadd [#allocation9], 4294934464 }
  0x7f   :  { %16672 = dma.done.wait [#allocation12], 4112  }
  0x80   :  { %16673 = vsyncadd [#allocation12], 4294963184  ;;  %v141_v0 = vld [vmem:[#allocation5] sm:$0xff]  ;;  %v142_v2 = vld [vmem:[#allocation5 + $0x8] sm:$0xff]  ;;  %s16691_s6 = smov [#allocation14]  }
  0x81   :  { %v145_v1 = vld [vmem:[#allocation5 + $0x20] sm:$0xff]  ;;  %v146_v4 = vld [vmem:[#allocation5 + $0x28] sm:$0xff]  ;;  %s13915_s3 = sshll.u32 %s16691_s6, 4  ;;  %s13916_s3 = int_to_ptr.vmem [resolvable:$true] %s13915_s3 }
  0x82   :  { %v13955_v3 = vcombine.high %v141_v0, %v145_v1  ;;  %v13954_v5 = vcombine.low %v141_v0, %v145_v1  ;;  %v149_v6 = vld [vmem:[#allocation5 + $0x40] sm:$0xff]  ;;  %v13957_v8 = vcombine.high %v142_v2, %v146_v4  ;;  %v13956_v9 = vcombine.low %v142_v2, %v146_v4  ;;  %v150_v11 = vld [vmem:[#allocation5 + $0x48] sm:$0xff]  ;;  %s16644_s15 = scalar_lea.vmem %s13916_s3, 256  ;;  %p16649_p1 = scmp.lt.s32.totalorder %s13916_s3, %s13916_s3 }
  0x83   :  { %v153_v7 = vld [vmem:[#allocation5 + $0x60] sm:$0xff]  ;;  %v154_v12 = vld [vmem:[#allocation5 + $0x68] sm:$0xff]  ;;  %p16645_p0 = scmp.ne.s32.totalorder %s13916_s3, %s16644_s15  ;;  %p16650_p2 = scmp.lt.s32.totalorder %s16644_s15, %s16644_s15 }
  0x84   :  { %v13963_v10 = vcombine.high %v149_v6, %v153_v7  ;;  %v157_v13 = vld [vmem:[#allocation5 + $0x80] sm:$0xff]  ;;  %9519 = vmatprep.subr.bf16.mxu0 %v13955_v3  ;;  %v13965_v14 = vcombine.high %v150_v11, %v154_v12  ;;  %v158_v16 = vld [vmem:[#allocation5 + $0x88] sm:$0xff]  ;;  %10035 = vmatprep.subr.bf16.mxu1 %v13957_v8  ;;  %v13962_v18 = vcombine.low %v149_v6, %v153_v7 }
  0x85   :  { %v161_v15 = vld [vmem:[#allocation5 + $0xa0] sm:$0xff]  ;;  %v162_v17 = vld [vmem:[#allocation5 + $0xa8] sm:$0xff]  ;;  %9520 = vmatpush1.bf16.msra.mxu0 %v13954_v5  ;;  %10036 = vmatpush1.bf16.msra.mxu1 %v13956_v9  ;;  %v13964_v19 = vcombine.low %v150_v11, %v154_v12  ;;  %p16651_p3 = por %p16650_p2, %p16649_p1 }
  0x86   :  { %9521 = vmatprep.subr.bf16.mxu0 %v13963_v10  ;;  %v13971_v20 = vcombine.high %v157_v13, %v161_v15  ;;  %10037 = vmatprep.subr.bf16.mxu1 %v13965_v14  ;;  %v13973_v21 = vcombine.high %v158_v16, %v162_v17  ;;  %v165_v22 = vld [vmem:[#allocation5 + $0xc0] sm:$0xff]  ;;  %v166_v24 = vld [vmem:[#allocation5 + $0xc8] sm:$0xff]  ;;  %v13970_v26 = vcombine.low %v157_v13, %v161_v15 }
  0x87   :  { %v169_v23 = vld [vmem:[#allocation5 + $0xe0] sm:$0xff]  ;;  %v170_v25 = vld [vmem:[#allocation5 + $0xe8] sm:$0xff]  ;;  %v13972_v27 = vcombine.low %v158_v16, %v162_v17  ;;  %p16652_p4 = pnand %p16651_p3, %p16645_p0 }
  0x88   :  { %v13979_v28 = vcombine.high %v165_v22, %v169_v23  ;;  %v13981_v29 = vcombine.high %v166_v24, %v170_v25  ;;  %v173_v30 = vld [vmem:[#allocation5 + $0x100] sm:$0xff]  ;;  %v174_v32 = vld [vmem:[#allocation5 + $0x108] sm:$0xff]  ;;  %v13978_v34 = vcombine.low %v165_v22, %v169_v23  ;;  %v13980_v35 = vcombine.low %v166_v24, %v170_v25 }
  0x89   :  { %9522 = vmatpush1.bf16.msra.mxu0 %v13962_v18  ;;  %10038 = vmatpush1.bf16.msra.mxu1 %v13964_v19  ;;  %v177_v31 = vld [vmem:[#allocation5 + $0x120] sm:$0xff]  ;;  %v178_v33 = vld [vmem:[#allocation5 + $0x128] sm:$0xff] }
  0x8a   :  { %9523 = vmatprep.subr.bf16.mxu0 %v13971_v20  ;;  %10039 = vmatprep.subr.bf16.mxu1 %v13973_v21  ;;  %v13987_v36 = vcombine.high %v173_v30, %v177_v31  ;;  %v13989_v37 = vcombine.high %v174_v32, %v178_v33  ;;  %v181_v38 = vld [vmem:[#allocation5 + $0x140] sm:$0xff]  ;;  %v182_v40 = vld [vmem:[#allocation5 + $0x148] sm:$0xff]  ;;  %v13986_v42 = vcombine.low %v173_v30, %v177_v31 }
  0x8b   :  { %v185_v39 = vld [vmem:[#allocation5 + $0x160] sm:$0xff]  ;;  %v186_v41 = vld [vmem:[#allocation5 + $0x168] sm:$0xff]  ;;  %v13988_v43 = vcombine.low %v174_v32, %v178_v33 }
  0x8c   :  { %v13995_v44 = vcombine.high %v181_v38, %v185_v39  ;;  %v13997_v45 = vcombine.high %v182_v40, %v186_v41  ;;  %v189_v46 = vld [vmem:[#allocation5 + $0x180] sm:$0xff]  ;;  %v190_v48 = vld [vmem:[#allocation5 + $0x188] sm:$0xff]  ;;  %v13994_v50 = vcombine.low %v181_v38, %v185_v39  ;;  %v13996_v51 = vcombine.low %v182_v40, %v186_v41 }
  0x8d   :  { %9524 = vmatpush1.bf16.msra.mxu0 %v13970_v26  ;;  %10040 = vmatpush1.bf16.msra.mxu1 %v13972_v27  ;;  %v193_v47 = vld [vmem:[#allocation5 + $0x1a0] sm:$0xff]  ;;  %v194_v49 = vld [vmem:[#allocation5 + $0x1a8] sm:$0xff] }
  0x8e   :  { %9525 = vmatprep.subr.bf16.mxu0 %v13979_v28  ;;  %10041 = vmatprep.subr.bf16.mxu1 %v13981_v29  ;;  %v14003_v52 = vcombine.high %v189_v46, %v193_v47  ;;  %v16818_v53 = vld [vmem:[#allocation2] sm:$0xff]  ;;  %v14005_v55 = vcombine.high %v190_v48, %v194_v49  ;;  %v198_v59 = vld [vmem:[#allocation5 + $0x1c8] sm:$0xff]  ;;  %v14002_v61 = vcombine.low %v189_v46, %v193_v47 }
  0x8f   :  { %v16820_v54 = vld [vmem:[#allocation2 + $0x60] sm:$0xff]  ;;  %v202_v60 = vld [vmem:[#allocation5 + $0x1e8] sm:$0xff]  ;;  %v14004_v62 = vcombine.low %v190_v48, %v194_v49 }
  0x90   :  { %v197_v56 = vld [vmem:[#allocation5 + $0x1c0] sm:$0xff]  ;;  %v16824_v58 = vcombine.high %v16818_v53, %v16820_v54  ;;  %v14013_v0 = vcombine.high %v198_v59, %v202_v60  ;;  %v206_v3 = vld [vmem:[#allocation5 + $0x208] sm:$0xff]  ;;  %v14012_v6 = vcombine.low %v198_v59, %v202_v60 }
  0x91   :  { %9526 = vmatpush1.bf16.msra.mxu0 %v13978_v34  ;;  %10042 = vmatpush1.bf16.msra.mxu1 %v13980_v35  ;;  %v201_v57 = vld [vmem:[#allocation5 + $0x1e0] sm:$0xff]  ;;  %v210_v4 = vld [vmem:[#allocation5 + $0x228] sm:$0xff] }
  0x92   :  { %9527 = vmatprep.subr.bf16.mxu0 %v13987_v36  ;;  %10043 = vmatprep.subr.bf16.mxu1 %v13989_v37  ;;  %v14011_v63 = vcombine.high %v197_v56, %v201_v57  ;;  %v205_v1 = vld [vmem:[#allocation5 + $0x200] sm:$0xff]  ;;  %v14010_v5 = vcombine.low %v197_v56, %v201_v57  ;;  %v14021_v8 = vcombine.high %v206_v3, %v210_v4  ;;  %v214_v11 = vld [vmem:[#allocation5 + $0x248] sm:$0xff] }
  0x93   :  { %9551 = vmatprep.mubr.bf16.mxu0 %v16824_v58  ;;  %v209_v2 = vld [vmem:[#allocation5 + $0x220] sm:$0xff]  ;;  %10067 = vmatprep.mubr.bf16.mxu1 %v16824_v58  ;;  %v218_v12 = vld [vmem:[#allocation5 + $0x268] sm:$0xff]  ;;  %v14020_v14 = vcombine.low %v206_v3, %v210_v4 }
  0x94   :  { %v14019_v7 = vcombine.high %v205_v1, %v209_v2  ;;  %v213_v9 = vld [vmem:[#allocation5 + $0x240] sm:$0xff]  ;;  %v14018_v13 = vcombine.low %v205_v1, %v209_v2  ;;  %v14029_v16 = vcombine.high %v214_v11, %v218_v12  ;;  %v222_v19 = vld [vmem:[#allocation5 + $0x288] sm:$0xff]  ;;  %v14028_v22 = vcombine.low %v214_v11, %v218_v12 }
  0x95   :  { %9528 = vmatpush1.bf16.msra.mxu0 %v13986_v42  ;;  %10044 = vmatpush1.bf16.msra.mxu1 %v13988_v43  ;;  %v217_v10 = vld [vmem:[#allocation5 + $0x260] sm:$0xff]  ;;  %v226_v20 = vld [vmem:[#allocation5 + $0x2a8] sm:$0xff] }
  0x96   :  { %9529 = vmatprep.subr.bf16.mxu0 %v13995_v44  ;;  %10045 = vmatprep.subr.bf16.mxu1 %v13997_v45  ;;  %v14027_v15 = vcombine.high %v213_v9, %v217_v10  ;;  %v221_v17 = vld [vmem:[#allocation5 + $0x280] sm:$0xff]  ;;  %v14026_v21 = vcombine.low %v213_v9, %v217_v10  ;;  %v14037_v24 = vcombine.high %v222_v19, %v226_v20  ;;  %v230_v27 = vld [vmem:[#allocation5 + $0x2c8] sm:$0xff] }
  0x97   :  { %v225_v18 = vld [vmem:[#allocation5 + $0x2a0] sm:$0xff]  ;;  %v234_v28 = vld [vmem:[#allocation5 + $0x2e8] sm:$0xff]  ;;  %v14036_v30 = vcombine.low %v222_v19, %v226_v20 }
  0x98   :  { %v14035_v23 = vcombine.high %v221_v17, %v225_v18  ;;  %v229_v25 = vld [vmem:[#allocation5 + $0x2c0] sm:$0xff]  ;;  %v14034_v29 = vcombine.low %v221_v17, %v225_v18  ;;  %v14045_v32 = vcombine.high %v230_v27, %v234_v28  ;;  %v238_v35 = vld [vmem:[#allocation5 + $0x308] sm:$0xff]  ;;  %v14044_v38 = vcombine.low %v230_v27, %v234_v28 }
  0x99   :  { %9530 = vmatpush1.bf16.msra.mxu0 %v13994_v50  ;;  %10046 = vmatpush1.bf16.msra.mxu1 %v13996_v51  ;;  %v233_v26 = vld [vmem:[#allocation5 + $0x2e0] sm:$0xff]  ;;  %v242_v36 = vld [vmem:[#allocation5 + $0x328] sm:$0xff] }
  0x9a   :  { %9531 = vmatprep.subr.bf16.mxu0 %v14003_v52  ;;  %10047 = vmatprep.subr.bf16.mxu1 %v14005_v55  ;;  %v14043_v31 = vcombine.high %v229_v25, %v233_v26  ;;  %v237_v33 = vld [vmem:[#allocation5 + $0x300] sm:$0xff]  ;;  %v14042_v37 = vcombine.low %v229_v25, %v233_v26  ;;  %v14053_v40 = vcombine.high %v238_v35, %v242_v36  ;;  %v246_v43 = vld [vmem:[#allocation5 + $0x348] sm:$0xff] }
  0x9b   :  { %v241_v34 = vld [vmem:[#allocation5 + $0x320] sm:$0xff]  ;;  %v250_v44 = vld [vmem:[#allocation5 + $0x368] sm:$0xff]  ;;  %v14052_v46 = vcombine.low %v238_v35, %v242_v36 }
  0x9c   :  { %v14051_v39 = vcombine.high %v237_v33, %v241_v34  ;;  %v245_v41 = vld [vmem:[#allocation5 + $0x340] sm:$0xff]  ;;  %v14050_v45 = vcombine.low %v237_v33, %v241_v34  ;;  %v14061_v48 = vcombine.high %v246_v43, %v250_v44  ;;  %v254_v51 = vld [vmem:[#allocation5 + $0x388] sm:$0xff]  ;;  %v14060_v56 = vcombine.low %v246_v43, %v250_v44 }
  0x9d   :  { %9532 = vmatpush1.bf16.msra.mxu0 %v14002_v61  ;;  %10048 = vmatpush1.bf16.msra.mxu1 %v14004_v62  ;;  %v249_v42 = vld [vmem:[#allocation5 + $0x360] sm:$0xff]  ;;  %v258_v52 = vld [vmem:[#allocation5 + $0x3a8] sm:$0xff] }
  0x9e   :  { %9533 = vmatprep.subr.bf16.mxu0 %v14011_v63  ;;  %10049 = vmatprep.subr.bf16.mxu1 %v14013_v0  ;;  %v14059_v47 = vcombine.high %v245_v41, %v249_v42  ;;  %v253_v49 = vld [vmem:[#allocation5 + $0x380] sm:$0xff]  ;;  %v14058_v55 = vcombine.low %v245_v41, %v249_v42  ;;  %v14069_v59 = vcombine.high %v254_v51, %v258_v52  ;;  %v262_v62 = vld [vmem:[#allocation5 + $0x3c8] sm:$0xff] }
  0x9f   :  { %v257_v50 = vld [vmem:[#allocation5 + $0x3a0] sm:$0xff]  ;;  %v266_v63 = vld [vmem:[#allocation5 + $0x3e8] sm:$0xff]  ;;  %v14068_v1 = vcombine.low %v254_v51, %v258_v52 }
  0xa0   :  { %v14067_v57 = vcombine.high %v253_v49, %v257_v50  ;;  %v261_v60 = vld [vmem:[#allocation5 + $0x3c0] sm:$0xff]  ;;  %v14066_v0 = vcombine.low %v253_v49, %v257_v50  ;;  %v14077_v3 = vcombine.high %v262_v62, %v266_v63  ;;  %v14076_v9 = vcombine.low %v262_v62, %v266_v63  ;;  %v16832_v17 = vld [vmem:[#allocation2 + $0x8] sm:$0xff] }
  0xa1   :  { %9534 = vmatpush1.bf16.msra.mxu0 %v14010_v5  ;;  %10050 = vmatpush1.bf16.msra.mxu1 %v14012_v6  ;;  %v265_v61 = vld [vmem:[#allocation5 + $0x3e0] sm:$0xff]  ;;  %v270_v6 = vld [vmem:[#allocation5 + $0x408] sm:$0xff] }
  0xa2   :  { %9535 = vmatprep.subr.bf16.mxu0 %v14019_v7  ;;  %10051 = vmatprep.subr.bf16.mxu1 %v14021_v8  ;;  %v14075_v2 = vcombine.high %v261_v60, %v265_v61  ;;  %v269_v4 = vld [vmem:[#allocation5 + $0x400] sm:$0xff]  ;;  %v274_v7 = vld [vmem:[#allocation5 + $0x428] sm:$0xff]  ;;  %v14074_v8 = vcombine.low %v261_v60, %v265_v61 }
  0xa3   :  { %v273_v5 = vld [vmem:[#allocation5 + $0x420] sm:$0xff]  ;;  %v14085_v11 = vcombine.high %v270_v6, %v274_v7  ;;  %v16834_v18 = vld [vmem:[#allocation2 + $0x68] sm:$0xff]  ;;  %v14084_v20 = vcombine.low %v270_v6, %v274_v7 }
  0xa4   :  { %v14083_v10 = vcombine.high %v269_v4, %v273_v5  ;;  %v277_v12 = vld [vmem:[#allocation5 + $0x440] sm:$0xff]  ;;  %v14082_v19 = vcombine.low %v269_v4, %v273_v5  ;;  %v286_v25 = vld [vmem:[#allocation5 + $0x488] sm:$0xff] }
  0xa5   :  { %9536 = vmatpush1.bf16.msra.mxu0 %v14018_v13  ;;  %10052 = vmatpush1.bf16.msra.mxu1 %v14020_v14  ;;  %v281_v13 = vld [vmem:[#allocation5 + $0x460] sm:$0xff]  ;;  %v278_v14 = vld [vmem:[#allocation5 + $0x448] sm:$0xff] }
  0xa6   :  { %9537 = vmatprep.subr.bf16.mxu0 %v14027_v15  ;;  %10053 = vmatprep.subr.bf16.mxu1 %v14029_v16  ;;  %v16830_v15 = vcombine.low %v16818_v53, %v16820_v54  ;;  %v282_v16 = vld [vmem:[#allocation5 + $0x468] sm:$0xff]  ;;  %v16838_v53 = vcombine.high %v16832_v17, %v16834_v18  ;;  %v14090_v26 = vcombine.low %v277_v12, %v281_v13 }
  0xa7   :  { %v290_v54 = vld [vmem:[#allocation5 + $0x4a8] sm:$0xff]  ;;  %v14092_v27 = vcombine.low %v278_v14, %v282_v16 }
  0xa8   :  { %v298_v33 = vld [vmem:[#allocation5 + $0x4e8] sm:$0xff]  ;;  %v14100_v35 = vcombine.low %v286_v25, %v290_v54 }
  0xa9   :  { %9538 = vmatpush1.bf16.msra.mxu0 %v14026_v21  ;;  %10054 = vmatpush1.bf16.msra.mxu1 %v14028_v22  ;;  %v14091_v21 = vcombine.high %v277_v12, %v281_v13  ;;  %v14093_v22 = vcombine.high %v278_v14, %v282_v16  ;;  %v306_v41 = vld [vmem:[#allocation5 + $0x528] sm:$0xff] }
  0xaa   :  { %9539 = vmatprep.subr.bf16.mxu0 %v14035_v23  ;;  %10055 = vmatprep.subr.bf16.mxu1 %v14037_v24  ;;  %v285_v23 = vld [vmem:[#allocation5 + $0x480] sm:$0xff]  ;;  %v314_v49 = vld [vmem:[#allocation5 + $0x568] sm:$0xff] }
  0xab   :  { %v289_v24 = vld [vmem:[#allocation5 + $0x4a0] sm:$0xff]  ;;  %v322_v60 = vld [vmem:[#allocation5 + $0x5a8] sm:$0xff] }
  0xac   :  { %v14099_v28 = vcombine.high %v285_v23, %v289_v24  ;;  %v14098_v34 = vcombine.low %v285_v23, %v289_v24  ;;  %v330_v4 = vld [vmem:[#allocation5 + $0x5e8] sm:$0xff] }
  0xad   :  { %9540 = vmatpush1.bf16.msra.mxu0 %v14034_v29  ;;  %10056 = vmatpush1.bf16.msra.mxu1 %v14036_v30  ;;  %v293_v29 = vld [vmem:[#allocation5 + $0x4c0] sm:$0xff]  ;;  %v338_v12 = vld [vmem:[#allocation5 + $0x628] sm:$0xff] }
  0xae   :  { %9541 = vmatprep.subr.bf16.mxu0 %v14043_v31  ;;  %10057 = vmatprep.subr.bf16.mxu1 %v14045_v32  ;;  %v297_v30 = vld [vmem:[#allocation5 + $0x4e0] sm:$0xff]  ;;  %v294_v31 = vld [vmem:[#allocation5 + $0x4c8] sm:$0xff]  ;;  %v14101_v32 = vcombine.high %v286_v25, %v290_v54 }
  0xaf   :  { %v14107_v36 = vcombine.high %v293_v29, %v297_v30  ;;  %v14106_v42 = vcombine.low %v293_v29, %v297_v30  ;;  %v14108_v43 = vcombine.low %v294_v31, %v298_v33  ;;  %v346_v23 = vld [vmem:[#allocation5 + $0x668] sm:$0xff] }
  0xb0   :  { %v354_v30 = vld [vmem:[#allocation5 + $0x6a8] sm:$0xff] }
  0xb1   :  { %9542 = vmatpush1.bf16.msra.mxu0 %v14042_v37  ;;  %10058 = vmatpush1.bf16.msra.mxu1 %v14044_v38  ;;  %v301_v37 = vld [vmem:[#allocation5 + $0x500] sm:$0xff] }
  0xb2   :  { %9543 = vmatprep.subr.bf16.mxu0 %v14051_v39  ;;  %10059 = vmatprep.subr.bf16.mxu1 %v14053_v40  ;;  %v305_v38 = vld [vmem:[#allocation5 + $0x520] sm:$0xff]  ;;  %v302_v39 = vld [vmem:[#allocation5 + $0x508] sm:$0xff]  ;;  %v14109_v40 = vcombine.high %v294_v31, %v298_v33 }
  0xb3   :  { %v14115_v44 = vcombine.high %v301_v37, %v305_v38  ;;  %v14114_v50 = vcombine.low %v301_v37, %v305_v38  ;;  %v14116_v51 = vcombine.low %v302_v39, %v306_v41  ;;  %v362_v38 = vld [vmem:[#allocation5 + $0x6e8] sm:$0xff] }
  0xb5   :  { %9544 = vmatpush1.bf16.msra.mxu0 %v14050_v45  ;;  %10060 = vmatpush1.bf16.msra.mxu1 %v14052_v46  ;;  %v309_v45 = vld [vmem:[#allocation5 + $0x540] sm:$0xff] }
  0xb6   :  { %9545 = vmatprep.subr.bf16.mxu0 %v14059_v47  ;;  %10061 = vmatprep.subr.bf16.mxu1 %v14061_v48  ;;  %v313_v46 = vld [vmem:[#allocation5 + $0x560] sm:$0xff]  ;;  %v310_v47 = vld [vmem:[#allocation5 + $0x548] sm:$0xff]  ;;  %v14117_v48 = vcombine.high %v302_v39, %v306_v41 }
  0xb7   :  { %v14123_v52 = vcombine.high %v309_v45, %v313_v46  ;;  %v14122_v61 = vcombine.low %v309_v45, %v313_v46  ;;  %v14124_v62 = vcombine.low %v310_v47, %v314_v49  ;;  %v370_v46 = vld [vmem:[#allocation5 + $0x728] sm:$0xff] }
  0xb9   :  { %9546 = vmatpush1.bf16.msra.mxu0 %v14058_v55  ;;  %10062 = vmatpush1.bf16.msra.mxu1 %v14060_v56  ;;  %v317_v55 = vld [vmem:[#allocation5 + $0x580] sm:$0xff] }
  0xba   :  { %9547 = vmatprep.subr.bf16.mxu0 %v14067_v57  ;;  %10063 = vmatprep.subr.bf16.mxu1 %v14069_v59  ;;  %v321_v56 = vld [vmem:[#allocation5 + $0x5a0] sm:$0xff]  ;;  %v318_v57 = vld [vmem:[#allocation5 + $0x588] sm:$0xff]  ;;  %v14125_v59 = vcombine.high %v310_v47, %v314_v49 }
  0xbb   :  { %v14131_v63 = vcombine.high %v317_v55, %v321_v56  ;;  %v14130_v5 = vcombine.low %v317_v55, %v321_v56  ;;  %v14132_v6 = vcombine.low %v318_v57, %v322_v60  ;;  %v378_v56 = vld [vmem:[#allocation5 + $0x768] sm:$0xff] }
  0xbd   :  { %9548 = vmatpush1.bf16.msra.mxu0 %v14066_v0  ;;  %10064 = vmatpush1.bf16.msra.mxu1 %v14068_v1  ;;  %v325_v0 = vld [vmem:[#allocation5 + $0x5c0] sm:$0xff] }
  0xbe   :  { %9549 = vmatprep.subr.bf16.mxu0 %v14075_v2  ;;  %10065 = vmatprep.subr.bf16.mxu1 %v14077_v3  ;;  %v329_v1 = vld [vmem:[#allocation5 + $0x5e0] sm:$0xff]  ;;  %v326_v2 = vld [vmem:[#allocation5 + $0x5c8] sm:$0xff]  ;;  %v14133_v3 = vcombine.high %v318_v57, %v322_v60 }
  0xbf   :  { %v14139_v7 = vcombine.high %v325_v0, %v329_v1  ;;  %v14138_v13 = vcombine.low %v325_v0, %v329_v1  ;;  %v14140_v14 = vcombine.low %v326_v2, %v330_v4  ;;  %v386_v1 = vld [vmem:[#allocation5 + $0x7a8] sm:$0xff] }
  0xc1   :  { %9550 = vmatpush1.bf16.msra.mxu0 %v14074_v8  ;;  %10066 = vmatpush1.bf16.msra.mxu1 %v14076_v9  ;;  %v333_v8 = vld [vmem:[#allocation5 + $0x600] sm:$0xff] }
  0xc2   :  { %9562 = vmatprep.subr.bf16.mxu0 %v14083_v10  ;;  %10078 = vmatprep.subr.bf16.mxu1 %v14085_v11  ;;  %v337_v9 = vld [vmem:[#allocation5 + $0x620] sm:$0xff]  ;;  %v334_v10 = vld [vmem:[#allocation5 + $0x608] sm:$0xff]  ;;  %v14141_v11 = vcombine.high %v326_v2, %v330_v4 }
  0xc3   :  { %v14147_v16 = vcombine.high %v333_v8, %v337_v9  ;;  %v14146_v24 = vcombine.low %v333_v8, %v337_v9  ;;  %v14148_v25 = vcombine.low %v334_v10, %v338_v12  ;;  %v394_v9 = vld [vmem:[#allocation5 + $0x7e8] sm:$0xff] }
  0xc4   :  { %9552 = vmatmul.mubr.bf16.vlgmr.msra.gmra.mrb[0].mxu0 %v16830_v15  ;;  %10068 = vmatmul.mubr.bf16.vlgmr.msra.gmra.mrb[0].mxu1 %v16830_v15 }
  0xc5   :  { %9563 = vmatpush1.bf16.msra.mxu0 %v14082_v19  ;;  %10079 = vmatpush1.bf16.msra.mxu1 %v14084_v20  ;;  %v341_v19 = vld [vmem:[#allocation5 + $0x640] sm:$0xff] }
  0xc6   :  { %9564 = vmatprep.subr.bf16.mxu0 %v14091_v21  ;;  %10080 = vmatprep.subr.bf16.mxu1 %v14093_v22  ;;  %v345_v20 = vld [vmem:[#allocation5 + $0x660] sm:$0xff]  ;;  %v342_v21 = vld [vmem:[#allocation5 + $0x648] sm:$0xff]  ;;  %v14149_v22 = vcombine.high %v334_v10, %v338_v12 }
  0xc7   :  { %9594 = vmatprep.mubr.bf16.mxu0 %v16838_v53  ;;  %10110 = vmatprep.mubr.bf16.mxu1 %v16838_v53  ;;  %v14155_v54 = vcombine.high %v341_v19, %v345_v20  ;;  %v14157_v29 = vcombine.high %v342_v21, %v346_v23  ;;  %v14154_v31 = vcombine.low %v341_v19, %v345_v20  ;;  %v402_v20 = vld [vmem:[#allocation5 + $0x828] sm:$0xff] }
  0xc9   :  { %9565 = vmatpush1.bf16.msra.mxu0 %v14090_v26  ;;  %10081 = vmatpush1.bf16.msra.mxu1 %v14092_v27  ;;  %v349_v26 = vld [vmem:[#allocation5 + $0x680] sm:$0xff] }
  0xca   :  { %9566 = vmatprep.subr.bf16.mxu0 %v14099_v28  ;;  %10082 = vmatprep.subr.bf16.mxu1 %v14101_v32  ;;  %v353_v27 = vld [vmem:[#allocation5 + $0x6a0] sm:$0xff]  ;;  %v350_v28 = vld [vmem:[#allocation5 + $0x688] sm:$0xff]  ;;  %v14156_v32 = vcombine.low %v342_v21, %v346_v23 }
  0xcb   :  { %v14163_v33 = vcombine.high %v349_v26, %v353_v27  ;;  %v14165_v37 = vcombine.high %v350_v28, %v354_v30  ;;  %v14162_v39 = vcombine.low %v349_v26, %v353_v27  ;;  %v409_v23 = vld [vmem:[#allocation5 + $0x860] sm:$0xff]  ;;  %v410_v26 = vld [vmem:[#allocation5 + $0x868] sm:$0xff]  ;;  %v16844_v27 = vld [vmem:[#allocation2 + $0x10] sm:$0xff] }
  0xcd   :  { %9567 = vmatpush1.bf16.msra.mxu0 %v14098_v34  ;;  %10083 = vmatpush1.bf16.msra.mxu1 %v14100_v35  ;;  %v357_v34 = vld [vmem:[#allocation5 + $0x6c0] sm:$0xff] }
  0xce   :  { %9568 = vmatprep.subr.bf16.mxu0 %v14107_v36  ;;  %10084 = vmatprep.subr.bf16.mxu1 %v14109_v40  ;;  %v361_v35 = vld [vmem:[#allocation5 + $0x6e0] sm:$0xff]  ;;  %v358_v36 = vld [vmem:[#allocation5 + $0x6c8] sm:$0xff]  ;;  %v14164_v40 = vcombine.low %v350_v28, %v354_v30  ;;  %v16850_v30 = vcombine.low %v16832_v17, %v16834_v18 }
  0xcf   :  { %v14171_v41 = vcombine.high %v357_v34, %v361_v35  ;;  %v14173_v45 = vcombine.high %v358_v36, %v362_v38  ;;  %v14170_v47 = vcombine.low %v357_v34, %v361_v35  ;;  %v413_v34 = vld [vmem:[#allocation5 + $0x880] sm:$0xff] }
  0xd1   :  { %9569 = vmatpush1.bf16.msra.mxu0 %v14106_v42  ;;  %10085 = vmatpush1.bf16.msra.mxu1 %v14108_v43  ;;  %v365_v42 = vld [vmem:[#allocation5 + $0x700] sm:$0xff] }
  0xd2   :  { %9570 = vmatprep.subr.bf16.mxu0 %v14115_v44  ;;  %10086 = vmatprep.subr.bf16.mxu1 %v14117_v48  ;;  %v369_v43 = vld [vmem:[#allocation5 + $0x720] sm:$0xff]  ;;  %v366_v44 = vld [vmem:[#allocation5 + $0x708] sm:$0xff]  ;;  %v14172_v48 = vcombine.low %v358_v36, %v362_v38 }
  0xd3   :  { %v14179_v49 = vcombine.high %v365_v42, %v369_v43  ;;  %v14181_v55 = vcombine.high %v366_v44, %v370_v46  ;;  %v14178_v57 = vcombine.low %v365_v42, %v369_v43  ;;  %v417_v36 = vld [vmem:[#allocation5 + $0x8a0] sm:$0xff]  ;;  %v418_v38 = vld [vmem:[#allocation5 + $0x8a8] sm:$0xff] }
  0xd4   :  { %v425_v42 = vld [vmem:[#allocation5 + $0x8e0] sm:$0xff]  ;;  %v422_v43 = vld [vmem:[#allocation5 + $0x8c8] sm:$0xff] }
  0xd5   :  { %9571 = vmatpush1.bf16.msra.mxu0 %v14114_v50  ;;  %10087 = vmatpush1.bf16.msra.mxu1 %v14116_v51  ;;  %v373_v50 = vld [vmem:[#allocation5 + $0x740] sm:$0xff] }
  0xd6   :  { %9572 = vmatprep.subr.bf16.mxu0 %v14123_v52  ;;  %10088 = vmatprep.subr.bf16.mxu1 %v14125_v59  ;;  %v377_v51 = vld [vmem:[#allocation5 + $0x760] sm:$0xff]  ;;  %v374_v52 = vld [vmem:[#allocation5 + $0x748] sm:$0xff]  ;;  %v14180_v59 = vcombine.low %v366_v44, %v370_v46  ;;  %v14226_v46 = vcombine.low %v413_v34, %v417_v36 }
  0xd7   :  { %v14187_v60 = vcombine.high %v373_v50, %v377_v51  ;;  %v14189_v0 = vcombine.high %v374_v52, %v378_v56  ;;  %v14186_v2 = vcombine.low %v373_v50, %v377_v51  ;;  %v433_v50 = vld [vmem:[#allocation5 + $0x920] sm:$0xff]  ;;  %v430_v51 = vld [vmem:[#allocation5 + $0x908] sm:$0xff] }
  0xd9   :  { %9573 = vmatpush1.bf16.msra.mxu0 %v14122_v61  ;;  %10089 = vmatpush1.bf16.msra.mxu1 %v14124_v62  ;;  %v381_v61 = vld [vmem:[#allocation5 + $0x780] sm:$0xff] }
  0xda   :  { %9574 = vmatprep.subr.bf16.mxu0 %v14131_v63  ;;  %10090 = vmatprep.subr.bf16.mxu1 %v14133_v3  ;;  %v385_v62 = vld [vmem:[#allocation5 + $0x7a0] sm:$0xff]  ;;  %v382_v63 = vld [vmem:[#allocation5 + $0x788] sm:$0xff]  ;;  %v14188_v3 = vcombine.low %v374_v52, %v378_v56 }
  0xdb   :  { %v14195_v4 = vcombine.high %v381_v61, %v385_v62  ;;  %v14197_v8 = vcombine.high %v382_v63, %v386_v1  ;;  %v14194_v10 = vcombine.low %v381_v61, %v385_v62  ;;  %v441_v61 = vld [vmem:[#allocation5 + $0x960] sm:$0xff]  ;;  %v438_v62 = vld [vmem:[#allocation5 + $0x948] sm:$0xff] }
  0xdd   :  { %9575 = vmatpush1.bf16.msra.mxu0 %v14130_v5  ;;  %10091 = vmatpush1.bf16.msra.mxu1 %v14132_v6  ;;  %v389_v5 = vld [vmem:[#allocation5 + $0x7c0] sm:$0xff] }
  0xde   :  { %9576 = vmatprep.subr.bf16.mxu0 %v14139_v7  ;;  %10092 = vmatprep.subr.bf16.mxu1 %v14141_v11  ;;  %v393_v6 = vld [vmem:[#allocation5 + $0x7e0] sm:$0xff]  ;;  %v390_v7 = vld [vmem:[#allocation5 + $0x7c8] sm:$0xff]  ;;  %v14196_v11 = vcombine.low %v382_v63, %v386_v1 }
  0xdf   :  { %v14203_v12 = vcombine.high %v389_v5, %v393_v6  ;;  %v14205_v19 = vcombine.high %v390_v7, %v394_v9  ;;  %v14202_v21 = vcombine.low %v389_v5, %v393_v6  ;;  %v449_v5 = vld [vmem:[#allocation5 + $0x9a0] sm:$0xff]  ;;  %v446_v6 = vld [vmem:[#allocation5 + $0x988] sm:$0xff] }
  0xe1   :  { %9577 = vmatpush1.bf16.msra.mxu0 %v14138_v13  ;;  %10093 = vmatpush1.bf16.msra.mxu1 %v14140_v14  ;;  %v397_v13 = vld [vmem:[#allocation5 + $0x800] sm:$0xff] }
  0xe2   :  { %9578 = vmatprep.subr.bf16.mxu0 %v14147_v16  ;;  %10094 = vmatprep.subr.bf16.mxu1 %v14149_v22  ;;  %v401_v14 = vld [vmem:[#allocation5 + $0x820] sm:$0xff]  ;;  %v398_v16 = vld [vmem:[#allocation5 + $0x808] sm:$0xff] }
  0xe3   :  { %v405_v22 = vld [vmem:[#allocation5 + $0x840] sm:$0xff]  ;;  %v14213_v28 = vcombine.high %v398_v16, %v402_v20 }
  0xe4   :  { %v14218_v17 = vcombine.low %v405_v22, %v409_v23 }
  0xe5   :  { %9579 = vmatpush1.bf16.msra.mxu0 %v14146_v24  ;;  %10095 = vmatpush1.bf16.msra.mxu1 %v14148_v25  ;;  %v14204_v24 = vcombine.low %v390_v7, %v394_v9  ;;  %v14211_v25 = vcombine.high %v397_v13, %v401_v14 }
  0xe6   :  { %9580 = vmatprep.subr.bf16.mxu0 %v14155_v54  ;;  %10096 = vmatprep.subr.bf16.mxu1 %v14157_v29  ;;  %v406_v54 = vld [vmem:[#allocation5 + $0x848] sm:$0xff]  ;;  %v16846_v29 = vld [vmem:[#allocation2 + $0x70] sm:$0xff] }
  0xe7   :  { %v14221_v35 = vcombine.high %v406_v54, %v410_v26  ;;  %v14220_v18 = vcombine.low %v406_v54, %v410_v26  ;;  %v466_v26 = vld [vmem:[#allocation5 + $0xa28] sm:$0xff] }
  0xe9   :  { %9581 = vmatpush1.bf16.msra.mxu0 %v14154_v31  ;;  %10097 = vmatpush1.bf16.msra.mxu1 %v14156_v32  ;;  %v14210_v31 = vcombine.low %v397_v13, %v401_v14  ;;  %v14212_v32 = vcombine.low %v398_v16, %v402_v20  ;;  %v457_v13 = vld [vmem:[#allocation5 + $0x9e0] sm:$0xff]  ;;  %v454_v14 = vld [vmem:[#allocation5 + $0x9c8] sm:$0xff] }
  0xea   :  { %9582 = vmatprep.subr.bf16.mxu0 %v14163_v33  ;;  %10098 = vmatprep.subr.bf16.mxu1 %v14165_v37  ;;  %v14219_v33 = vcombine.high %v405_v22, %v409_v23  ;;  %v414_v37 = vld [vmem:[#allocation5 + $0x888] sm:$0xff]  ;;  %v461_v23 = vld [vmem:[#allocation5 + $0xa00] sm:$0xff] }
  0xeb   :  { %v14229_v44 = vcombine.high %v414_v37, %v418_v38 }
  0xed   :  { %9583 = vmatpush1.bf16.msra.mxu0 %v14162_v39  ;;  %10099 = vmatpush1.bf16.msra.mxu1 %v14164_v40  ;;  %v16854_v39 = vcombine.high %v16844_v27, %v16846_v29  ;;  %v14227_v40 = vcombine.high %v413_v34, %v417_v36  ;;  %v473_v34 = vld [vmem:[#allocation5 + $0xa60] sm:$0xff] }
  0xee   :  { %9584 = vmatprep.subr.bf16.mxu0 %v14171_v41  ;;  %10100 = vmatprep.subr.bf16.mxu1 %v14173_v45  ;;  %v421_v41 = vld [vmem:[#allocation5 + $0x8c0] sm:$0xff]  ;;  %v426_v45 = vld [vmem:[#allocation5 + $0x8e8] sm:$0xff] }
  0xef   :  { %v14237_v52 = vcombine.high %v422_v43, %v426_v45  ;;  %v14234_v56 = vcombine.low %v421_v41, %v425_v42 }
  0xf1   :  { %9585 = vmatpush1.bf16.msra.mxu0 %v14170_v47  ;;  %10101 = vmatpush1.bf16.msra.mxu1 %v14172_v48  ;;  %v14228_v47 = vcombine.low %v414_v37, %v418_v38  ;;  %v14235_v48 = vcombine.high %v421_v41, %v425_v42  ;;  %v474_v37 = vld [vmem:[#allocation5 + $0xa68] sm:$0xff]  ;;  %v481_v41 = vld [vmem:[#allocation5 + $0xaa0] sm:$0xff] }
  0xf2   :  { %9586 = vmatprep.subr.bf16.mxu0 %v14179_v49  ;;  %10102 = vmatprep.subr.bf16.mxu1 %v14181_v55  ;;  %v429_v49 = vld [vmem:[#allocation5 + $0x900] sm:$0xff]  ;;  %v434_v55 = vld [vmem:[#allocation5 + $0x928] sm:$0xff] }
  0xf3   :  { %v14245_v63 = vcombine.high %v430_v51, %v434_v55  ;;  %v14242_v1 = vcombine.low %v429_v49, %v433_v50  ;;  %v478_v42 = vld [vmem:[#allocation5 + $0xa88] sm:$0xff] }
  0xf5   :  { %9587 = vmatpush1.bf16.msra.mxu0 %v14178_v57  ;;  %10103 = vmatpush1.bf16.msra.mxu1 %v14180_v59  ;;  %v14236_v57 = vcombine.low %v422_v43, %v426_v45  ;;  %v14243_v59 = vcombine.high %v429_v49, %v433_v50  ;;  %v489_v49 = vld [vmem:[#allocation5 + $0xae0] sm:$0xff]  ;;  %v486_v50 = vld [vmem:[#allocation5 + $0xac8] sm:$0xff] }
  0xf6   :  { %9588 = vmatprep.subr.bf16.mxu0 %v14187_v60  ;;  %10104 = vmatprep.subr.bf16.mxu1 %v14189_v0  ;;  %v437_v60 = vld [vmem:[#allocation5 + $0x940] sm:$0xff]  ;;  %v442_v0 = vld [vmem:[#allocation5 + $0x968] sm:$0xff] }
  0xf7   :  { %v14253_v7 = vcombine.high %v438_v62, %v442_v0  ;;  %v14250_v9 = vcombine.low %v437_v60, %v441_v61 }
  0xf9   :  { %9589 = vmatpush1.bf16.msra.mxu0 %v14186_v2  ;;  %10105 = vmatpush1.bf16.msra.mxu1 %v14188_v3  ;;  %v14244_v2 = vcombine.low %v430_v51, %v434_v55  ;;  %v14251_v3 = vcombine.high %v437_v60, %v441_v61  ;;  %v497_v60 = vld [vmem:[#allocation5 + $0xb20] sm:$0xff]  ;;  %v494_v61 = vld [vmem:[#allocation5 + $0xb08] sm:$0xff] }
  0xfa   :  { %9590 = vmatprep.subr.bf16.mxu0 %v14195_v4  ;;  %10106 = vmatprep.subr.bf16.mxu1 %v14197_v8  ;;  %v445_v4 = vld [vmem:[#allocation5 + $0x980] sm:$0xff]  ;;  %v450_v8 = vld [vmem:[#allocation5 + $0x9a8] sm:$0xff] }
  0xfb   :  { %v14261_v16 = vcombine.high %v446_v6, %v450_v8  ;;  %v14258_v20 = vcombine.low %v445_v4, %v449_v5 }
  0xfd   :  { %9591 = vmatpush1.bf16.msra.mxu0 %v14194_v10  ;;  %10107 = vmatpush1.bf16.msra.mxu1 %v14196_v11  ;;  %v14252_v10 = vcombine.low %v438_v62, %v442_v0  ;;  %v14259_v11 = vcombine.high %v445_v4, %v449_v5  ;;  %v505_v4 = vld [vmem:[#allocation5 + $0xb60] sm:$0xff]  ;;  %v502_v5 = vld [vmem:[#allocation5 + $0xb48] sm:$0xff] }
  0xfe   :  { %9592 = vmatprep.subr.bf16.mxu0 %v14203_v12  ;;  %10108 = vmatprep.subr.bf16.mxu1 %v14205_v19  ;;  %v453_v12 = vld [vmem:[#allocation5 + $0x9c0] sm:$0xff]  ;;  %v458_v19 = vld [vmem:[#allocation5 + $0x9e8] sm:$0xff] }
  0xff   :  { %v14267_v22 = vcombine.high %v453_v12, %v457_v13  ;;  %v14269_v54 = vcombine.high %v454_v14, %v458_v19 }
 0x101   :  { %9593 = vmatpush1.bf16.msra.mxu0 %v14202_v21  ;;  %10109 = vmatpush1.bf16.msra.mxu1 %v14204_v24  ;;  %v14260_v21 = vcombine.low %v446_v6, %v450_v8  ;;  %v465_v24 = vld [vmem:[#allocation5 + $0xa20] sm:$0xff] }
 0x102   :  { %9605 = vmatprep.subr.bf16.mxu0 %v14211_v25  ;;  %10121 = vmatprep.subr.bf16.mxu1 %v14213_v28  ;;  %v462_v25 = vld [vmem:[#allocation5 + $0xa08] sm:$0xff]  ;;  %v14266_v28 = vcombine.low %v453_v12, %v457_v13  ;;  %v14274_v38 = vcombine.low %v461_v23, %v465_v24  ;;  %v513_v12 = vld [vmem:[#allocation5 + $0xba0] sm:$0xff] }
 0x103   :  { %v14277_v36 = vcombine.high %v462_v25, %v466_v26  ;;  %v510_v13 = vld [vmem:[#allocation5 + $0xb88] sm:$0xff] }
 0x104   :  { %9595 = vmatmul.mubr.bf16.vlgmr.msra.gmra.mrb[0].mxu0 %v16850_v30  ;;  %10111 = vmatmul.mubr.bf16.vlgmr.msra.gmra.mrb[0].mxu1 %v16850_v30 }
 0x105   :  { %9606 = vmatpush1.bf16.msra.mxu0 %v14210_v31  ;;  %10122 = vmatpush1.bf16.msra.mxu1 %v14212_v32  ;;  %v14268_v31 = vcombine.low %v454_v14, %v458_v19  ;;  %v14275_v32 = vcombine.high %v461_v23, %v465_v24  ;;  %v521_v23 = vld [vmem:[#allocation5 + $0xbe0] sm:$0xff]  ;;  %v518_v24 = vld [vmem:[#allocation5 + $0xbc8] sm:$0xff] }
 0x106   :  { %9607 = vmatprep.subr.bf16.mxu0 %v14219_v33  ;;  %10123 = vmatprep.subr.bf16.mxu1 %v14221_v35  ;;  %v469_v33 = vld [vmem:[#allocation5 + $0xa40] sm:$0xff]  ;;  %v470_v35 = vld [vmem:[#allocation5 + $0xa48] sm:$0xff] }
 0x107   :  { %9637 = vmatprep.mubr.bf16.mxu0 %v16854_v39  ;;  %10153 = vmatprep.mubr.bf16.mxu1 %v16854_v39  ;;  %v14285_v43 = vcombine.high %v470_v35, %v474_v37  ;;  %v14282_v45 = vcombine.low %v469_v33, %v473_v34 }
 0x109   :  { %9608 = vmatpush1.bf16.msra.mxu0 %v14218_v17  ;;  %10124 = vmatpush1.bf16.msra.mxu1 %v14220_v18  ;;  %v14276_v17 = vcombine.low %v462_v25, %v466_v26  ;;  %v14283_v18 = vcombine.high %v469_v33, %v473_v34  ;;  %v529_v33 = vld [vmem:[#allocation5 + $0xc20] sm:$0xff]  ;;  %v526_v34 = vld [vmem:[#allocation5 + $0xc08] sm:$0xff] }
 0x10a   :  { %9609 = vmatprep.subr.bf16.mxu0 %v14227_v40  ;;  %10125 = vmatprep.subr.bf16.mxu1 %v14229_v44  ;;  %v477_v40 = vld [vmem:[#allocation5 + $0xa80] sm:$0xff]  ;;  %v482_v44 = vld [vmem:[#allocation5 + $0xaa8] sm:$0xff] }
 0x10b   :  { %v14293_v51 = vcombine.high %v478_v42, %v482_v44  ;;  %v14290_v55 = vcombine.low %v477_v40, %v481_v41 }
 0x10d   :  { %9610 = vmatpush1.bf16.msra.mxu0 %v14226_v46  ;;  %10126 = vmatpush1.bf16.msra.mxu1 %v14228_v47  ;;  %v14284_v46 = vcombine.low %v470_v35, %v474_v37  ;;  %v14291_v47 = vcombine.high %v477_v40, %v481_v41  ;;  %v534_v41 = vld [vmem:[#allocation5 + $0xc48] sm:$0xff] }
 0x10e   :  { %9611 = vmatprep.subr.bf16.mxu0 %v14235_v48  ;;  %10127 = vmatprep.subr.bf16.mxu1 %v14237_v52  ;;  %v485_v48 = vld [vmem:[#allocation5 + $0xac0] sm:$0xff]  ;;  %v490_v52 = vld [vmem:[#allocation5 + $0xae8] sm:$0xff] }
 0x10f   :  { %v14301_v62 = vcombine.high %v486_v50, %v490_v52  ;;  %v14298_v0 = vcombine.low %v485_v48, %v489_v49 }
 0x111   :  { %9612 = vmatpush1.bf16.msra.mxu0 %v14234_v56  ;;  %10128 = vmatpush1.bf16.msra.mxu1 %v14236_v57  ;;  %v14292_v56 = vcombine.low %v478_v42, %v482_v44  ;;  %v14299_v57 = vcombine.high %v485_v48, %v489_v49  ;;  %v538_v42 = vld [vmem:[#allocation5 + $0xc68] sm:$0xff] }
 0x112   :  { %9613 = vmatprep.subr.bf16.mxu0 %v14243_v59  ;;  %10129 = vmatprep.subr.bf16.mxu1 %v14245_v63  ;;  %v493_v59 = vld [vmem:[#allocation5 + $0xb00] sm:$0xff]  ;;  %v498_v63 = vld [vmem:[#allocation5 + $0xb28] sm:$0xff] }
 0x113   :  { %v14309_v6 = vcombine.high %v494_v61, %v498_v63  ;;  %v14306_v8 = vcombine.low %v493_v59, %v497_v60 }
 0x115   :  { %9614 = vmatpush1.bf16.msra.mxu0 %v14242_v1  ;;  %10130 = vmatpush1.bf16.msra.mxu1 %v14244_v2  ;;  %v14300_v1 = vcombine.low %v486_v50, %v490_v52  ;;  %v14307_v2 = vcombine.high %v493_v59, %v497_v60  ;;  %v541_v50 = vld [vmem:[#allocation5 + $0xc80] sm:$0xff] }
 0x116   :  { %9615 = vmatprep.subr.bf16.mxu0 %v14251_v3  ;;  %10131 = vmatprep.subr.bf16.mxu1 %v14253_v7  ;;  %v501_v3 = vld [vmem:[#allocation5 + $0xb40] sm:$0xff]  ;;  %v506_v7 = vld [vmem:[#allocation5 + $0xb68] sm:$0xff] }
 0x117   :  { %v14317_v14 = vcombine.high %v502_v5, %v506_v7  ;;  %v14314_v19 = vcombine.low %v501_v3, %v505_v4  ;;  %v545_v52 = vld [vmem:[#allocation5 + $0xca0] sm:$0xff] }
 0x118   :  { %v14355_v59 = vcombine.high %v541_v50, %v545_v52  ;;  %v549_v60 = vld [vmem:[#allocation5 + $0xcc0] sm:$0xff] }
 0x119   :  { %9616 = vmatpush1.bf16.msra.mxu0 %v14250_v9  ;;  %10132 = vmatpush1.bf16.msra.mxu1 %v14252_v10  ;;  %v14308_v9 = vcombine.low %v494_v61, %v498_v63  ;;  %v14315_v10 = vcombine.high %v501_v3, %v505_v4  ;;  %v553_v61 = vld [vmem:[#allocation5 + $0xce0] sm:$0xff] }
 0x11a   :  { %9617 = vmatprep.subr.bf16.mxu0 %v14259_v11  ;;  %10133 = vmatprep.subr.bf16.mxu1 %v14261_v16  ;;  %v509_v11 = vld [vmem:[#allocation5 + $0xb80] sm:$0xff]  ;;  %v514_v16 = vld [vmem:[#allocation5 + $0xba8] sm:$0xff]  ;;  %v14363_v3 = vcombine.high %v549_v60, %v553_v61 }
 0x11b   :  { %v14325_v25 = vcombine.high %v510_v13, %v514_v16  ;;  %v14322_v26 = vcombine.low %v509_v11, %v513_v12  ;;  %v557_v4 = vld [vmem:[#allocation5 + $0xd00] sm:$0xff] }
 0x11d   :  { %9618 = vmatpush1.bf16.msra.mxu0 %v14258_v20  ;;  %10134 = vmatpush1.bf16.msra.mxu1 %v14260_v21  ;;  %v14316_v20 = vcombine.low %v502_v5, %v506_v7  ;;  %v14323_v21 = vcombine.high %v509_v11, %v513_v12  ;;  %v561_v5 = vld [vmem:[#allocation5 + $0xd20] sm:$0xff] }
 0x11e   :  { %9619 = vmatprep.subr.bf16.mxu0 %v14267_v22  ;;  %10135 = vmatprep.subr.bf16.mxu1 %v14269_v54  ;;  %v517_v22 = vld [vmem:[#allocation5 + $0xbc0] sm:$0xff]  ;;  %v522_v54 = vld [vmem:[#allocation5 + $0xbe8] sm:$0xff]  ;;  %v14371_v11 = vcombine.high %v557_v4, %v561_v5 }
 0x11f   :  { %v14333_v35 = vcombine.high %v518_v24, %v522_v54  ;;  %v14330_v37 = vcombine.low %v517_v22, %v521_v23  ;;  %v565_v12 = vld [vmem:[#allocation5 + $0xd40] sm:$0xff] }
 0x121   :  { %9620 = vmatpush1.bf16.msra.mxu0 %v14266_v28  ;;  %10136 = vmatpush1.bf16.msra.mxu1 %v14268_v31  ;;  %v14324_v28 = vcombine.low %v510_v13, %v514_v16  ;;  %v14331_v31 = vcombine.high %v517_v22, %v521_v23  ;;  %v569_v13 = vld [vmem:[#allocation5 + $0xd60] sm:$0xff] }
 0x122   :  { %9621 = vmatprep.subr.bf16.mxu0 %v14275_v32  ;;  %10137 = vmatprep.subr.bf16.mxu1 %v14277_v36  ;;  %v525_v32 = vld [vmem:[#allocation5 + $0xc00] sm:$0xff]  ;;  %v530_v36 = vld [vmem:[#allocation5 + $0xc28] sm:$0xff]  ;;  %v14379_v22 = vcombine.high %v565_v12, %v569_v13 }
 0x123   :  { %v14339_v40 = vcombine.high %v525_v32, %v529_v33  ;;  %v14341_v44 = vcombine.high %v526_v34, %v530_v36  ;;  %v14340_v48 = vcombine.low %v526_v34, %v530_v36  ;;  %v573_v23 = vld [vmem:[#allocation5 + $0xd80] sm:$0xff] }
 0x124   :  { %v585_v34 = vld [vmem:[#allocation5 + $0xde0] sm:$0xff] }
 0x125   :  { %9622 = vmatpush1.bf16.msra.mxu0 %v14274_v38  ;;  %10138 = vmatpush1.bf16.msra.mxu1 %v14276_v17  ;;  %v533_v38 = vld [vmem:[#allocation5 + $0xc40] sm:$0xff] }
 0x126   :  { %9623 = vmatprep.subr.bf16.mxu0 %v14283_v18  ;;  %10139 = vmatprep.subr.bf16.mxu1 %v14285_v43  ;;  %v537_v17 = vld [vmem:[#allocation5 + $0xc60] sm:$0xff]  ;;  %v14332_v18 = vcombine.low %v518_v24, %v522_v54  ;;  %v16860_v43 = vld [vmem:[#allocation2 + $0x18] sm:$0xff] }
 0x127   :  { %v14347_v49 = vcombine.high %v533_v38, %v537_v17  ;;  %v577_v24 = vld [vmem:[#allocation5 + $0xda0] sm:$0xff] }
 0x129   :  { %9624 = vmatpush1.bf16.msra.mxu0 %v14282_v45  ;;  %10140 = vmatpush1.bf16.msra.mxu1 %v14284_v46  ;;  %v16862_v45 = vld [vmem:[#allocation2 + $0x78] sm:$0xff]  ;;  %v16866_v46 = vcombine.low %v16844_v27, %v16846_v29  ;;  %v14346_v27 = vcombine.low %v533_v38, %v537_v17  ;;  %v14348_v29 = vcombine.low %v534_v41, %v538_v42 }
 0x12a   :  { %9625 = vmatprep.subr.bf16.mxu0 %v14291_v47  ;;  %10141 = vmatprep.subr.bf16.mxu1 %v14293_v51  ;;  %v14338_v47 = vcombine.low %v525_v32, %v529_v33  ;;  %v14349_v51 = vcombine.high %v534_v41, %v538_v42  ;;  %v14387_v32 = vcombine.high %v573_v23, %v577_v24  ;;  %v581_v33 = vld [vmem:[#allocation5 + $0xdc0] sm:$0xff]  ;;  %v590_v42 = vld [vmem:[#allocation5 + $0xe08] sm:$0xff] }
 0x12b   :  { %v14386_v38 = vcombine.low %v573_v23, %v577_v24  ;;  %v593_v41 = vld [vmem:[#allocation5 + $0xe20] sm:$0xff] }
 0x12d   :  { %9626 = vmatpush1.bf16.msra.mxu0 %v14290_v55  ;;  %10142 = vmatpush1.bf16.msra.mxu1 %v14292_v56  ;;  %v542_v55 = vld [vmem:[#allocation5 + $0xc88] sm:$0xff] }
 0x12e   :  { %9627 = vmatprep.subr.bf16.mxu0 %v14299_v57  ;;  %10143 = vmatprep.subr.bf16.mxu1 %v14301_v62  ;;  %v546_v56 = vld [vmem:[#allocation5 + $0xca8] sm:$0xff]  ;;  %v16870_v57 = vcombine.high %v16860_v43, %v16862_v45 }
 0x12f   :  { %v550_v62 = vld [vmem:[#allocation5 + $0xcc8] sm:$0xff]  ;;  %v14357_v63 = vcombine.high %v542_v55, %v546_v56 }
 0x131   :  { %9628 = vmatpush1.bf16.msra.mxu0 %v14298_v0  ;;  %10144 = vmatpush1.bf16.msra.mxu1 %v14300_v1  ;;  %v554_v0 = vld [vmem:[#allocation5 + $0xce8] sm:$0xff]  ;;  %v14354_v1 = vcombine.low %v541_v50, %v545_v52  ;;  %v601_v52 = vld [vmem:[#allocation5 + $0xe60] sm:$0xff] }
 0x132   :  { %9629 = vmatprep.subr.bf16.mxu0 %v14307_v2  ;;  %10145 = vmatprep.subr.bf16.mxu1 %v14309_v6  ;;  %v14356_v2 = vcombine.low %v542_v55, %v546_v56  ;;  %v558_v6 = vld [vmem:[#allocation5 + $0xd08] sm:$0xff]  ;;  %v14365_v7 = vcombine.high %v550_v62, %v554_v0 }
 0x133   :  { %v598_v55 = vld [vmem:[#allocation5 + $0xe48] sm:$0xff] }
 0x135   :  { %9630 = vmatpush1.bf16.msra.mxu0 %v14306_v8  ;;  %10146 = vmatpush1.bf16.msra.mxu1 %v14308_v9  ;;  %v562_v8 = vld [vmem:[#allocation5 + $0xd28] sm:$0xff]  ;;  %v14362_v9 = vcombine.low %v549_v60, %v553_v61  ;;  %v605_v61 = vld [vmem:[#allocation5 + $0xe80] sm:$0xff] }
 0x136   :  { %9631 = vmatprep.subr.bf16.mxu0 %v14315_v10  ;;  %10147 = vmatprep.subr.bf16.mxu1 %v14317_v14  ;;  %v14364_v10 = vcombine.low %v550_v62, %v554_v0  ;;  %v566_v14 = vld [vmem:[#allocation5 + $0xd48] sm:$0xff]  ;;  %v14373_v16 = vcombine.high %v558_v6, %v562_v8  ;;  %v609_v62 = vld [vmem:[#allocation5 + $0xea0] sm:$0xff] }
 0x139   :  { %9632 = vmatpush1.bf16.msra.mxu0 %v14314_v19  ;;  %10148 = vmatpush1.bf16.msra.mxu1 %v14316_v20  ;;  %v570_v19 = vld [vmem:[#allocation5 + $0xd68] sm:$0xff]  ;;  %v14370_v20 = vcombine.low %v557_v4, %v561_v5  ;;  %v14419_v4 = vcombine.high %v605_v61, %v609_v62 }
 0x13a   :  { %9633 = vmatprep.subr.bf16.mxu0 %v14323_v21  ;;  %10149 = vmatprep.subr.bf16.mxu1 %v14325_v25  ;;  %v14372_v21 = vcombine.low %v558_v6, %v562_v8  ;;  %v574_v25 = vld [vmem:[#allocation5 + $0xd88] sm:$0xff]  ;;  %v14381_v54 = vcombine.high %v566_v14, %v570_v19  ;;  %v613_v6 = vld [vmem:[#allocation5 + $0xec0] sm:$0xff] }
 0x13b   :  { %v614_v8 = vld [vmem:[#allocation5 + $0xec8] sm:$0xff] }
 0x13d   :  { %9634 = vmatpush1.bf16.msra.mxu0 %v14322_v26  ;;  %10150 = vmatpush1.bf16.msra.mxu1 %v14324_v28  ;;  %v578_v26 = vld [vmem:[#allocation5 + $0xda8] sm:$0xff]  ;;  %v14378_v28 = vcombine.low %v565_v12, %v569_v13 }
 0x13e   :  { %9635 = vmatprep.subr.bf16.mxu0 %v14331_v31  ;;  %10151 = vmatprep.subr.bf16.mxu1 %v14333_v35  ;;  %v14380_v31 = vcombine.low %v566_v14, %v570_v19  ;;  %v582_v35 = vld [vmem:[#allocation5 + $0xdc8] sm:$0xff]  ;;  %v14389_v36 = vcombine.high %v574_v25, %v578_v26  ;;  %v14388_v17 = vcombine.low %v574_v25, %v578_v26  ;;  %v621_v14 = vld [vmem:[#allocation5 + $0xf00] sm:$0xff] }
 0x13f   :  { %v622_v19 = vld [vmem:[#allocation5 + $0xf08] sm:$0xff]  ;;  %v629_v25 = vld [vmem:[#allocation5 + $0xf40] sm:$0xff] }
 0x140   :  { %v630_v26 = vld [vmem:[#allocation5 + $0xf48] sm:$0xff] }
 0x141   :  { %9636 = vmatpush1.bf16.msra.mxu0 %v14330_v37  ;;  %10152 = vmatpush1.bf16.msra.mxu1 %v14332_v18  ;;  %v586_v37 = vld [vmem:[#allocation5 + $0xde8] sm:$0xff]  ;;  %v14395_v18 = vcombine.high %v581_v33, %v585_v34 }
 0x142   :  { %9648 = vmatprep.subr.bf16.mxu0 %v14339_v40  ;;  %10164 = vmatprep.subr.bf16.mxu1 %v14341_v44  ;;  %v589_v40 = vld [vmem:[#allocation5 + $0xe00] sm:$0xff]  ;;  %v14397_v44 = vcombine.high %v582_v35, %v586_v37 }
 0x143   :  { %v14403_v50 = vcombine.high %v589_v40, %v593_v41 }
 0x144   :  { %9638 = vmatmul.mubr.bf16.vlgmr.msra.gmra.mrb[0].mxu0 %v16866_v46  ;;  %10154 = vmatmul.mubr.bf16.vlgmr.msra.gmra.mrb[0].mxu1 %v16866_v46 }
 0x145   :  { %9649 = vmatpush1.bf16.msra.mxu0 %v14338_v47  ;;  %10165 = vmatpush1.bf16.msra.mxu1 %v14340_v48  ;;  %v594_v47 = vld [vmem:[#allocation5 + $0xe28] sm:$0xff]  ;;  %v14394_v48 = vcombine.low %v581_v33, %v585_v34 }
 0x146   :  { %9650 = vmatprep.subr.bf16.mxu0 %v14347_v49  ;;  %10166 = vmatprep.subr.bf16.mxu1 %v14349_v51  ;;  %v14396_v49 = vcombine.low %v582_v35, %v586_v37  ;;  %v597_v51 = vld [vmem:[#allocation5 + $0xe40] sm:$0xff]  ;;  %v14405_v56 = vcombine.high %v590_v42, %v594_v47  ;;  %v638_v37 = vld [vmem:[#allocation5 + $0xf88] sm:$0xff] }
 0x147   :  { %9680 = vmatprep.mubr.bf16.mxu0 %v16870_v57  ;;  %10196 = vmatprep.mubr.bf16.mxu1 %v16870_v57  ;;  %v14411_v60 = vcombine.high %v597_v51, %v601_v52  ;;  %v637_v35 = vld [vmem:[#allocation5 + $0xf80] sm:$0xff] }
 0x149   :  { %9651 = vmatpush1.bf16.msra.mxu0 %v14346_v27  ;;  %10167 = vmatpush1.bf16.msra.mxu1 %v14348_v29  ;;  %v602_v27 = vld [vmem:[#allocation5 + $0xe68] sm:$0xff]  ;;  %v14402_v29 = vcombine.low %v589_v40, %v593_v41 }
 0x14a   :  { %9652 = vmatprep.subr.bf16.mxu0 %v14355_v59  ;;  %10168 = vmatprep.subr.bf16.mxu1 %v14357_v63  ;;  %v14404_v59 = vcombine.low %v590_v42, %v594_v47  ;;  %v606_v63 = vld [vmem:[#allocation5 + $0xe88] sm:$0xff]  ;;  %v14413_v0 = vcombine.high %v598_v55, %v602_v27  ;;  %v645_v42 = vld [vmem:[#allocation5 + $0xfc0] sm:$0xff] }
 0x14b   :  { %v646_v47 = vld [vmem:[#allocation5 + $0xfc8] sm:$0xff] }
 0x14d   :  { %9653 = vmatpush1.bf16.msra.mxu0 %v14354_v1  ;;  %10169 = vmatpush1.bf16.msra.mxu1 %v14356_v2  ;;  %v610_v1 = vld [vmem:[#allocation5 + $0xea8] sm:$0xff]  ;;  %v14410_v2 = vcombine.low %v597_v51, %v601_v52 }
 0x14e   :  { %9654 = vmatprep.subr.bf16.mxu0 %v14363_v3  ;;  %10170 = vmatprep.subr.bf16.mxu1 %v14365_v7  ;;  %v14412_v3 = vcombine.low %v598_v55, %v602_v27  ;;  %v14421_v5 = vcombine.high %v606_v63, %v610_v1  ;;  %v617_v7 = vld [vmem:[#allocation5 + $0xee0] sm:$0xff]  ;;  %v654_v27 = vld [vmem:[#allocation5 + $0x1008] sm:$0xff] }
 0x14f   :  { %v14427_v12 = vcombine.high %v613_v6, %v617_v7  ;;  %v653_v55 = vld [vmem:[#allocation5 + $0x1000] sm:$0xff] }
 0x151   :  { %9655 = vmatpush1.bf16.msra.mxu0 %v14362_v9  ;;  %10171 = vmatpush1.bf16.msra.mxu1 %v14364_v10  ;;  %v618_v9 = vld [vmem:[#allocation5 + $0xee8] sm:$0xff]  ;;  %v14418_v10 = vcombine.low %v605_v61, %v609_v62 }
 0x152   :  { %9656 = vmatprep.subr.bf16.mxu0 %v14371_v11  ;;  %10172 = vmatprep.subr.bf16.mxu1 %v14373_v16  ;;  %v14420_v11 = vcombine.low %v606_v63, %v610_v1  ;;  %v14429_v13 = vcombine.high %v614_v8, %v618_v9  ;;  %v625_v16 = vld [vmem:[#allocation5 + $0xf20] sm:$0xff]  ;;  %v662_v1 = vld [vmem:[#allocation5 + $0x1048] sm:$0xff] }
 0x153   :  { %v14435_v23 = vcombine.high %v621_v14, %v625_v16  ;;  %v661_v63 = vld [vmem:[#allocation5 + $0x1040] sm:$0xff] }
 0x155   :  { %9657 = vmatpush1.bf16.msra.mxu0 %v14370_v20  ;;  %10173 = vmatpush1.bf16.msra.mxu1 %v14372_v21  ;;  %v626_v20 = vld [vmem:[#allocation5 + $0xf28] sm:$0xff]  ;;  %v14426_v21 = vcombine.low %v613_v6, %v617_v7 }
 0x156   :  { %9658 = vmatprep.subr.bf16.mxu0 %v14379_v22  ;;  %10174 = vmatprep.subr.bf16.mxu1 %v14381_v54  ;;  %v14428_v22 = vcombine.low %v614_v8, %v618_v9  ;;  %v14437_v24 = vcombine.high %v622_v19, %v626_v20  ;;  %v633_v54 = vld [vmem:[#allocation5 + $0xf60] sm:$0xff] }
 0x157   :  { %v14443_v33 = vcombine.high %v629_v25, %v633_v54 }
 0x159   :  { %9659 = vmatpush1.bf16.msra.mxu0 %v14378_v28  ;;  %10175 = vmatpush1.bf16.msra.mxu1 %v14380_v31  ;;  %v634_v28 = vld [vmem:[#allocation5 + $0xf68] sm:$0xff]  ;;  %v14434_v31 = vcombine.low %v621_v14, %v625_v16 }
 0x15a   :  { %9660 = vmatprep.subr.bf16.mxu0 %v14387_v32  ;;  %10176 = vmatprep.subr.bf16.mxu1 %v14389_v36  ;;  %v14436_v32 = vcombine.low %v622_v19, %v626_v20  ;;  %v14445_v34 = vcombine.high %v630_v26, %v634_v28  ;;  %v641_v36 = vld [vmem:[#allocation5 + $0xfa0] sm:$0xff] }
 0x15b   :  { %v14451_v40 = vcombine.high %v637_v35, %v641_v36  ;;  %v677_v20 = vld [vmem:[#allocation5 + $0x10c0] sm:$0xff] }
 0x15d   :  { %9661 = vmatpush1.bf16.msra.mxu0 %v14386_v38  ;;  %10177 = vmatpush1.bf16.msra.mxu1 %v14388_v17  ;;  %v642_v38 = vld [vmem:[#allocation5 + $0xfa8] sm:$0xff]  ;;  %v14442_v17 = vcombine.low %v629_v25, %v633_v54 }
 0x15e   :  { %9662 = vmatprep.subr.bf16.mxu0 %v14395_v18  ;;  %10178 = vmatprep.subr.bf16.mxu1 %v14397_v44  ;;  %v14444_v18 = vcombine.low %v630_v26, %v634_v28  ;;  %v14453_v41 = vcombine.high %v638_v37, %v642_v38  ;;  %v649_v44 = vld [vmem:[#allocation5 + $0xfe0] sm:$0xff] }
 0x15f   :  { %v14459_v51 = vcombine.high %v645_v42, %v649_v44  ;;  %v685_v28 = vld [vmem:[#allocation5 + $0x1100] sm:$0xff] }
 0x161   :  { %9663 = vmatpush1.bf16.msra.mxu0 %v14394_v48  ;;  %10179 = vmatpush1.bf16.msra.mxu1 %v14396_v49  ;;  %v650_v48 = vld [vmem:[#allocation5 + $0xfe8] sm:$0xff]  ;;  %v14450_v49 = vcombine.low %v637_v35, %v641_v36 }
 0x162   :  { %9664 = vmatprep.subr.bf16.mxu0 %v14403_v50  ;;  %10180 = vmatprep.subr.bf16.mxu1 %v14405_v56  ;;  %v14452_v50 = vcombine.low %v638_v37, %v642_v38  ;;  %v14461_v52 = vcombine.high %v646_v47, %v650_v48  ;;  %v657_v56 = vld [vmem:[#allocation5 + $0x1020] sm:$0xff] }
 0x163   :  { %v14467_v61 = vcombine.high %v653_v55, %v657_v56  ;;  %v14466_v6 = vcombine.low %v653_v55, %v657_v56  ;;  %v693_v38 = vld [vmem:[#allocation5 + $0x1140] sm:$0xff] }
 0x165   :  { %9665 = vmatpush1.bf16.msra.mxu0 %v14402_v29  ;;  %10181 = vmatpush1.bf16.msra.mxu1 %v14404_v59  ;;  %v658_v29 = vld [vmem:[#allocation5 + $0x1028] sm:$0xff]  ;;  %v14458_v59 = vcombine.low %v645_v42, %v649_v44 }
 0x166   :  { %9666 = vmatprep.subr.bf16.mxu0 %v14411_v60  ;;  %10182 = vmatprep.subr.bf16.mxu1 %v14413_v0  ;;  %v14460_v60 = vcombine.low %v646_v47, %v650_v48  ;;  %v14469_v62 = vcombine.high %v654_v27, %v658_v29  ;;  %v665_v0 = vld [vmem:[#allocation5 + $0x1060] sm:$0xff]  ;;  %v14468_v7 = vcombine.low %v654_v27, %v658_v29 }
 0x167   :  { %v14475_v8 = vcombine.high %v661_v63, %v665_v0  ;;  %v701_v48 = vld [vmem:[#allocation5 + $0x1180] sm:$0xff] }
 0x168   :  { %v709_v29 = vld [vmem:[#allocation5 + $0x11c0] sm:$0xff] }
 0x169   :  { %9667 = vmatpush1.bf16.msra.mxu0 %v14410_v2  ;;  %10183 = vmatpush1.bf16.msra.mxu1 %v14412_v3  ;;  %v16878_v2 = vcombine.low %v16860_v43, %v16862_v45  ;;  %v666_v3 = vld [vmem:[#allocation5 + $0x1068] sm:$0xff] }
 0x16a   :  { %9668 = vmatprep.subr.bf16.mxu0 %v14419_v4  ;;  %10184 = vmatprep.subr.bf16.mxu1 %v14421_v5  ;;  %v16880_v4 = vld [vmem:[#allocation2 + $0x20] sm:$0xff]  ;;  %v14477_v9 = vcombine.high %v662_v1, %v666_v3  ;;  %v670_v43 = vld [vmem:[#allocation5 + $0x1088] sm:$0xff]  ;;  %v14476_v14 = vcombine.low %v662_v1, %v666_v3 }
 0x16b   :  { %v16882_v5 = vld [vmem:[#allocation2 + $0x80] sm:$0xff]  ;;  %v674_v45 = vld [vmem:[#allocation5 + $0x10a8] sm:$0xff] }
 0x16c   :  { %v14485_v19 = vcombine.high %v670_v43, %v674_v45  ;;  %v14484_v25 = vcombine.low %v670_v43, %v674_v45  ;;  %v717_v3 = vld [vmem:[#allocation5 + $0x1200] sm:$0xff] }
 0x16d   :  { %9669 = vmatpush1.bf16.msra.mxu0 %v14418_v10  ;;  %10185 = vmatpush1.bf16.msra.mxu1 %v14420_v11  ;;  %v669_v10 = vld [vmem:[#allocation5 + $0x1080] sm:$0xff] }
 0x16e   :  { %9670 = vmatprep.subr.bf16.mxu0 %v14427_v12  ;;  %10186 = vmatprep.subr.bf16.mxu1 %v14429_v13  ;;  %v673_v11 = vld [vmem:[#allocation5 + $0x10a0] sm:$0xff]  ;;  %v16886_v12 = vcombine.high %v16880_v4, %v16882_v5  ;;  %v14474_v13 = vcombine.low %v661_v63, %v665_v0 }
 0x16f   :  { %v14483_v16 = vcombine.high %v669_v10, %v673_v11  ;;  %v725_v45 = vld [vmem:[#allocation5 + $0x1240] sm:$0xff] }
 0x171   :  { %9671 = vmatpush1.bf16.msra.mxu0 %v14426_v21  ;;  %10187 = vmatpush1.bf16.msra.mxu1 %v14428_v22  ;;  %v681_v21 = vld [vmem:[#allocation5 + $0x10e0] sm:$0xff]  ;;  %v678_v22 = vld [vmem:[#allocation5 + $0x10c8] sm:$0xff] }
 0x172   :  { %9672 = vmatprep.subr.bf16.mxu0 %v14435_v23  ;;  %10188 = vmatprep.subr.bf16.mxu1 %v14437_v24  ;;  %v682_v23 = vld [vmem:[#allocation5 + $0x10e8] sm:$0xff]  ;;  %v14482_v24 = vcombine.low %v669_v10, %v673_v11  ;;  %v14491_v54 = vcombine.high %v677_v20, %v681_v21 }
 0x173   :  { %v14493_v26 = vcombine.high %v678_v22, %v682_v23  ;;  %v14492_v35 = vcombine.low %v678_v22, %v682_v23  ;;  %v733_v23 = vld [vmem:[#allocation5 + $0x1280] sm:$0xff] }
 0x175   :  { %9673 = vmatpush1.bf16.msra.mxu0 %v14434_v31  ;;  %10189 = vmatpush1.bf16.msra.mxu1 %v14436_v32  ;;  %v689_v31 = vld [vmem:[#allocation5 + $0x1120] sm:$0xff]  ;;  %v686_v32 = vld [vmem:[#allocation5 + $0x1108] sm:$0xff] }
 0x176   :  { %9674 = vmatprep.subr.bf16.mxu0 %v14443_v33  ;;  %10190 = vmatprep.subr.bf16.mxu1 %v14445_v34  ;;  %v690_v33 = vld [vmem:[#allocation5 + $0x1128] sm:$0xff]  ;;  %v14490_v34 = vcombine.low %v677_v20, %v681_v21  ;;  %v14499_v36 = vcombine.high %v685_v28, %v689_v31 }
 0x177   :  { %v14501_v37 = vcombine.high %v686_v32, %v690_v33  ;;  %v14500_v42 = vcombine.low %v686_v32, %v690_v33  ;;  %v741_v33 = vld [vmem:[#allocation5 + $0x12c0] sm:$0xff] }
 0x179   :  { %9675 = vmatpush1.bf16.msra.mxu0 %v14442_v17  ;;  %10191 = vmatpush1.bf16.msra.mxu1 %v14444_v18  ;;  %v697_v17 = vld [vmem:[#allocation5 + $0x1160] sm:$0xff]  ;;  %v694_v18 = vld [vmem:[#allocation5 + $0x1148] sm:$0xff] }
 0x17a   :  { %9676 = vmatprep.subr.bf16.mxu0 %v14451_v40  ;;  %10192 = vmatprep.subr.bf16.mxu1 %v14453_v41  ;;  %v698_v40 = vld [vmem:[#allocation5 + $0x1168] sm:$0xff]  ;;  %v14498_v41 = vcombine.low %v685_v28, %v689_v31  ;;  %v14507_v44 = vcombine.high %v693_v38, %v697_v17 }
 0x17b   :  { %v14509_v47 = vcombine.high %v694_v18, %v698_v40  ;;  %v14508_v55 = vcombine.low %v694_v18, %v698_v40  ;;  %v749_v40 = vld [vmem:[#allocation5 + $0x1300] sm:$0xff] }
 0x17d   :  { %9677 = vmatpush1.bf16.msra.mxu0 %v14450_v49  ;;  %10193 = vmatpush1.bf16.msra.mxu1 %v14452_v50  ;;  %v705_v49 = vld [vmem:[#allocation5 + $0x11a0] sm:$0xff]  ;;  %v702_v50 = vld [vmem:[#allocation5 + $0x1188] sm:$0xff] }
 0x17e   :  { %9678 = vmatprep.subr.bf16.mxu0 %v14459_v51  ;;  %10194 = vmatprep.subr.bf16.mxu1 %v14461_v52  ;;  %v706_v51 = vld [vmem:[#allocation5 + $0x11a8] sm:$0xff]  ;;  %v14506_v52 = vcombine.low %v693_v38, %v697_v17  ;;  %v14515_v56 = vcombine.high %v701_v48, %v705_v49 }
 0x17f   :  { %v14517_v27 = vcombine.high %v702_v50, %v706_v51  ;;  %v14516_v63 = vcombine.low %v702_v50, %v706_v51  ;;  %v757_v51 = vld [vmem:[#allocation5 + $0x1340] sm:$0xff] }
 0x181   :  { %9679 = vmatpush1.bf16.msra.mxu0 %v14458_v59  ;;  %10195 = vmatpush1.bf16.msra.mxu1 %v14460_v60  ;;  %v713_v59 = vld [vmem:[#allocation5 + $0x11e0] sm:$0xff]  ;;  %v710_v60 = vld [vmem:[#allocation5 + $0x11c8] sm:$0xff] }
 0x182   :  { %9691 = vmatprep.subr.bf16.mxu0 %v14467_v61  ;;  %10207 = vmatprep.subr.bf16.mxu1 %v14469_v62  ;;  %v714_v61 = vld [vmem:[#allocation5 + $0x11e8] sm:$0xff]  ;;  %v14514_v62 = vcombine.low %v701_v48, %v705_v49  ;;  %v14523_v0 = vcombine.high %v709_v29, %v713_v59 }
 0x183   :  { %v14525_v1 = vcombine.high %v710_v60, %v714_v61  ;;  %v14524_v10 = vcombine.low %v710_v60, %v714_v61  ;;  %v765_v61 = vld [vmem:[#allocation5 + $0x1380] sm:$0xff] }
 0x184   :  { %9681 = vmatmul.mubr.bf16.vlgmr.msra.gmra.mrb[0].mxu0 %v16878_v2  ;;  %10197 = vmatmul.mubr.bf16.vlgmr.msra.gmra.mrb[0].mxu1 %v16878_v2 }
 0x185   :  { %9692 = vmatpush1.bf16.msra.mxu0 %v14466_v6  ;;  %10208 = vmatpush1.bf16.msra.mxu1 %v14468_v7  ;;  %v721_v6 = vld [vmem:[#allocation5 + $0x1220] sm:$0xff]  ;;  %v718_v7 = vld [vmem:[#allocation5 + $0x1208] sm:$0xff] }
 0x186   :  { %9693 = vmatprep.subr.bf16.mxu0 %v14475_v8  ;;  %10209 = vmatprep.subr.bf16.mxu1 %v14477_v9  ;;  %v722_v8 = vld [vmem:[#allocation5 + $0x1228] sm:$0xff]  ;;  %v14522_v9 = vcombine.low %v709_v29, %v713_v59  ;;  %v14531_v11 = vcombine.high %v717_v3, %v721_v6 }
 0x187   :  { %9723 = vmatprep.mubr.bf16.mxu0 %v16886_v12  ;;  %10239 = vmatprep.mubr.bf16.mxu1 %v16886_v12  ;;  %v14533_v43 = vcombine.high %v718_v7, %v722_v8  ;;  %v14532_v20 = vcombine.low %v718_v7, %v722_v8  ;;  %v773_v8 = vld [vmem:[#allocation5 + $0x13c0] sm:$0xff] }
 0x189   :  { %9694 = vmatpush1.bf16.msra.mxu0 %v14474_v13  ;;  %10210 = vmatpush1.bf16.msra.mxu1 %v14476_v14  ;;  %v729_v13 = vld [vmem:[#allocation5 + $0x1260] sm:$0xff]  ;;  %v726_v14 = vld [vmem:[#allocation5 + $0x1248] sm:$0xff] }
 0x18a   :  { %9695 = vmatprep.subr.bf16.mxu0 %v14483_v16  ;;  %10211 = vmatprep.subr.bf16.mxu1 %v14485_v19  ;;  %v730_v16 = vld [vmem:[#allocation5 + $0x1268] sm:$0xff]  ;;  %v14530_v19 = vcombine.low %v717_v3, %v721_v6  ;;  %v14539_v21 = vcombine.high %v725_v45, %v729_v13 }
 0x18b   :  { %v14541_v22 = vcombine.high %v726_v14, %v730_v16  ;;  %v14540_v28 = vcombine.low %v726_v14, %v730_v16  ;;  %v781_v16 = vld [vmem:[#allocation5 + $0x1400] sm:$0xff] }
 0x18d   :  { %9696 = vmatpush1.bf16.msra.mxu0 %v14482_v24  ;;  %10212 = vmatpush1.bf16.msra.mxu1 %v14484_v25  ;;  %v737_v24 = vld [vmem:[#allocation5 + $0x12a0] sm:$0xff]  ;;  %v734_v25 = vld [vmem:[#allocation5 + $0x1288] sm:$0xff] }
 0x18e   :  { %9697 = vmatprep.subr.bf16.mxu0 %v14491_v54  ;;  %10213 = vmatprep.subr.bf16.mxu1 %v14493_v26  ;;  %v738_v54 = vld [vmem:[#allocation5 + $0x12a8] sm:$0xff]  ;;  %v14538_v26 = vcombine.low %v725_v45, %v729_v13  ;;  %v14547_v31 = vcombine.high %v733_v23, %v737_v24 }
 0x18f   :  { %v14549_v32 = vcombine.high %v734_v25, %v738_v54  ;;  %v14548_v38 = vcombine.low %v734_v25, %v738_v54  ;;  %v789_v54 = vld [vmem:[#allocation5 + $0x1440] sm:$0xff] }
 0x191   :  { %9698 = vmatpush1.bf16.msra.mxu0 %v14490_v34  ;;  %10214 = vmatpush1.bf16.msra.mxu1 %v14492_v35  ;;  %v745_v34 = vld [vmem:[#allocation5 + $0x12e0] sm:$0xff]  ;;  %v742_v35 = vld [vmem:[#allocation5 + $0x12c8] sm:$0xff] }
 0x192   :  { %9699 = vmatprep.subr.bf16.mxu0 %v14499_v36  ;;  %10215 = vmatprep.subr.bf16.mxu1 %v14501_v37  ;;  %v746_v36 = vld [vmem:[#allocation5 + $0x12e8] sm:$0xff]  ;;  %v14546_v37 = vcombine.low %v733_v23, %v737_v24  ;;  %v14555_v17 = vcombine.high %v741_v33, %v745_v34 }
 0x193   :  { %v14557_v18 = vcombine.high %v742_v35, %v746_v36  ;;  %v14556_v48 = vcombine.low %v742_v35, %v746_v36 }
 0x195   :  { %9700 = vmatpush1.bf16.msra.mxu0 %v14498_v41  ;;  %10216 = vmatpush1.bf16.msra.mxu1 %v14500_v42  ;;  %v753_v41 = vld [vmem:[#allocation5 + $0x1320] sm:$0xff]  ;;  %v750_v42 = vld [vmem:[#allocation5 + $0x1308] sm:$0xff] }
 0x196   :  { %9701 = vmatprep.subr.bf16.mxu0 %v14507_v44  ;;  %10217 = vmatprep.subr.bf16.mxu1 %v14509_v47  ;;  %v754_v44 = vld [vmem:[#allocation5 + $0x1328] sm:$0xff]  ;;  %v14554_v47 = vcombine.low %v741_v33, %v745_v34  ;;  %v14563_v49 = vcombine.high %v749_v40, %v753_v41 }
 0x197   :  { %v14565_v50 = vcombine.high %v750_v42, %v754_v44  ;;  %v14564_v29 = vcombine.low %v750_v42, %v754_v44  ;;  %v16896_v33 = vld [vmem:[#allocation2 + $0x28] sm:$0xff] }
 0x198   :  { %v16898_v34 = vld [vmem:[#allocation2 + $0x88] sm:$0xff] }
 0x199   :  { %9702 = vmatpush1.bf16.msra.mxu0 %v14506_v52  ;;  %10218 = vmatpush1.bf16.msra.mxu1 %v14508_v55  ;;  %v761_v52 = vld [vmem:[#allocation5 + $0x1360] sm:$0xff]  ;;  %v758_v55 = vld [vmem:[#allocation5 + $0x1348] sm:$0xff] }
 0x19a   :  { %9703 = vmatprep.subr.bf16.mxu0 %v14515_v56  ;;  %10219 = vmatprep.subr.bf16.mxu1 %v14517_v27  ;;  %v762_v56 = vld [vmem:[#allocation5 + $0x1368] sm:$0xff]  ;;  %v14562_v27 = vcombine.low %v749_v40, %v753_v41  ;;  %v14571_v59 = vcombine.high %v757_v51, %v761_v52  ;;  %v16902_v40 = vcombine.high %v16896_v33, %v16898_v34 }
 0x19b   :  { %v14573_v60 = vcombine.high %v758_v55, %v762_v56  ;;  %v14572_v3 = vcombine.low %v758_v55, %v762_v56 }
 0x19d   :  { %9704 = vmatpush1.bf16.msra.mxu0 %v14514_v62  ;;  %10220 = vmatpush1.bf16.msra.mxu1 %v14516_v63  ;;  %v769_v62 = vld [vmem:[#allocation5 + $0x13a0] sm:$0xff]  ;;  %v766_v63 = vld [vmem:[#allocation5 + $0x1388] sm:$0xff] }
 0x19e   :  { %9705 = vmatprep.subr.bf16.mxu0 %v14523_v0  ;;  %10221 = vmatprep.subr.bf16.mxu1 %v14525_v1  ;;  %v770_v0 = vld [vmem:[#allocation5 + $0x13a8] sm:$0xff]  ;;  %v14570_v1 = vcombine.low %v757_v51, %v761_v52  ;;  %v14579_v6 = vcombine.high %v765_v61, %v769_v62 }
 0x19f   :  { %v14581_v7 = vcombine.high %v766_v63, %v770_v0  ;;  %v14580_v45 = vcombine.low %v766_v63, %v770_v0  ;;  %v810_v51 = vld [vmem:[#allocation5 + $0x14e8] sm:$0xff] }
 0x1a1   :  { %9706 = vmatpush1.bf16.msra.mxu0 %v14522_v9  ;;  %10222 = vmatpush1.bf16.msra.mxu1 %v14524_v10  ;;  %v777_v9 = vld [vmem:[#allocation5 + $0x13e0] sm:$0xff]  ;;  %v774_v10 = vld [vmem:[#allocation5 + $0x13c8] sm:$0xff] }
 0x1a2   :  { %9707 = vmatprep.subr.bf16.mxu0 %v14531_v11  ;;  %10223 = vmatprep.subr.bf16.mxu1 %v14533_v43  ;;  %v778_v11 = vld [vmem:[#allocation5 + $0x13e8] sm:$0xff]  ;;  %v14578_v43 = vcombine.low %v765_v61, %v769_v62  ;;  %v14587_v13 = vcombine.high %v773_v8, %v777_v9 }
 0x1a3   :  { %v14589_v14 = vcombine.high %v774_v10, %v778_v11  ;;  %v14588_v23 = vcombine.low %v774_v10, %v778_v11  ;;  %v818_v61 = vld [vmem:[#allocation5 + $0x1528] sm:$0xff] }
 0x1a5   :  { %9708 = vmatpush1.bf16.msra.mxu0 %v14530_v19  ;;  %10224 = vmatpush1.bf16.msra.mxu1 %v14532_v20  ;;  %v785_v19 = vld [vmem:[#allocation5 + $0x1420] sm:$0xff]  ;;  %v782_v20 = vld [vmem:[#allocation5 + $0x1408] sm:$0xff] }
 0x1a6   :  { %9709 = vmatprep.subr.bf16.mxu0 %v14539_v21  ;;  %10225 = vmatprep.subr.bf16.mxu1 %v14541_v22  ;;  %v786_v21 = vld [vmem:[#allocation5 + $0x1428] sm:$0xff]  ;;  %v14586_v22 = vcombine.low %v773_v8, %v777_v9  ;;  %v14595_v24 = vcombine.high %v781_v16, %v785_v19  ;;  %v14594_v35 = vcombine.low %v781_v16, %v785_v19 }
 0x1a7   :  { %v14597_v25 = vcombine.high %v782_v20, %v786_v21  ;;  %v14596_v36 = vcombine.low %v782_v20, %v786_v21  ;;  %v826_v8 = vld [vmem:[#allocation5 + $0x1568] sm:$0xff] }
 0x1a8   :  { %v834_v16 = vld [vmem:[#allocation5 + $0x15a8] sm:$0xff] }
 0x1a9   :  { %9710 = vmatpush1.bf16.msra.mxu0 %v14538_v26  ;;  %10226 = vmatpush1.bf16.msra.mxu1 %v14540_v28  ;;  %v793_v26 = vld [vmem:[#allocation5 + $0x1460] sm:$0xff]  ;;  %v790_v28 = vld [vmem:[#allocation5 + $0x1448] sm:$0xff] }
 0x1aa   :  { %9711 = vmatprep.subr.bf16.mxu0 %v14547_v31  ;;  %10227 = vmatprep.subr.bf16.mxu1 %v14549_v32  ;;  %v16894_v31 = vcombine.low %v16880_v4, %v16882_v5  ;;  %v794_v32 = vld [vmem:[#allocation5 + $0x1468] sm:$0xff]  ;;  %v14602_v41 = vcombine.low %v789_v54, %v793_v26 }
 0x1ab   :  { %v798_v4 = vld [vmem:[#allocation5 + $0x1488] sm:$0xff]  ;;  %v14604_v42 = vcombine.low %v790_v28, %v794_v32 }
 0x1ac   :  { %v802_v5 = vld [vmem:[#allocation5 + $0x14a8] sm:$0xff] }
 0x1ad   :  { %9712 = vmatpush1.bf16.msra.mxu0 %v14546_v37  ;;  %10228 = vmatpush1.bf16.msra.mxu1 %v14548_v38  ;;  %v14603_v37 = vcombine.high %v789_v54, %v793_v26  ;;  %v14605_v38 = vcombine.high %v790_v28, %v794_v32  ;;  %v14612_v55 = vcombine.low %v798_v4, %v802_v5  ;;  %v842_v54 = vld [vmem:[#allocation5 + $0x15e8] sm:$0xff] }
 0x1ae   :  { %9713 = vmatprep.subr.bf16.mxu0 %v14555_v17  ;;  %10229 = vmatprep.subr.bf16.mxu1 %v14557_v18  ;;  %v797_v17 = vld [vmem:[#allocation5 + $0x1480] sm:$0xff] }
 0x1af   :  { %v801_v18 = vld [vmem:[#allocation5 + $0x14a0] sm:$0xff] }
 0x1b0   :  { %v14611_v44 = vcombine.high %v797_v17, %v801_v18  ;;  %v14610_v52 = vcombine.low %v797_v17, %v801_v18  ;;  %v850_v17 = vld [vmem:[#allocation5 + $0x1628] sm:$0xff] }
 0x1b1   :  { %9714 = vmatpush1.bf16.msra.mxu0 %v14554_v47  ;;  %10230 = vmatpush1.bf16.msra.mxu1 %v14556_v48  ;;  %v14613_v47 = vcombine.high %v798_v4, %v802_v5  ;;  %v805_v48 = vld [vmem:[#allocation5 + $0x14c0] sm:$0xff] }
 0x1b2   :  { %9715 = vmatprep.subr.bf16.mxu0 %v14563_v49  ;;  %10231 = vmatprep.subr.bf16.mxu1 %v14565_v50  ;;  %v809_v49 = vld [vmem:[#allocation5 + $0x14e0] sm:$0xff]  ;;  %v806_v50 = vld [vmem:[#allocation5 + $0x14c8] sm:$0xff] }
 0x1b3   :  { %v14619_v56 = vcombine.high %v805_v48, %v809_v49  ;;  %v14618_v62 = vcombine.low %v805_v48, %v809_v49  ;;  %v14620_v63 = vcombine.low %v806_v50, %v810_v51  ;;  %v858_v48 = vld [vmem:[#allocation5 + $0x1668] sm:$0xff] }
 0x1b5   :  { %9716 = vmatpush1.bf16.msra.mxu0 %v14562_v27  ;;  %10232 = vmatpush1.bf16.msra.mxu1 %v14564_v29  ;;  %v14621_v27 = vcombine.high %v806_v50, %v810_v51  ;;  %v813_v29 = vld [vmem:[#allocation5 + $0x1500] sm:$0xff] }
 0x1b6   :  { %9717 = vmatprep.subr.bf16.mxu0 %v14571_v59  ;;  %10233 = vmatprep.subr.bf16.mxu1 %v14573_v60  ;;  %v817_v59 = vld [vmem:[#allocation5 + $0x1520] sm:$0xff]  ;;  %v814_v60 = vld [vmem:[#allocation5 + $0x1508] sm:$0xff] }
 0x1b7   :  { %v14627_v0 = vcombine.high %v813_v29, %v817_v59  ;;  %v14626_v9 = vcombine.low %v813_v29, %v817_v59  ;;  %v14628_v10 = vcombine.low %v814_v60, %v818_v61  ;;  %v866_v29 = vld [vmem:[#allocation5 + $0x16a8] sm:$0xff] }
 0x1b9   :  { %9718 = vmatpush1.bf16.msra.mxu0 %v14570_v1  ;;  %10234 = vmatpush1.bf16.msra.mxu1 %v14572_v3  ;;  %v14629_v1 = vcombine.high %v814_v60, %v818_v61  ;;  %v821_v3 = vld [vmem:[#allocation5 + $0x1540] sm:$0xff] }
 0x1ba   :  { %9719 = vmatprep.subr.bf16.mxu0 %v14579_v6  ;;  %10235 = vmatprep.subr.bf16.mxu1 %v14581_v7  ;;  %v825_v6 = vld [vmem:[#allocation5 + $0x1560] sm:$0xff]  ;;  %v822_v7 = vld [vmem:[#allocation5 + $0x1548] sm:$0xff] }
 0x1bb   :  { %v14635_v11 = vcombine.high %v821_v3, %v825_v6  ;;  %v14634_v19 = vcombine.low %v821_v3, %v825_v6  ;;  %v14636_v20 = vcombine.low %v822_v7, %v826_v8  ;;  %v874_v3 = vld [vmem:[#allocation5 + $0x16e8] sm:$0xff] }
 0x1bd   :  { %9720 = vmatpush1.bf16.msra.mxu0 %v14578_v43  ;;  %10236 = vmatpush1.bf16.msra.mxu1 %v14580_v45  ;;  %v14637_v43 = vcombine.high %v822_v7, %v826_v8  ;;  %v829_v45 = vld [vmem:[#allocation5 + $0x1580] sm:$0xff] }
 0x1be   :  { %9721 = vmatprep.subr.bf16.mxu0 %v14587_v13  ;;  %10237 = vmatprep.subr.bf16.mxu1 %v14589_v14  ;;  %v833_v13 = vld [vmem:[#allocation5 + $0x15a0] sm:$0xff]  ;;  %v830_v14 = vld [vmem:[#allocation5 + $0x1588] sm:$0xff] }
 0x1bf   :  { %v14643_v21 = vcombine.high %v829_v45, %v833_v13  ;;  %v14642_v26 = vcombine.low %v829_v45, %v833_v13  ;;  %v14644_v28 = vcombine.low %v830_v14, %v834_v16  ;;  %v882_v45 = vld [vmem:[#allocation5 + $0x1728] sm:$0xff] }
 0x1c1   :  { %9722 = vmatpush1.bf16.msra.mxu0 %v14586_v22  ;;  %10238 = vmatpush1.bf16.msra.mxu1 %v14588_v23  ;;  %v14645_v22 = vcombine.high %v830_v14, %v834_v16  ;;  %v837_v23 = vld [vmem:[#allocation5 + $0x15c0] sm:$0xff] }
 0x1c2   :  { %9734 = vmatprep.subr.bf16.mxu0 %v14595_v24  ;;  %10250 = vmatprep.subr.bf16.mxu1 %v14597_v25  ;;  %v841_v24 = vld [vmem:[#allocation5 + $0x15e0] sm:$0xff]  ;;  %v838_v25 = vld [vmem:[#allocation5 + $0x15c8] sm:$0xff] }
 0x1c3   :  { %v14651_v32 = vcombine.high %v837_v23, %v841_v24  ;;  %v14650_v18 = vcombine.low %v837_v23, %v841_v24  ;;  %v14652_v4 = vcombine.low %v838_v25, %v842_v54  ;;  %v890_v23 = vld [vmem:[#allocation5 + $0x1768] sm:$0xff] }
 0x1c4   :  { %9724 = vmatmul.mubr.bf16.vlgmr.msra.gmra.mrb[0].mxu0 %v16894_v31  ;;  %10240 = vmatmul.mubr.bf16.vlgmr.msra.gmra.mrb[0].mxu1 %v16894_v31 }
 0x1c5   :  { %9735 = vmatpush1.bf16.msra.mxu0 %v14594_v35  ;;  %10251 = vmatpush1.bf16.msra.mxu1 %v14596_v36  ;;  %v14653_v35 = vcombine.high %v838_v25, %v842_v54  ;;  %v845_v36 = vld [vmem:[#allocation5 + $0x1600] sm:$0xff] }
 0x1c6   :  { %9736 = vmatprep.subr.bf16.mxu0 %v14603_v37  ;;  %10252 = vmatprep.subr.bf16.mxu1 %v14605_v38  ;;  %v849_v37 = vld [vmem:[#allocation5 + $0x1620] sm:$0xff]  ;;  %v846_v38 = vld [vmem:[#allocation5 + $0x1608] sm:$0xff] }
 0x1c7   :  { %9766 = vmatprep.mubr.bf16.mxu0 %v16902_v40  ;;  %10282 = vmatprep.mubr.bf16.mxu1 %v16902_v40  ;;  %v14659_v5 = vcombine.high %v845_v36, %v849_v37  ;;  %v14658_v49 = vcombine.low %v845_v36, %v849_v37  ;;  %v14660_v50 = vcombine.low %v846_v38, %v850_v17  ;;  %v898_v36 = vld [vmem:[#allocation5 + $0x17a8] sm:$0xff] }
 0x1c9   :  { %9737 = vmatpush1.bf16.msra.mxu0 %v14602_v41  ;;  %10253 = vmatpush1.bf16.msra.mxu1 %v14604_v42  ;;  %v14661_v41 = vcombine.high %v846_v38, %v850_v17  ;;  %v853_v42 = vld [vmem:[#allocation5 + $0x1640] sm:$0xff] }
 0x1ca   :  { %9738 = vmatprep.subr.bf16.mxu0 %v14611_v44  ;;  %10254 = vmatprep.subr.bf16.mxu1 %v14613_v47  ;;  %v857_v44 = vld [vmem:[#allocation5 + $0x1660] sm:$0xff]  ;;  %v854_v47 = vld [vmem:[#allocation5 + $0x1648] sm:$0xff] }
 0x1cb   :  { %v14667_v51 = vcombine.high %v853_v42, %v857_v44  ;;  %v14666_v59 = vcombine.low %v853_v42, %v857_v44  ;;  %v14668_v60 = vcombine.low %v854_v47, %v858_v48  ;;  %v906_v42 = vld [vmem:[#allocation5 + $0x17e8] sm:$0xff] }
 0x1cd   :  { %9739 = vmatpush1.bf16.msra.mxu0 %v14610_v52  ;;  %10255 = vmatpush1.bf16.msra.mxu1 %v14612_v55  ;;  %v14669_v52 = vcombine.high %v854_v47, %v858_v48  ;;  %v861_v55 = vld [vmem:[#allocation5 + $0x1680] sm:$0xff] }
 0x1ce   :  { %9740 = vmatprep.subr.bf16.mxu0 %v14619_v56  ;;  %10256 = vmatprep.subr.bf16.mxu1 %v14621_v27  ;;  %v865_v56 = vld [vmem:[#allocation5 + $0x16a0] sm:$0xff]  ;;  %v862_v27 = vld [vmem:[#allocation5 + $0x1688] sm:$0xff] }
 0x1cf   :  { %v14675_v61 = vcombine.high %v861_v55, %v865_v56  ;;  %v14674_v6 = vcombine.low %v861_v55, %v865_v56  ;;  %v14676_v7 = vcombine.low %v862_v27, %v866_v29  ;;  %v914_v55 = vld [vmem:[#allocation5 + $0x1828] sm:$0xff] }
 0x1d1   :  { %9741 = vmatpush1.bf16.msra.mxu0 %v14618_v62  ;;  %10257 = vmatpush1.bf16.msra.mxu1 %v14620_v63  ;;  %v14677_v62 = vcombine.high %v862_v27, %v866_v29  ;;  %v869_v63 = vld [vmem:[#allocation5 + $0x16c0] sm:$0xff] }
 0x1d2   :  { %9742 = vmatprep.subr.bf16.mxu0 %v14627_v0  ;;  %10258 = vmatprep.subr.bf16.mxu1 %v14629_v1  ;;  %v873_v0 = vld [vmem:[#allocation5 + $0x16e0] sm:$0xff]  ;;  %v870_v1 = vld [vmem:[#allocation5 + $0x16c8] sm:$0xff] }
 0x1d3   :  { %v14683_v8 = vcombine.high %v869_v63, %v873_v0  ;;  %v14682_v13 = vcombine.low %v869_v63, %v873_v0  ;;  %v14684_v14 = vcombine.low %v870_v1, %v874_v3  ;;  %v16910_v63 = vcombine.low %v16896_v33, %v16898_v34  ;;  %v922_v0 = vld [vmem:[#allocation5 + $0x1868] sm:$0xff] }
 0x1d4   :  { %v926_v33 = vld [vmem:[#allocation5 + $0x1888] sm:$0xff] }
 0x1d5   :  { %9743 = vmatpush1.bf16.msra.mxu0 %v14626_v9  ;;  %10259 = vmatpush1.bf16.msra.mxu1 %v14628_v10  ;;  %v14685_v9 = vcombine.high %v870_v1, %v874_v3  ;;  %v877_v10 = vld [vmem:[#allocation5 + $0x1700] sm:$0xff]  ;;  %v16912_v1 = vld [vmem:[#allocation2 + $0x30] sm:$0xff]  ;;  %v930_v34 = vld [vmem:[#allocation5 + $0x18a8] sm:$0xff] }
 0x1d6   :  { %9744 = vmatprep.subr.bf16.mxu0 %v14635_v11  ;;  %10260 = vmatprep.subr.bf16.mxu1 %v14637_v43  ;;  %v881_v11 = vld [vmem:[#allocation5 + $0x1720] sm:$0xff]  ;;  %v878_v43 = vld [vmem:[#allocation5 + $0x1708] sm:$0xff]  ;;  %v16914_v3 = vld [vmem:[#allocation2 + $0x90] sm:$0xff] }
 0x1d7   :  { %v14691_v16 = vcombine.high %v877_v10, %v881_v11  ;;  %v14690_v24 = vcombine.low %v877_v10, %v881_v11  ;;  %v14692_v25 = vcombine.low %v878_v43, %v882_v45  ;;  %v925_v10 = vld [vmem:[#allocation5 + $0x1880] sm:$0xff] }
 0x1d8   :  { %v929_v11 = vld [vmem:[#allocation5 + $0x18a0] sm:$0xff] }
 0x1d9   :  { %9745 = vmatpush1.bf16.msra.mxu0 %v14634_v19  ;;  %10261 = vmatpush1.bf16.msra.mxu1 %v14636_v20  ;;  %v14693_v19 = vcombine.high %v878_v43, %v882_v45  ;;  %v885_v20 = vld [vmem:[#allocation5 + $0x1740] sm:$0xff]  ;;  %v16918_v43 = vcombine.high %v16912_v1, %v16914_v3 }
 0x1da   :  { %9746 = vmatprep.subr.bf16.mxu0 %v14643_v21  ;;  %10262 = vmatprep.subr.bf16.mxu1 %v14645_v22  ;;  %v889_v21 = vld [vmem:[#allocation5 + $0x1760] sm:$0xff]  ;;  %v886_v22 = vld [vmem:[#allocation5 + $0x1748] sm:$0xff] }
 0x1db   :  { %v14699_v54 = vcombine.high %v885_v20, %v889_v21  ;;  %v14698_v37 = vcombine.low %v885_v20, %v889_v21  ;;  %v14700_v38 = vcombine.low %v886_v22, %v890_v23  ;;  %v937_v20 = vld [vmem:[#allocation5 + $0x18e0] sm:$0xff]  ;;  %v934_v21 = vld [vmem:[#allocation5 + $0x18c8] sm:$0xff] }
 0x1dd   :  { %9747 = vmatpush1.bf16.msra.mxu0 %v14642_v26  ;;  %10263 = vmatpush1.bf16.msra.mxu1 %v14644_v28  ;;  %v14701_v26 = vcombine.high %v886_v22, %v890_v23  ;;  %v893_v28 = vld [vmem:[#allocation5 + $0x1780] sm:$0xff]  ;;  %v938_v22 = vld [vmem:[#allocation5 + $0x18e8] sm:$0xff]  ;;  %v14738_v23 = vcombine.low %v925_v10, %v929_v11 }
 0x1de   :  { %9748 = vmatprep.subr.bf16.mxu0 %v14651_v32  ;;  %10264 = vmatprep.subr.bf16.mxu1 %v14653_v35  ;;  %v897_v32 = vld [vmem:[#allocation5 + $0x17a0] sm:$0xff]  ;;  %v894_v35 = vld [vmem:[#allocation5 + $0x1788] sm:$0xff] }
 0x1df   :  { %v14707_v17 = vcombine.high %v893_v28, %v897_v32  ;;  %v14706_v44 = vcombine.low %v893_v28, %v897_v32  ;;  %v14708_v47 = vcombine.low %v894_v35, %v898_v36  ;;  %v945_v28 = vld [vmem:[#allocation5 + $0x1920] sm:$0xff]  ;;  %v942_v32 = vld [vmem:[#allocation5 + $0x1908] sm:$0xff] }
 0x1e1   :  { %9749 = vmatpush1.bf16.msra.mxu0 %v14650_v18  ;;  %10265 = vmatpush1.bf16.msra.mxu1 %v14652_v4  ;;  %v14709_v18 = vcombine.high %v894_v35, %v898_v36  ;;  %v901_v4 = vld [vmem:[#allocation5 + $0x17c0] sm:$0xff]  ;;  %v946_v35 = vld [vmem:[#allocation5 + $0x1928] sm:$0xff] }
 0x1e2   :  { %9750 = vmatprep.subr.bf16.mxu0 %v14659_v5  ;;  %10266 = vmatprep.subr.bf16.mxu1 %v14661_v41  ;;  %v905_v5 = vld [vmem:[#allocation5 + $0x17e0] sm:$0xff]  ;;  %v902_v41 = vld [vmem:[#allocation5 + $0x17c8] sm:$0xff] }
 0x1e3   :  { %v14715_v48 = vcombine.high %v901_v4, %v905_v5  ;;  %v14714_v56 = vcombine.low %v901_v4, %v905_v5  ;;  %v14716_v27 = vcombine.low %v902_v41, %v906_v42  ;;  %v953_v4 = vld [vmem:[#allocation5 + $0x1960] sm:$0xff]  ;;  %v950_v5 = vld [vmem:[#allocation5 + $0x1948] sm:$0xff] }
 0x1e5   :  { %9751 = vmatpush1.bf16.msra.mxu0 %v14658_v49  ;;  %10267 = vmatpush1.bf16.msra.mxu1 %v14660_v50  ;;  %v14717_v49 = vcombine.high %v902_v41, %v906_v42  ;;  %v909_v50 = vld [vmem:[#allocation5 + $0x1800] sm:$0xff]  ;;  %v954_v41 = vld [vmem:[#allocation5 + $0x1968] sm:$0xff] }
 0x1e6   :  { %9752 = vmatprep.subr.bf16.mxu0 %v14667_v51  ;;  %10268 = vmatprep.subr.bf16.mxu1 %v14669_v52  ;;  %v913_v51 = vld [vmem:[#allocation5 + $0x1820] sm:$0xff]  ;;  %v910_v52 = vld [vmem:[#allocation5 + $0x1808] sm:$0xff] }
 0x1e7   :  { %v14723_v29 = vcombine.high %v909_v50, %v913_v51 }
 0x1e9   :  { %9753 = vmatpush1.bf16.msra.mxu0 %v14666_v59  ;;  %10269 = vmatpush1.bf16.msra.mxu1 %v14668_v60  ;;  %v14725_v59 = vcombine.high %v910_v52, %v914_v55  ;;  %v917_v60 = vld [vmem:[#allocation5 + $0x1840] sm:$0xff] }
 0x1ea   :  { %9754 = vmatprep.subr.bf16.mxu0 %v14675_v61  ;;  %10270 = vmatprep.subr.bf16.mxu1 %v14677_v62  ;;  %v921_v61 = vld [vmem:[#allocation5 + $0x1860] sm:$0xff]  ;;  %v918_v62 = vld [vmem:[#allocation5 + $0x1848] sm:$0xff] }
 0x1eb   :  { %v14730_v45 = vcombine.low %v917_v60, %v921_v61 }
 0x1ed   :  { %9755 = vmatpush1.bf16.msra.mxu0 %v14674_v6  ;;  %10271 = vmatpush1.bf16.msra.mxu1 %v14676_v7  ;;  %v14722_v6 = vcombine.low %v909_v50, %v913_v51  ;;  %v14724_v7 = vcombine.low %v910_v52, %v914_v55  ;;  %v961_v50 = vld [vmem:[#allocation5 + $0x19a0] sm:$0xff]  ;;  %v958_v51 = vld [vmem:[#allocation5 + $0x1988] sm:$0xff] }
 0x1ee   :  { %9756 = vmatprep.subr.bf16.mxu0 %v14683_v8  ;;  %10272 = vmatprep.subr.bf16.mxu1 %v14685_v9  ;;  %v14731_v8 = vcombine.high %v917_v60, %v921_v61  ;;  %v14733_v9 = vcombine.high %v918_v62, %v922_v0  ;;  %v962_v52 = vld [vmem:[#allocation5 + $0x19a8] sm:$0xff]  ;;  %v969_v60 = vld [vmem:[#allocation5 + $0x19e0] sm:$0xff] }
 0x1ef   :  { %v966_v61 = vld [vmem:[#allocation5 + $0x19c8] sm:$0xff] }
 0x1f1   :  { %9757 = vmatpush1.bf16.msra.mxu0 %v14682_v13  ;;  %10273 = vmatpush1.bf16.msra.mxu1 %v14684_v14  ;;  %v14732_v13 = vcombine.low %v918_v62, %v922_v0  ;;  %v14739_v14 = vcombine.high %v925_v10, %v929_v11  ;;  %v970_v62 = vld [vmem:[#allocation5 + $0x19e8] sm:$0xff]  ;;  %v977_v10 = vld [vmem:[#allocation5 + $0x1a20] sm:$0xff] }
 0x1f2   :  { %9758 = vmatprep.subr.bf16.mxu0 %v14691_v16  ;;  %10274 = vmatprep.subr.bf16.mxu1 %v14693_v19  ;;  %v14741_v16 = vcombine.high %v926_v33, %v930_v34  ;;  %v933_v19 = vld [vmem:[#allocation5 + $0x18c0] sm:$0xff]  ;;  %v974_v11 = vld [vmem:[#allocation5 + $0x1a08] sm:$0xff] }
 0x1f3   :  { %v14746_v36 = vcombine.low %v933_v19, %v937_v20 }
 0x1f5   :  { %9759 = vmatpush1.bf16.msra.mxu0 %v14690_v24  ;;  %10275 = vmatpush1.bf16.msra.mxu1 %v14692_v25  ;;  %v14740_v24 = vcombine.low %v926_v33, %v930_v34  ;;  %v14747_v25 = vcombine.high %v933_v19, %v937_v20  ;;  %v978_v33 = vld [vmem:[#allocation5 + $0x1a28] sm:$0xff]  ;;  %v985_v19 = vld [vmem:[#allocation5 + $0x1a60] sm:$0xff] }
 0x1f6   :  { %9760 = vmatprep.subr.bf16.mxu0 %v14699_v54  ;;  %10276 = vmatprep.subr.bf16.mxu1 %v14701_v26  ;;  %v14749_v54 = vcombine.high %v934_v21, %v938_v22  ;;  %v941_v26 = vld [vmem:[#allocation5 + $0x1900] sm:$0xff]  ;;  %v982_v20 = vld [vmem:[#allocation5 + $0x1a48] sm:$0xff] }
 0x1f7   :  { %v14754_v42 = vcombine.low %v941_v26, %v945_v28 }
 0x1f9   :  { %9761 = vmatpush1.bf16.msra.mxu0 %v14698_v37  ;;  %10277 = vmatpush1.bf16.msra.mxu1 %v14700_v38  ;;  %v14748_v37 = vcombine.low %v934_v21, %v938_v22  ;;  %v14755_v38 = vcombine.high %v941_v26, %v945_v28  ;;  %v986_v21 = vld [vmem:[#allocation5 + $0x1a68] sm:$0xff]  ;;  %v993_v26 = vld [vmem:[#allocation5 + $0x1aa0] sm:$0xff] }
 0x1fa   :  { %9762 = vmatprep.subr.bf16.mxu0 %v14707_v17  ;;  %10278 = vmatprep.subr.bf16.mxu1 %v14709_v18  ;;  %v14757_v17 = vcombine.high %v942_v32, %v946_v35  ;;  %v949_v18 = vld [vmem:[#allocation5 + $0x1940] sm:$0xff]  ;;  %v990_v28 = vld [vmem:[#allocation5 + $0x1a88] sm:$0xff] }
 0x1fb   :  { %v14762_v55 = vcombine.low %v949_v18, %v953_v4 }
 0x1fd   :  { %9763 = vmatpush1.bf16.msra.mxu0 %v14706_v44  ;;  %10279 = vmatpush1.bf16.msra.mxu1 %v14708_v47  ;;  %v14756_v44 = vcombine.low %v942_v32, %v946_v35  ;;  %v14763_v47 = vcombine.high %v949_v18, %v953_v4  ;;  %v994_v32 = vld [vmem:[#allocation5 + $0x1aa8] sm:$0xff]  ;;  %v1001_v18 = vld [vmem:[#allocation5 + $0x1ae0] sm:$0xff] }
 0x1fe   :  { %9764 = vmatprep.subr.bf16.mxu0 %v14715_v48  ;;  %10280 = vmatprep.subr.bf16.mxu1 %v14717_v49  ;;  %v14765_v48 = vcombine.high %v950_v5, %v954_v41  ;;  %v957_v49 = vld [vmem:[#allocation5 + $0x1980] sm:$0xff]  ;;  %v998_v4 = vld [vmem:[#allocation5 + $0x1ac8] sm:$0xff] }
 0x1ff   :  { %v14770_v0 = vcombine.low %v957_v49, %v961_v50 }
 0x201   :  { %9765 = vmatpush1.bf16.msra.mxu0 %v14714_v56  ;;  %10281 = vmatpush1.bf16.msra.mxu1 %v14716_v27  ;;  %v14764_v56 = vcombine.low %v950_v5, %v954_v41  ;;  %v14771_v27 = vcombine.high %v957_v49, %v961_v50  ;;  %v1002_v5 = vld [vmem:[#allocation5 + $0x1ae8] sm:$0xff]  ;;  %v1009_v49 = vld [vmem:[#allocation5 + $0x1b20] sm:$0xff] }
 0x202   :  { %9777 = vmatprep.subr.bf16.mxu0 %v14723_v29  ;;  %10293 = vmatprep.subr.bf16.mxu1 %v14725_v59  ;;  %v14773_v29 = vcombine.high %v958_v51, %v962_v52  ;;  %v965_v59 = vld [vmem:[#allocation5 + $0x19c0] sm:$0xff]  ;;  %v1006_v50 = vld [vmem:[#allocation5 + $0x1b08] sm:$0xff] }
 0x203   :  { %v14778_v34 = vcombine.low %v965_v59, %v969_v60 }
 0x204   :  { %9767 = vmatmul.mubr.bf16.vlgmr.msra.gmra.mrb[0].mxu0 %v16910_v63  ;;  %10283 = vmatmul.mubr.bf16.vlgmr.msra.gmra.mrb[0].mxu1 %v16910_v63 }
 0x205   :  { %9778 = vmatpush1.bf16.msra.mxu0 %v14722_v6  ;;  %10294 = vmatpush1.bf16.msra.mxu1 %v14724_v7  ;;  %v14772_v6 = vcombine.low %v958_v51, %v962_v52  ;;  %v14779_v7 = vcombine.high %v965_v59, %v969_v60  ;;  %v1010_v51 = vld [vmem:[#allocation5 + $0x1b28] sm:$0xff]  ;;  %v1017_v59 = vld [vmem:[#allocation5 + $0x1b60] sm:$0xff] }
 0x206   :  { %9779 = vmatprep.subr.bf16.mxu0 %v14731_v8  ;;  %10295 = vmatprep.subr.bf16.mxu1 %v14733_v9  ;;  %v14781_v8 = vcombine.high %v966_v61, %v970_v62  ;;  %v973_v9 = vld [vmem:[#allocation5 + $0x1a00] sm:$0xff]  ;;  %v1014_v60 = vld [vmem:[#allocation5 + $0x1b48] sm:$0xff] }
 0x207   :  { %9809 = vmatprep.mubr.bf16.mxu0 %v16918_v43  ;;  %10325 = vmatprep.mubr.bf16.mxu1 %v16918_v43  ;;  %v14786_v22 = vcombine.low %v973_v9, %v977_v10 }
 0x209   :  { %9780 = vmatpush1.bf16.msra.mxu0 %v14730_v45  ;;  %10296 = vmatpush1.bf16.msra.mxu1 %v14732_v13  ;;  %v14780_v45 = vcombine.low %v966_v61, %v970_v62  ;;  %v14787_v13 = vcombine.high %v973_v9, %v977_v10  ;;  %v1018_v61 = vld [vmem:[#allocation5 + $0x1b68] sm:$0xff]  ;;  %v1025_v9 = vld [vmem:[#allocation5 + $0x1ba0] sm:$0xff] }
 0x20a   :  { %9781 = vmatprep.subr.bf16.mxu0 %v14739_v14  ;;  %10297 = vmatprep.subr.bf16.mxu1 %v14741_v16  ;;  %v14789_v14 = vcombine.high %v974_v11, %v978_v33  ;;  %v981_v16 = vld [vmem:[#allocation5 + $0x1a40] sm:$0xff]  ;;  %v1022_v10 = vld [vmem:[#allocation5 + $0x1b88] sm:$0xff] }
 0x20b   :  { %v14794_v35 = vcombine.low %v981_v16, %v985_v19 }
 0x20d   :  { %9782 = vmatpush1.bf16.msra.mxu0 %v14738_v23  ;;  %10298 = vmatpush1.bf16.msra.mxu1 %v14740_v24  ;;  %v14788_v23 = vcombine.low %v974_v11, %v978_v33  ;;  %v14795_v24 = vcombine.high %v981_v16, %v985_v19  ;;  %v1026_v11 = vld [vmem:[#allocation5 + $0x1ba8] sm:$0xff]  ;;  %v1033_v16 = vld [vmem:[#allocation5 + $0x1be0] sm:$0xff] }
 0x20e   :  { %9783 = vmatprep.subr.bf16.mxu0 %v14747_v25  ;;  %10299 = vmatprep.subr.bf16.mxu1 %v14749_v54  ;;  %v14797_v25 = vcombine.high %v982_v20, %v986_v21  ;;  %v989_v54 = vld [vmem:[#allocation5 + $0x1a80] sm:$0xff]  ;;  %v1030_v19 = vld [vmem:[#allocation5 + $0x1bc8] sm:$0xff] }
 0x20f   :  { %v14802_v41 = vcombine.low %v989_v54, %v993_v26 }
 0x211   :  { %9784 = vmatpush1.bf16.msra.mxu0 %v14746_v36  ;;  %10300 = vmatpush1.bf16.msra.mxu1 %v14748_v37  ;;  %v14796_v36 = vcombine.low %v982_v20, %v986_v21  ;;  %v14803_v37 = vcombine.high %v989_v54, %v993_v26  ;;  %v1034_v20 = vld [vmem:[#allocation5 + $0x1be8] sm:$0xff]  ;;  %v1041_v54 = vld [vmem:[#allocation5 + $0x1c20] sm:$0xff] }
 0x212   :  { %9785 = vmatprep.subr.bf16.mxu0 %v14755_v38  ;;  %10301 = vmatprep.subr.bf16.mxu1 %v14757_v17  ;;  %v14805_v38 = vcombine.high %v990_v28, %v994_v32  ;;  %v997_v17 = vld [vmem:[#allocation5 + $0x1ac0] sm:$0xff]  ;;  %v1038_v26 = vld [vmem:[#allocation5 + $0x1c08] sm:$0xff] }
 0x213   :  { %v14810_v52 = vcombine.low %v997_v17, %v1001_v18 }
 0x215   :  { %9786 = vmatpush1.bf16.msra.mxu0 %v14754_v42  ;;  %10302 = vmatpush1.bf16.msra.mxu1 %v14756_v44  ;;  %v14804_v42 = vcombine.low %v990_v28, %v994_v32  ;;  %v14811_v44 = vcombine.high %v997_v17, %v1001_v18  ;;  %v1042_v28 = vld [vmem:[#allocation5 + $0x1c28] sm:$0xff]  ;;  %v1049_v17 = vld [vmem:[#allocation5 + $0x1c60] sm:$0xff] }
 0x216   :  { %9787 = vmatprep.subr.bf16.mxu0 %v14763_v47  ;;  %10303 = vmatprep.subr.bf16.mxu1 %v14765_v48  ;;  %v14813_v47 = vcombine.high %v998_v4, %v1002_v5  ;;  %v1005_v48 = vld [vmem:[#allocation5 + $0x1b00] sm:$0xff]  ;;  %v1046_v18 = vld [vmem:[#allocation5 + $0x1c48] sm:$0xff] }
 0x217   :  { %v14818_v62 = vcombine.low %v1005_v48, %v1009_v49 }
 0x219   :  { %9788 = vmatpush1.bf16.msra.mxu0 %v14762_v55  ;;  %10304 = vmatpush1.bf16.msra.mxu1 %v14764_v56  ;;  %v14812_v55 = vcombine.low %v998_v4, %v1002_v5  ;;  %v14819_v56 = vcombine.high %v1005_v48, %v1009_v49  ;;  %v16926_v4 = vcombine.low %v16912_v1, %v16914_v3  ;;  %v1050_v5 = vld [vmem:[#allocation5 + $0x1c68] sm:$0xff] }
 0x21a   :  { %9789 = vmatprep.subr.bf16.mxu0 %v14771_v27  ;;  %10305 = vmatprep.subr.bf16.mxu1 %v14773_v29  ;;  %v14821_v27 = vcombine.high %v1006_v50, %v1010_v51  ;;  %v1013_v29 = vld [vmem:[#allocation5 + $0x1b40] sm:$0xff]  ;;  %v14861_v49 = vcombine.high %v1046_v18, %v1050_v5  ;;  %v1054_v1 = vld [vmem:[#allocation5 + $0x1c88] sm:$0xff] }
 0x21b   :  { %v14826_v33 = vcombine.low %v1013_v29, %v1017_v59  ;;  %v1058_v3 = vld [vmem:[#allocation5 + $0x1ca8] sm:$0xff] }
 0x21d   :  { %9790 = vmatpush1.bf16.msra.mxu0 %v14770_v0  ;;  %10306 = vmatpush1.bf16.msra.mxu1 %v14772_v6  ;;  %v14820_v0 = vcombine.low %v1006_v50, %v1010_v51  ;;  %v14827_v6 = vcombine.high %v1013_v29, %v1017_v59  ;;  %v1053_v50 = vld [vmem:[#allocation5 + $0x1c80] sm:$0xff]  ;;  %v14869_v29 = vcombine.high %v1054_v1, %v1058_v3 }
 0x21e   :  { %9791 = vmatprep.subr.bf16.mxu0 %v14779_v7  ;;  %10307 = vmatprep.subr.bf16.mxu1 %v14781_v8  ;;  %v14829_v7 = vcombine.high %v1014_v60, %v1018_v61  ;;  %v1021_v8 = vld [vmem:[#allocation5 + $0x1b80] sm:$0xff] }
 0x21f   :  { %v14834_v21 = vcombine.low %v1021_v8, %v1025_v9  ;;  %v1057_v51 = vld [vmem:[#allocation5 + $0x1ca0] sm:$0xff] }
 0x220   :  { %v1061_v59 = vld [vmem:[#allocation5 + $0x1cc0] sm:$0xff] }
 0x221   :  { %9792 = vmatpush1.bf16.msra.mxu0 %v14778_v34  ;;  %10308 = vmatpush1.bf16.msra.mxu1 %v14780_v45  ;;  %v14828_v34 = vcombine.low %v1014_v60, %v1018_v61  ;;  %v14835_v45 = vcombine.high %v1021_v8, %v1025_v9  ;;  %v1065_v60 = vld [vmem:[#allocation5 + $0x1ce0] sm:$0xff]  ;;  %v1062_v61 = vld [vmem:[#allocation5 + $0x1cc8] sm:$0xff] }
 0x222   :  { %9793 = vmatprep.subr.bf16.mxu0 %v14787_v13  ;;  %10309 = vmatprep.subr.bf16.mxu1 %v14789_v14  ;;  %v14837_v13 = vcombine.high %v1022_v10, %v1026_v11  ;;  %v1029_v14 = vld [vmem:[#allocation5 + $0x1bc0] sm:$0xff] }
 0x223   :  { %v14842_v32 = vcombine.low %v1029_v14, %v1033_v16  ;;  %v1069_v9 = vld [vmem:[#allocation5 + $0x1d00] sm:$0xff] }
 0x225   :  { %9794 = vmatpush1.bf16.msra.mxu0 %v14786_v22  ;;  %10310 = vmatpush1.bf16.msra.mxu1 %v14788_v23  ;;  %v14836_v22 = vcombine.low %v1022_v10, %v1026_v11  ;;  %v14843_v23 = vcombine.high %v1029_v14, %v1033_v16  ;;  %v1073_v10 = vld [vmem:[#allocation5 + $0x1d20] sm:$0xff]  ;;  %v1070_v11 = vld [vmem:[#allocation5 + $0x1d08] sm:$0xff] }
 0x226   :  { %9795 = vmatprep.subr.bf16.mxu0 %v14795_v24  ;;  %10311 = vmatprep.subr.bf16.mxu1 %v14797_v25  ;;  %v14845_v24 = vcombine.high %v1030_v19, %v1034_v20  ;;  %v1037_v25 = vld [vmem:[#allocation5 + $0x1c00] sm:$0xff] }
 0x227   :  { %v1077_v16 = vld [vmem:[#allocation5 + $0x1d40] sm:$0xff] }
 0x229   :  { %9796 = vmatpush1.bf16.msra.mxu0 %v14794_v35  ;;  %10312 = vmatpush1.bf16.msra.mxu1 %v14796_v36  ;;  %v14844_v35 = vcombine.low %v1030_v19, %v1034_v20  ;;  %v14851_v36 = vcombine.high %v1037_v25, %v1041_v54  ;;  %v1081_v19 = vld [vmem:[#allocation5 + $0x1d60] sm:$0xff]  ;;  %v1078_v20 = vld [vmem:[#allocation5 + $0x1d48] sm:$0xff] }
 0x22a   :  { %9797 = vmatprep.subr.bf16.mxu0 %v14803_v37  ;;  %10313 = vmatprep.subr.bf16.mxu1 %v14805_v38  ;;  %v14853_v37 = vcombine.high %v1038_v26, %v1042_v28  ;;  %v1045_v38 = vld [vmem:[#allocation5 + $0x1c40] sm:$0xff] }
 0x22b   :  { %v14859_v48 = vcombine.high %v1045_v38, %v1049_v17 }
 0x22d   :  { %9798 = vmatpush1.bf16.msra.mxu0 %v14802_v41  ;;  %10314 = vmatpush1.bf16.msra.mxu1 %v14804_v42  ;;  %v16928_v41 = vld [vmem:[#allocation2 + $0x38] sm:$0xff] }
 0x22e   :  { %9799 = vmatprep.subr.bf16.mxu0 %v14811_v44  ;;  %10315 = vmatprep.subr.bf16.mxu1 %v14813_v47  ;;  %v16930_v42 = vld [vmem:[#allocation2 + $0x98] sm:$0xff]  ;;  %v14850_v44 = vcombine.low %v1037_v25, %v1041_v54  ;;  %v14852_v47 = vcombine.low %v1038_v26, %v1042_v28  ;;  %v1085_v54 = vld [vmem:[#allocation5 + $0x1d80] sm:$0xff]  ;;  %v1086_v28 = vld [vmem:[#allocation5 + $0x1d88] sm:$0xff] }
 0x22f   :  { %v1089_v26 = vld [vmem:[#allocation5 + $0x1da0] sm:$0xff] }
 0x231   :  { %9800 = vmatpush1.bf16.msra.mxu0 %v14810_v52  ;;  %10316 = vmatpush1.bf16.msra.mxu1 %v14812_v55  ;;  %v16934_v52 = vcombine.high %v16928_v41, %v16930_v42  ;;  %v14858_v55 = vcombine.low %v1045_v38, %v1049_v17  ;;  %v1093_v17 = vld [vmem:[#allocation5 + $0x1dc0] sm:$0xff] }
 0x232   :  { %9801 = vmatprep.subr.bf16.mxu0 %v14819_v56  ;;  %10317 = vmatprep.subr.bf16.mxu1 %v14821_v27  ;;  %v14860_v56 = vcombine.low %v1046_v18, %v1050_v5  ;;  %v14867_v27 = vcombine.high %v1053_v50, %v1057_v51  ;;  %v1097_v18 = vld [vmem:[#allocation5 + $0x1de0] sm:$0xff]  ;;  %v1094_v5 = vld [vmem:[#allocation5 + $0x1dc8] sm:$0xff] }
 0x235   :  { %9802 = vmatpush1.bf16.msra.mxu0 %v14818_v62  ;;  %10318 = vmatpush1.bf16.msra.mxu1 %v14820_v0  ;;  %v1066_v62 = vld [vmem:[#allocation5 + $0x1ce8] sm:$0xff]  ;;  %v14866_v0 = vcombine.low %v1053_v50, %v1057_v51  ;;  %v1101_v51 = vld [vmem:[#allocation5 + $0x1e00] sm:$0xff] }
 0x236   :  { %9803 = vmatprep.subr.bf16.mxu0 %v14827_v6  ;;  %10319 = vmatprep.subr.bf16.mxu1 %v14829_v7  ;;  %v14868_v6 = vcombine.low %v1054_v1, %v1058_v3  ;;  %v14875_v7 = vcombine.high %v1061_v59, %v1065_v60  ;;  %v14877_v8 = vcombine.high %v1062_v61, %v1066_v62  ;;  %v1105_v1 = vld [vmem:[#allocation5 + $0x1e20] sm:$0xff]  ;;  %v1102_v3 = vld [vmem:[#allocation5 + $0x1e08] sm:$0xff] }
 0x239   :  { %9804 = vmatpush1.bf16.msra.mxu0 %v14826_v33  ;;  %10320 = vmatpush1.bf16.msra.mxu1 %v14828_v34  ;;  %v1074_v33 = vld [vmem:[#allocation5 + $0x1d28] sm:$0xff]  ;;  %v14874_v34 = vcombine.low %v1061_v59, %v1065_v60  ;;  %v1109_v60 = vld [vmem:[#allocation5 + $0x1e40] sm:$0xff] }
 0x23a   :  { %9805 = vmatprep.subr.bf16.mxu0 %v14835_v45  ;;  %10321 = vmatprep.subr.bf16.mxu1 %v14837_v13  ;;  %v14876_v45 = vcombine.low %v1062_v61, %v1066_v62  ;;  %v14883_v13 = vcombine.high %v1069_v9, %v1073_v10  ;;  %v14885_v14 = vcombine.high %v1070_v11, %v1074_v33  ;;  %v1113_v61 = vld [vmem:[#allocation5 + $0x1e60] sm:$0xff]  ;;  %v1110_v62 = vld [vmem:[#allocation5 + $0x1e48] sm:$0xff] }
 0x23d   :  { %9806 = vmatpush1.bf16.msra.mxu0 %v14834_v21  ;;  %10322 = vmatpush1.bf16.msra.mxu1 %v14836_v22  ;;  %v1082_v21 = vld [vmem:[#allocation5 + $0x1d68] sm:$0xff]  ;;  %v14882_v22 = vcombine.low %v1069_v9, %v1073_v10  ;;  %v1117_v10 = vld [vmem:[#allocation5 + $0x1e80] sm:$0xff] }
 0x23e   :  { %9807 = vmatprep.subr.bf16.mxu0 %v14843_v23  ;;  %10323 = vmatprep.subr.bf16.mxu1 %v14845_v24  ;;  %v14884_v23 = vcombine.low %v1070_v11, %v1074_v33  ;;  %v14891_v24 = vcombine.high %v1077_v16, %v1081_v19  ;;  %v14893_v25 = vcombine.high %v1078_v20, %v1082_v21  ;;  %v1121_v11 = vld [vmem:[#allocation5 + $0x1ea0] sm:$0xff]  ;;  %v1118_v33 = vld [vmem:[#allocation5 + $0x1e88] sm:$0xff] }
 0x241   :  { %9808 = vmatpush1.bf16.msra.mxu0 %v14842_v32  ;;  %10324 = vmatpush1.bf16.msra.mxu1 %v14844_v35  ;;  %v1090_v32 = vld [vmem:[#allocation5 + $0x1da8] sm:$0xff]  ;;  %v14890_v35 = vcombine.low %v1077_v16, %v1081_v19  ;;  %v1125_v19 = vld [vmem:[#allocation5 + $0x1ec0] sm:$0xff] }
 0x242   :  { %9820 = vmatprep.subr.bf16.mxu0 %v14851_v36  ;;  %10336 = vmatprep.subr.bf16.mxu1 %v14853_v37  ;;  %v14892_v36 = vcombine.low %v1078_v20, %v1082_v21  ;;  %v14899_v37 = vcombine.high %v1085_v54, %v1089_v26  ;;  %v14901_v38 = vcombine.high %v1086_v28, %v1090_v32  ;;  %v1129_v20 = vld [vmem:[#allocation5 + $0x1ee0] sm:$0xff]  ;;  %v1126_v21 = vld [vmem:[#allocation5 + $0x1ec8] sm:$0xff] }
 0x244   :  { %9810 = vmatmul.mubr.bf16.vlgmr.msra.gmra.mrb[0].mxu0 %v16926_v4  ;;  %10326 = vmatmul.mubr.bf16.vlgmr.msra.gmra.mrb[0].mxu1 %v16926_v4 }
 0x245   :  { %9821 = vmatpush1.bf16.msra.mxu0 %v14850_v44  ;;  %10337 = vmatpush1.bf16.msra.mxu1 %v14852_v47  ;;  %v1098_v44 = vld [vmem:[#allocation5 + $0x1de8] sm:$0xff]  ;;  %v14898_v47 = vcombine.low %v1085_v54, %v1089_v26  ;;  %v1133_v26 = vld [vmem:[#allocation5 + $0x1f00] sm:$0xff] }
 0x246   :  { %9822 = vmatprep.subr.bf16.mxu0 %v14859_v48  ;;  %10338 = vmatprep.subr.bf16.mxu1 %v14861_v49  ;;  %v14900_v48 = vcombine.low %v1086_v28, %v1090_v32  ;;  %v14907_v49 = vcombine.high %v1093_v17, %v1097_v18  ;;  %v14909_v50 = vcombine.high %v1094_v5, %v1098_v44  ;;  %v1137_v28 = vld [vmem:[#allocation5 + $0x1f20] sm:$0xff]  ;;  %v1134_v32 = vld [vmem:[#allocation5 + $0x1f08] sm:$0xff] }
 0x247   :  { %9852 = vmatprep.mubr.bf16.mxu0 %v16934_v52  ;;  %10368 = vmatprep.mubr.bf16.mxu1 %v16934_v52 }
 0x249   :  { %9823 = vmatpush1.bf16.msra.mxu0 %v14858_v55  ;;  %10339 = vmatpush1.bf16.msra.mxu1 %v14860_v56  ;;  %v1106_v55 = vld [vmem:[#allocation5 + $0x1e28] sm:$0xff]  ;;  %v14906_v56 = vcombine.low %v1093_v17, %v1097_v18  ;;  %v1141_v18 = vld [vmem:[#allocation5 + $0x1f40] sm:$0xff] }
 0x24a   :  { %9824 = vmatprep.subr.bf16.mxu0 %v14867_v27  ;;  %10340 = vmatprep.subr.bf16.mxu1 %v14869_v29  ;;  %v14908_v27 = vcombine.low %v1094_v5, %v1098_v44  ;;  %v14915_v29 = vcombine.high %v1101_v51, %v1105_v1  ;;  %v14917_v59 = vcombine.high %v1102_v3, %v1106_v55  ;;  %v1145_v5 = vld [vmem:[#allocation5 + $0x1f60] sm:$0xff]  ;;  %v1142_v44 = vld [vmem:[#allocation5 + $0x1f48] sm:$0xff] }
 0x24d   :  { %9825 = vmatpush1.bf16.msra.mxu0 %v14866_v0  ;;  %10341 = vmatpush1.bf16.msra.mxu1 %v14868_v6  ;;  %v1114_v0 = vld [vmem:[#allocation5 + $0x1e68] sm:$0xff]  ;;  %v14914_v6 = vcombine.low %v1101_v51, %v1105_v1  ;;  %v1149_v1 = vld [vmem:[#allocation5 + $0x1f80] sm:$0xff] }
 0x24e   :  { %9826 = vmatprep.subr.bf16.mxu0 %v14875_v7  ;;  %10342 = vmatprep.subr.bf16.mxu1 %v14877_v8  ;;  %v14916_v7 = vcombine.low %v1102_v3, %v1106_v55  ;;  %v14923_v8 = vcombine.high %v1109_v60, %v1113_v61  ;;  %v14925_v9 = vcombine.high %v1110_v62, %v1114_v0  ;;  %v1153_v3 = vld [vmem:[#allocation5 + $0x1fa0] sm:$0xff]  ;;  %v1150_v55 = vld [vmem:[#allocation5 + $0x1f88] sm:$0xff] }
 0x251   :  { %9827 = vmatpush1.bf16.msra.mxu0 %v14874_v34  ;;  %10343 = vmatpush1.bf16.msra.mxu1 %v14876_v45  ;;  %v1122_v34 = vld [vmem:[#allocation5 + $0x1ea8] sm:$0xff]  ;;  %v14922_v45 = vcombine.low %v1109_v60, %v1113_v61  ;;  %v1157_v61 = vld [vmem:[#allocation5 + $0x1fc0] sm:$0xff] }
 0x252   :  { %9828 = vmatprep.subr.bf16.mxu0 %v14883_v13  ;;  %10344 = vmatprep.subr.bf16.mxu1 %v14885_v14  ;;  %v14924_v13 = vcombine.low %v1110_v62, %v1114_v0  ;;  %v14931_v14 = vcombine.high %v1117_v10, %v1121_v11  ;;  %v14933_v16 = vcombine.high %v1118_v33, %v1122_v34  ;;  %v1161_v62 = vld [vmem:[#allocation5 + $0x1fe0] sm:$0xff]  ;;  %v1158_v0 = vld [vmem:[#allocation5 + $0x1fc8] sm:$0xff] }
 0x255   :  { %9829 = vmatpush1.bf16.msra.mxu0 %v14882_v22  ;;  %10345 = vmatpush1.bf16.msra.mxu1 %v14884_v23  ;;  %v1130_v22 = vld [vmem:[#allocation5 + $0x1ee8] sm:$0xff]  ;;  %v14930_v23 = vcombine.low %v1117_v10, %v1121_v11  ;;  %v1165_v11 = vld [vmem:[#allocation5 + $0x2000] sm:$0xff] }
 0x256   :  { %9830 = vmatprep.subr.bf16.mxu0 %v14891_v24  ;;  %10346 = vmatprep.subr.bf16.mxu1 %v14893_v25  ;;  %v14932_v24 = vcombine.low %v1118_v33, %v1122_v34  ;;  %v14939_v25 = vcombine.high %v1125_v19, %v1129_v20  ;;  %v14941_v54 = vcombine.high %v1126_v21, %v1130_v22  ;;  %v1169_v33 = vld [vmem:[#allocation5 + $0x2020] sm:$0xff]  ;;  %v1166_v34 = vld [vmem:[#allocation5 + $0x2008] sm:$0xff] }
 0x259   :  { %9831 = vmatpush1.bf16.msra.mxu0 %v14890_v35  ;;  %10347 = vmatpush1.bf16.msra.mxu1 %v14892_v36  ;;  %v1138_v35 = vld [vmem:[#allocation5 + $0x1f28] sm:$0xff]  ;;  %v14938_v36 = vcombine.low %v1125_v19, %v1129_v20  ;;  %v1173_v20 = vld [vmem:[#allocation5 + $0x2040] sm:$0xff] }
 0x25a   :  { %9832 = vmatprep.subr.bf16.mxu0 %v14899_v37  ;;  %10348 = vmatprep.subr.bf16.mxu1 %v14901_v38  ;;  %v14940_v37 = vcombine.low %v1126_v21, %v1130_v22  ;;  %v14947_v38 = vcombine.high %v1133_v26, %v1137_v28  ;;  %v14949_v17 = vcombine.high %v1134_v32, %v1138_v35  ;;  %v1177_v21 = vld [vmem:[#allocation5 + $0x2060] sm:$0xff]  ;;  %v1174_v22 = vld [vmem:[#allocation5 + $0x2048] sm:$0xff] }
 0x25d   :  { %9833 = vmatpush1.bf16.msra.mxu0 %v14898_v47  ;;  %10349 = vmatpush1.bf16.msra.mxu1 %v14900_v48  ;;  %v1146_v47 = vld [vmem:[#allocation5 + $0x1f68] sm:$0xff]  ;;  %v14946_v48 = vcombine.low %v1133_v26, %v1137_v28  ;;  %v14978_v26 = vcombine.low %v1165_v11, %v1169_v33 }
 0x25e   :  { %9834 = vmatprep.subr.bf16.mxu0 %v14907_v49  ;;  %10350 = vmatprep.subr.bf16.mxu1 %v14909_v50  ;;  %v14948_v49 = vcombine.low %v1134_v32, %v1138_v35  ;;  %v14955_v50 = vcombine.high %v1141_v18, %v1145_v5  ;;  %v14957_v51 = vcombine.high %v1142_v44, %v1146_v47 }
 0x25f   :  { %v14987_v32 = vcombine.high %v1173_v20, %v1177_v21 }
 0x261   :  { %9835 = vmatpush1.bf16.msra.mxu0 %v14906_v56  ;;  %10351 = vmatpush1.bf16.msra.mxu1 %v14908_v27  ;;  %v1154_v56 = vld [vmem:[#allocation5 + $0x1fa8] sm:$0xff]  ;;  %v14954_v27 = vcombine.low %v1141_v18, %v1145_v5 }
 0x262   :  { %9836 = vmatprep.subr.bf16.mxu0 %v14915_v29  ;;  %10352 = vmatprep.subr.bf16.mxu1 %v14917_v59  ;;  %v14956_v29 = vcombine.low %v1142_v44, %v1146_v47  ;;  %v14963_v59 = vcombine.high %v1149_v1, %v1153_v3  ;;  %v14965_v60 = vcombine.high %v1150_v55, %v1154_v56  ;;  %v1189_v47 = vld [vmem:[#allocation5 + $0x20c0] sm:$0xff] }
 0x265   :  { %9837 = vmatpush1.bf16.msra.mxu0 %v14914_v6  ;;  %10353 = vmatpush1.bf16.msra.mxu1 %v14916_v7  ;;  %v1162_v6 = vld [vmem:[#allocation5 + $0x1fe8] sm:$0xff]  ;;  %v14962_v7 = vcombine.low %v1149_v1, %v1153_v3 }
 0x266   :  { %9838 = vmatprep.subr.bf16.mxu0 %v14923_v8  ;;  %10354 = vmatprep.subr.bf16.mxu1 %v14925_v9  ;;  %v14964_v8 = vcombine.low %v1150_v55, %v1154_v56  ;;  %v14971_v9 = vcombine.high %v1157_v61, %v1161_v62  ;;  %v14973_v10 = vcombine.high %v1158_v0, %v1162_v6  ;;  %v1197_v56 = vld [vmem:[#allocation5 + $0x2100] sm:$0xff] }
 0x269   :  { %9839 = vmatpush1.bf16.msra.mxu0 %v14922_v45  ;;  %10355 = vmatpush1.bf16.msra.mxu1 %v14924_v13  ;;  %v1170_v45 = vld [vmem:[#allocation5 + $0x2028] sm:$0xff]  ;;  %v14970_v13 = vcombine.low %v1157_v61, %v1161_v62 }
 0x26a   :  { %9840 = vmatprep.subr.bf16.mxu0 %v14931_v14  ;;  %10356 = vmatprep.subr.bf16.mxu1 %v14933_v16  ;;  %v14972_v14 = vcombine.low %v1158_v0, %v1162_v6  ;;  %v14979_v16 = vcombine.high %v1165_v11, %v1169_v33  ;;  %v14981_v19 = vcombine.high %v1166_v34, %v1170_v45  ;;  %v1205_v6 = vld [vmem:[#allocation5 + $0x2140] sm:$0xff] }
 0x26b   :  { %v14980_v28 = vcombine.low %v1166_v34, %v1170_v45  ;;  %v1213_v45 = vld [vmem:[#allocation5 + $0x2180] sm:$0xff] }
 0x26d   :  { %9841 = vmatpush1.bf16.msra.mxu0 %v14930_v23  ;;  %10357 = vmatpush1.bf16.msra.mxu1 %v14932_v24  ;;  %v16942_v23 = vcombine.low %v16928_v41, %v16930_v42  ;;  %v1178_v24 = vld [vmem:[#allocation5 + $0x2068] sm:$0xff] }
 0x26e   :  { %9842 = vmatprep.subr.bf16.mxu0 %v14939_v25  ;;  %10358 = vmatprep.subr.bf16.mxu1 %v14941_v54  ;;  %v16944_v25 = vld [vmem:[#allocation2 + $0x40] sm:$0xff]  ;;  %v14989_v35 = vcombine.high %v1174_v22, %v1178_v24  ;;  %v1182_v41 = vld [vmem:[#allocation5 + $0x2088] sm:$0xff]  ;;  %v14988_v18 = vcombine.low %v1174_v22, %v1178_v24 }
 0x26f   :  { %v16946_v54 = vld [vmem:[#allocation2 + $0xa0] sm:$0xff]  ;;  %v1186_v42 = vld [vmem:[#allocation5 + $0x20a8] sm:$0xff] }
 0x270   :  { %v14997_v44 = vcombine.high %v1182_v41, %v1186_v42  ;;  %v14996_v1 = vcombine.low %v1182_v41, %v1186_v42  ;;  %v1221_v24 = vld [vmem:[#allocation5 + $0x21c0] sm:$0xff] }
 0x271   :  { %9843 = vmatpush1.bf16.msra.mxu0 %v14938_v36  ;;  %10359 = vmatpush1.bf16.msra.mxu1 %v14940_v37  ;;  %v1181_v36 = vld [vmem:[#allocation5 + $0x2080] sm:$0xff] }
 0x272   :  { %9844 = vmatprep.subr.bf16.mxu0 %v14947_v38  ;;  %10360 = vmatprep.subr.bf16.mxu1 %v14949_v17  ;;  %v1185_v37 = vld [vmem:[#allocation5 + $0x20a0] sm:$0xff]  ;;  %v16950_v38 = vcombine.high %v16944_v25, %v16946_v54  ;;  %v14986_v17 = vcombine.low %v1173_v20, %v1177_v21 }
 0x273   :  { %v14995_v5 = vcombine.high %v1181_v36, %v1185_v37  ;;  %v1229_v42 = vld [vmem:[#allocation5 + $0x2200] sm:$0xff] }
 0x275   :  { %9845 = vmatpush1.bf16.msra.mxu0 %v14946_v48  ;;  %10361 = vmatpush1.bf16.msra.mxu1 %v14948_v49  ;;  %v1193_v48 = vld [vmem:[#allocation5 + $0x20e0] sm:$0xff]  ;;  %v1190_v49 = vld [vmem:[#allocation5 + $0x20c8] sm:$0xff] }
 0x276   :  { %9846 = vmatprep.subr.bf16.mxu0 %v14955_v50  ;;  %10362 = vmatprep.subr.bf16.mxu1 %v14957_v51  ;;  %v1194_v50 = vld [vmem:[#allocation5 + $0x20e8] sm:$0xff]  ;;  %v14994_v51 = vcombine.low %v1181_v36, %v1185_v37  ;;  %v15003_v3 = vcombine.high %v1189_v47, %v1193_v48 }
 0x277   :  { %v15005_v55 = vcombine.high %v1190_v49, %v1194_v50  ;;  %v15004_v61 = vcombine.low %v1190_v49, %v1194_v50  ;;  %v1237_v50 = vld [vmem:[#allocation5 + $0x2240] sm:$0xff] }
 0x279   :  { %9847 = vmatpush1.bf16.msra.mxu0 %v14954_v27  ;;  %10363 = vmatpush1.bf16.msra.mxu1 %v14956_v29  ;;  %v1201_v27 = vld [vmem:[#allocation5 + $0x2120] sm:$0xff]  ;;  %v1198_v29 = vld [vmem:[#allocation5 + $0x2108] sm:$0xff] }
 0x27a   :  { %9848 = vmatprep.subr.bf16.mxu0 %v14963_v59  ;;  %10364 = vmatprep.subr.bf16.mxu1 %v14965_v60  ;;  %v1202_v59 = vld [vmem:[#allocation5 + $0x2128] sm:$0xff]  ;;  %v15002_v60 = vcombine.low %v1189_v47, %v1193_v48  ;;  %v15011_v62 = vcombine.high %v1197_v56, %v1201_v27 }
 0x27b   :  { %v15013_v0 = vcombine.high %v1198_v29, %v1202_v59  ;;  %v15012_v11 = vcombine.low %v1198_v29, %v1202_v59  ;;  %v1245_v59 = vld [vmem:[#allocation5 + $0x2280] sm:$0xff] }
 0x27d   :  { %9849 = vmatpush1.bf16.msra.mxu0 %v14962_v7  ;;  %10365 = vmatpush1.bf16.msra.mxu1 %v14964_v8  ;;  %v1209_v7 = vld [vmem:[#allocation5 + $0x2160] sm:$0xff]  ;;  %v1206_v8 = vld [vmem:[#allocation5 + $0x2148] sm:$0xff] }
 0x27e   :  { %9850 = vmatprep.subr.bf16.mxu0 %v14971_v9  ;;  %10366 = vmatprep.subr.bf16.mxu1 %v14973_v10  ;;  %v1210_v9 = vld [vmem:[#allocation5 + $0x2168] sm:$0xff]  ;;  %v15010_v10 = vcombine.low %v1197_v56, %v1201_v27  ;;  %v15019_v33 = vcombine.high %v1205_v6, %v1209_v7 }
 0x27f   :  { %v15021_v34 = vcombine.high %v1206_v8, %v1210_v9  ;;  %v15020_v20 = vcombine.low %v1206_v8, %v1210_v9  ;;  %v1253_v9 = vld [vmem:[#allocation5 + $0x22c0] sm:$0xff] }
 0x281   :  { %9851 = vmatpush1.bf16.msra.mxu0 %v14970_v13  ;;  %10367 = vmatpush1.bf16.msra.mxu1 %v14972_v14  ;;  %v1217_v13 = vld [vmem:[#allocation5 + $0x21a0] sm:$0xff]  ;;  %v1214_v14 = vld [vmem:[#allocation5 + $0x2188] sm:$0xff] }
 0x282   :  { %9863 = vmatprep.subr.bf16.mxu0 %v14979_v16  ;;  %10379 = vmatprep.subr.bf16.mxu1 %v14981_v19  ;;  %v1218_v16 = vld [vmem:[#allocation5 + $0x21a8] sm:$0xff]  ;;  %v15018_v19 = vcombine.low %v1205_v6, %v1209_v7  ;;  %v15027_v21 = vcombine.high %v1213_v45, %v1217_v13 }
 0x283   :  { %v15029_v22 = vcombine.high %v1214_v14, %v1218_v16  ;;  %v15028_v36 = vcombine.low %v1214_v14, %v1218_v16  ;;  %v1261_v16 = vld [vmem:[#allocation5 + $0x2300] sm:$0xff] }
 0x284   :  { %9853 = vmatmul.mubr.bf16.vlgmr.msra.gmra.mrb[0].mxu0 %v16942_v23  ;;  %10369 = vmatmul.mubr.bf16.vlgmr.msra.gmra.mrb[0].mxu1 %v16942_v23 }
 0x285   :  { %9864 = vmatpush1.bf16.msra.mxu0 %v14978_v26  ;;  %10380 = vmatpush1.bf16.msra.mxu1 %v14980_v28  ;;  %v1225_v26 = vld [vmem:[#allocation5 + $0x21e0] sm:$0xff]  ;;  %v1222_v28 = vld [vmem:[#allocation5 + $0x21c8] sm:$0xff] }
 0x286   :  { %9865 = vmatprep.subr.bf16.mxu0 %v14987_v32  ;;  %10381 = vmatprep.subr.bf16.mxu1 %v14989_v35  ;;  %v1226_v32 = vld [vmem:[#allocation5 + $0x21e8] sm:$0xff]  ;;  %v15026_v35 = vcombine.low %v1213_v45, %v1217_v13  ;;  %v15035_v37 = vcombine.high %v1221_v24, %v1225_v26 }
 0x287   :  { %9895 = vmatprep.mubr.bf16.mxu0 %v16950_v38  ;;  %10411 = vmatprep.mubr.bf16.mxu1 %v16950_v38  ;;  %v15037_v41 = vcombine.high %v1222_v28, %v1226_v32  ;;  %v15036_v47 = vcombine.low %v1222_v28, %v1226_v32  ;;  %v1269_v32 = vld [vmem:[#allocation5 + $0x2340] sm:$0xff] }
 0x289   :  { %9866 = vmatpush1.bf16.msra.mxu0 %v14986_v17  ;;  %10382 = vmatpush1.bf16.msra.mxu1 %v14988_v18  ;;  %v1233_v17 = vld [vmem:[#allocation5 + $0x2220] sm:$0xff]  ;;  %v1230_v18 = vld [vmem:[#allocation5 + $0x2208] sm:$0xff] }
 0x28a   :  { %9867 = vmatprep.subr.bf16.mxu0 %v14995_v5  ;;  %10383 = vmatprep.subr.bf16.mxu1 %v14997_v44  ;;  %v1234_v5 = vld [vmem:[#allocation5 + $0x2228] sm:$0xff]  ;;  %v15034_v44 = vcombine.low %v1221_v24, %v1225_v26  ;;  %v15043_v48 = vcombine.high %v1229_v42, %v1233_v17 }
 0x28b   :  { %v15045_v49 = vcombine.high %v1230_v18, %v1234_v5  ;;  %v15044_v56 = vcombine.low %v1230_v18, %v1234_v5  ;;  %v1277_v5 = vld [vmem:[#allocation5 + $0x2380] sm:$0xff] }
 0x28d   :  { %9868 = vmatpush1.bf16.msra.mxu0 %v14994_v51  ;;  %10384 = vmatpush1.bf16.msra.mxu1 %v14996_v1  ;;  %v1241_v51 = vld [vmem:[#allocation5 + $0x2260] sm:$0xff]  ;;  %v1238_v1 = vld [vmem:[#allocation5 + $0x2248] sm:$0xff] }
 0x28e   :  { %9869 = vmatprep.subr.bf16.mxu0 %v15003_v3  ;;  %10385 = vmatprep.subr.bf16.mxu1 %v15005_v55  ;;  %v1242_v3 = vld [vmem:[#allocation5 + $0x2268] sm:$0xff]  ;;  %v15042_v55 = vcombine.low %v1229_v42, %v1233_v17  ;;  %v15051_v27 = vcombine.high %v1237_v50, %v1241_v51 }
 0x28f   :  { %v15053_v29 = vcombine.high %v1238_v1, %v1242_v3  ;;  %v15052_v6 = vcombine.low %v1238_v1, %v1242_v3  ;;  %v1285_v3 = vld [vmem:[#allocation5 + $0x23c0] sm:$0xff] }
 0x291   :  { %9870 = vmatpush1.bf16.msra.mxu0 %v15002_v60  ;;  %10386 = vmatpush1.bf16.msra.mxu1 %v15004_v61  ;;  %v1249_v60 = vld [vmem:[#allocation5 + $0x22a0] sm:$0xff]  ;;  %v1246_v61 = vld [vmem:[#allocation5 + $0x2288] sm:$0xff] }
 0x292   :  { %9871 = vmatprep.subr.bf16.mxu0 %v15011_v62  ;;  %10387 = vmatprep.subr.bf16.mxu1 %v15013_v0  ;;  %v1250_v62 = vld [vmem:[#allocation5 + $0x22a8] sm:$0xff]  ;;  %v15050_v0 = vcombine.low %v1237_v50, %v1241_v51  ;;  %v15059_v7 = vcombine.high %v1245_v59, %v1249_v60 }
 0x293   :  { %v15061_v8 = vcombine.high %v1246_v61, %v1250_v62  ;;  %v15060_v45 = vcombine.low %v1246_v61, %v1250_v62  ;;  %v1293_v62 = vld [vmem:[#allocation5 + $0x2400] sm:$0xff] }
 0x295   :  { %9872 = vmatpush1.bf16.msra.mxu0 %v15010_v10  ;;  %10388 = vmatpush1.bf16.msra.mxu1 %v15012_v11  ;;  %v1257_v10 = vld [vmem:[#allocation5 + $0x22e0] sm:$0xff]  ;;  %v1254_v11 = vld [vmem:[#allocation5 + $0x22c8] sm:$0xff] }
 0x296   :  { %9873 = vmatprep.subr.bf16.mxu0 %v15019_v33  ;;  %10389 = vmatprep.subr.bf16.mxu1 %v15021_v34  ;;  %v1258_v33 = vld [vmem:[#allocation5 + $0x22e8] sm:$0xff]  ;;  %v15058_v34 = vcombine.low %v1245_v59, %v1249_v60  ;;  %v15067_v13 = vcombine.high %v1253_v9, %v1257_v10 }
 0x297   :  { %v15069_v14 = vcombine.high %v1254_v11, %v1258_v33  ;;  %v15068_v24 = vcombine.low %v1254_v11, %v1258_v33  ;;  %v1301_v33 = vld [vmem:[#allocation5 + $0x2440] sm:$0xff] }
 0x299   :  { %9874 = vmatpush1.bf16.msra.mxu0 %v15018_v19  ;;  %10390 = vmatpush1.bf16.msra.mxu1 %v15020_v20  ;;  %v1265_v19 = vld [vmem:[#allocation5 + $0x2320] sm:$0xff]  ;;  %v1262_v20 = vld [vmem:[#allocation5 + $0x2308] sm:$0xff] }
 0x29a   :  { %9875 = vmatprep.subr.bf16.mxu0 %v15027_v21  ;;  %10391 = vmatprep.subr.bf16.mxu1 %v15029_v22  ;;  %v1266_v21 = vld [vmem:[#allocation5 + $0x2328] sm:$0xff]  ;;  %v15066_v22 = vcombine.low %v1253_v9, %v1257_v10  ;;  %v15075_v26 = vcombine.high %v1261_v16, %v1265_v19 }
 0x29b   :  { %v15077_v28 = vcombine.high %v1262_v20, %v1266_v21  ;;  %v15076_v42 = vcombine.low %v1262_v20, %v1266_v21 }
 0x29d   :  { %9876 = vmatpush1.bf16.msra.mxu0 %v15026_v35  ;;  %10392 = vmatpush1.bf16.msra.mxu1 %v15028_v36  ;;  %v1273_v35 = vld [vmem:[#allocation5 + $0x2360] sm:$0xff]  ;;  %v1270_v36 = vld [vmem:[#allocation5 + $0x2348] sm:$0xff] }
 0x29e   :  { %9877 = vmatprep.subr.bf16.mxu0 %v15035_v37  ;;  %10393 = vmatprep.subr.bf16.mxu1 %v15037_v41  ;;  %v1274_v37 = vld [vmem:[#allocation5 + $0x2368] sm:$0xff]  ;;  %v15074_v41 = vcombine.low %v1261_v16, %v1265_v19  ;;  %v15083_v17 = vcombine.high %v1269_v32, %v1273_v35 }
 0x29f   :  { %v15085_v18 = vcombine.high %v1270_v36, %v1274_v37  ;;  %v15084_v50 = vcombine.low %v1270_v36, %v1274_v37  ;;  %v16960_v16 = vld [vmem:[#allocation2 + $0x48] sm:$0xff] }
 0x2a0   :  { %v16962_v19 = vld [vmem:[#allocation2 + $0xa8] sm:$0xff] }
 0x2a1   :  { %9878 = vmatpush1.bf16.msra.mxu0 %v15034_v44  ;;  %10394 = vmatpush1.bf16.msra.mxu1 %v15036_v47  ;;  %v1281_v44 = vld [vmem:[#allocation5 + $0x23a0] sm:$0xff]  ;;  %v1278_v47 = vld [vmem:[#allocation5 + $0x2388] sm:$0xff] }
 0x2a2   :  { %9879 = vmatprep.subr.bf16.mxu0 %v15043_v48  ;;  %10395 = vmatprep.subr.bf16.mxu1 %v15045_v49  ;;  %v1282_v48 = vld [vmem:[#allocation5 + $0x23a8] sm:$0xff]  ;;  %v15082_v49 = vcombine.low %v1269_v32, %v1273_v35  ;;  %v15091_v51 = vcombine.high %v1277_v5, %v1281_v44  ;;  %v16966_v32 = vcombine.high %v16960_v16, %v16962_v19 }
 0x2a3   :  { %v15093_v1 = vcombine.high %v1278_v47, %v1282_v48  ;;  %v15092_v59 = vcombine.low %v1278_v47, %v1282_v48 }
 0x2a5   :  { %9880 = vmatpush1.bf16.msra.mxu0 %v15042_v55  ;;  %10396 = vmatpush1.bf16.msra.mxu1 %v15044_v56  ;;  %v1289_v55 = vld [vmem:[#allocation5 + $0x23e0] sm:$0xff]  ;;  %v1286_v56 = vld [vmem:[#allocation5 + $0x23c8] sm:$0xff] }
 0x2a6   :  { %9881 = vmatprep.subr.bf16.mxu0 %v15051_v27  ;;  %10397 = vmatprep.subr.bf16.mxu1 %v15053_v29  ;;  %v1290_v27 = vld [vmem:[#allocation5 + $0x23e8] sm:$0xff]  ;;  %v15090_v29 = vcombine.low %v1277_v5, %v1281_v44  ;;  %v15099_v60 = vcombine.high %v1285_v3, %v1289_v55 }
 0x2a7   :  { %v15101_v61 = vcombine.high %v1286_v56, %v1290_v27  ;;  %v15100_v9 = vcombine.low %v1286_v56, %v1290_v27  ;;  %v1322_v5 = vld [vmem:[#allocation5 + $0x24e8] sm:$0xff] }
 0x2a9   :  { %9882 = vmatpush1.bf16.msra.mxu0 %v15050_v0  ;;  %10398 = vmatpush1.bf16.msra.mxu1 %v15052_v6  ;;  %v1297_v0 = vld [vmem:[#allocation5 + $0x2420] sm:$0xff]  ;;  %v1294_v6 = vld [vmem:[#allocation5 + $0x2408] sm:$0xff] }
 0x2aa   :  { %9883 = vmatprep.subr.bf16.mxu0 %v15059_v7  ;;  %10399 = vmatprep.subr.bf16.mxu1 %v15061_v8  ;;  %v1298_v7 = vld [vmem:[#allocation5 + $0x2428] sm:$0xff]  ;;  %v15098_v8 = vcombine.low %v1285_v3, %v1289_v55  ;;  %v15107_v10 = vcombine.high %v1293_v62, %v1297_v0  ;;  %v15106_v20 = vcombine.low %v1293_v62, %v1297_v0 }
 0x2ab   :  { %v15109_v11 = vcombine.high %v1294_v6, %v1298_v7  ;;  %v15108_v21 = vcombine.low %v1294_v6, %v1298_v7  ;;  %v1330_v3 = vld [vmem:[#allocation5 + $0x2528] sm:$0xff] }
 0x2ac   :  { %v1338_v62 = vld [vmem:[#allocation5 + $0x2568] sm:$0xff] }
 0x2ad   :  { %9884 = vmatpush1.bf16.msra.mxu0 %v15058_v34  ;;  %10400 = vmatpush1.bf16.msra.mxu1 %v15060_v45  ;;  %v1305_v34 = vld [vmem:[#allocation5 + $0x2460] sm:$0xff]  ;;  %v1302_v45 = vld [vmem:[#allocation5 + $0x2448] sm:$0xff] }
 0x2ae   :  { %9885 = vmatprep.subr.bf16.mxu0 %v15067_v13  ;;  %10401 = vmatprep.subr.bf16.mxu1 %v15069_v14  ;;  %v16958_v13 = vcombine.low %v16944_v25, %v16946_v54  ;;  %v1306_v14 = vld [vmem:[#allocation5 + $0x2468] sm:$0xff]  ;;  %v15114_v35 = vcombine.low %v1301_v33, %v1305_v34 }
 0x2af   :  { %v1310_v25 = vld [vmem:[#allocation5 + $0x2488] sm:$0xff]  ;;  %v15116_v36 = vcombine.low %v1302_v45, %v1306_v14 }
 0x2b0   :  { %v1314_v54 = vld [vmem:[#allocation5 + $0x24a8] sm:$0xff] }
 0x2b1   :  { %9886 = vmatpush1.bf16.msra.mxu0 %v15066_v22  ;;  %10402 = vmatpush1.bf16.msra.mxu1 %v15068_v24  ;;  %v15115_v22 = vcombine.high %v1301_v33, %v1305_v34  ;;  %v15117_v24 = vcombine.high %v1302_v45, %v1306_v14  ;;  %v15124_v47 = vcombine.low %v1310_v25, %v1314_v54  ;;  %v1346_v33 = vld [vmem:[#allocation5 + $0x25a8] sm:$0xff] }
 0x2b2   :  { %9887 = vmatprep.subr.bf16.mxu0 %v15075_v26  ;;  %10403 = vmatprep.subr.bf16.mxu1 %v15077_v28  ;;  %v1309_v26 = vld [vmem:[#allocation5 + $0x2480] sm:$0xff] }
 0x2b3   :  { %v1313_v28 = vld [vmem:[#allocation5 + $0x24a0] sm:$0xff] }
 0x2b4   :  { %v15123_v37 = vcombine.high %v1309_v26, %v1313_v28  ;;  %v15122_v44 = vcombine.low %v1309_v26, %v1313_v28  ;;  %v1354_v26 = vld [vmem:[#allocation5 + $0x25e8] sm:$0xff] }
 0x2b5   :  { %9888 = vmatpush1.bf16.msra.mxu0 %v15074_v41  ;;  %10404 = vmatpush1.bf16.msra.mxu1 %v15076_v42  ;;  %v15125_v41 = vcombine.high %v1310_v25, %v1314_v54  ;;  %v1317_v42 = vld [vmem:[#allocation5 + $0x24c0] sm:$0xff] }
 0x2b6   :  { %9889 = vmatprep.subr.bf16.mxu0 %v15083_v17  ;;  %10405 = vmatprep.subr.bf16.mxu1 %v15085_v18  ;;  %v1321_v17 = vld [vmem:[#allocation5 + $0x24e0] sm:$0xff]  ;;  %v1318_v18 = vld [vmem:[#allocation5 + $0x24c8] sm:$0xff] }
 0x2b7   :  { %v15131_v48 = vcombine.high %v1317_v42, %v1321_v17  ;;  %v15130_v55 = vcombine.low %v1317_v42, %v1321_v17  ;;  %v15132_v56 = vcombine.low %v1318_v18, %v1322_v5  ;;  %v1362_v42 = vld [vmem:[#allocation5 + $0x2628] sm:$0xff] }
 0x2b9   :  { %9890 = vmatpush1.bf16.msra.mxu0 %v15082_v49  ;;  %10406 = vmatpush1.bf16.msra.mxu1 %v15084_v50  ;;  %v15133_v49 = vcombine.high %v1318_v18, %v1322_v5  ;;  %v1325_v50 = vld [vmem:[#allocation5 + $0x2500] sm:$0xff] }
 0x2ba   :  { %9891 = vmatprep.subr.bf16.mxu0 %v15091_v51  ;;  %10407 = vmatprep.subr.bf16.mxu1 %v15093_v1  ;;  %v1329_v51 = vld [vmem:[#allocation5 + $0x2520] sm:$0xff]  ;;  %v1326_v1 = vld [vmem:[#allocation5 + $0x2508] sm:$0xff] }
 0x2bb   :  { %v15139_v27 = vcombine.high %v1325_v50, %v1329_v51  ;;  %v15138_v0 = vcombine.low %v1325_v50, %v1329_v51  ;;  %v15140_v6 = vcombine.low %v1326_v1, %v1330_v3  ;;  %v1370_v50 = vld [vmem:[#allocation5 + $0x2668] sm:$0xff] }
 0x2bd   :  { %9892 = vmatpush1.bf16.msra.mxu0 %v15090_v29  ;;  %10408 = vmatpush1.bf16.msra.mxu1 %v15092_v59  ;;  %v15141_v29 = vcombine.high %v1326_v1, %v1330_v3  ;;  %v1333_v59 = vld [vmem:[#allocation5 + $0x2540] sm:$0xff] }
 0x2be   :  { %9893 = vmatprep.subr.bf16.mxu0 %v15099_v60  ;;  %10409 = vmatprep.subr.bf16.mxu1 %v15101_v61  ;;  %v1337_v60 = vld [vmem:[#allocation5 + $0x2560] sm:$0xff]  ;;  %v1334_v61 = vld [vmem:[#allocation5 + $0x2548] sm:$0xff] }
 0x2bf   :  { %v15147_v7 = vcombine.high %v1333_v59, %v1337_v60  ;;  %v15146_v34 = vcombine.low %v1333_v59, %v1337_v60  ;;  %v15148_v45 = vcombine.low %v1334_v61, %v1338_v62  ;;  %v1378_v59 = vld [vmem:[#allocation5 + $0x26a8] sm:$0xff] }
 0x2c1   :  { %9894 = vmatpush1.bf16.msra.mxu0 %v15098_v8  ;;  %10410 = vmatpush1.bf16.msra.mxu1 %v15100_v9  ;;  %v15149_v8 = vcombine.high %v1334_v61, %v1338_v62  ;;  %v1341_v9 = vld [vmem:[#allocation5 + $0x2580] sm:$0xff] }
 0x2c2   :  { %9906 = vmatprep.subr.bf16.mxu0 %v15107_v10  ;;  %10422 = vmatprep.subr.bf16.mxu1 %v15109_v11  ;;  %v1345_v10 = vld [vmem:[#allocation5 + $0x25a0] sm:$0xff]  ;;  %v1342_v11 = vld [vmem:[#allocation5 + $0x2588] sm:$0xff] }
 0x2c3   :  { %v15155_v14 = vcombine.high %v1341_v9, %v1345_v10  ;;  %v15154_v28 = vcombine.low %v1341_v9, %v1345_v10  ;;  %v15156_v25 = vcombine.low %v1342_v11, %v1346_v33  ;;  %v1386_v9 = vld [vmem:[#allocation5 + $0x26e8] sm:$0xff] }
 0x2c4   :  { %9896 = vmatmul.mubr.bf16.vlgmr.msra.gmra.mrb[0].mxu0 %v16958_v13  ;;  %10412 = vmatmul.mubr.bf16.vlgmr.msra.gmra.mrb[0].mxu1 %v16958_v13 }
 0x2c5   :  { %9907 = vmatpush1.bf16.msra.mxu0 %v15106_v20  ;;  %10423 = vmatpush1.bf16.msra.mxu1 %v15108_v21  ;;  %v15157_v20 = vcombine.high %v1342_v11, %v1346_v33  ;;  %v1349_v21 = vld [vmem:[#allocation5 + $0x25c0] sm:$0xff] }
 0x2c6   :  { %9908 = vmatprep.subr.bf16.mxu0 %v15115_v22  ;;  %10424 = vmatprep.subr.bf16.mxu1 %v15117_v24  ;;  %v1353_v22 = vld [vmem:[#allocation5 + $0x25e0] sm:$0xff]  ;;  %v1350_v24 = vld [vmem:[#allocation5 + $0x25c8] sm:$0xff] }
 0x2c7   :  { %9938 = vmatprep.mubr.bf16.mxu0 %v16966_v32  ;;  %10454 = vmatprep.mubr.bf16.mxu1 %v16966_v32  ;;  %v15163_v54 = vcombine.high %v1349_v21, %v1353_v22  ;;  %v15162_v17 = vcombine.low %v1349_v21, %v1353_v22  ;;  %v15164_v18 = vcombine.low %v1350_v24, %v1354_v26  ;;  %v1394_v21 = vld [vmem:[#allocation5 + $0x2728] sm:$0xff] }
 0x2c9   :  { %9909 = vmatpush1.bf16.msra.mxu0 %v15114_v35  ;;  %10425 = vmatpush1.bf16.msra.mxu1 %v15116_v36  ;;  %v15165_v35 = vcombine.high %v1350_v24, %v1354_v26  ;;  %v1357_v36 = vld [vmem:[#allocation5 + $0x2600] sm:$0xff] }
 0x2ca   :  { %9910 = vmatprep.subr.bf16.mxu0 %v15123_v37  ;;  %10426 = vmatprep.subr.bf16.mxu1 %v15125_v41  ;;  %v1361_v37 = vld [vmem:[#allocation5 + $0x2620] sm:$0xff]  ;;  %v1358_v41 = vld [vmem:[#allocation5 + $0x2608] sm:$0xff] }
 0x2cb   :  { %v15171_v5 = vcombine.high %v1357_v36, %v1361_v37  ;;  %v15170_v51 = vcombine.low %v1357_v36, %v1361_v37  ;;  %v15172_v1 = vcombine.low %v1358_v41, %v1362_v42  ;;  %v1402_v36 = vld [vmem:[#allocation5 + $0x2768] sm:$0xff] }
 0x2cd   :  { %9911 = vmatpush1.bf16.msra.mxu0 %v15122_v44  ;;  %10427 = vmatpush1.bf16.msra.mxu1 %v15124_v47  ;;  %v15173_v44 = vcombine.high %v1358_v41, %v1362_v42  ;;  %v1365_v47 = vld [vmem:[#allocation5 + $0x2640] sm:$0xff] }
 0x2ce   :  { %9912 = vmatprep.subr.bf16.mxu0 %v15131_v48  ;;  %10428 = vmatprep.subr.bf16.mxu1 %v15133_v49  ;;  %v1369_v48 = vld [vmem:[#allocation5 + $0x2660] sm:$0xff]  ;;  %v1366_v49 = vld [vmem:[#allocation5 + $0x2648] sm:$0xff] }
 0x2cf   :  { %v15179_v3 = vcombine.high %v1365_v47, %v1369_v48  ;;  %v15178_v60 = vcombine.low %v1365_v47, %v1369_v48  ;;  %v15180_v61 = vcombine.low %v1366_v49, %v1370_v50  ;;  %v1410_v47 = vld [vmem:[#allocation5 + $0x27a8] sm:$0xff] }
 0x2d1   :  { %9913 = vmatpush1.bf16.msra.mxu0 %v15130_v55  ;;  %10429 = vmatpush1.bf16.msra.mxu1 %v15132_v56  ;;  %v15181_v55 = vcombine.high %v1366_v49, %v1370_v50  ;;  %v1373_v56 = vld [vmem:[#allocation5 + $0x2680] sm:$0xff] }
 0x2d2   :  { %9914 = vmatprep.subr.bf16.mxu0 %v15139_v27  ;;  %10430 = vmatprep.subr.bf16.mxu1 %v15141_v29  ;;  %v1377_v27 = vld [vmem:[#allocation5 + $0x26a0] sm:$0xff]  ;;  %v1374_v29 = vld [vmem:[#allocation5 + $0x2688] sm:$0xff] }
 0x2d3   :  { %v15187_v62 = vcombine.high %v1373_v56, %v1377_v27  ;;  %v15186_v10 = vcombine.low %v1373_v56, %v1377_v27  ;;  %v15188_v11 = vcombine.low %v1374_v29, %v1378_v59  ;;  %v1418_v56 = vld [vmem:[#allocation5 + $0x27e8] sm:$0xff] }
 0x2d5   :  { %9915 = vmatpush1.bf16.msra.mxu0 %v15138_v0  ;;  %10431 = vmatpush1.bf16.msra.mxu1 %v15140_v6  ;;  %v15189_v0 = vcombine.high %v1374_v29, %v1378_v59  ;;  %v1381_v6 = vld [vmem:[#allocation5 + $0x26c0] sm:$0xff] }
 0x2d6   :  { %9916 = vmatprep.subr.bf16.mxu0 %v15147_v7  ;;  %10432 = vmatprep.subr.bf16.mxu1 %v15149_v8  ;;  %v1385_v7 = vld [vmem:[#allocation5 + $0x26e0] sm:$0xff]  ;;  %v1382_v8 = vld [vmem:[#allocation5 + $0x26c8] sm:$0xff] }
 0x2d7   :  { %v15195_v33 = vcombine.high %v1381_v6, %v1385_v7  ;;  %v15194_v22 = vcombine.low %v1381_v6, %v1385_v7  ;;  %v15196_v24 = vcombine.low %v1382_v8, %v1386_v9  ;;  %v1426_v6 = vld [vmem:[#allocation5 + $0x2828] sm:$0xff] }
 0x2d9   :  { %9917 = vmatpush1.bf16.msra.mxu0 %v15146_v34  ;;  %10433 = vmatpush1.bf16.msra.mxu1 %v15148_v45  ;;  %v15197_v34 = vcombine.high %v1382_v8, %v1386_v9  ;;  %v1389_v45 = vld [vmem:[#allocation5 + $0x2700] sm:$0xff] }
 0x2da   :  { %9918 = vmatprep.subr.bf16.mxu0 %v15155_v14  ;;  %10434 = vmatprep.subr.bf16.mxu1 %v15157_v20  ;;  %v1393_v14 = vld [vmem:[#allocation5 + $0x2720] sm:$0xff]  ;;  %v1390_v20 = vld [vmem:[#allocation5 + $0x2708] sm:$0xff] }
 0x2db   :  { %v15203_v26 = vcombine.high %v1389_v45, %v1393_v14  ;;  %v15202_v37 = vcombine.low %v1389_v45, %v1393_v14  ;;  %v15204_v41 = vcombine.low %v1390_v20, %v1394_v21  ;;  %v16974_v45 = vcombine.low %v16960_v16, %v16962_v19  ;;  %v1434_v14 = vld [vmem:[#allocation5 + $0x2868] sm:$0xff] }
 0x2dc   :  { %v1438_v16 = vld [vmem:[#allocation5 + $0x2888] sm:$0xff] }
 0x2dd   :  { %9919 = vmatpush1.bf16.msra.mxu0 %v15154_v28  ;;  %10435 = vmatpush1.bf16.msra.mxu1 %v15156_v25  ;;  %v15205_v28 = vcombine.high %v1390_v20, %v1394_v21  ;;  %v1397_v25 = vld [vmem:[#allocation5 + $0x2740] sm:$0xff]  ;;  %v16976_v20 = vld [vmem:[#allocation2 + $0x50] sm:$0xff]  ;;  %v1442_v19 = vld [vmem:[#allocation5 + $0x28a8] sm:$0xff] }
 0x2de   :  { %9920 = vmatprep.subr.bf16.mxu0 %v15163_v54  ;;  %10436 = vmatprep.subr.bf16.mxu1 %v15165_v35  ;;  %v1401_v54 = vld [vmem:[#allocation5 + $0x2760] sm:$0xff]  ;;  %v1398_v35 = vld [vmem:[#allocation5 + $0x2748] sm:$0xff]  ;;  %v16978_v21 = vld [vmem:[#allocation2 + $0xb0] sm:$0xff] }
 0x2df   :  { %v15211_v42 = vcombine.high %v1397_v25, %v1401_v54  ;;  %v15210_v48 = vcombine.low %v1397_v25, %v1401_v54  ;;  %v15212_v49 = vcombine.low %v1398_v35, %v1402_v36  ;;  %v1437_v25 = vld [vmem:[#allocation5 + $0x2880] sm:$0xff] }
 0x2e0   :  { %v1441_v54 = vld [vmem:[#allocation5 + $0x28a0] sm:$0xff] }
 0x2e1   :  { %9921 = vmatpush1.bf16.msra.mxu0 %v15162_v17  ;;  %10437 = vmatpush1.bf16.msra.mxu1 %v15164_v18  ;;  %v15213_v17 = vcombine.high %v1398_v35, %v1402_v36  ;;  %v1405_v18 = vld [vmem:[#allocation5 + $0x2780] sm:$0xff]  ;;  %v16982_v35 = vcombine.high %v16976_v20, %v16978_v21 }
 0x2e2   :  { %9922 = vmatprep.subr.bf16.mxu0 %v15171_v5  ;;  %10438 = vmatprep.subr.bf16.mxu1 %v15173_v44  ;;  %v1409_v5 = vld [vmem:[#allocation5 + $0x27a0] sm:$0xff]  ;;  %v1406_v44 = vld [vmem:[#allocation5 + $0x2788] sm:$0xff] }
 0x2e3   :  { %v15219_v50 = vcombine.high %v1405_v18, %v1409_v5  ;;  %v15218_v27 = vcombine.low %v1405_v18, %v1409_v5  ;;  %v15220_v29 = vcombine.low %v1406_v44, %v1410_v47  ;;  %v1449_v18 = vld [vmem:[#allocation5 + $0x28e0] sm:$0xff]  ;;  %v1446_v5 = vld [vmem:[#allocation5 + $0x28c8] sm:$0xff] }
 0x2e5   :  { %9923 = vmatpush1.bf16.msra.mxu0 %v15170_v51  ;;  %10439 = vmatpush1.bf16.msra.mxu1 %v15172_v1  ;;  %v15221_v51 = vcombine.high %v1406_v44, %v1410_v47  ;;  %v1413_v1 = vld [vmem:[#allocation5 + $0x27c0] sm:$0xff]  ;;  %v1450_v44 = vld [vmem:[#allocation5 + $0x28e8] sm:$0xff]  ;;  %v15250_v47 = vcombine.low %v1437_v25, %v1441_v54 }
 0x2e6   :  { %9924 = vmatprep.subr.bf16.mxu0 %v15179_v3  ;;  %10440 = vmatprep.subr.bf16.mxu1 %v15181_v55  ;;  %v1417_v3 = vld [vmem:[#allocation5 + $0x27e0] sm:$0xff]  ;;  %v1414_v55 = vld [vmem:[#allocation5 + $0x27c8] sm:$0xff] }
 0x2e7   :  { %v15227_v59 = vcombine.high %v1413_v1, %v1417_v3  ;;  %v15226_v7 = vcombine.low %v1413_v1, %v1417_v3  ;;  %v15228_v8 = vcombine.low %v1414_v55, %v1418_v56  ;;  %v1457_v1 = vld [vmem:[#allocation5 + $0x2920] sm:$0xff]  ;;  %v1454_v3 = vld [vmem:[#allocation5 + $0x2908] sm:$0xff] }
 0x2e9   :  { %9925 = vmatpush1.bf16.msra.mxu0 %v15178_v60  ;;  %10441 = vmatpush1.bf16.msra.mxu1 %v15180_v61  ;;  %v15229_v60 = vcombine.high %v1414_v55, %v1418_v56  ;;  %v1421_v61 = vld [vmem:[#allocation5 + $0x2800] sm:$0xff]  ;;  %v1458_v55 = vld [vmem:[#allocation5 + $0x2928] sm:$0xff] }
 0x2ea   :  { %9926 = vmatprep.subr.bf16.mxu0 %v15187_v62  ;;  %10442 = vmatprep.subr.bf16.mxu1 %v15189_v0  ;;  %v1425_v62 = vld [vmem:[#allocation5 + $0x2820] sm:$0xff]  ;;  %v1422_v0 = vld [vmem:[#allocation5 + $0x2808] sm:$0xff] }
 0x2eb   :  { %v15235_v9 = vcombine.high %v1421_v61, %v1425_v62 }
 0x2ed   :  { %9927 = vmatpush1.bf16.msra.mxu0 %v15186_v10  ;;  %10443 = vmatpush1.bf16.msra.mxu1 %v15188_v11  ;;  %v15237_v10 = vcombine.high %v1422_v0, %v1426_v6  ;;  %v1429_v11 = vld [vmem:[#allocation5 + $0x2840] sm:$0xff] }
 0x2ee   :  { %9928 = vmatprep.subr.bf16.mxu0 %v15195_v33  ;;  %10444 = vmatprep.subr.bf16.mxu1 %v15197_v34  ;;  %v1433_v33 = vld [vmem:[#allocation5 + $0x2860] sm:$0xff]  ;;  %v1430_v34 = vld [vmem:[#allocation5 + $0x2848] sm:$0xff] }
 0x2ef   :  { %v15242_v36 = vcombine.low %v1429_v11, %v1433_v33 }
 0x2f1   :  { %9929 = vmatpush1.bf16.msra.mxu0 %v15194_v22  ;;  %10445 = vmatpush1.bf16.msra.mxu1 %v15196_v24  ;;  %v15234_v22 = vcombine.low %v1421_v61, %v1425_v62  ;;  %v15236_v24 = vcombine.low %v1422_v0, %v1426_v6  ;;  %v1465_v61 = vld [vmem:[#allocation5 + $0x2960] sm:$0xff]  ;;  %v1462_v62 = vld [vmem:[#allocation5 + $0x2948] sm:$0xff] }
 0x2f2   :  { %9930 = vmatprep.subr.bf16.mxu0 %v15203_v26  ;;  %10446 = vmatprep.subr.bf16.mxu1 %v15205_v28  ;;  %v15243_v26 = vcombine.high %v1429_v11, %v1433_v33  ;;  %v15245_v28 = vcombine.high %v1430_v34, %v1434_v14  ;;  %v1466_v0 = vld [vmem:[#allocation5 + $0x2968] sm:$0xff]  ;;  %v1473_v11 = vld [vmem:[#allocation5 + $0x29a0] sm:$0xff] }
 0x2f3   :  { %v1470_v33 = vld [vmem:[#allocation5 + $0x2988] sm:$0xff] }
 0x2f5   :  { %9931 = vmatpush1.bf16.msra.mxu0 %v15202_v37  ;;  %10447 = vmatpush1.bf16.msra.mxu1 %v15204_v41  ;;  %v15244_v37 = vcombine.low %v1430_v34, %v1434_v14  ;;  %v15251_v41 = vcombine.high %v1437_v25, %v1441_v54  ;;  %v1474_v34 = vld [vmem:[#allocation5 + $0x29a8] sm:$0xff]  ;;  %v1481_v25 = vld [vmem:[#allocation5 + $0x29e0] sm:$0xff] }
 0x2f6   :  { %9932 = vmatprep.subr.bf16.mxu0 %v15211_v42  ;;  %10448 = vmatprep.subr.bf16.mxu1 %v15213_v17  ;;  %v15253_v42 = vcombine.high %v1438_v16, %v1442_v19  ;;  %v1445_v17 = vld [vmem:[#allocation5 + $0x28c0] sm:$0xff]  ;;  %v1478_v54 = vld [vmem:[#allocation5 + $0x29c8] sm:$0xff] }
 0x2f7   :  { %v15258_v56 = vcombine.low %v1445_v17, %v1449_v18 }
 0x2f9   :  { %9933 = vmatpush1.bf16.msra.mxu0 %v15210_v48  ;;  %10449 = vmatpush1.bf16.msra.mxu1 %v15212_v49  ;;  %v15252_v48 = vcombine.low %v1438_v16, %v1442_v19  ;;  %v15259_v49 = vcombine.high %v1445_v17, %v1449_v18  ;;  %v1482_v16 = vld [vmem:[#allocation5 + $0x29e8] sm:$0xff]  ;;  %v1489_v17 = vld [vmem:[#allocation5 + $0x2a20] sm:$0xff] }
 0x2fa   :  { %9934 = vmatprep.subr.bf16.mxu0 %v15219_v50  ;;  %10450 = vmatprep.subr.bf16.mxu1 %v15221_v51  ;;  %v15261_v50 = vcombine.high %v1446_v5, %v1450_v44  ;;  %v1453_v51 = vld [vmem:[#allocation5 + $0x2900] sm:$0xff]  ;;  %v1486_v18 = vld [vmem:[#allocation5 + $0x2a08] sm:$0xff] }
 0x2fb   :  { %v15266_v6 = vcombine.low %v1453_v51, %v1457_v1 }
 0x2fd   :  { %9935 = vmatpush1.bf16.msra.mxu0 %v15218_v27  ;;  %10451 = vmatpush1.bf16.msra.mxu1 %v15220_v29  ;;  %v15260_v27 = vcombine.low %v1446_v5, %v1450_v44  ;;  %v15267_v29 = vcombine.high %v1453_v51, %v1457_v1  ;;  %v1490_v5 = vld [vmem:[#allocation5 + $0x2a28] sm:$0xff]  ;;  %v1497_v51 = vld [vmem:[#allocation5 + $0x2a60] sm:$0xff] }
 0x2fe   :  { %9936 = vmatprep.subr.bf16.mxu0 %v15227_v59  ;;  %10452 = vmatprep.subr.bf16.mxu1 %v15229_v60  ;;  %v15269_v59 = vcombine.high %v1454_v3, %v1458_v55  ;;  %v1461_v60 = vld [vmem:[#allocation5 + $0x2940] sm:$0xff]  ;;  %v1494_v1 = vld [vmem:[#allocation5 + $0x2a48] sm:$0xff] }
 0x2ff   :  { %v15274_v14 = vcombine.low %v1461_v60, %v1465_v61 }
 0x301   :  { %9937 = vmatpush1.bf16.msra.mxu0 %v15226_v7  ;;  %10453 = vmatpush1.bf16.msra.mxu1 %v15228_v8  ;;  %v15268_v7 = vcombine.low %v1454_v3, %v1458_v55  ;;  %v15275_v8 = vcombine.high %v1461_v60, %v1465_v61  ;;  %v1498_v3 = vld [vmem:[#allocation5 + $0x2a68] sm:$0xff]  ;;  %v1505_v60 = vld [vmem:[#allocation5 + $0x2aa0] sm:$0xff] }
 0x302   :  { %9949 = vmatprep.subr.bf16.mxu0 %v15235_v9  ;;  %10465 = vmatprep.subr.bf16.mxu1 %v15237_v10  ;;  %v15277_v9 = vcombine.high %v1462_v62, %v1466_v0  ;;  %v1469_v10 = vld [vmem:[#allocation5 + $0x2980] sm:$0xff]  ;;  %v1502_v61 = vld [vmem:[#allocation5 + $0x2a88] sm:$0xff] }
 0x303   :  { %v15282_v19 = vcombine.low %v1469_v10, %v1473_v11 }
 0x304   :  { %9939 = vmatmul.mubr.bf16.vlgmr.msra.gmra.mrb[0].mxu0 %v16974_v45  ;;  %10455 = vmatmul.mubr.bf16.vlgmr.msra.gmra.mrb[0].mxu1 %v16974_v45 }
 0x305   :  { %9950 = vmatpush1.bf16.msra.mxu0 %v15234_v22  ;;  %10466 = vmatpush1.bf16.msra.mxu1 %v15236_v24  ;;  %v15276_v22 = vcombine.low %v1462_v62, %v1466_v0  ;;  %v15283_v24 = vcombine.high %v1469_v10, %v1473_v11  ;;  %v1506_v62 = vld [vmem:[#allocation5 + $0x2aa8] sm:$0xff]  ;;  %v1513_v10 = vld [vmem:[#allocation5 + $0x2ae0] sm:$0xff] }
 0x306   :  { %9951 = vmatprep.subr.bf16.mxu0 %v15243_v26  ;;  %10467 = vmatprep.subr.bf16.mxu1 %v15245_v28  ;;  %v15285_v26 = vcombine.high %v1470_v33, %v1474_v34  ;;  %v1477_v28 = vld [vmem:[#allocation5 + $0x29c0] sm:$0xff]  ;;  %v1510_v11 = vld [vmem:[#allocation5 + $0x2ac8] sm:$0xff] }
 0x307   :  { %9981 = vmatprep.mubr.bf16.mxu0 %v16982_v35  ;;  %10497 = vmatprep.mubr.bf16.mxu1 %v16982_v35  ;;  %v15290_v44 = vcombine.low %v1477_v28, %v1481_v25 }
 0x309   :  { %9952 = vmatpush1.bf16.msra.mxu0 %v15242_v36  ;;  %10468 = vmatpush1.bf16.msra.mxu1 %v15244_v37  ;;  %v15284_v36 = vcombine.low %v1470_v33, %v1474_v34  ;;  %v15291_v37 = vcombine.high %v1477_v28, %v1481_v25  ;;  %v1514_v33 = vld [vmem:[#allocation5 + $0x2ae8] sm:$0xff]  ;;  %v1521_v28 = vld [vmem:[#allocation5 + $0x2b20] sm:$0xff] }
 0x30a   :  { %9953 = vmatprep.subr.bf16.mxu0 %v15251_v41  ;;  %10469 = vmatprep.subr.bf16.mxu1 %v15253_v42  ;;  %v15293_v41 = vcombine.high %v1478_v54, %v1482_v16  ;;  %v1485_v42 = vld [vmem:[#allocation5 + $0x2a00] sm:$0xff]  ;;  %v1518_v25 = vld [vmem:[#allocation5 + $0x2b08] sm:$0xff] }
 0x30b   :  { %v15298_v55 = vcombine.low %v1485_v42, %v1489_v17 }
 0x30d   :  { %9954 = vmatpush1.bf16.msra.mxu0 %v15250_v47  ;;  %10470 = vmatpush1.bf16.msra.mxu1 %v15252_v48  ;;  %v15292_v47 = vcombine.low %v1478_v54, %v1482_v16  ;;  %v15299_v48 = vcombine.high %v1485_v42, %v1489_v17  ;;  %v1522_v54 = vld [vmem:[#allocation5 + $0x2b28] sm:$0xff]  ;;  %v1529_v42 = vld [vmem:[#allocation5 + $0x2b60] sm:$0xff] }
 0x30e   :  { %9955 = vmatprep.subr.bf16.mxu0 %v15259_v49  ;;  %10471 = vmatprep.subr.bf16.mxu1 %v15261_v50  ;;  %v15301_v49 = vcombine.high %v1486_v18, %v1490_v5  ;;  %v1493_v50 = vld [vmem:[#allocation5 + $0x2a40] sm:$0xff]  ;;  %v1526_v17 = vld [vmem:[#allocation5 + $0x2b48] sm:$0xff] }
 0x30f   :  { %v15306_v0 = vcombine.low %v1493_v50, %v1497_v51 }
 0x311   :  { %9956 = vmatpush1.bf16.msra.mxu0 %v15258_v56  ;;  %10472 = vmatpush1.bf16.msra.mxu1 %v15260_v27  ;;  %v15300_v56 = vcombine.low %v1486_v18, %v1490_v5  ;;  %v15307_v27 = vcombine.high %v1493_v50, %v1497_v51  ;;  %v1530_v18 = vld [vmem:[#allocation5 + $0x2b68] sm:$0xff]  ;;  %v1537_v50 = vld [vmem:[#allocation5 + $0x2ba0] sm:$0xff] }
 0x312   :  { %9957 = vmatprep.subr.bf16.mxu0 %v15267_v29  ;;  %10473 = vmatprep.subr.bf16.mxu1 %v15269_v59  ;;  %v15309_v29 = vcombine.high %v1494_v1, %v1498_v3  ;;  %v1501_v59 = vld [vmem:[#allocation5 + $0x2a80] sm:$0xff]  ;;  %v1534_v51 = vld [vmem:[#allocation5 + $0x2b88] sm:$0xff] }
 0x313   :  { %v15314_v34 = vcombine.low %v1501_v59, %v1505_v60 }
 0x315   :  { %9958 = vmatpush1.bf16.msra.mxu0 %v15266_v6  ;;  %10474 = vmatpush1.bf16.msra.mxu1 %v15268_v7  ;;  %v15308_v6 = vcombine.low %v1494_v1, %v1498_v3  ;;  %v15315_v7 = vcombine.high %v1501_v59, %v1505_v60  ;;  %v1538_v1 = vld [vmem:[#allocation5 + $0x2ba8] sm:$0xff]  ;;  %v1545_v59 = vld [vmem:[#allocation5 + $0x2be0] sm:$0xff] }
 0x316   :  { %9959 = vmatprep.subr.bf16.mxu0 %v15275_v8  ;;  %10475 = vmatprep.subr.bf16.mxu1 %v15277_v9  ;;  %v15317_v8 = vcombine.high %v1502_v61, %v1506_v62  ;;  %v1509_v9 = vld [vmem:[#allocation5 + $0x2ac0] sm:$0xff]  ;;  %v1542_v60 = vld [vmem:[#allocation5 + $0x2bc8] sm:$0xff] }
 0x317   :  { %v15322_v16 = vcombine.low %v1509_v9, %v1513_v10 }
 0x319   :  { %9960 = vmatpush1.bf16.msra.mxu0 %v15274_v14  ;;  %10476 = vmatpush1.bf16.msra.mxu1 %v15276_v22  ;;  %v15316_v14 = vcombine.low %v1502_v61, %v1506_v62  ;;  %v15323_v22 = vcombine.high %v1509_v9, %v1513_v10  ;;  %v1546_v61 = vld [vmem:[#allocation5 + $0x2be8] sm:$0xff]  ;;  %v1553_v9 = vld [vmem:[#allocation5 + $0x2c20] sm:$0xff] }
 0x31a   :  { %9961 = vmatprep.subr.bf16.mxu0 %v15283_v24  ;;  %10477 = vmatprep.subr.bf16.mxu1 %v15285_v26  ;;  %v15325_v24 = vcombine.high %v1510_v11, %v1514_v33  ;;  %v1517_v26 = vld [vmem:[#allocation5 + $0x2b00] sm:$0xff]  ;;  %v1550_v10 = vld [vmem:[#allocation5 + $0x2c08] sm:$0xff] }
 0x31b   :  { %v15330_v5 = vcombine.low %v1517_v26, %v1521_v28 }
 0x31d   :  { %9962 = vmatpush1.bf16.msra.mxu0 %v15282_v19  ;;  %10478 = vmatpush1.bf16.msra.mxu1 %v15284_v36  ;;  %v15324_v19 = vcombine.low %v1510_v11, %v1514_v33  ;;  %v15331_v36 = vcombine.high %v1517_v26, %v1521_v28  ;;  %v1554_v11 = vld [vmem:[#allocation5 + $0x2c28] sm:$0xff]  ;;  %v1561_v26 = vld [vmem:[#allocation5 + $0x2c60] sm:$0xff] }
 0x31e   :  { %9963 = vmatprep.subr.bf16.mxu0 %v15291_v37  ;;  %10479 = vmatprep.subr.bf16.mxu1 %v15293_v41  ;;  %v15333_v37 = vcombine.high %v1518_v25, %v1522_v54  ;;  %v1525_v41 = vld [vmem:[#allocation5 + $0x2b40] sm:$0xff]  ;;  %v1558_v28 = vld [vmem:[#allocation5 + $0x2c48] sm:$0xff] }
 0x31f   :  { %v15338_v3 = vcombine.low %v1525_v41, %v1529_v42 }
 0x321   :  { %9964 = vmatpush1.bf16.msra.mxu0 %v15290_v44  ;;  %10480 = vmatpush1.bf16.msra.mxu1 %v15292_v47  ;;  %v15332_v44 = vcombine.low %v1518_v25, %v1522_v54  ;;  %v15339_v47 = vcombine.high %v1525_v41, %v1529_v42  ;;  %v16990_v25 = vcombine.low %v16976_v20, %v16978_v21  ;;  %v1562_v54 = vld [vmem:[#allocation5 + $0x2c68] sm:$0xff] }
 0x322   :  { %9965 = vmatprep.subr.bf16.mxu0 %v15299_v48  ;;  %10481 = vmatprep.subr.bf16.mxu1 %v15301_v49  ;;  %v15341_v48 = vcombine.high %v1526_v17, %v1530_v18  ;;  %v1533_v49 = vld [vmem:[#allocation5 + $0x2b80] sm:$0xff]  ;;  %v15373_v42 = vcombine.high %v1558_v28, %v1562_v54  ;;  %v1566_v20 = vld [vmem:[#allocation5 + $0x2c88] sm:$0xff] }
 0x323   :  { %v15346_v62 = vcombine.low %v1533_v49, %v1537_v50  ;;  %v1570_v21 = vld [vmem:[#allocation5 + $0x2ca8] sm:$0xff] }
 0x325   :  { %9966 = vmatpush1.bf16.msra.mxu0 %v15298_v55  ;;  %10482 = vmatpush1.bf16.msra.mxu1 %v15300_v56  ;;  %v15340_v55 = vcombine.low %v1526_v17, %v1530_v18  ;;  %v15347_v56 = vcombine.high %v1533_v49, %v1537_v50  ;;  %v1565_v17 = vld [vmem:[#allocation5 + $0x2c80] sm:$0xff]  ;;  %v15381_v49 = vcombine.high %v1566_v20, %v1570_v21 }
 0x326   :  { %9967 = vmatprep.subr.bf16.mxu0 %v15307_v27  ;;  %10483 = vmatprep.subr.bf16.mxu1 %v15309_v29  ;;  %v15349_v27 = vcombine.high %v1534_v51, %v1538_v1  ;;  %v1541_v29 = vld [vmem:[#allocation5 + $0x2bc0] sm:$0xff] }
 0x327   :  { %v15354_v33 = vcombine.low %v1541_v29, %v1545_v59  ;;  %v1569_v18 = vld [vmem:[#allocation5 + $0x2ca0] sm:$0xff] }
 0x328   :  { %v1573_v50 = vld [vmem:[#allocation5 + $0x2cc0] sm:$0xff] }
 0x329   :  { %9968 = vmatpush1.bf16.msra.mxu0 %v15306_v0  ;;  %10484 = vmatpush1.bf16.msra.mxu1 %v15308_v6  ;;  %v15348_v0 = vcombine.low %v1534_v51, %v1538_v1  ;;  %v15355_v6 = vcombine.high %v1541_v29, %v1545_v59  ;;  %v1577_v51 = vld [vmem:[#allocation5 + $0x2ce0] sm:$0xff]  ;;  %v1574_v1 = vld [vmem:[#allocation5 + $0x2cc8] sm:$0xff] }
 0x32a   :  { %9969 = vmatprep.subr.bf16.mxu0 %v15315_v7  ;;  %10485 = vmatprep.subr.bf16.mxu1 %v15317_v8  ;;  %v15357_v7 = vcombine.high %v1542_v60, %v1546_v61  ;;  %v1549_v8 = vld [vmem:[#allocation5 + $0x2c00] sm:$0xff] }
 0x32b   :  { %v1581_v59 = vld [vmem:[#allocation5 + $0x2d00] sm:$0xff] }
 0x32d   :  { %9970 = vmatpush1.bf16.msra.mxu0 %v15314_v34  ;;  %10486 = vmatpush1.bf16.msra.mxu1 %v15316_v14  ;;  %v15356_v34 = vcombine.low %v1542_v60, %v1546_v61  ;;  %v15363_v14 = vcombine.high %v1549_v8, %v1553_v9  ;;  %v1585_v60 = vld [vmem:[#allocation5 + $0x2d20] sm:$0xff]  ;;  %v1582_v61 = vld [vmem:[#allocation5 + $0x2d08] sm:$0xff] }
 0x32e   :  { %9971 = vmatprep.subr.bf16.mxu0 %v15323_v22  ;;  %10487 = vmatprep.subr.bf16.mxu1 %v15325_v24  ;;  %v15365_v22 = vcombine.high %v1550_v10, %v1554_v11  ;;  %v1557_v24 = vld [vmem:[#allocation5 + $0x2c40] sm:$0xff] }
 0x32f   :  { %v15371_v41 = vcombine.high %v1557_v24, %v1561_v26 }
 0x331   :  { %9972 = vmatpush1.bf16.msra.mxu0 %v15322_v16  ;;  %10488 = vmatpush1.bf16.msra.mxu1 %v15324_v19  ;;  %v16992_v16 = vld [vmem:[#allocation2 + $0x58] sm:$0xff] }
 0x332   :  { %9973 = vmatprep.subr.bf16.mxu0 %v15331_v36  ;;  %10489 = vmatprep.subr.bf16.mxu1 %v15333_v37  ;;  %v16994_v19 = vld [vmem:[#allocation2 + $0xb8] sm:$0xff]  ;;  %v15362_v36 = vcombine.low %v1549_v8, %v1553_v9  ;;  %v15364_v37 = vcombine.low %v1550_v10, %v1554_v11  ;;  %v1589_v9 = vld [vmem:[#allocation5 + $0x2d40] sm:$0xff]  ;;  %v1590_v11 = vld [vmem:[#allocation5 + $0x2d48] sm:$0xff] }
 0x333   :  { %v1593_v10 = vld [vmem:[#allocation5 + $0x2d60] sm:$0xff] }
 0x335   :  { %9974 = vmatpush1.bf16.msra.mxu0 %v15330_v5  ;;  %10490 = vmatpush1.bf16.msra.mxu1 %v15332_v44  ;;  %v16998_v5 = vcombine.high %v16992_v16, %v16994_v19  ;;  %v15370_v44 = vcombine.low %v1557_v24, %v1561_v26  ;;  %v1597_v26 = vld [vmem:[#allocation5 + $0x2d80] sm:$0xff] }
 0x336   :  { %9975 = vmatprep.subr.bf16.mxu0 %v15339_v47  ;;  %10491 = vmatprep.subr.bf16.mxu1 %v15341_v48  ;;  %v15372_v47 = vcombine.low %v1558_v28, %v1562_v54  ;;  %v15379_v48 = vcombine.high %v1565_v17, %v1569_v18  ;;  %v1601_v28 = vld [vmem:[#allocation5 + $0x2da0] sm:$0xff]  ;;  %v1598_v54 = vld [vmem:[#allocation5 + $0x2d88] sm:$0xff] }
 0x339   :  { %9976 = vmatpush1.bf16.msra.mxu0 %v15338_v3  ;;  %10492 = vmatpush1.bf16.msra.mxu1 %v15340_v55  ;;  %v1578_v3 = vld [vmem:[#allocation5 + $0x2ce8] sm:$0xff]  ;;  %v15378_v55 = vcombine.low %v1565_v17, %v1569_v18  ;;  %v1605_v18 = vld [vmem:[#allocation5 + $0x2dc0] sm:$0xff] }
 0x33a   :  { %9977 = vmatprep.subr.bf16.mxu0 %v15347_v56  ;;  %10493 = vmatprep.subr.bf16.mxu1 %v15349_v27  ;;  %v15380_v56 = vcombine.low %v1566_v20, %v1570_v21  ;;  %v15387_v27 = vcombine.high %v1573_v50, %v1577_v51  ;;  %v15389_v29 = vcombine.high %v1574_v1, %v1578_v3  ;;  %v1609_v20 = vld [vmem:[#allocation5 + $0x2de0] sm:$0xff]  ;;  %v1606_v21 = vld [vmem:[#allocation5 + $0x2dc8] sm:$0xff] }
 0x33d   :  { %9978 = vmatpush1.bf16.msra.mxu0 %v15346_v62  ;;  %10494 = vmatpush1.bf16.msra.mxu1 %v15348_v0  ;;  %v1586_v62 = vld [vmem:[#allocation5 + $0x2d28] sm:$0xff]  ;;  %v15386_v0 = vcombine.low %v1573_v50, %v1577_v51  ;;  %v1613_v51 = vld [vmem:[#allocation5 + $0x2e00] sm:$0xff] }
 0x33e   :  { %9979 = vmatprep.subr.bf16.mxu0 %v15355_v6  ;;  %10495 = vmatprep.subr.bf16.mxu1 %v15357_v7  ;;  %v15388_v6 = vcombine.low %v1574_v1, %v1578_v3  ;;  %v15395_v7 = vcombine.high %v1581_v59, %v1585_v60  ;;  %v15397_v8 = vcombine.high %v1582_v61, %v1586_v62  ;;  %v1617_v1 = vld [vmem:[#allocation5 + $0x2e20] sm:$0xff]  ;;  %v1614_v3 = vld [vmem:[#allocation5 + $0x2e08] sm:$0xff] }
 0x341   :  { %9980 = vmatpush1.bf16.msra.mxu0 %v15354_v33  ;;  %10496 = vmatpush1.bf16.msra.mxu1 %v15356_v34  ;;  %v1594_v33 = vld [vmem:[#allocation5 + $0x2d68] sm:$0xff]  ;;  %v15394_v34 = vcombine.low %v1581_v59, %v1585_v60  ;;  %v1621_v60 = vld [vmem:[#allocation5 + $0x2e40] sm:$0xff] }
 0x342   :  { %9992 = vmatprep.subr.bf16.mxu0 %v15363_v14  ;;  %10508 = vmatprep.subr.bf16.mxu1 %v15365_v22  ;;  %v15396_v14 = vcombine.low %v1582_v61, %v1586_v62  ;;  %v15403_v22 = vcombine.high %v1589_v9, %v1593_v10  ;;  %v15405_v24 = vcombine.high %v1590_v11, %v1594_v33  ;;  %v1625_v61 = vld [vmem:[#allocation5 + $0x2e60] sm:$0xff]  ;;  %v1622_v62 = vld [vmem:[#allocation5 + $0x2e48] sm:$0xff] }
 0x344   :  { %9982 = vmatmul.mubr.bf16.vlgmr.msra.gmra.mrb[0].mxu0 %v16990_v25  ;;  %10498 = vmatmul.mubr.bf16.vlgmr.msra.gmra.mrb[0].mxu1 %v16990_v25 }
 0x345   :  { %9993 = vmatpush1.bf16.msra.mxu0 %v15362_v36  ;;  %10509 = vmatpush1.bf16.msra.mxu1 %v15364_v37  ;;  %v1602_v36 = vld [vmem:[#allocation5 + $0x2da8] sm:$0xff]  ;;  %v15402_v37 = vcombine.low %v1589_v9, %v1593_v10  ;;  %v1629_v10 = vld [vmem:[#allocation5 + $0x2e80] sm:$0xff] }
 0x346   :  { %9994 = vmatprep.subr.bf16.mxu0 %v15371_v41  ;;  %10510 = vmatprep.subr.bf16.mxu1 %v15373_v42  ;;  %v15404_v41 = vcombine.low %v1590_v11, %v1594_v33  ;;  %v15411_v42 = vcombine.high %v1597_v26, %v1601_v28  ;;  %v15413_v17 = vcombine.high %v1598_v54, %v1602_v36  ;;  %v1633_v11 = vld [vmem:[#allocation5 + $0x2ea0] sm:$0xff]  ;;  %v1630_v33 = vld [vmem:[#allocation5 + $0x2e88] sm:$0xff] }
 0x347   :  { %10024 = vmatprep.mubr.bf16.mxu0 %v16998_v5  ;;  %10540 = vmatprep.mubr.bf16.mxu1 %v16998_v5 }
 0x349   :  { %9995 = vmatpush1.bf16.msra.mxu0 %v15370_v44  ;;  %10511 = vmatpush1.bf16.msra.mxu1 %v15372_v47  ;;  %v1610_v44 = vld [vmem:[#allocation5 + $0x2de8] sm:$0xff]  ;;  %v15410_v47 = vcombine.low %v1597_v26, %v1601_v28  ;;  %v1637_v28 = vld [vmem:[#allocation5 + $0x2ec0] sm:$0xff] }
 0x34a   :  { %9996 = vmatprep.subr.bf16.mxu0 %v15379_v48  ;;  %10512 = vmatprep.subr.bf16.mxu1 %v15381_v49  ;;  %v15412_v48 = vcombine.low %v1598_v54, %v1602_v36  ;;  %v15419_v49 = vcombine.high %v1605_v18, %v1609_v20  ;;  %v15421_v50 = vcombine.high %v1606_v21, %v1610_v44  ;;  %v1641_v54 = vld [vmem:[#allocation5 + $0x2ee0] sm:$0xff]  ;;  %v1638_v36 = vld [vmem:[#allocation5 + $0x2ec8] sm:$0xff] }
 0x34d   :  { %9997 = vmatpush1.bf16.msra.mxu0 %v15378_v55  ;;  %10513 = vmatpush1.bf16.msra.mxu1 %v15380_v56  ;;  %v1618_v55 = vld [vmem:[#allocation5 + $0x2e28] sm:$0xff]  ;;  %v15418_v56 = vcombine.low %v1605_v18, %v1609_v20  ;;  %v1645_v20 = vld [vmem:[#allocation5 + $0x2f00] sm:$0xff] }
 0x34e   :  { %9998 = vmatprep.subr.bf16.mxu0 %v15387_v27  ;;  %10514 = vmatprep.subr.bf16.mxu1 %v15389_v29  ;;  %v15420_v27 = vcombine.low %v1606_v21, %v1610_v44  ;;  %v15427_v29 = vcombine.high %v1613_v51, %v1617_v1  ;;  %v15429_v59 = vcombine.high %v1614_v3, %v1618_v55  ;;  %v1649_v21 = vld [vmem:[#allocation5 + $0x2f20] sm:$0xff]  ;;  %v1646_v44 = vld [vmem:[#allocation5 + $0x2f08] sm:$0xff] }
 0x351   :  { %9999 = vmatpush1.bf16.msra.mxu0 %v15386_v0  ;;  %10515 = vmatpush1.bf16.msra.mxu1 %v15388_v6  ;;  %v1626_v0 = vld [vmem:[#allocation5 + $0x2e68] sm:$0xff]  ;;  %v15426_v6 = vcombine.low %v1613_v51, %v1617_v1  ;;  %v1653_v1 = vld [vmem:[#allocation5 + $0x2f40] sm:$0xff] }
 0x352   :  { %10000 = vmatprep.subr.bf16.mxu0 %v15395_v7  ;;  %10516 = vmatprep.subr.bf16.mxu1 %v15397_v8  ;;  %v15428_v7 = vcombine.low %v1614_v3, %v1618_v55  ;;  %v15435_v8 = vcombine.high %v1621_v60, %v1625_v61  ;;  %v15437_v9 = vcombine.high %v1622_v62, %v1626_v0  ;;  %v1657_v3 = vld [vmem:[#allocation5 + $0x2f60] sm:$0xff]  ;;  %v1654_v55 = vld [vmem:[#allocation5 + $0x2f48] sm:$0xff] }
 0x355   :  { %10001 = vmatpush1.bf16.msra.mxu0 %v15394_v34  ;;  %10517 = vmatpush1.bf16.msra.mxu1 %v15396_v14  ;;  %v1634_v34 = vld [vmem:[#allocation5 + $0x2ea8] sm:$0xff]  ;;  %v15434_v14 = vcombine.low %v1621_v60, %v1625_v61  ;;  %v1661_v61 = vld [vmem:[#allocation5 + $0x2f80] sm:$0xff] }
 0x356   :  { %10002 = vmatprep.subr.bf16.mxu0 %v15403_v22  ;;  %10518 = vmatprep.subr.bf16.mxu1 %v15405_v24  ;;  %v15436_v22 = vcombine.low %v1622_v62, %v1626_v0  ;;  %v15443_v24 = vcombine.high %v1629_v10, %v1633_v11  ;;  %v15445_v26 = vcombine.high %v1630_v33, %v1634_v34  ;;  %v1665_v62 = vld [vmem:[#allocation5 + $0x2fa0] sm:$0xff]  ;;  %v1662_v0 = vld [vmem:[#allocation5 + $0x2f88] sm:$0xff] }
 0x359   :  { %10003 = vmatpush1.bf16.msra.mxu0 %v15402_v37  ;;  %10519 = vmatpush1.bf16.msra.mxu1 %v15404_v41  ;;  %v1642_v37 = vld [vmem:[#allocation5 + $0x2ee8] sm:$0xff]  ;;  %v15442_v41 = vcombine.low %v1629_v10, %v1633_v11  ;;  %v1669_v11 = vld [vmem:[#allocation5 + $0x2fc0] sm:$0xff] }
 0x35a   :  { %10004 = vmatprep.subr.bf16.mxu0 %v15411_v42  ;;  %10520 = vmatprep.subr.bf16.mxu1 %v15413_v17  ;;  %v15444_v42 = vcombine.low %v1630_v33, %v1634_v34  ;;  %v15451_v17 = vcombine.high %v1637_v28, %v1641_v54  ;;  %v15453_v18 = vcombine.high %v1638_v36, %v1642_v37  ;;  %v1673_v33 = vld [vmem:[#allocation5 + $0x2fe0] sm:$0xff]  ;;  %v1670_v34 = vld [vmem:[#allocation5 + $0x2fc8] sm:$0xff] }
 0x35d   :  { %10005 = vmatpush1.bf16.msra.mxu0 %v15410_v47  ;;  %10521 = vmatpush1.bf16.msra.mxu1 %v15412_v48  ;;  %v1650_v47 = vld [vmem:[#allocation5 + $0x2f28] sm:$0xff]  ;;  %v15450_v48 = vcombine.low %v1637_v28, %v1641_v54  ;;  %v143_v54 = vld [vmem:[#allocation5 + $0x10] sm:$0xff] }
 0x35e   :  { %10006 = vmatprep.subr.bf16.mxu0 %v15419_v49  ;;  %10522 = vmatprep.subr.bf16.mxu1 %v15421_v50  ;;  %v15452_v49 = vcombine.low %v1638_v36, %v1642_v37  ;;  %v15459_v50 = vcombine.high %v1645_v20, %v1649_v21  ;;  %v15461_v51 = vcombine.high %v1646_v44, %v1650_v47  ;;  %v147_v36 = vld [vmem:[#allocation5 + $0x30] sm:$0xff]  ;;  %v144_v37 = vld [vmem:[#allocation5 + $0x18] sm:$0xff] }
 0x361   :  { %10007 = vmatpush1.bf16.msra.mxu0 %v15418_v56  ;;  %10523 = vmatpush1.bf16.msra.mxu1 %v15420_v27  ;;  %v1658_v56 = vld [vmem:[#allocation5 + $0x2f68] sm:$0xff]  ;;  %v15458_v27 = vcombine.low %v1645_v20, %v1649_v21  ;;  %v151_v21 = vld [vmem:[#allocation5 + $0x50] sm:$0xff] }
 0x362   :  { %10008 = vmatprep.subr.bf16.mxu0 %v15427_v29  ;;  %10524 = vmatprep.subr.bf16.mxu1 %v15429_v59  ;;  %v15460_v29 = vcombine.low %v1646_v44, %v1650_v47  ;;  %v15467_v59 = vcombine.high %v1653_v1, %v1657_v3  ;;  %v15469_v60 = vcombine.high %v1654_v55, %v1658_v56  ;;  %v155_v44 = vld [vmem:[#allocation5 + $0x70] sm:$0xff] }
 0x363   :  { %v17006_v47 = vcombine.low %v16992_v16, %v16994_v19  ;;  %v13966_v16 = vcombine.low %v151_v21, %v155_v44 }
 0x365   :  { %10009 = vmatpush1.bf16.msra.mxu0 %v15426_v6  ;;  %10525 = vmatpush1.bf16.msra.mxu1 %v15428_v7  ;;  %v1666_v6 = vld [vmem:[#allocation5 + $0x2fa8] sm:$0xff]  ;;  %v15466_v7 = vcombine.low %v1653_v1, %v1657_v3  ;;  %v13967_v1 = vcombine.high %v151_v21, %v155_v44  ;;  %v195_v21 = vld [vmem:[#allocation5 + $0x1b0] sm:$0xff]  ;;  %v192_v44 = vld [vmem:[#allocation5 + $0x198] sm:$0xff] }
 0x366   :  { %10010 = vmatprep.subr.bf16.mxu0 %v15435_v8  ;;  %10526 = vmatprep.subr.bf16.mxu1 %v15437_v9  ;;  %v15468_v8 = vcombine.low %v1654_v55, %v1658_v56  ;;  %v15475_v9 = vcombine.high %v1661_v61, %v1665_v62  ;;  %v15477_v10 = vcombine.high %v1662_v0, %v1666_v6  ;;  %v159_v55 = vld [vmem:[#allocation5 + $0x90] sm:$0xff] }
 0x367   :  { %v163_v56 = vld [vmem:[#allocation5 + $0xb0] sm:$0xff] }
 0x369   :  { %10011 = vmatpush1.bf16.msra.mxu0 %v15434_v14  ;;  %10527 = vmatpush1.bf16.msra.mxu1 %v15436_v22  ;;  %v1674_v14 = vld [vmem:[#allocation5 + $0x2fe8] sm:$0xff]  ;;  %v15474_v22 = vcombine.low %v1661_v61, %v1665_v62  ;;  %v167_v61 = vld [vmem:[#allocation5 + $0xd0] sm:$0xff] }
 0x36a   :  { %10012 = vmatprep.subr.bf16.mxu0 %v15443_v24  ;;  %10528 = vmatprep.subr.bf16.mxu1 %v15445_v26  ;;  %v15476_v24 = vcombine.low %v1662_v0, %v1666_v6  ;;  %v15483_v26 = vcombine.high %v1669_v11, %v1673_v33  ;;  %v15485_v28 = vcombine.high %v1670_v34, %v1674_v14  ;;  %v171_v62 = vld [vmem:[#allocation5 + $0xf0] sm:$0xff]  ;;  %v168_v0 = vld [vmem:[#allocation5 + $0xd8] sm:$0xff] }
 0x36b   :  { %v172_v6 = vld [vmem:[#allocation5 + $0xf8] sm:$0xff] }
 0x36d   :  { %10013 = vmatpush1.bf16.msra.mxu0 %v15442_v41  ;;  %10529 = vmatpush1.bf16.msra.mxu1 %v15444_v42  ;;  %v148_v41 = vld [vmem:[#allocation5 + $0x38] sm:$0xff]  ;;  %v15482_v42 = vcombine.low %v1669_v11, %v1673_v33  ;;  %v175_v11 = vld [vmem:[#allocation5 + $0x110] sm:$0xff] }
 0x36e   :  { %10014 = vmatprep.subr.bf16.mxu0 %v15451_v17  ;;  %10530 = vmatprep.subr.bf16.mxu1 %v15453_v18  ;;  %v15484_v17 = vcombine.low %v1670_v34, %v1674_v14  ;;  %v13959_v18 = vcombine.high %v143_v54, %v147_v36  ;;  %v13961_v20 = vcombine.high %v144_v37, %v148_v41  ;;  %v179_v33 = vld [vmem:[#allocation5 + $0x130] sm:$0xff]  ;;  %v176_v34 = vld [vmem:[#allocation5 + $0x118] sm:$0xff] }
 0x36f   :  { %v180_v14 = vld [vmem:[#allocation5 + $0x138] sm:$0xff] }
 0x371   :  { %10015 = vmatpush1.bf16.msra.mxu0 %v15450_v48  ;;  %10531 = vmatpush1.bf16.msra.mxu1 %v15452_v49  ;;  %v152_v48 = vld [vmem:[#allocation5 + $0x58] sm:$0xff] }
 0x372   :  { %10016 = vmatprep.subr.bf16.mxu0 %v15459_v50  ;;  %10532 = vmatprep.subr.bf16.mxu1 %v15461_v51  ;;  %v156_v49 = vld [vmem:[#allocation5 + $0x78] sm:$0xff]  ;;  %v13958_v50 = vcombine.low %v143_v54, %v147_v36  ;;  %v13960_v51 = vcombine.low %v144_v37, %v148_v41  ;;  %v187_v54 = vld [vmem:[#allocation5 + $0x170] sm:$0xff]  ;;  %v13990_v41 = vcombine.low %v175_v11, %v179_v33 }
 0x373   :  { %v13969_v3 = vcombine.high %v152_v48, %v156_v49  ;;  %v13968_v19 = vcombine.low %v152_v48, %v156_v49  ;;  %v184_v36 = vld [vmem:[#allocation5 + $0x158] sm:$0xff] }
 0x374   :  { %v188_v37 = vld [vmem:[#allocation5 + $0x178] sm:$0xff] }
 0x375   :  { %10017 = vmatpush1.bf16.msra.mxu0 %v15458_v27  ;;  %10533 = vmatpush1.bf16.msra.mxu1 %v15460_v29  ;;  %v160_v27 = vld [vmem:[#allocation5 + $0x98] sm:$0xff] }
 0x376   :  { %10018 = vmatprep.subr.bf16.mxu0 %v15467_v59  ;;  %10534 = vmatprep.subr.bf16.mxu1 %v15469_v60  ;;  %v164_v29 = vld [vmem:[#allocation5 + $0xb8] sm:$0xff]  ;;  %v13975_v59 = vcombine.high %v159_v55, %v163_v56 }
 0x377   :  { %v13977_v60 = vcombine.high %v160_v27, %v164_v29  ;;  %v196_v48 = vld [vmem:[#allocation5 + $0x1b8] sm:$0xff] }
 0x379   :  { %10019 = vmatpush1.bf16.msra.mxu0 %v15466_v7  ;;  %10535 = vmatpush1.bf16.msra.mxu1 %v15468_v8  ;;  %v13974_v7 = vcombine.low %v159_v55, %v163_v56  ;;  %v13976_v8 = vcombine.low %v160_v27, %v164_v29  ;;  %v203_v55 = vld [vmem:[#allocation5 + $0x1f0] sm:$0xff]  ;;  %v200_v56 = vld [vmem:[#allocation5 + $0x1d8] sm:$0xff] }
 0x37a   :  { %10020 = vmatprep.subr.bf16.mxu0 %v15475_v9  ;;  %10536 = vmatprep.subr.bf16.mxu1 %v15477_v10  ;;  %v13983_v9 = vcombine.high %v167_v61, %v171_v62  ;;  %v13985_v10 = vcombine.high %v168_v0, %v172_v6  ;;  %v204_v27 = vld [vmem:[#allocation5 + $0x1f8] sm:$0xff] }
 0x37d   :  { %10021 = vmatpush1.bf16.msra.mxu0 %v15474_v22  ;;  %10537 = vmatpush1.bf16.msra.mxu1 %v15476_v24  ;;  %v13982_v22 = vcombine.low %v167_v61, %v171_v62  ;;  %v13984_v24 = vcombine.low %v168_v0, %v172_v6  ;;  %v211_v61 = vld [vmem:[#allocation5 + $0x230] sm:$0xff]  ;;  %v208_v62 = vld [vmem:[#allocation5 + $0x218] sm:$0xff] }
 0x37e   :  { %10022 = vmatprep.subr.bf16.mxu0 %v15483_v26  ;;  %10538 = vmatprep.subr.bf16.mxu1 %v15485_v28  ;;  %v13991_v26 = vcombine.high %v175_v11, %v179_v33  ;;  %v183_v28 = vld [vmem:[#allocation5 + $0x150] sm:$0xff]  ;;  %v212_v0 = vld [vmem:[#allocation5 + $0x238] sm:$0xff] }
 0x37f   :  { %v13998_v49 = vcombine.low %v183_v28, %v187_v54  ;;  %v219_v11 = vld [vmem:[#allocation5 + $0x270] sm:$0xff]  ;;  %v216_v33 = vld [vmem:[#allocation5 + $0x258] sm:$0xff] }
 0x381   :  { %10023 = vmatpush1.bf16.msra.mxu0 %v15482_v42  ;;  %10539 = vmatpush1.bf16.msra.mxu1 %v15484_v17  ;;  %v13992_v42 = vcombine.low %v176_v34, %v180_v14  ;;  %v13999_v17 = vcombine.high %v183_v28, %v187_v54  ;;  %v227_v28 = vld [vmem:[#allocation5 + $0x2b0] sm:$0xff]  ;;  %v224_v54 = vld [vmem:[#allocation5 + $0x298] sm:$0xff] }
 0x382   :  { %10551 = vmatprep.subr.bf16.mxu0 %v13959_v18  ;;  %11067 = vmatprep.subr.bf16.mxu1 %v13961_v20  ;;  %v14001_v18 = vcombine.high %v184_v36, %v188_v37  ;;  %v191_v20 = vld [vmem:[#allocation5 + $0x190] sm:$0xff] }
 0x383   :  { %v14006_v29 = vcombine.low %v191_v20, %v195_v21 }
 0x384   :  { %10025 = vmatmul.mubr.bf16.vlgmr.msra.gmra.mrb[0].mxu0 %v17006_v47  ;;  %10541 = vmatmul.mubr.bf16.vlgmr.msra.gmra.mrb[0].mxu1 %v17006_v47 }
 0x385   :  { %10552 = vmatpush1.bf16.msra.mxu0 %v13958_v50  ;;  %11068 = vmatpush1.bf16.msra.mxu1 %v13960_v51  ;;  %v14000_v50 = vcombine.low %v184_v36, %v188_v37  ;;  %v14007_v51 = vcombine.high %v191_v20, %v195_v21  ;;  %v228_v36 = vld [vmem:[#allocation5 + $0x2b8] sm:$0xff]  ;;  %v235_v20 = vld [vmem:[#allocation5 + $0x2f0] sm:$0xff] }
 0x386   :  { %10553 = vmatprep.subr.bf16.mxu0 %v13967_v1  ;;  %11069 = vmatprep.subr.bf16.mxu1 %v13969_v3  ;;  %v14009_v1 = vcombine.high %v192_v44, %v196_v48  ;;  %v199_v3 = vld [vmem:[#allocation5 + $0x1d0] sm:$0xff]  ;;  %v232_v21 = vld [vmem:[#allocation5 + $0x2d8] sm:$0xff] }
 0x387   :  { %10583 = vmatprep.mubr.bf16.mxu0 %v16824_v58  ;;  %11099 = vmatprep.mubr.bf16.mxu1 %v16824_v58  ;;  %v13993_v58 = vcombine.high %v176_v34, %v180_v14  ;;  %v14014_v6 = vcombine.low %v199_v3, %v203_v55  ;;  %v220_v34 = vld [vmem:[#allocation5 + $0x278] sm:$0xff] }
 0x389   :  { %10554 = vmatpush1.bf16.msra.mxu0 %v13966_v16  ;;  %11070 = vmatpush1.bf16.msra.mxu1 %v13968_v19  ;;  %v14008_v16 = vcombine.low %v192_v44, %v196_v48  ;;  %v14015_v19 = vcombine.high %v199_v3, %v203_v55  ;;  %v236_v44 = vld [vmem:[#allocation5 + $0x2f8] sm:$0xff]  ;;  %v243_v3 = vld [vmem:[#allocation5 + $0x330] sm:$0xff] }
 0x38a   :  { %10555 = vmatprep.subr.bf16.mxu0 %v13975_v59  ;;  %11071 = vmatprep.subr.bf16.mxu1 %v13977_v60  ;;  %v14017_v59 = vcombine.high %v200_v56, %v204_v27  ;;  %v207_v60 = vld [vmem:[#allocation5 + $0x210] sm:$0xff]  ;;  %v240_v55 = vld [vmem:[#allocation5 + $0x318] sm:$0xff] }
 0x38b   :  { %v14022_v14 = vcombine.low %v207_v60, %v211_v61 }
 0x38d   :  { %10556 = vmatpush1.bf16.msra.mxu0 %v13974_v7  ;;  %11072 = vmatpush1.bf16.msra.mxu1 %v13976_v8  ;;  %v14016_v7 = vcombine.low %v200_v56, %v204_v27  ;;  %v14023_v8 = vcombine.high %v207_v60, %v211_v61  ;;  %v244_v56 = vld [vmem:[#allocation5 + $0x338] sm:$0xff]  ;;  %v251_v60 = vld [vmem:[#allocation5 + $0x370] sm:$0xff] }
 0x38e   :  { %10557 = vmatprep.subr.bf16.mxu0 %v13983_v9  ;;  %11073 = vmatprep.subr.bf16.mxu1 %v13985_v10  ;;  %v14025_v9 = vcombine.high %v208_v62, %v212_v0  ;;  %v215_v10 = vld [vmem:[#allocation5 + $0x250] sm:$0xff]  ;;  %v248_v61 = vld [vmem:[#allocation5 + $0x358] sm:$0xff] }
 0x38f   :  { %v14030_v37 = vcombine.low %v215_v10, %v219_v11 }
 0x391   :  { %10558 = vmatpush1.bf16.msra.mxu0 %v13982_v22  ;;  %11074 = vmatpush1.bf16.msra.mxu1 %v13984_v24  ;;  %v14024_v22 = vcombine.low %v208_v62, %v212_v0  ;;  %v14031_v24 = vcombine.high %v215_v10, %v219_v11  ;;  %v252_v62 = vld [vmem:[#allocation5 + $0x378] sm:$0xff]  ;;  %v259_v10 = vld [vmem:[#allocation5 + $0x3b0] sm:$0xff] }
 0x392   :  { %10559 = vmatprep.subr.bf16.mxu0 %v13991_v26  ;;  %11075 = vmatprep.subr.bf16.mxu1 %v13993_v58  ;;  %v14033_v26 = vcombine.high %v216_v33, %v220_v34  ;;  %v223_v58 = vld [vmem:[#allocation5 + $0x290] sm:$0xff]  ;;  %v256_v11 = vld [vmem:[#allocation5 + $0x398] sm:$0xff] }
 0x393   :  { %v14038_v48 = vcombine.low %v223_v58, %v227_v28 }
 0x395   :  { %10560 = vmatpush1.bf16.msra.mxu0 %v13990_v41  ;;  %11076 = vmatpush1.bf16.msra.mxu1 %v13992_v42  ;;  %v14032_v41 = vcombine.low %v216_v33, %v220_v34  ;;  %v14039_v42 = vcombine.high %v223_v58, %v227_v28  ;;  %v260_v33 = vld [vmem:[#allocation5 + $0x3b8] sm:$0xff]  ;;  %v267_v58 = vld [vmem:[#allocation5 + $0x3f0] sm:$0xff] }
 0x396   :  { %10561 = vmatprep.subr.bf16.mxu0 %v13999_v17  ;;  %11077 = vmatprep.subr.bf16.mxu1 %v14001_v18  ;;  %v14041_v17 = vcombine.high %v224_v54, %v228_v36  ;;  %v231_v18 = vld [vmem:[#allocation5 + $0x2d0] sm:$0xff]  ;;  %v264_v28 = vld [vmem:[#allocation5 + $0x3d8] sm:$0xff] }
 0x397   :  { %v14046_v27 = vcombine.low %v231_v18, %v235_v20 }
 0x399   :  { %10562 = vmatpush1.bf16.msra.mxu0 %v13998_v49  ;;  %11078 = vmatpush1.bf16.msra.mxu1 %v14000_v50  ;;  %v14040_v49 = vcombine.low %v224_v54, %v228_v36  ;;  %v14047_v50 = vcombine.high %v231_v18, %v235_v20  ;;  %v268_v54 = vld [vmem:[#allocation5 + $0x3f8] sm:$0xff]  ;;  %v275_v18 = vld [vmem:[#allocation5 + $0x430] sm:$0xff] }
 0x39a   :  { %10563 = vmatprep.subr.bf16.mxu0 %v14007_v51  ;;  %11079 = vmatprep.subr.bf16.mxu1 %v14009_v1  ;;  %v14049_v51 = vcombine.high %v232_v21, %v236_v44  ;;  %v239_v1 = vld [vmem:[#allocation5 + $0x310] sm:$0xff]  ;;  %v272_v20 = vld [vmem:[#allocation5 + $0x418] sm:$0xff] }
 0x39b   :  { %v14054_v0 = vcombine.low %v239_v1, %v243_v3 }
 0x39d   :  { %10564 = vmatpush1.bf16.msra.mxu0 %v14006_v29  ;;  %11080 = vmatpush1.bf16.msra.mxu1 %v14008_v16  ;;  %v14048_v29 = vcombine.low %v232_v21, %v236_v44  ;;  %v14055_v16 = vcombine.high %v239_v1, %v243_v3  ;;  %v276_v21 = vld [vmem:[#allocation5 + $0x438] sm:$0xff]  ;;  %v283_v1 = vld [vmem:[#allocation5 + $0x470] sm:$0xff] }
 0x39e   :  { %10565 = vmatprep.subr.bf16.mxu0 %v14015_v19  ;;  %11081 = vmatprep.subr.bf16.mxu1 %v14017_v59  ;;  %v14057_v19 = vcombine.high %v240_v55, %v244_v56  ;;  %v247_v59 = vld [vmem:[#allocation5 + $0x350] sm:$0xff]  ;;  %v280_v3 = vld [vmem:[#allocation5 + $0x458] sm:$0xff] }
 0x39f   :  { %v14062_v34 = vcombine.low %v247_v59, %v251_v60 }
 0x3a1   :  { %10566 = vmatpush1.bf16.msra.mxu0 %v14014_v6  ;;  %11082 = vmatpush1.bf16.msra.mxu1 %v14016_v7  ;;  %v14056_v6 = vcombine.low %v240_v55, %v244_v56  ;;  %v14063_v7 = vcombine.high %v247_v59, %v251_v60  ;;  %v284_v55 = vld [vmem:[#allocation5 + $0x478] sm:$0xff]  ;;  %v291_v59 = vld [vmem:[#allocation5 + $0x4b0] sm:$0xff] }
 0x3a2   :  { %10567 = vmatprep.subr.bf16.mxu0 %v14023_v8  ;;  %11083 = vmatprep.subr.bf16.mxu1 %v14025_v9  ;;  %v14065_v8 = vcombine.high %v248_v61, %v252_v62  ;;  %v255_v9 = vld [vmem:[#allocation5 + $0x390] sm:$0xff]  ;;  %v288_v60 = vld [vmem:[#allocation5 + $0x498] sm:$0xff] }
 0x3a3   :  { %v14070_v36 = vcombine.low %v255_v9, %v259_v10 }
 0x3a5   :  { %10568 = vmatpush1.bf16.msra.mxu0 %v14022_v14  ;;  %11084 = vmatpush1.bf16.msra.mxu1 %v14024_v22  ;;  %v14064_v14 = vcombine.low %v248_v61, %v252_v62  ;;  %v14071_v22 = vcombine.high %v255_v9, %v259_v10  ;;  %v292_v61 = vld [vmem:[#allocation5 + $0x4b8] sm:$0xff]  ;;  %v299_v9 = vld [vmem:[#allocation5 + $0x4f0] sm:$0xff] }
 0x3a6   :  { %10569 = vmatprep.subr.bf16.mxu0 %v14031_v24  ;;  %11085 = vmatprep.subr.bf16.mxu1 %v14033_v26  ;;  %v14073_v24 = vcombine.high %v256_v11, %v260_v33  ;;  %v263_v26 = vld [vmem:[#allocation5 + $0x3d0] sm:$0xff]  ;;  %v296_v10 = vld [vmem:[#allocation5 + $0x4d8] sm:$0xff] }
 0x3a7   :  { %v14078_v44 = vcombine.low %v263_v26, %v267_v58 }
 0x3a9   :  { %10570 = vmatpush1.bf16.msra.mxu0 %v14030_v37  ;;  %11086 = vmatpush1.bf16.msra.mxu1 %v14032_v41  ;;  %v14072_v37 = vcombine.low %v256_v11, %v260_v33  ;;  %v14079_v41 = vcombine.high %v263_v26, %v267_v58  ;;  %v300_v11 = vld [vmem:[#allocation5 + $0x4f8] sm:$0xff] }
 0x3aa   :  { %10571 = vmatprep.subr.bf16.mxu0 %v14039_v42  ;;  %11087 = vmatprep.subr.bf16.mxu1 %v14041_v17  ;;  %v14081_v42 = vcombine.high %v264_v28, %v268_v54  ;;  %v271_v17 = vld [vmem:[#allocation5 + $0x410] sm:$0xff]  ;;  %v304_v26 = vld [vmem:[#allocation5 + $0x518] sm:$0xff] }
 0x3ab   :  { %v14086_v56 = vcombine.low %v271_v17, %v275_v18  ;;  %v308_v58 = vld [vmem:[#allocation5 + $0x538] sm:$0xff] }
 0x3ad   :  { %10572 = vmatpush1.bf16.msra.mxu0 %v14038_v48  ;;  %11088 = vmatpush1.bf16.msra.mxu1 %v14040_v49  ;;  %v14080_v48 = vcombine.low %v264_v28, %v268_v54  ;;  %v14087_v49 = vcombine.high %v271_v17, %v275_v18  ;;  %v14112_v54 = vcombine.low %v296_v10, %v300_v11  ;;  %v316_v17 = vld [vmem:[#allocation5 + $0x578] sm:$0xff] }
 0x3ae   :  { %10573 = vmatprep.subr.bf16.mxu0 %v14047_v50  ;;  %11089 = vmatprep.subr.bf16.mxu1 %v14049_v51  ;;  %v14089_v50 = vcombine.high %v272_v20, %v276_v21  ;;  %v279_v51 = vld [vmem:[#allocation5 + $0x450] sm:$0xff] }
 0x3af   :  { %v14094_v62 = vcombine.low %v279_v51, %v283_v1 }
 0x3b1   :  { %10574 = vmatpush1.bf16.msra.mxu0 %v14046_v27  ;;  %11090 = vmatpush1.bf16.msra.mxu1 %v14048_v29  ;;  %v14088_v27 = vcombine.low %v272_v20, %v276_v21  ;;  %v14095_v29 = vcombine.high %v279_v51, %v283_v1  ;;  %v14120_v20 = vcombine.low %v304_v26, %v308_v58  ;;  %v324_v51 = vld [vmem:[#allocation5 + $0x5b8] sm:$0xff] }
 0x3b2   :  { %10575 = vmatprep.subr.bf16.mxu0 %v14055_v16  ;;  %11091 = vmatprep.subr.bf16.mxu1 %v14057_v19  ;;  %v14097_v16 = vcombine.high %v280_v3, %v284_v55  ;;  %v287_v19 = vld [vmem:[#allocation5 + $0x490] sm:$0xff] }
 0x3b3   :  { %v14102_v33 = vcombine.low %v287_v19, %v291_v59 }
 0x3b5   :  { %10576 = vmatpush1.bf16.msra.mxu0 %v14054_v0  ;;  %11092 = vmatpush1.bf16.msra.mxu1 %v14056_v6  ;;  %v14096_v0 = vcombine.low %v280_v3, %v284_v55  ;;  %v14103_v6 = vcombine.high %v287_v19, %v291_v59  ;;  %v332_v19 = vld [vmem:[#allocation5 + $0x5f8] sm:$0xff] }
 0x3b6   :  { %10577 = vmatprep.subr.bf16.mxu0 %v14063_v7  ;;  %11093 = vmatprep.subr.bf16.mxu1 %v14065_v8  ;;  %v14105_v7 = vcombine.high %v288_v60, %v292_v61  ;;  %v295_v8 = vld [vmem:[#allocation5 + $0x4d0] sm:$0xff] }
 0x3b7   :  { %v14110_v28 = vcombine.low %v295_v8, %v299_v9 }
 0x3b9   :  { %10578 = vmatpush1.bf16.msra.mxu0 %v14062_v34  ;;  %11094 = vmatpush1.bf16.msra.mxu1 %v14064_v14  ;;  %v14111_v34 = vcombine.high %v295_v8, %v299_v9  ;;  %v14113_v14 = vcombine.high %v296_v10, %v300_v11  ;;  %v340_v8 = vld [vmem:[#allocation5 + $0x638] sm:$0xff] }
 0x3ba   :  { %10579 = vmatprep.subr.bf16.mxu0 %v14071_v22  ;;  %11095 = vmatprep.subr.bf16.mxu1 %v14073_v24  ;;  %v303_v22 = vld [vmem:[#allocation5 + $0x510] sm:$0xff] }
 0x3bb   :  { %v307_v24 = vld [vmem:[#allocation5 + $0x530] sm:$0xff] }
 0x3bc   :  { %v14118_v18 = vcombine.low %v303_v22, %v307_v24 }
 0x3bd   :  { %10580 = vmatpush1.bf16.msra.mxu0 %v14070_v36  ;;  %11096 = vmatpush1.bf16.msra.mxu1 %v14072_v37  ;;  %v14119_v36 = vcombine.high %v303_v22, %v307_v24  ;;  %v311_v37 = vld [vmem:[#allocation5 + $0x550] sm:$0xff]  ;;  %v348_v22 = vld [vmem:[#allocation5 + $0x678] sm:$0xff] }
 0x3be   :  { %10581 = vmatprep.subr.bf16.mxu0 %v14079_v41  ;;  %11097 = vmatprep.subr.bf16.mxu1 %v14081_v42  ;;  %v315_v41 = vld [vmem:[#allocation5 + $0x570] sm:$0xff]  ;;  %v312_v42 = vld [vmem:[#allocation5 + $0x558] sm:$0xff] }
 0x3bf   :  { %v14127_v21 = vcombine.high %v311_v37, %v315_v41  ;;  %v14126_v1 = vcombine.low %v311_v37, %v315_v41  ;;  %v14128_v3 = vcombine.low %v312_v42, %v316_v17  ;;  %v356_v37 = vld [vmem:[#allocation5 + $0x6b8] sm:$0xff] }
 0x3c1   :  { %10582 = vmatpush1.bf16.msra.mxu0 %v14078_v44  ;;  %11098 = vmatpush1.bf16.msra.mxu1 %v14080_v48  ;;  %v14129_v44 = vcombine.high %v312_v42, %v316_v17  ;;  %v319_v48 = vld [vmem:[#allocation5 + $0x590] sm:$0xff] }
 0x3c2   :  { %10594 = vmatprep.subr.bf16.mxu0 %v14087_v49  ;;  %11110 = vmatprep.subr.bf16.mxu1 %v14089_v50  ;;  %v323_v49 = vld [vmem:[#allocation5 + $0x5b0] sm:$0xff]  ;;  %v320_v50 = vld [vmem:[#allocation5 + $0x598] sm:$0xff] }
 0x3c3   :  { %v14135_v55 = vcombine.high %v319_v48, %v323_v49  ;;  %v14134_v59 = vcombine.low %v319_v48, %v323_v49  ;;  %v364_v48 = vld [vmem:[#allocation5 + $0x6f8] sm:$0xff] }
 0x3c4   :  { %10584 = vmatmul.mubr.bf16.vlgmr.msra.gmra.mrb[4].mxu0 %v16830_v15  ;;  %11100 = vmatmul.mubr.bf16.vlgmr.msra.gmra.mrb[4].mxu1 %v16830_v15  ;;  %v14104_v15 = vcombine.low %v288_v60, %v292_v61  ;;  %v14136_v60 = vcombine.low %v320_v50, %v324_v51 }
 0x3c5   :  { %10595 = vmatpush1.bf16.msra.mxu0 %v14086_v56  ;;  %11111 = vmatpush1.bf16.msra.mxu1 %v14088_v27  ;;  %v14137_v56 = vcombine.high %v320_v50, %v324_v51  ;;  %v327_v27 = vld [vmem:[#allocation5 + $0x5d0] sm:$0xff] }
 0x3c6   :  { %10596 = vmatprep.subr.bf16.mxu0 %v14095_v29  ;;  %11112 = vmatprep.subr.bf16.mxu1 %v14097_v16  ;;  %v331_v29 = vld [vmem:[#allocation5 + $0x5f0] sm:$0xff]  ;;  %v328_v16 = vld [vmem:[#allocation5 + $0x5d8] sm:$0xff] }
 0x3c7   :  { %10626 = vmatprep.mubr.bf16.mxu0 %v16838_v53  ;;  %11142 = vmatprep.mubr.bf16.mxu1 %v16838_v53  ;;  %v14121_v53 = vcombine.high %v304_v26, %v308_v58  ;;  %v14143_v61 = vcombine.high %v327_v27, %v331_v29  ;;  %v14142_v9 = vcombine.low %v327_v27, %v331_v29  ;;  %v372_v27 = vld [vmem:[#allocation5 + $0x738] sm:$0xff] }
 0x3c8   :  { %v14144_v10 = vcombine.low %v328_v16, %v332_v19 }
 0x3c9   :  { %10597 = vmatpush1.bf16.msra.mxu0 %v14094_v62  ;;  %11113 = vmatpush1.bf16.msra.mxu1 %v14096_v0  ;;  %v14145_v62 = vcombine.high %v328_v16, %v332_v19  ;;  %v335_v0 = vld [vmem:[#allocation5 + $0x610] sm:$0xff] }
 0x3ca   :  { %10598 = vmatprep.subr.bf16.mxu0 %v14103_v6  ;;  %11114 = vmatprep.subr.bf16.mxu1 %v14105_v7  ;;  %v339_v6 = vld [vmem:[#allocation5 + $0x630] sm:$0xff]  ;;  %v336_v7 = vld [vmem:[#allocation5 + $0x618] sm:$0xff] }
 0x3cb   :  { %v14151_v11 = vcombine.high %v335_v0, %v339_v6  ;;  %v14150_v24 = vcombine.low %v335_v0, %v339_v6  ;;  %v14152_v26 = vcombine.low %v336_v7, %v340_v8  ;;  %v380_v0 = vld [vmem:[#allocation5 + $0x778] sm:$0xff] }
 0x3cd   :  { %10599 = vmatpush1.bf16.msra.mxu0 %v14102_v33  ;;  %11115 = vmatpush1.bf16.msra.mxu1 %v14104_v15  ;;  %v14153_v33 = vcombine.high %v336_v7, %v340_v8  ;;  %v343_v15 = vld [vmem:[#allocation5 + $0x650] sm:$0xff] }
 0x3ce   :  { %10600 = vmatprep.subr.bf16.mxu0 %v14111_v34  ;;  %11116 = vmatprep.subr.bf16.mxu1 %v14113_v14  ;;  %v347_v34 = vld [vmem:[#allocation5 + $0x670] sm:$0xff]  ;;  %v344_v14 = vld [vmem:[#allocation5 + $0x658] sm:$0xff] }
 0x3cf   :  { %v14159_v58 = vcombine.high %v343_v15, %v347_v34  ;;  %v14158_v41 = vcombine.low %v343_v15, %v347_v34  ;;  %v14160_v42 = vcombine.low %v344_v14, %v348_v22  ;;  %v388_v15 = vld [vmem:[#allocation5 + $0x7b8] sm:$0xff] }
 0x3d1   :  { %10601 = vmatpush1.bf16.msra.mxu0 %v14110_v28  ;;  %11117 = vmatpush1.bf16.msra.mxu1 %v14112_v54  ;;  %v14161_v28 = vcombine.high %v344_v14, %v348_v22  ;;  %v351_v54 = vld [vmem:[#allocation5 + $0x690] sm:$0xff] }
 0x3d2   :  { %10602 = vmatprep.subr.bf16.mxu0 %v14119_v36  ;;  %11118 = vmatprep.subr.bf16.mxu1 %v14121_v53  ;;  %v355_v36 = vld [vmem:[#allocation5 + $0x6b0] sm:$0xff]  ;;  %v352_v53 = vld [vmem:[#allocation5 + $0x698] sm:$0xff] }
 0x3d3   :  { %v14167_v17 = vcombine.high %v351_v54, %v355_v36  ;;  %v14166_v49 = vcombine.low %v351_v54, %v355_v36  ;;  %v14168_v50 = vcombine.low %v352_v53, %v356_v37  ;;  %v396_v54 = vld [vmem:[#allocation5 + $0x7f8] sm:$0xff] }
 0x3d5   :  { %10603 = vmatpush1.bf16.msra.mxu0 %v14118_v18  ;;  %11119 = vmatpush1.bf16.msra.mxu1 %v14120_v20  ;;  %v14169_v18 = vcombine.high %v352_v53, %v356_v37  ;;  %v359_v20 = vld [vmem:[#allocation5 + $0x6d0] sm:$0xff] }
 0x3d6   :  { %10604 = vmatprep.subr.bf16.mxu0 %v14127_v21  ;;  %11120 = vmatprep.subr.bf16.mxu1 %v14129_v44  ;;  %v363_v21 = vld [vmem:[#allocation5 + $0x6f0] sm:$0xff]  ;;  %v360_v44 = vld [vmem:[#allocation5 + $0x6d8] sm:$0xff] }
 0x3d7   :  { %v14175_v51 = vcombine.high %v359_v20, %v363_v21  ;;  %v14174_v29 = vcombine.low %v359_v20, %v363_v21  ;;  %v14176_v16 = vcombine.low %v360_v44, %v364_v48  ;;  %v404_v20 = vld [vmem:[#allocation5 + $0x838] sm:$0xff] }
 0x3d9   :  { %10605 = vmatpush1.bf16.msra.mxu0 %v14126_v1  ;;  %11121 = vmatpush1.bf16.msra.mxu1 %v14128_v3  ;;  %v14177_v1 = vcombine.high %v360_v44, %v364_v48  ;;  %v367_v3 = vld [vmem:[#allocation5 + $0x710] sm:$0xff] }
 0x3da   :  { %10606 = vmatprep.subr.bf16.mxu0 %v14135_v55  ;;  %11122 = vmatprep.subr.bf16.mxu1 %v14137_v56  ;;  %v371_v55 = vld [vmem:[#allocation5 + $0x730] sm:$0xff]  ;;  %v368_v56 = vld [vmem:[#allocation5 + $0x718] sm:$0xff] }
 0x3db   :  { %v14183_v19 = vcombine.high %v367_v3, %v371_v55  ;;  %v14182_v6 = vcombine.low %v367_v3, %v371_v55  ;;  %v14184_v7 = vcombine.low %v368_v56, %v372_v27  ;;  %v412_v3 = vld [vmem:[#allocation5 + $0x878] sm:$0xff] }
 0x3dd   :  { %10607 = vmatpush1.bf16.msra.mxu0 %v14134_v59  ;;  %11123 = vmatpush1.bf16.msra.mxu1 %v14136_v60  ;;  %v14185_v59 = vcombine.high %v368_v56, %v372_v27  ;;  %v375_v60 = vld [vmem:[#allocation5 + $0x750] sm:$0xff] }
 0x3de   :  { %10608 = vmatprep.subr.bf16.mxu0 %v14143_v61  ;;  %11124 = vmatprep.subr.bf16.mxu1 %v14145_v62  ;;  %v379_v61 = vld [vmem:[#allocation5 + $0x770] sm:$0xff]  ;;  %v376_v62 = vld [vmem:[#allocation5 + $0x758] sm:$0xff] }
 0x3df   :  { %v14191_v8 = vcombine.high %v375_v60, %v379_v61  ;;  %v14190_v34 = vcombine.low %v375_v60, %v379_v61  ;;  %v14192_v14 = vcombine.low %v376_v62, %v380_v0  ;;  %v420_v60 = vld [vmem:[#allocation5 + $0x8b8] sm:$0xff] }
 0x3e1   :  { %10609 = vmatpush1.bf16.msra.mxu0 %v14142_v9  ;;  %11125 = vmatpush1.bf16.msra.mxu1 %v14144_v10  ;;  %v14193_v9 = vcombine.high %v376_v62, %v380_v0  ;;  %v383_v10 = vld [vmem:[#allocation5 + $0x790] sm:$0xff] }
 0x3e2   :  { %10610 = vmatprep.subr.bf16.mxu0 %v14151_v11  ;;  %11126 = vmatprep.subr.bf16.mxu1 %v14153_v33  ;;  %v387_v11 = vld [vmem:[#allocation5 + $0x7b0] sm:$0xff]  ;;  %v384_v33 = vld [vmem:[#allocation5 + $0x798] sm:$0xff] }
 0x3e3   :  { %v14199_v22 = vcombine.high %v383_v10, %v387_v11  ;;  %v14198_v36 = vcombine.low %v383_v10, %v387_v11  ;;  %v14200_v53 = vcombine.low %v384_v33, %v388_v15  ;;  %v428_v10 = vld [vmem:[#allocation5 + $0x8f8] sm:$0xff] }
 0x3e5   :  { %10611 = vmatpush1.bf16.msra.mxu0 %v14150_v24  ;;  %11127 = vmatpush1.bf16.msra.mxu1 %v14152_v26  ;;  %v14201_v24 = vcombine.high %v384_v33, %v388_v15  ;;  %v391_v26 = vld [vmem:[#allocation5 + $0x7d0] sm:$0xff] }
 0x3e6   :  { %10612 = vmatprep.subr.bf16.mxu0 %v14159_v58  ;;  %11128 = vmatprep.subr.bf16.mxu1 %v14161_v28  ;;  %v395_v58 = vld [vmem:[#allocation5 + $0x7f0] sm:$0xff]  ;;  %v392_v28 = vld [vmem:[#allocation5 + $0x7d8] sm:$0xff] }
 0x3e7   :  { %v14207_v37 = vcombine.high %v391_v26, %v395_v58  ;;  %v14206_v21 = vcombine.low %v391_v26, %v395_v58  ;;  %v14208_v44 = vcombine.low %v392_v28, %v396_v54 }
 0x3e9   :  { %10613 = vmatpush1.bf16.msra.mxu0 %v14158_v41  ;;  %11129 = vmatpush1.bf16.msra.mxu1 %v14160_v42  ;;  %v14209_v41 = vcombine.high %v392_v28, %v396_v54  ;;  %v399_v42 = vld [vmem:[#allocation5 + $0x810] sm:$0xff] }
 0x3ea   :  { %10614 = vmatprep.subr.bf16.mxu0 %v14167_v17  ;;  %11130 = vmatprep.subr.bf16.mxu1 %v14169_v18  ;;  %v403_v17 = vld [vmem:[#allocation5 + $0x830] sm:$0xff]  ;;  %v400_v18 = vld [vmem:[#allocation5 + $0x818] sm:$0xff] }
 0x3eb   :  { %v14215_v48 = vcombine.high %v399_v42, %v403_v17  ;;  %v14214_v55 = vcombine.low %v399_v42, %v403_v17  ;;  %v14216_v56 = vcombine.low %v400_v18, %v404_v20  ;;  %v439_v54 = vld [vmem:[#allocation5 + $0x950] sm:$0xff] }
 0x3ed   :  { %10615 = vmatpush1.bf16.msra.mxu0 %v14166_v49  ;;  %11131 = vmatpush1.bf16.msra.mxu1 %v14168_v50  ;;  %v14217_v49 = vcombine.high %v400_v18, %v404_v20  ;;  %v407_v50 = vld [vmem:[#allocation5 + $0x850] sm:$0xff] }
 0x3ee   :  { %10616 = vmatprep.subr.bf16.mxu0 %v14175_v51  ;;  %11132 = vmatprep.subr.bf16.mxu1 %v14177_v1  ;;  %v411_v51 = vld [vmem:[#allocation5 + $0x870] sm:$0xff]  ;;  %v408_v1 = vld [vmem:[#allocation5 + $0x858] sm:$0xff] }
 0x3ef   :  { %v14223_v27 = vcombine.high %v407_v50, %v411_v51  ;;  %v14222_v61 = vcombine.low %v407_v50, %v411_v51  ;;  %v14224_v62 = vcombine.low %v408_v1, %v412_v3  ;;  %v447_v20 = vld [vmem:[#allocation5 + $0x990] sm:$0xff] }
 0x3f1   :  { %10617 = vmatpush1.bf16.msra.mxu0 %v14174_v29  ;;  %11133 = vmatpush1.bf16.msra.mxu1 %v14176_v16  ;;  %v14225_v29 = vcombine.high %v408_v1, %v412_v3  ;;  %v415_v16 = vld [vmem:[#allocation5 + $0x890] sm:$0xff] }
 0x3f2   :  { %10618 = vmatprep.subr.bf16.mxu0 %v14183_v19  ;;  %11134 = vmatprep.subr.bf16.mxu1 %v14185_v59  ;;  %v419_v19 = vld [vmem:[#allocation5 + $0x8b0] sm:$0xff]  ;;  %v416_v59 = vld [vmem:[#allocation5 + $0x898] sm:$0xff] }
 0x3f3   :  { %v14231_v0 = vcombine.high %v415_v16, %v419_v19  ;;  %v14230_v11 = vcombine.low %v415_v16, %v419_v19  ;;  %v455_v3 = vld [vmem:[#allocation5 + $0x9d0] sm:$0xff] }
 0x3f5   :  { %10619 = vmatpush1.bf16.msra.mxu0 %v14182_v6  ;;  %11135 = vmatpush1.bf16.msra.mxu1 %v14184_v7  ;;  %v14233_v6 = vcombine.high %v416_v59, %v420_v60  ;;  %v423_v7 = vld [vmem:[#allocation5 + $0x8d0] sm:$0xff] }
 0x3f6   :  { %10620 = vmatprep.subr.bf16.mxu0 %v14191_v8  ;;  %11136 = vmatprep.subr.bf16.mxu1 %v14193_v9  ;;  %v427_v8 = vld [vmem:[#allocation5 + $0x8f0] sm:$0xff]  ;;  %v424_v9 = vld [vmem:[#allocation5 + $0x8d8] sm:$0xff] }
 0x3f7   :  { %v14239_v33 = vcombine.high %v423_v7, %v427_v8  ;;  %v14241_v15 = vcombine.high %v424_v9, %v428_v10  ;;  %v14238_v26 = vcombine.low %v423_v7, %v427_v8  ;;  %v14240_v58 = vcombine.low %v424_v9, %v428_v10  ;;  %v471_v10 = vld [vmem:[#allocation5 + $0xa50] sm:$0xff] }
 0x3f9   :  { %10621 = vmatpush1.bf16.msra.mxu0 %v14190_v34  ;;  %11137 = vmatpush1.bf16.msra.mxu1 %v14192_v14  ;;  %v431_v34 = vld [vmem:[#allocation5 + $0x910] sm:$0xff] }
 0x3fa   :  { %10622 = vmatprep.subr.bf16.mxu0 %v14199_v22  ;;  %11138 = vmatprep.subr.bf16.mxu1 %v14201_v24  ;;  %v435_v14 = vld [vmem:[#allocation5 + $0x930] sm:$0xff]  ;;  %v432_v22 = vld [vmem:[#allocation5 + $0x918] sm:$0xff] }
 0x3fb   :  { %v436_v24 = vld [vmem:[#allocation5 + $0x938] sm:$0xff]  ;;  %v14247_v28 = vcombine.high %v431_v34, %v435_v14 }
 0x3fc   :  { %v14248_v42 = vcombine.low %v432_v22, %v436_v24 }
 0x3fd   :  { %10623 = vmatpush1.bf16.msra.mxu0 %v14198_v36  ;;  %11139 = vmatpush1.bf16.msra.mxu1 %v14200_v53  ;;  %v443_v36 = vld [vmem:[#allocation5 + $0x970] sm:$0xff]  ;;  %v440_v53 = vld [vmem:[#allocation5 + $0x958] sm:$0xff] }
 0x3fe   :  { %10624 = vmatprep.subr.bf16.mxu0 %v14207_v37  ;;  %11140 = vmatprep.subr.bf16.mxu1 %v14209_v41  ;;  %v444_v37 = vld [vmem:[#allocation5 + $0x978] sm:$0xff]  ;;  %v14246_v41 = vcombine.low %v431_v34, %v435_v14  ;;  %v14255_v17 = vcombine.high %v439_v54, %v443_v36 }
 0x3ff   :  { %v14257_v18 = vcombine.high %v440_v53, %v444_v37  ;;  %v14256_v50 = vcombine.low %v440_v53, %v444_v37  ;;  %v487_v37 = vld [vmem:[#allocation5 + $0xad0] sm:$0xff] }
 0x401   :  { %10625 = vmatpush1.bf16.msra.mxu0 %v14206_v21  ;;  %11141 = vmatpush1.bf16.msra.mxu1 %v14208_v44  ;;  %v451_v21 = vld [vmem:[#allocation5 + $0x9b0] sm:$0xff]  ;;  %v448_v44 = vld [vmem:[#allocation5 + $0x998] sm:$0xff] }
 0x402   :  { %10637 = vmatprep.subr.bf16.mxu0 %v14215_v48  ;;  %11153 = vmatprep.subr.bf16.mxu1 %v14217_v49  ;;  %v452_v48 = vld [vmem:[#allocation5 + $0x9b8] sm:$0xff]  ;;  %v14254_v49 = vcombine.low %v439_v54, %v443_v36  ;;  %v14263_v51 = vcombine.high %v447_v20, %v451_v21 }
 0x403   :  { %v14265_v1 = vcombine.high %v448_v44, %v452_v48  ;;  %v14264_v16 = vcombine.low %v448_v44, %v452_v48  ;;  %v495_v48 = vld [vmem:[#allocation5 + $0xb10] sm:$0xff] }
 0x404   :  { %10627 = vmatmul.mubr.bf16.vlgmr.msra.gmra.mrb[4].mxu0 %v16850_v30  ;;  %11143 = vmatmul.mubr.bf16.vlgmr.msra.gmra.mrb[4].mxu1 %v16850_v30  ;;  %v14232_v30 = vcombine.low %v416_v59, %v420_v60  ;;  %v463_v60 = vld [vmem:[#allocation5 + $0xa10] sm:$0xff] }
 0x405   :  { %10638 = vmatpush1.bf16.msra.mxu0 %v14214_v55  ;;  %11154 = vmatpush1.bf16.msra.mxu1 %v14216_v56  ;;  %v459_v55 = vld [vmem:[#allocation5 + $0x9f0] sm:$0xff]  ;;  %v456_v56 = vld [vmem:[#allocation5 + $0x9d8] sm:$0xff] }
 0x406   :  { %10639 = vmatprep.subr.bf16.mxu0 %v14223_v27  ;;  %11155 = vmatprep.subr.bf16.mxu1 %v14225_v29  ;;  %v460_v27 = vld [vmem:[#allocation5 + $0x9f8] sm:$0xff]  ;;  %v14262_v29 = vcombine.low %v447_v20, %v451_v21  ;;  %v14271_v19 = vcombine.high %v455_v3, %v459_v55 }
 0x407   :  { %10669 = vmatprep.mubr.bf16.mxu0 %v16854_v39  ;;  %11185 = vmatprep.mubr.bf16.mxu1 %v16854_v39  ;;  %v14249_v39 = vcombine.high %v432_v22, %v436_v24  ;;  %v14273_v59 = vcombine.high %v456_v56, %v460_v27  ;;  %v14272_v7 = vcombine.low %v456_v56, %v460_v27  ;;  %v479_v24 = vld [vmem:[#allocation5 + $0xa90] sm:$0xff] }
 0x408   :  { %v503_v27 = vld [vmem:[#allocation5 + $0xb50] sm:$0xff] }
 0x409   :  { %10640 = vmatpush1.bf16.msra.mxu0 %v14222_v61  ;;  %11156 = vmatpush1.bf16.msra.mxu1 %v14224_v62  ;;  %v467_v61 = vld [vmem:[#allocation5 + $0xa30] sm:$0xff]  ;;  %v464_v62 = vld [vmem:[#allocation5 + $0xa18] sm:$0xff] }
 0x40a   :  { %10641 = vmatprep.subr.bf16.mxu0 %v14231_v0  ;;  %11157 = vmatprep.subr.bf16.mxu1 %v14233_v6  ;;  %v468_v0 = vld [vmem:[#allocation5 + $0xa38] sm:$0xff]  ;;  %v14270_v6 = vcombine.low %v455_v3, %v459_v55  ;;  %v14279_v8 = vcombine.high %v463_v60, %v467_v61 }
 0x40b   :  { %v14281_v9 = vcombine.high %v464_v62, %v468_v0  ;;  %v14280_v34 = vcombine.low %v464_v62, %v468_v0  ;;  %v511_v0 = vld [vmem:[#allocation5 + $0xb90] sm:$0xff] }
 0x40d   :  { %10642 = vmatpush1.bf16.msra.mxu0 %v14230_v11  ;;  %11158 = vmatpush1.bf16.msra.mxu1 %v14232_v30  ;;  %v475_v11 = vld [vmem:[#allocation5 + $0xa70] sm:$0xff]  ;;  %v472_v30 = vld [vmem:[#allocation5 + $0xa58] sm:$0xff] }
 0x40e   :  { %10643 = vmatprep.subr.bf16.mxu0 %v14239_v33  ;;  %11159 = vmatprep.subr.bf16.mxu1 %v14241_v15  ;;  %v476_v33 = vld [vmem:[#allocation5 + $0xa78] sm:$0xff]  ;;  %v14278_v15 = vcombine.low %v463_v60, %v467_v61  ;;  %v14287_v14 = vcombine.high %v471_v10, %v475_v11 }
 0x40f   :  { %v14289_v22 = vcombine.high %v472_v30, %v476_v33  ;;  %v14288_v54 = vcombine.low %v472_v30, %v476_v33  ;;  %v519_v33 = vld [vmem:[#allocation5 + $0xbd0] sm:$0xff] }
 0x411   :  { %10644 = vmatpush1.bf16.msra.mxu0 %v14238_v26  ;;  %11160 = vmatpush1.bf16.msra.mxu1 %v14240_v58  ;;  %v483_v26 = vld [vmem:[#allocation5 + $0xab0] sm:$0xff]  ;;  %v480_v58 = vld [vmem:[#allocation5 + $0xa98] sm:$0xff] }
 0x412   :  { %10645 = vmatprep.subr.bf16.mxu0 %v14247_v28  ;;  %11161 = vmatprep.subr.bf16.mxu1 %v14249_v39  ;;  %v484_v28 = vld [vmem:[#allocation5 + $0xab8] sm:$0xff]  ;;  %v14286_v39 = vcombine.low %v471_v10, %v475_v11  ;;  %v14295_v36 = vcombine.high %v479_v24, %v483_v26 }
 0x413   :  { %v14297_v53 = vcombine.high %v480_v58, %v484_v28  ;;  %v14296_v20 = vcombine.low %v480_v58, %v484_v28  ;;  %v527_v28 = vld [vmem:[#allocation5 + $0xc10] sm:$0xff] }
 0x415   :  { %10646 = vmatpush1.bf16.msra.mxu0 %v14246_v41  ;;  %11162 = vmatpush1.bf16.msra.mxu1 %v14248_v42  ;;  %v491_v41 = vld [vmem:[#allocation5 + $0xaf0] sm:$0xff]  ;;  %v488_v42 = vld [vmem:[#allocation5 + $0xad8] sm:$0xff] }
 0x416   :  { %10647 = vmatprep.subr.bf16.mxu0 %v14255_v17  ;;  %11163 = vmatprep.subr.bf16.mxu1 %v14257_v18  ;;  %v492_v17 = vld [vmem:[#allocation5 + $0xaf8] sm:$0xff]  ;;  %v14294_v18 = vcombine.low %v479_v24, %v483_v26  ;;  %v14303_v21 = vcombine.high %v487_v37, %v491_v41 }
 0x417   :  { %v14305_v44 = vcombine.high %v488_v42, %v492_v17  ;;  %v14304_v3 = vcombine.low %v488_v42, %v492_v17  ;;  %v535_v17 = vld [vmem:[#allocation5 + $0xc50] sm:$0xff] }
 0x419   :  { %10648 = vmatpush1.bf16.msra.mxu0 %v14254_v49  ;;  %11164 = vmatpush1.bf16.msra.mxu1 %v14256_v50  ;;  %v499_v49 = vld [vmem:[#allocation5 + $0xb30] sm:$0xff]  ;;  %v496_v50 = vld [vmem:[#allocation5 + $0xb18] sm:$0xff] }
 0x41a   :  { %10649 = vmatprep.subr.bf16.mxu0 %v14263_v51  ;;  %11165 = vmatprep.subr.bf16.mxu1 %v14265_v1  ;;  %v500_v51 = vld [vmem:[#allocation5 + $0xb38] sm:$0xff]  ;;  %v14302_v1 = vcombine.low %v487_v37, %v491_v41  ;;  %v14311_v55 = vcombine.high %v495_v48, %v499_v49 }
 0x41b   :  { %v14313_v56 = vcombine.high %v496_v50, %v500_v51  ;;  %v14312_v60 = vcombine.low %v496_v50, %v500_v51  ;;  %v543_v51 = vld [vmem:[#allocation5 + $0xc90] sm:$0xff] }
 0x41d   :  { %10650 = vmatpush1.bf16.msra.mxu0 %v14262_v29  ;;  %11166 = vmatpush1.bf16.msra.mxu1 %v14264_v16  ;;  %v507_v29 = vld [vmem:[#allocation5 + $0xb70] sm:$0xff]  ;;  %v504_v16 = vld [vmem:[#allocation5 + $0xb58] sm:$0xff] }
 0x41e   :  { %10651 = vmatprep.subr.bf16.mxu0 %v14271_v19  ;;  %11167 = vmatprep.subr.bf16.mxu1 %v14273_v59  ;;  %v508_v19 = vld [vmem:[#allocation5 + $0xb78] sm:$0xff]  ;;  %v14310_v59 = vcombine.low %v495_v48, %v499_v49  ;;  %v14319_v61 = vcombine.high %v503_v27, %v507_v29 }
 0x41f   :  { %v14321_v62 = vcombine.high %v504_v16, %v508_v19  ;;  %v14320_v10 = vcombine.low %v504_v16, %v508_v19  ;;  %v551_v19 = vld [vmem:[#allocation5 + $0xcd0] sm:$0xff] }
 0x421   :  { %10652 = vmatpush1.bf16.msra.mxu0 %v14270_v6  ;;  %11168 = vmatpush1.bf16.msra.mxu1 %v14272_v7  ;;  %v515_v6 = vld [vmem:[#allocation5 + $0xbb0] sm:$0xff]  ;;  %v512_v7 = vld [vmem:[#allocation5 + $0xb98] sm:$0xff] }
 0x422   :  { %10653 = vmatprep.subr.bf16.mxu0 %v14279_v8  ;;  %11169 = vmatprep.subr.bf16.mxu1 %v14281_v9  ;;  %v516_v8 = vld [vmem:[#allocation5 + $0xbb8] sm:$0xff]  ;;  %v14318_v9 = vcombine.low %v503_v27, %v507_v29  ;;  %v14327_v11 = vcombine.high %v511_v0, %v515_v6 }
 0x423   :  { %v14329_v30 = vcombine.high %v512_v7, %v516_v8  ;;  %v14328_v24 = vcombine.low %v512_v7, %v516_v8  ;;  %v559_v8 = vld [vmem:[#allocation5 + $0xd10] sm:$0xff] }
 0x425   :  { %10654 = vmatpush1.bf16.msra.mxu0 %v14278_v15  ;;  %11170 = vmatpush1.bf16.msra.mxu1 %v14280_v34  ;;  %v523_v15 = vld [vmem:[#allocation5 + $0xbf0] sm:$0xff]  ;;  %v520_v34 = vld [vmem:[#allocation5 + $0xbd8] sm:$0xff] }
 0x426   :  { %10655 = vmatprep.subr.bf16.mxu0 %v14287_v14  ;;  %11171 = vmatprep.subr.bf16.mxu1 %v14289_v22  ;;  %v524_v14 = vld [vmem:[#allocation5 + $0xbf8] sm:$0xff]  ;;  %v14326_v22 = vcombine.low %v511_v0, %v515_v6  ;;  %v14335_v26 = vcombine.high %v519_v33, %v523_v15 }
 0x427   :  { %v14337_v58 = vcombine.high %v520_v34, %v524_v14  ;;  %v14336_v37 = vcombine.low %v520_v34, %v524_v14  ;;  %v567_v14 = vld [vmem:[#allocation5 + $0xd50] sm:$0xff] }
 0x429   :  { %10656 = vmatpush1.bf16.msra.mxu0 %v14286_v39  ;;  %11172 = vmatpush1.bf16.msra.mxu1 %v14288_v54  ;;  %v531_v39 = vld [vmem:[#allocation5 + $0xc30] sm:$0xff]  ;;  %v528_v54 = vld [vmem:[#allocation5 + $0xc18] sm:$0xff] }
 0x42a   :  { %10657 = vmatprep.subr.bf16.mxu0 %v14295_v36  ;;  %11173 = vmatprep.subr.bf16.mxu1 %v14297_v53  ;;  %v532_v36 = vld [vmem:[#allocation5 + $0xc38] sm:$0xff]  ;;  %v14334_v53 = vcombine.low %v519_v33, %v523_v15  ;;  %v14343_v41 = vcombine.high %v527_v28, %v531_v39 }
 0x42b   :  { %v14345_v42 = vcombine.high %v528_v54, %v532_v36  ;;  %v14344_v48 = vcombine.low %v528_v54, %v532_v36 }
 0x42d   :  { %10658 = vmatpush1.bf16.msra.mxu0 %v14294_v18  ;;  %11174 = vmatpush1.bf16.msra.mxu1 %v14296_v20  ;;  %v539_v18 = vld [vmem:[#allocation5 + $0xc70] sm:$0xff]  ;;  %v536_v20 = vld [vmem:[#allocation5 + $0xc58] sm:$0xff] }
 0x42e   :  { %10659 = vmatprep.subr.bf16.mxu0 %v14303_v21  ;;  %11175 = vmatprep.subr.bf16.mxu1 %v14305_v44  ;;  %v540_v21 = vld [vmem:[#allocation5 + $0xc78] sm:$0xff]  ;;  %v14342_v44 = vcombine.low %v527_v28, %v531_v39  ;;  %v14351_v49 = vcombine.high %v535_v17, %v539_v18  ;;  %v1677_v39 = vld [vmem:[#allocation7] sm:$0xff] }
 0x42f   :  { %v14353_v50 = vcombine.high %v536_v20, %v540_v21  ;;  %v14352_v27 = vcombine.low %v536_v20, %v540_v21  ;;  %v576_v21 = vld [vmem:[#allocation5 + $0xd98] sm:$0xff] }
 0x431   :  { %10660 = vmatpush1.bf16.msra.mxu0 %v14302_v1  ;;  %11176 = vmatpush1.bf16.msra.mxu1 %v14304_v3  ;;  %v547_v1 = vld [vmem:[#allocation5 + $0xcb0] sm:$0xff]  ;;  %v544_v3 = vld [vmem:[#allocation5 + $0xc98] sm:$0xff] }
 0x432   :  { %10661 = vmatprep.subr.bf16.mxu0 %v14311_v55  ;;  %11177 = vmatprep.subr.bf16.mxu1 %v14313_v56  ;;  %v548_v55 = vld [vmem:[#allocation5 + $0xcb8] sm:$0xff]  ;;  %v14350_v56 = vcombine.low %v535_v17, %v539_v18  ;;  %v14359_v29 = vcombine.high %v543_v51, %v547_v1  ;;  %v14358_v0 = vcombine.low %v543_v51, %v547_v1  ;;  %v575_v17 = vld [vmem:[#allocation5 + $0xd90] sm:$0xff] }
 0x433   :  { %v14361_v16 = vcombine.high %v544_v3, %v548_v55  ;;  %v579_v18 = vld [vmem:[#allocation5 + $0xdb0] sm:$0xff] }
 0x435   :  { %10662 = vmatpush1.bf16.msra.mxu0 %v14310_v59  ;;  %11178 = vmatpush1.bf16.msra.mxu1 %v14312_v60  ;;  %v555_v59 = vld [vmem:[#allocation5 + $0xcf0] sm:$0xff]  ;;  %v552_v60 = vld [vmem:[#allocation5 + $0xcd8] sm:$0xff] }
 0x436   :  { %10663 = vmatprep.subr.bf16.mxu0 %v14319_v61  ;;  %11179 = vmatprep.subr.bf16.mxu1 %v14321_v62  ;;  %v556_v61 = vld [vmem:[#allocation5 + $0xcf8] sm:$0xff]  ;;  %v1679_v62 = vlaneseq  ;;  %v14367_v6 = vcombine.high %v551_v19, %v555_v59  ;;  %v14366_v33 = vcombine.low %v551_v19, %v555_v59 }
 0x437   :  { %v14369_v7 = vcombine.high %v552_v60, %v556_v61  ;;  %v14368_v15 = vcombine.low %v552_v60, %v556_v61  ;;  %v588_v19 = vld [vmem:[#allocation5 + $0xdf8] sm:$0xff] }
 0x439   :  { %10664 = vmatpush1.bf16.msra.mxu0 %v14318_v9  ;;  %11180 = vmatpush1.bf16.msra.mxu1 %v14320_v10  ;;  %v563_v9 = vld [vmem:[#allocation5 + $0xd30] sm:$0xff]  ;;  %v560_v10 = vld [vmem:[#allocation5 + $0xd18] sm:$0xff] }
 0x43a   :  { %10665 = vmatprep.subr.bf16.mxu0 %v14327_v11  ;;  %11181 = vmatprep.subr.bf16.mxu1 %v14329_v30  ;;  %v564_v11 = vld [vmem:[#allocation5 + $0xd38] sm:$0xff]  ;;  %v17024_v30 = vshrl.u32 %v1679_v62, 7  ;;  %v14374_v28 = vcombine.low %v559_v8, %v563_v9  ;;  %v14390_v62 = vcombine.low %v575_v17, %v579_v18 }
 0x43b   :  { %v14377_v34 = vcombine.high %v560_v10, %v564_v11 }
 0x43c   :  { %v1689_v54 = vsub.s32 2, %v17024_v30  ;;  %v1685_v36 = vsub.s32 1, %v17024_v30 }
 0x43d   :  { %10666 = vmatpush1.bf16.msra.mxu0 %v14326_v22  ;;  %11182 = vmatpush1.bf16.msra.mxu1 %v14328_v24  ;;  %v571_v22 = vld [vmem:[#allocation5 + $0xd70] sm:$0xff]  ;;  %v1681_v24 = vsub.s32 0, %v17024_v30 }
 0x43e   :  { %10667 = vmatprep.subr.bf16.mxu0 %v14335_v26  ;;  %11183 = vmatprep.subr.bf16.mxu1 %v14337_v58  ;;  %v568_v26 = vld [vmem:[#allocation5 + $0xd58] sm:$0xff] }
 0x43f   :  { %v572_v58 = vld [vmem:[#allocation5 + $0xd78] sm:$0xff]  ;;  %v1682_v20 = vrot.slane %v1677_v39, %v1681_v24 }
 0x440   :  { %v14384_v1 = vcombine.low %v568_v26, %v572_v58 }
 0x441   :  { %10668 = vmatpush1.bf16.msra.mxu0 %v14334_v53  ;;  %11184 = vmatpush1.bf16.msra.mxu1 %v14336_v37  ;;  %v14376_v53 = vcombine.low %v560_v10, %v564_v11  ;;  %v1693_v37 = vsub.s32 3, %v17024_v30 }
 0x442   :  { %10680 = vmatprep.subr.bf16.mxu0 %v14343_v41  ;;  %11196 = vmatprep.subr.bf16.mxu1 %v14345_v42  ;;  %v14383_v41 = vcombine.high %v567_v14, %v571_v22  ;;  %v14385_v42 = vcombine.high %v568_v26, %v572_v58 }
 0x443   :  { %v1694_v51 = vrot.slane %v1677_v39, %v1693_v37 }
 0x444   :  { %10670 = vmatmul.mubr.bf16.vlgmr.msra.gmra.mrb[4].mxu0 %v16866_v46  ;;  %11186 = vmatmul.mubr.bf16.vlgmr.msra.gmra.mrb[4].mxu1 %v16866_v46  ;;  %v14360_v46 = vcombine.low %v544_v3, %v548_v55  ;;  %v14391_v3 = vcombine.high %v575_v17, %v579_v18  ;;  %v17038_v55 = vld [vmem:[#allocation5 + $0xdd0] sm:$0xff] }
 0x445   :  { %10681 = vmatpush1.bf16.msra.mxu0 %v14342_v44  ;;  %11197 = vmatpush1.bf16.msra.mxu1 %v14344_v48  ;;  %v580_v44 = vld [vmem:[#allocation5 + $0xdb8] sm:$0xff]  ;;  %v1690_v48 = vrot.slane %v1677_v39, %v1689_v54 }
 0x446   :  { %10682 = vmatprep.subr.bf16.mxu0 %v14351_v49  ;;  %11198 = vmatprep.subr.bf16.mxu1 %v14353_v50  ;;  %v1686_v49 = vrot.slane %v1677_v39, %v1685_v36  ;;  %v14382_v50 = vcombine.low %v567_v14, %v571_v22  ;;  %v591_v14 = vld [vmem:[#allocation5 + $0xe10] sm:$0xff] }
 0x447   :  { %10712 = vmatprep.mubr.bf16.mxu0 %v16870_v57  ;;  %11228 = vmatprep.mubr.bf16.mxu1 %v16870_v57  ;;  %v14375_v57 = vcombine.high %v559_v8, %v563_v9  ;;  %v14392_v8 = vcombine.low %v576_v21, %v580_v44  ;;  %v595_v22 = vld [vmem:[#allocation5 + $0xe30] sm:$0xff] }
 0x449   :  { %10683 = vmatpush1.bf16.msra.mxu0 %v14350_v56  ;;  %11199 = vmatpush1.bf16.msra.mxu1 %v14352_v27  ;;  %v17040_v56 = vld [vmem:[#allocation5 + $0xdf0] sm:$0xff] }
 0x44a   :  { %10684 = vmatprep.subr.bf16.mxu0 %v14359_v29  ;;  %11200 = vmatprep.subr.bf16.mxu1 %v14361_v16  ;;  %v14393_v29 = vcombine.high %v576_v21, %v580_v44  ;;  %v17042_v16 = vld [vmem:[#allocation5 + $0xdd8] sm:$0xff]  ;;  %v14399_v9 = vcombine.high %v17038_v55, %v17040_v56 }
 0x44d   :  { %10685 = vmatpush1.bf16.msra.mxu0 %v14358_v0  ;;  %11201 = vmatpush1.bf16.msra.mxu1 %v14360_v46 }
 0x44e   :  { %10686 = vmatprep.subr.bf16.mxu0 %v14367_v6  ;;  %11202 = vmatprep.subr.bf16.mxu1 %v14369_v7 }
 0x451   :  { %10687 = vmatpush1.bf16.msra.mxu0 %v14366_v33  ;;  %11203 = vmatpush1.bf16.msra.mxu1 %v14368_v15 }
 0x452   :  { %10688 = vmatprep.subr.bf16.mxu0 %v14375_v57  ;;  %11204 = vmatprep.subr.bf16.mxu1 %v14377_v34  ;;  %v14401_v34 = vcombine.high %v17042_v16, %v588_v19 }
 0x455   :  { %10689 = vmatpush1.bf16.msra.mxu0 %v14374_v28  ;;  %11205 = vmatpush1.bf16.msra.mxu1 %v14376_v53 }
 0x456   :  { %10690 = vmatprep.subr.bf16.mxu0 %v14383_v41  ;;  %11206 = vmatprep.subr.bf16.mxu1 %v14385_v42  ;;  %v592_v41 = vld [vmem:[#allocation5 + $0xe18] sm:$0xff] }
 0x457   :  { %v10026_v27 = vpop.f32.mrb[0].mxu0  ;;  %v10542_v60 = vpop.f32.mrb[0].mxu1  ;;  %v596_v42 = vld [vmem:[#allocation5 + $0xe38] sm:$0xff] }
 0x458   :  { %v15823_v59 = vadd.f32 %v10026_v27, %v1682_v20  ;;  %v10028_v61 = vpop.f32.mrb[1].mxu0  ;;  %v15827_v0 = vadd.f32 %v10542_v60, %v1690_v48  ;;  %v10544_v6 = vpop.f32.mrb[1].mxu1 }
 0x459   :  { %v15824_v46 = vadd.f32 %v10028_v61, %v1686_v49  ;;  %v10030_v7 = vpop.f32.mrb[2].mxu0  ;;  %10691 = vmatpush1.bf16.msra.mxu0 %v14382_v50  ;;  %v15828_v11 = vadd.f32 %v10544_v6, %v1694_v51  ;;  %v10546_v15 = vpop.f32.mrb[2].mxu1  ;;  %11207 = vmatpush1.bf16.msra.mxu1 %v14384_v1  ;;  %v14400_v1 = vcombine.low %v17042_v16, %v588_v19  ;;  %v600_v6 = vld [vmem:[#allocation5 + $0xe58] sm:$0xff] }
 0x45a   :  { %v11583_v10 = vmax.f32 %v15823_v59, 0.0  ;;  %v15825_v33 = vadd.f32 %v10030_v7, %v1682_v20  ;;  %v10032_v57 = vpop.f32.mrb[3].mxu0  ;;  %10692 = vmatprep.subr.bf16.mxu0 %v14391_v3  ;;  %v11585_v26 = vmax.f32 %v15827_v0, 0.0  ;;  %v15829_v28 = vadd.f32 %v10546_v15, %v1690_v48  ;;  %v10548_v53 = vpop.f32.mrb[3].mxu1  ;;  %11208 = vmatprep.subr.bf16.mxu1 %v14393_v29  ;;  %v604_v16 = vld [vmem:[#allocation5 + $0xe78] sm:$0xff]  ;;  %v607_v15 = vld [vmem:[#allocation5 + $0xe90] sm:$0xff] }
 0x45b   :  { %v11584_v58 = vmax.f32 %v15824_v46, 0.0  ;;  %v15826_v39 = vadd.f32 %v10032_v57, %v1686_v49  ;;  %v11586_v17 = vmax.f32 %v15828_v11, 0.0  ;;  %v15830_v21 = vadd.f32 %v10548_v53, %v1694_v51  ;;  %v599_v51 = vld [vmem:[#allocation5 + $0xe50] sm:$0xff] }
 0x45c   :  { %v11591_v18 = vmax.f32 %v15825_v33, 0.0  ;;  %v14398_v20 = vcombine.low %v17038_v55, %v17040_v56  ;;  %v11593_v44 = vmax.f32 %v15829_v28, 0.0  ;;  %v14407_v3 = vcombine.high %v591_v14, %v595_v22  ;;  %v603_v46 = vld [vmem:[#allocation5 + $0xe70] sm:$0xff] }
 0x45d   :  { %v11592_v50 = vmax.f32 %v15826_v39, 0.0  ;;  %10693 = vmatpush1.bf16.msra.mxu0 %v14390_v62  ;;  %v11599_v27 = vmin.f32 %v11583_v10, 6.0  ;;  %v11594_v48 = vmax.f32 %v15830_v21, 0.0  ;;  %11209 = vmatpush1.bf16.msra.mxu1 %v14392_v8  ;;  %v14409_v49 = vcombine.high %v592_v41, %v596_v42  ;;  %v611_v57 = vld [vmem:[#allocation5 + $0xeb0] sm:$0xff] }
 0x45e   :  { %v11607_v59 = vmin.f32 %v11591_v18, 6.0  ;;  %10694 = vmatprep.subr.bf16.mxu0 %v14399_v9  ;;  %v11601_v29 = vmin.f32 %v11585_v26, 6.0  ;;  %v11600_v60 = vmin.f32 %v11584_v58, 6.0  ;;  %v11609_v61 = vmin.f32 %v11593_v44, 6.0  ;;  %11210 = vmatprep.subr.bf16.mxu1 %v14401_v34  ;;  %v608_v34 = vld [vmem:[#allocation5 + $0xe98] sm:$0xff]  ;;  %v619_v53 = vld [vmem:[#allocation5 + $0xef0] sm:$0xff] }
 0x45f   :  { %v11608_v0 = vmin.f32 %v11592_v50, 6.0  ;;  %v11602_v55 = vmin.f32 %v11586_v17, 6.0  ;;  %v11610_v62 = vmin.f32 %v11594_v48, 6.0  ;;  %v14406_v8 = vcombine.low %v591_v14, %v595_v22  ;;  %v612_v26 = vld [vmem:[#allocation5 + $0xeb8] sm:$0xff]  ;;  %v615_v22 = vld [vmem:[#allocation5 + $0xed0] sm:$0xff] }
 0x460   :  { %v17050_v56 = vpack.c.bf16 %v11607_v59, %v11599_v27  ;;  %v17052_v19 = vpack.c.bf16 %v11609_v61, %v11601_v29  ;;  %v14408_v10 = vcombine.low %v592_v41, %v596_v42  ;;  %v14415_v11 = vcombine.high %v599_v51, %v603_v46  ;;  %v616_v17 = vld [vmem:[#allocation5 + $0xed8] sm:$0xff]  ;;  %v623_v44 = vld [vmem:[#allocation5 + $0xf10] sm:$0xff] }
 0x461   :  { %v17054_v7 = vpack.c.bf16 %v11608_v0, %v11600_v60  ;;  %10695 = vmatpush1.bf16.msra.mxu0 %v14398_v20  ;;  %v17056_v9 = vpack.c.bf16 %v11610_v62, %v11602_v55  ;;  %11211 = vmatpush1.bf16.msra.mxu1 %v14400_v1  ;;  %v14417_v33 = vcombine.high %v600_v6, %v604_v16  ;;  %v620_v18 = vld [vmem:[#allocation5 + $0xef8] sm:$0xff]  ;;  %v627_v50 = vld [vmem:[#allocation5 + $0xf30] sm:$0xff] }
 0x462   :  { %10696 = vmatprep.subr.bf16.mxu0 %v14407_v3  ;;  %11212 = vmatprep.subr.bf16.mxu1 %v14409_v49  ;;  %v14414_v58 = vcombine.low %v599_v51, %v603_v46  ;;  %v14416_v28 = vcombine.low %v600_v6, %v604_v16  ;;  %v14423_v39 = vcombine.high %v607_v15, %v611_v57  ;;  %v624_v1 = vld [vmem:[#allocation5 + $0xf18] sm:$0xff]  ;;  %v631_v29 = vld [vmem:[#allocation5 + $0xf50] sm:$0xff] }
 0x463   :  { %v14425_v14 = vcombine.high %v608_v34, %v612_v26  ;;  %v14422_v41 = vcombine.low %v607_v15, %v611_v57  ;;  %v14424_v42 = vcombine.low %v608_v34, %v612_v26  ;;  %v14431_v21 = vcombine.high %v615_v22, %v619_v53  ;;  %v628_v3 = vld [vmem:[#allocation5 + $0xf38] sm:$0xff]  ;;  %v635_v60 = vld [vmem:[#allocation5 + $0xf70] sm:$0xff] }
 0x464   :  { %v14433_v20 = vcombine.high %v616_v17, %v620_v18  ;;  %v14430_v27 = vcombine.low %v615_v22, %v619_v53  ;;  %v14432_v59 = vcombine.low %v616_v17, %v620_v18  ;;  %v14439_v48 = vcombine.high %v623_v44, %v627_v50  ;;  %v632_v61 = vld [vmem:[#allocation5 + $0xf58] sm:$0xff]  ;;  %v639_v6 = vld [vmem:[#allocation5 + $0xf90] sm:$0xff] }
 0x465   :  { %10697 = vmatpush1.bf16.msra.mxu0 %v14406_v8  ;;  %11213 = vmatpush1.bf16.msra.mxu1 %v14408_v10  ;;  %v14441_v49 = vcombine.high %v624_v1, %v628_v3  ;;  %v636_v0 = vld [vmem:[#allocation5 + $0xf78] sm:$0xff]  ;;  %v14438_v51 = vcombine.low %v623_v44, %v627_v50  ;;  %v14440_v46 = vcombine.low %v624_v1, %v628_v3  ;;  %v643_v16 = vld [vmem:[#allocation5 + $0xfb0] sm:$0xff] }
 0x466   :  { %10698 = vmatprep.subr.bf16.mxu0 %v14415_v11  ;;  %11214 = vmatprep.subr.bf16.mxu1 %v14417_v33  ;;  %v14447_v55 = vcombine.high %v631_v29, %v635_v60  ;;  %v14449_v62 = vcombine.high %v632_v61, %v636_v0  ;;  %v640_v8 = vld [vmem:[#allocation5 + $0xf98] sm:$0xff]  ;;  %v14446_v11 = vcombine.low %v631_v29, %v635_v60  ;;  %v647_v34 = vld [vmem:[#allocation5 + $0xfd0] sm:$0xff] }
 0x467   :  { %v644_v10 = vld [vmem:[#allocation5 + $0xfb8] sm:$0xff]  ;;  %v14448_v33 = vcombine.low %v632_v61, %v636_v0  ;;  %v14455_v15 = vcombine.high %v639_v6, %v643_v16  ;;  %v651_v26 = vld [vmem:[#allocation5 + $0xff0] sm:$0xff] }
 0x468   :  { %v14457_v57 = vcombine.high %v640_v8, %v644_v10  ;;  %v14463_v22 = vcombine.high %v647_v34, %v651_v26  ;;  %v655_v17 = vld [vmem:[#allocation5 + $0x1010] sm:$0xff] }
 0x469   :  { %10699 = vmatpush1.bf16.msra.mxu0 %v14414_v58  ;;  %11215 = vmatpush1.bf16.msra.mxu1 %v14416_v28  ;;  %v648_v58 = vld [vmem:[#allocation5 + $0xfd8] sm:$0xff]  ;;  %v659_v18 = vld [vmem:[#allocation5 + $0x1030] sm:$0xff] }
 0x46a   :  { %10700 = vmatprep.subr.bf16.mxu0 %v14423_v39  ;;  %11216 = vmatprep.subr.bf16.mxu1 %v14425_v14  ;;  %v652_v28 = vld [vmem:[#allocation5 + $0xff8] sm:$0xff]  ;;  %v14454_v39 = vcombine.low %v639_v6, %v643_v16  ;;  %v14456_v14 = vcombine.low %v640_v8, %v644_v10  ;;  %v14471_v44 = vcombine.high %v655_v17, %v659_v18  ;;  %v663_v1 = vld [vmem:[#allocation5 + $0x1050] sm:$0xff] }
 0x46b   :  { %v14465_v53 = vcombine.high %v648_v58, %v652_v28  ;;  %v667_v3 = vld [vmem:[#allocation5 + $0x1070] sm:$0xff] }
 0x46c   :  { %v14479_v29 = vcombine.high %v663_v1, %v667_v3  ;;  %v671_v61 = vld [vmem:[#allocation5 + $0x1090] sm:$0xff] }
 0x46d   :  { %10701 = vmatpush1.bf16.msra.mxu0 %v14422_v41  ;;  %11217 = vmatpush1.bf16.msra.mxu1 %v14424_v42  ;;  %v656_v41 = vld [vmem:[#allocation5 + $0x1018] sm:$0xff]  ;;  %v675_v0 = vld [vmem:[#allocation5 + $0x10b0] sm:$0xff] }
 0x46e   :  { %10702 = vmatprep.subr.bf16.mxu0 %v14431_v21  ;;  %11218 = vmatprep.subr.bf16.mxu1 %v14433_v20  ;;  %v660_v42 = vld [vmem:[#allocation5 + $0x1038] sm:$0xff]  ;;  %v14462_v21 = vcombine.low %v647_v34, %v651_v26  ;;  %v14464_v20 = vcombine.low %v648_v58, %v652_v28  ;;  %v14487_v6 = vcombine.high %v671_v61, %v675_v0  ;;  %v679_v8 = vld [vmem:[#allocation5 + $0x10d0] sm:$0xff] }
 0x46f   :  { %v14473_v50 = vcombine.high %v656_v41, %v660_v42  ;;  %v683_v10 = vld [vmem:[#allocation5 + $0x10f0] sm:$0xff]  ;;  %v688_v28 = vld [vmem:[#allocation5 + $0x1118] sm:$0xff] }
 0x470   :  { %v687_v26 = vld [vmem:[#allocation5 + $0x1110] sm:$0xff] }
 0x471   :  { %10703 = vmatpush1.bf16.msra.mxu0 %v14430_v27  ;;  %11219 = vmatpush1.bf16.msra.mxu1 %v14432_v59  ;;  %v664_v27 = vld [vmem:[#allocation5 + $0x1058] sm:$0xff]  ;;  %v691_v58 = vld [vmem:[#allocation5 + $0x1130] sm:$0xff] }
 0x472   :  { %10704 = vmatprep.subr.bf16.mxu0 %v14439_v48  ;;  %11220 = vmatprep.subr.bf16.mxu1 %v14441_v49  ;;  %v668_v59 = vld [vmem:[#allocation5 + $0x1078] sm:$0xff]  ;;  %v14470_v48 = vcombine.low %v655_v17, %v659_v18  ;;  %v14472_v49 = vcombine.low %v656_v41, %v660_v42  ;;  %v695_v17 = vld [vmem:[#allocation5 + $0x1150] sm:$0xff] }
 0x473   :  { %v14481_v60 = vcombine.high %v664_v27, %v668_v59  ;;  %v699_v18 = vld [vmem:[#allocation5 + $0x1170] sm:$0xff]  ;;  %v696_v41 = vld [vmem:[#allocation5 + $0x1158] sm:$0xff] }
 0x474   :  { %v700_v42 = vld [vmem:[#allocation5 + $0x1178] sm:$0xff] }
 0x475   :  { %10705 = vmatpush1.bf16.msra.mxu0 %v14438_v51  ;;  %11221 = vmatpush1.bf16.msra.mxu1 %v14440_v46  ;;  %v672_v51 = vld [vmem:[#allocation5 + $0x1098] sm:$0xff] }
 0x476   :  { %10706 = vmatprep.subr.bf16.mxu0 %v14447_v55  ;;  %11222 = vmatprep.subr.bf16.mxu1 %v14449_v62  ;;  %v676_v46 = vld [vmem:[#allocation5 + $0x10b8] sm:$0xff]  ;;  %v14478_v55 = vcombine.low %v663_v1, %v667_v3  ;;  %v14480_v62 = vcombine.low %v664_v27, %v668_v59  ;;  %v703_v1 = vld [vmem:[#allocation5 + $0x1190] sm:$0xff] }
 0x477   :  { %v14489_v16 = vcombine.high %v672_v51, %v676_v46  ;;  %v707_v3 = vld [vmem:[#allocation5 + $0x11b0] sm:$0xff]  ;;  %v704_v27 = vld [vmem:[#allocation5 + $0x1198] sm:$0xff] }
 0x478   :  { %v708_v59 = vld [vmem:[#allocation5 + $0x11b8] sm:$0xff] }
 0x479   :  { %10707 = vmatpush1.bf16.msra.mxu0 %v14446_v11  ;;  %11223 = vmatpush1.bf16.msra.mxu1 %v14448_v33  ;;  %v680_v11 = vld [vmem:[#allocation5 + $0x10d8] sm:$0xff] }
 0x47a   :  { %10708 = vmatprep.subr.bf16.mxu0 %v14455_v15  ;;  %11224 = vmatprep.subr.bf16.mxu1 %v14457_v57  ;;  %v684_v33 = vld [vmem:[#allocation5 + $0x10f8] sm:$0xff]  ;;  %v14486_v15 = vcombine.low %v671_v61, %v675_v0  ;;  %v14495_v57 = vcombine.high %v679_v8, %v683_v10  ;;  %v711_v61 = vld [vmem:[#allocation5 + $0x11d0] sm:$0xff] }
 0x47b   :  { %v14497_v34 = vcombine.high %v680_v11, %v684_v33  ;;  %v715_v0 = vld [vmem:[#allocation5 + $0x11f0] sm:$0xff] }
 0x47d   :  { %10709 = vmatpush1.bf16.msra.mxu0 %v14454_v39  ;;  %11225 = vmatpush1.bf16.msra.mxu1 %v14456_v14  ;;  %v692_v39 = vld [vmem:[#allocation5 + $0x1138] sm:$0xff]  ;;  %v14494_v14 = vcombine.low %v679_v8, %v683_v10  ;;  %v719_v8 = vld [vmem:[#allocation5 + $0x1210] sm:$0xff] }
 0x47e   :  { %10710 = vmatprep.subr.bf16.mxu0 %v14463_v22  ;;  %11226 = vmatprep.subr.bf16.mxu1 %v14465_v53  ;;  %v14496_v22 = vcombine.low %v680_v11, %v684_v33  ;;  %v14503_v53 = vcombine.high %v687_v26, %v691_v58  ;;  %v723_v10 = vld [vmem:[#allocation5 + $0x1230] sm:$0xff]  ;;  %v720_v11 = vld [vmem:[#allocation5 + $0x1218] sm:$0xff] }
 0x47f   :  { %v724_v33 = vld [vmem:[#allocation5 + $0x1238] sm:$0xff] }
 0x481   :  { %10711 = vmatpush1.bf16.msra.mxu0 %v14462_v21  ;;  %11227 = vmatpush1.bf16.msra.mxu1 %v14464_v20  ;;  %v14502_v21 = vcombine.low %v687_v26, %v691_v58  ;;  %v14504_v20 = vcombine.low %v688_v28, %v692_v39  ;;  %v727_v26 = vld [vmem:[#allocation5 + $0x1250] sm:$0xff] }
 0x482   :  { %10723 = vmatprep.subr.bf16.mxu0 %v14471_v44  ;;  %11239 = vmatprep.subr.bf16.mxu1 %v14473_v50  ;;  %v14511_v44 = vcombine.high %v695_v17, %v699_v18  ;;  %v14513_v50 = vcombine.high %v696_v41, %v700_v42  ;;  %v731_v58 = vld [vmem:[#allocation5 + $0x1270] sm:$0xff] }
 0x484   :  { %10713 = vmatmul.mubr.bf16.vlgmr.msra.gmra.mrb[4].mxu0 %v16878_v2  ;;  %11229 = vmatmul.mubr.bf16.vlgmr.msra.gmra.mrb[4].mxu1 %v16878_v2  ;;  %v14488_v2 = vcombine.low %v672_v51, %v676_v46  ;;  %v712_v51 = vld [vmem:[#allocation5 + $0x11d8] sm:$0xff] }
 0x485   :  { %10724 = vmatpush1.bf16.msra.mxu0 %v14470_v48  ;;  %11240 = vmatpush1.bf16.msra.mxu1 %v14472_v49  ;;  %v14510_v48 = vcombine.low %v695_v17, %v699_v18  ;;  %v14512_v49 = vcombine.low %v696_v41, %v700_v42  ;;  %v716_v46 = vld [vmem:[#allocation5 + $0x11f8] sm:$0xff]  ;;  %v735_v17 = vld [vmem:[#allocation5 + $0x1290] sm:$0xff] }
 0x486   :  { %10725 = vmatprep.subr.bf16.mxu0 %v14479_v29  ;;  %11241 = vmatprep.subr.bf16.mxu1 %v14481_v60  ;;  %v14519_v29 = vcombine.high %v703_v1, %v707_v3  ;;  %v14521_v60 = vcombine.high %v704_v27, %v708_v59  ;;  %v739_v18 = vld [vmem:[#allocation5 + $0x12b0] sm:$0xff]  ;;  %v736_v41 = vld [vmem:[#allocation5 + $0x1298] sm:$0xff] }
 0x487   :  { %10755 = vmatprep.mubr.bf16.mxu0 %v16886_v12  ;;  %11271 = vmatprep.mubr.bf16.mxu1 %v16886_v12  ;;  %v14505_v12 = vcombine.high %v688_v28, %v692_v39  ;;  %v728_v28 = vld [vmem:[#allocation5 + $0x1258] sm:$0xff] }
 0x488   :  { %v732_v39 = vld [vmem:[#allocation5 + $0x1278] sm:$0xff] }
 0x489   :  { %10726 = vmatpush1.bf16.msra.mxu0 %v14478_v55  ;;  %11242 = vmatpush1.bf16.msra.mxu1 %v14480_v62  ;;  %v14518_v55 = vcombine.low %v703_v1, %v707_v3  ;;  %v14520_v62 = vcombine.low %v704_v27, %v708_v59  ;;  %v740_v42 = vld [vmem:[#allocation5 + $0x12b8] sm:$0xff]  ;;  %v743_v1 = vld [vmem:[#allocation5 + $0x12d0] sm:$0xff] }
 0x48a   :  { %10727 = vmatprep.subr.bf16.mxu0 %v14487_v6  ;;  %11243 = vmatprep.subr.bf16.mxu1 %v14489_v16  ;;  %v14527_v6 = vcombine.high %v711_v61, %v715_v0  ;;  %v14529_v16 = vcombine.high %v712_v51, %v716_v46  ;;  %v747_v3 = vld [vmem:[#allocation5 + $0x12f0] sm:$0xff]  ;;  %v744_v27 = vld [vmem:[#allocation5 + $0x12d8] sm:$0xff] }
 0x48b   :  { %v748_v59 = vld [vmem:[#allocation5 + $0x12f8] sm:$0xff] }
 0x48d   :  { %10728 = vmatpush1.bf16.msra.mxu0 %v14486_v15  ;;  %11244 = vmatpush1.bf16.msra.mxu1 %v14488_v2  ;;  %v14526_v15 = vcombine.low %v711_v61, %v715_v0  ;;  %v14528_v2 = vcombine.low %v712_v51, %v716_v46  ;;  %v751_v61 = vld [vmem:[#allocation5 + $0x1310] sm:$0xff]  ;;  %v752_v51 = vld [vmem:[#allocation5 + $0x1318] sm:$0xff] }
 0x48e   :  { %10729 = vmatprep.subr.bf16.mxu0 %v14495_v57  ;;  %11245 = vmatprep.subr.bf16.mxu1 %v14497_v34  ;;  %v14535_v57 = vcombine.high %v719_v8, %v723_v10  ;;  %v14537_v34 = vcombine.high %v720_v11, %v724_v33  ;;  %v755_v0 = vld [vmem:[#allocation5 + $0x1330] sm:$0xff]  ;;  %v756_v46 = vld [vmem:[#allocation5 + $0x1338] sm:$0xff] }
 0x491   :  { %10730 = vmatpush1.bf16.msra.mxu0 %v14494_v14  ;;  %11246 = vmatpush1.bf16.msra.mxu1 %v14496_v22  ;;  %v14534_v14 = vcombine.low %v719_v8, %v723_v10  ;;  %v14536_v22 = vcombine.low %v720_v11, %v724_v33  ;;  %v759_v8 = vld [vmem:[#allocation5 + $0x1350] sm:$0xff]  ;;  %v760_v11 = vld [vmem:[#allocation5 + $0x1358] sm:$0xff] }
 0x492   :  { %10731 = vmatprep.subr.bf16.mxu0 %v14503_v53  ;;  %11247 = vmatprep.subr.bf16.mxu1 %v14505_v12  ;;  %v14543_v53 = vcombine.high %v727_v26, %v731_v58  ;;  %v14545_v12 = vcombine.high %v728_v28, %v732_v39  ;;  %v763_v10 = vld [vmem:[#allocation5 + $0x1370] sm:$0xff]  ;;  %v764_v33 = vld [vmem:[#allocation5 + $0x1378] sm:$0xff] }
 0x495   :  { %10732 = vmatpush1.bf16.msra.mxu0 %v14502_v21  ;;  %11248 = vmatpush1.bf16.msra.mxu1 %v14504_v20  ;;  %v14542_v21 = vcombine.low %v727_v26, %v731_v58  ;;  %v14544_v20 = vcombine.low %v728_v28, %v732_v39  ;;  %v767_v26 = vld [vmem:[#allocation5 + $0x1390] sm:$0xff]  ;;  %v768_v28 = vld [vmem:[#allocation5 + $0x1398] sm:$0xff] }
 0x496   :  { %10733 = vmatprep.subr.bf16.mxu0 %v14511_v44  ;;  %11249 = vmatprep.subr.bf16.mxu1 %v14513_v50  ;;  %v14551_v44 = vcombine.high %v735_v17, %v739_v18  ;;  %v14553_v50 = vcombine.high %v736_v41, %v740_v42  ;;  %v771_v58 = vld [vmem:[#allocation5 + $0x13b0] sm:$0xff]  ;;  %v772_v39 = vld [vmem:[#allocation5 + $0x13b8] sm:$0xff] }
 0x499   :  { %10734 = vmatpush1.bf16.msra.mxu0 %v14510_v48  ;;  %11250 = vmatpush1.bf16.msra.mxu1 %v14512_v49  ;;  %v14550_v48 = vcombine.low %v735_v17, %v739_v18  ;;  %v14552_v49 = vcombine.low %v736_v41, %v740_v42  ;;  %v775_v17 = vld [vmem:[#allocation5 + $0x13d0] sm:$0xff]  ;;  %v776_v41 = vld [vmem:[#allocation5 + $0x13d8] sm:$0xff] }
 0x49a   :  { %10735 = vmatprep.subr.bf16.mxu0 %v14519_v29  ;;  %11251 = vmatprep.subr.bf16.mxu1 %v14521_v60  ;;  %v14559_v29 = vcombine.high %v743_v1, %v747_v3  ;;  %v14561_v60 = vcombine.high %v744_v27, %v748_v59  ;;  %v779_v18 = vld [vmem:[#allocation5 + $0x13f0] sm:$0xff]  ;;  %v780_v42 = vld [vmem:[#allocation5 + $0x13f8] sm:$0xff] }
 0x49d   :  { %10736 = vmatpush1.bf16.msra.mxu0 %v14518_v55  ;;  %11252 = vmatpush1.bf16.msra.mxu1 %v14520_v62  ;;  %v14558_v55 = vcombine.low %v743_v1, %v747_v3  ;;  %v14560_v62 = vcombine.low %v744_v27, %v748_v59  ;;  %v783_v1 = vld [vmem:[#allocation5 + $0x1410] sm:$0xff]  ;;  %v784_v27 = vld [vmem:[#allocation5 + $0x1418] sm:$0xff] }
 0x49e   :  { %10737 = vmatprep.subr.bf16.mxu0 %v14527_v6  ;;  %11253 = vmatprep.subr.bf16.mxu1 %v14529_v16  ;;  %v14567_v6 = vcombine.high %v751_v61, %v755_v0  ;;  %v14569_v16 = vcombine.high %v752_v51, %v756_v46  ;;  %v787_v3 = vld [vmem:[#allocation5 + $0x1430] sm:$0xff]  ;;  %v788_v59 = vld [vmem:[#allocation5 + $0x1438] sm:$0xff] }
 0x4a1   :  { %10738 = vmatpush1.bf16.msra.mxu0 %v14526_v15  ;;  %11254 = vmatpush1.bf16.msra.mxu1 %v14528_v2  ;;  %v14566_v15 = vcombine.low %v751_v61, %v755_v0  ;;  %v14568_v2 = vcombine.low %v752_v51, %v756_v46  ;;  %v791_v61 = vld [vmem:[#allocation5 + $0x1450] sm:$0xff]  ;;  %v792_v51 = vld [vmem:[#allocation5 + $0x1458] sm:$0xff] }
 0x4a2   :  { %10739 = vmatprep.subr.bf16.mxu0 %v14535_v57  ;;  %11255 = vmatprep.subr.bf16.mxu1 %v14537_v34  ;;  %v14575_v57 = vcombine.high %v759_v8, %v763_v10  ;;  %v14577_v34 = vcombine.high %v760_v11, %v764_v33  ;;  %v795_v0 = vld [vmem:[#allocation5 + $0x1470] sm:$0xff]  ;;  %v796_v46 = vld [vmem:[#allocation5 + $0x1478] sm:$0xff] }
 0x4a5   :  { %10740 = vmatpush1.bf16.msra.mxu0 %v14534_v14  ;;  %11256 = vmatpush1.bf16.msra.mxu1 %v14536_v22  ;;  %v14574_v14 = vcombine.low %v759_v8, %v763_v10  ;;  %v14576_v22 = vcombine.low %v760_v11, %v764_v33  ;;  %v799_v8 = vld [vmem:[#allocation5 + $0x1490] sm:$0xff]  ;;  %v800_v11 = vld [vmem:[#allocation5 + $0x1498] sm:$0xff] }
 0x4a6   :  { %10741 = vmatprep.subr.bf16.mxu0 %v14543_v53  ;;  %11257 = vmatprep.subr.bf16.mxu1 %v14545_v12  ;;  %v14583_v53 = vcombine.high %v767_v26, %v771_v58  ;;  %v14585_v12 = vcombine.high %v768_v28, %v772_v39  ;;  %v803_v10 = vld [vmem:[#allocation5 + $0x14b0] sm:$0xff]  ;;  %v804_v33 = vld [vmem:[#allocation5 + $0x14b8] sm:$0xff] }
 0x4a9   :  { %10742 = vmatpush1.bf16.msra.mxu0 %v14542_v21  ;;  %11258 = vmatpush1.bf16.msra.mxu1 %v14544_v20  ;;  %v14582_v21 = vcombine.low %v767_v26, %v771_v58  ;;  %v14584_v20 = vcombine.low %v768_v28, %v772_v39  ;;  %v807_v26 = vld [vmem:[#allocation5 + $0x14d0] sm:$0xff]  ;;  %v808_v28 = vld [vmem:[#allocation5 + $0x14d8] sm:$0xff] }
 0x4aa   :  { %10743 = vmatprep.subr.bf16.mxu0 %v14551_v44  ;;  %11259 = vmatprep.subr.bf16.mxu1 %v14553_v50  ;;  %v14591_v44 = vcombine.high %v775_v17, %v779_v18  ;;  %v14593_v50 = vcombine.high %v776_v41, %v780_v42  ;;  %v811_v58 = vld [vmem:[#allocation5 + $0x14f0] sm:$0xff]  ;;  %v812_v39 = vld [vmem:[#allocation5 + $0x14f8] sm:$0xff] }
 0x4ad   :  { %10744 = vmatpush1.bf16.msra.mxu0 %v14550_v48  ;;  %11260 = vmatpush1.bf16.msra.mxu1 %v14552_v49  ;;  %v14590_v48 = vcombine.low %v775_v17, %v779_v18  ;;  %v14592_v49 = vcombine.low %v776_v41, %v780_v42  ;;  %v819_v17 = vld [vmem:[#allocation5 + $0x1530] sm:$0xff]  ;;  %v816_v18 = vld [vmem:[#allocation5 + $0x1518] sm:$0xff]  ;;  %v14622_v42 = vcombine.low %v807_v26, %v811_v58 }
 0x4ae   :  { %10745 = vmatprep.subr.bf16.mxu0 %v14559_v29  ;;  %11261 = vmatprep.subr.bf16.mxu1 %v14561_v60  ;;  %v14599_v29 = vcombine.high %v783_v1, %v787_v3  ;;  %v14601_v60 = vcombine.high %v784_v27, %v788_v59  ;;  %v820_v41 = vld [vmem:[#allocation5 + $0x1538] sm:$0xff] }
 0x4b1   :  { %10746 = vmatpush1.bf16.msra.mxu0 %v14558_v55  ;;  %11262 = vmatpush1.bf16.msra.mxu1 %v14560_v62  ;;  %v14598_v55 = vcombine.low %v783_v1, %v787_v3  ;;  %v14600_v62 = vcombine.low %v784_v27, %v788_v59  ;;  %v824_v1 = vld [vmem:[#allocation5 + $0x1558] sm:$0xff]  ;;  %v14632_v59 = vcombine.low %v816_v18, %v820_v41 }
 0x4b2   :  { %10747 = vmatprep.subr.bf16.mxu0 %v14567_v6  ;;  %11263 = vmatprep.subr.bf16.mxu1 %v14569_v16  ;;  %v14607_v6 = vcombine.high %v791_v61, %v795_v0  ;;  %v14609_v16 = vcombine.high %v792_v51, %v796_v46  ;;  %v828_v3 = vld [vmem:[#allocation5 + $0x1578] sm:$0xff] }
 0x4b5   :  { %10748 = vmatpush1.bf16.msra.mxu0 %v14566_v15  ;;  %11264 = vmatpush1.bf16.msra.mxu1 %v14568_v2  ;;  %v14606_v15 = vcombine.low %v791_v61, %v795_v0  ;;  %v14608_v2 = vcombine.low %v792_v51, %v796_v46  ;;  %v832_v61 = vld [vmem:[#allocation5 + $0x1598] sm:$0xff]  ;;  %v14640_v46 = vcombine.low %v824_v1, %v828_v3 }
 0x4b6   :  { %10749 = vmatprep.subr.bf16.mxu0 %v14575_v57  ;;  %11265 = vmatprep.subr.bf16.mxu1 %v14577_v34  ;;  %v14615_v57 = vcombine.high %v799_v8, %v803_v10  ;;  %v14617_v34 = vcombine.high %v800_v11, %v804_v33  ;;  %v836_v0 = vld [vmem:[#allocation5 + $0x15b8] sm:$0xff] }
 0x4b9   :  { %10750 = vmatpush1.bf16.msra.mxu0 %v14574_v14  ;;  %11266 = vmatpush1.bf16.msra.mxu1 %v14576_v22  ;;  %v14614_v14 = vcombine.low %v799_v8, %v803_v10  ;;  %v14623_v22 = vcombine.high %v807_v26, %v811_v58  ;;  %v840_v8 = vld [vmem:[#allocation5 + $0x15d8] sm:$0xff] }
 0x4ba   :  { %10751 = vmatprep.subr.bf16.mxu0 %v14583_v53  ;;  %11267 = vmatprep.subr.bf16.mxu1 %v14585_v12  ;;  %v14625_v53 = vcombine.high %v808_v28, %v812_v39  ;;  %v815_v12 = vld [vmem:[#allocation5 + $0x1510] sm:$0xff]  ;;  %v844_v10 = vld [vmem:[#allocation5 + $0x15f8] sm:$0xff] }
 0x4bb   :  { %v14630_v27 = vcombine.low %v815_v12, %v819_v17  ;;  %v848_v26 = vld [vmem:[#allocation5 + $0x1618] sm:$0xff] }
 0x4bc   :  { %v852_v58 = vld [vmem:[#allocation5 + $0x1638] sm:$0xff] }
 0x4bd   :  { %10752 = vmatpush1.bf16.msra.mxu0 %v14582_v21  ;;  %11268 = vmatpush1.bf16.msra.mxu1 %v14584_v20  ;;  %v14624_v21 = vcombine.low %v808_v28, %v812_v39  ;;  %v14631_v20 = vcombine.high %v815_v12, %v819_v17  ;;  %v14656_v39 = vcombine.low %v840_v8, %v844_v10  ;;  %v856_v12 = vld [vmem:[#allocation5 + $0x1658] sm:$0xff] }
 0x4be   :  { %10753 = vmatprep.subr.bf16.mxu0 %v14591_v44  ;;  %11269 = vmatprep.subr.bf16.mxu1 %v14593_v50  ;;  %v823_v44 = vld [vmem:[#allocation5 + $0x1550] sm:$0xff]  ;;  %v860_v17 = vld [vmem:[#allocation5 + $0x1678] sm:$0xff] }
 0x4bf   :  { %v827_v50 = vld [vmem:[#allocation5 + $0x1570] sm:$0xff] }
 0x4c0   :  { %v14638_v51 = vcombine.low %v823_v44, %v827_v50 }
 0x4c1   :  { %10754 = vmatpush1.bf16.msra.mxu0 %v14590_v48  ;;  %11270 = vmatpush1.bf16.msra.mxu1 %v14592_v49  ;;  %v14639_v48 = vcombine.high %v823_v44, %v827_v50  ;;  %v14641_v49 = vcombine.high %v824_v1, %v828_v3  ;;  %v864_v44 = vld [vmem:[#allocation5 + $0x1698] sm:$0xff]  ;;  %v14672_v3 = vcombine.low %v856_v12, %v860_v17 }
 0x4c2   :  { %10766 = vmatprep.subr.bf16.mxu0 %v14599_v29  ;;  %11282 = vmatprep.subr.bf16.mxu1 %v14601_v60  ;;  %v831_v29 = vld [vmem:[#allocation5 + $0x1590] sm:$0xff]  ;;  %v868_v50 = vld [vmem:[#allocation5 + $0x16b8] sm:$0xff] }
 0x4c3   :  { %v835_v60 = vld [vmem:[#allocation5 + $0x15b0] sm:$0xff] }
 0x4c4   :  { %10756 = vmatmul.mubr.bf16.vlgmr.msra.gmra.mrb[4].mxu0 %v16894_v31  ;;  %11272 = vmatmul.mubr.bf16.vlgmr.msra.gmra.mrb[4].mxu1 %v16894_v31  ;;  %v14616_v31 = vcombine.low %v800_v11, %v804_v33  ;;  %v14646_v11 = vcombine.low %v831_v29, %v835_v60  ;;  %v14648_v33 = vcombine.low %v832_v61, %v836_v0 }
 0x4c5   :  { %10767 = vmatpush1.bf16.msra.mxu0 %v14598_v55  ;;  %11283 = vmatpush1.bf16.msra.mxu1 %v14600_v62  ;;  %v14647_v55 = vcombine.high %v831_v29, %v835_v60  ;;  %v14649_v62 = vcombine.high %v832_v61, %v836_v0  ;;  %v872_v29 = vld [vmem:[#allocation5 + $0x16d8] sm:$0xff]  ;;  %v14680_v0 = vcombine.low %v864_v44, %v868_v50 }
 0x4c6   :  { %10768 = vmatprep.subr.bf16.mxu0 %v14607_v6  ;;  %11284 = vmatprep.subr.bf16.mxu1 %v14609_v16  ;;  %v839_v6 = vld [vmem:[#allocation5 + $0x15d0] sm:$0xff]  ;;  %v876_v60 = vld [vmem:[#allocation5 + $0x16f8] sm:$0xff] }
 0x4c7   :  { %10798 = vmatprep.mubr.bf16.mxu0 %v16902_v40  ;;  %11314 = vmatprep.mubr.bf16.mxu1 %v16902_v40  ;;  %v14633_v40 = vcombine.high %v816_v18, %v820_v41  ;;  %v843_v16 = vld [vmem:[#allocation5 + $0x15f0] sm:$0xff]  ;;  %v14664_v41 = vcombine.low %v848_v26, %v852_v58 }
 0x4c8   :  { %v14654_v28 = vcombine.low %v839_v6, %v843_v16 }
 0x4c9   :  { %10769 = vmatpush1.bf16.msra.mxu0 %v14606_v15  ;;  %11285 = vmatpush1.bf16.msra.mxu1 %v14608_v2  ;;  %v14655_v15 = vcombine.high %v839_v6, %v843_v16  ;;  %v14657_v2 = vcombine.high %v840_v8, %v844_v10  ;;  %v880_v6 = vld [vmem:[#allocation5 + $0x1718] sm:$0xff]  ;;  %v14688_v10 = vcombine.low %v872_v29, %v876_v60 }
 0x4ca   :  { %10770 = vmatprep.subr.bf16.mxu0 %v14615_v57  ;;  %11286 = vmatprep.subr.bf16.mxu1 %v14617_v34  ;;  %v847_v57 = vld [vmem:[#allocation5 + $0x1610] sm:$0xff]  ;;  %v884_v16 = vld [vmem:[#allocation5 + $0x1738] sm:$0xff] }
 0x4cb   :  { %v851_v34 = vld [vmem:[#allocation5 + $0x1630] sm:$0xff] }
 0x4cc   :  { %v14662_v18 = vcombine.low %v847_v57, %v851_v34 }
 0x4cd   :  { %10771 = vmatpush1.bf16.msra.mxu0 %v14614_v14  ;;  %11287 = vmatpush1.bf16.msra.mxu1 %v14616_v31  ;;  %v14663_v14 = vcombine.high %v847_v57, %v851_v34  ;;  %v14665_v31 = vcombine.high %v848_v26, %v852_v58  ;;  %v888_v57 = vld [vmem:[#allocation5 + $0x1758] sm:$0xff]  ;;  %v14696_v58 = vcombine.low %v880_v6, %v884_v16 }
 0x4ce   :  { %10772 = vmatprep.subr.bf16.mxu0 %v14623_v22  ;;  %11288 = vmatprep.subr.bf16.mxu1 %v14625_v53  ;;  %v855_v22 = vld [vmem:[#allocation5 + $0x1650] sm:$0xff]  ;;  %v892_v34 = vld [vmem:[#allocation5 + $0x1778] sm:$0xff] }
 0x4cf   :  { %v859_v53 = vld [vmem:[#allocation5 + $0x1670] sm:$0xff] }
 0x4d0   :  { %v14670_v1 = vcombine.low %v855_v22, %v859_v53 }
 0x4d1   :  { %10773 = vmatpush1.bf16.msra.mxu0 %v14622_v42  ;;  %11289 = vmatpush1.bf16.msra.mxu1 %v14624_v21  ;;  %v14671_v42 = vcombine.high %v855_v22, %v859_v53  ;;  %v14673_v21 = vcombine.high %v856_v12, %v860_v17  ;;  %v896_v22 = vld [vmem:[#allocation5 + $0x1798] sm:$0xff]  ;;  %v14704_v17 = vcombine.low %v888_v57, %v892_v34 }
 0x4d2   :  { %10774 = vmatprep.subr.bf16.mxu0 %v14631_v20  ;;  %11290 = vmatprep.subr.bf16.mxu1 %v14633_v40  ;;  %v863_v20 = vld [vmem:[#allocation5 + $0x1690] sm:$0xff]  ;;  %v900_v53 = vld [vmem:[#allocation5 + $0x17b8] sm:$0xff] }
 0x4d3   :  { %v867_v40 = vld [vmem:[#allocation5 + $0x16b0] sm:$0xff] }
 0x4d4   :  { %v14678_v61 = vcombine.low %v863_v20, %v867_v40 }
 0x4d5   :  { %10775 = vmatpush1.bf16.msra.mxu0 %v14630_v27  ;;  %11291 = vmatpush1.bf16.msra.mxu1 %v14632_v59  ;;  %v14679_v27 = vcombine.high %v863_v20, %v867_v40  ;;  %v14681_v59 = vcombine.high %v864_v44, %v868_v50  ;;  %v904_v20 = vld [vmem:[#allocation5 + $0x17d8] sm:$0xff]  ;;  %v14712_v50 = vcombine.low %v896_v22, %v900_v53 }
 0x4d6   :  { %10776 = vmatprep.subr.bf16.mxu0 %v14639_v48  ;;  %11292 = vmatprep.subr.bf16.mxu1 %v14641_v49  ;;  %v871_v48 = vld [vmem:[#allocation5 + $0x16d0] sm:$0xff]  ;;  %v908_v40 = vld [vmem:[#allocation5 + $0x17f8] sm:$0xff] }
 0x4d7   :  { %v875_v49 = vld [vmem:[#allocation5 + $0x16f0] sm:$0xff] }
 0x4d8   :  { %v14686_v8 = vcombine.low %v871_v48, %v875_v49 }
 0x4d9   :  { %10777 = vmatpush1.bf16.msra.mxu0 %v14638_v51  ;;  %11293 = vmatpush1.bf16.msra.mxu1 %v14640_v46  ;;  %v14687_v51 = vcombine.high %v871_v48, %v875_v49  ;;  %v14689_v46 = vcombine.high %v872_v29, %v876_v60  ;;  %v912_v48 = vld [vmem:[#allocation5 + $0x1818] sm:$0xff]  ;;  %v14720_v60 = vcombine.low %v904_v20, %v908_v40 }
 0x4da   :  { %10778 = vmatprep.subr.bf16.mxu0 %v14647_v55  ;;  %11294 = vmatprep.subr.bf16.mxu1 %v14649_v62  ;;  %v879_v55 = vld [vmem:[#allocation5 + $0x1710] sm:$0xff]  ;;  %v916_v49 = vld [vmem:[#allocation5 + $0x1838] sm:$0xff] }
 0x4db   :  { %v883_v62 = vld [vmem:[#allocation5 + $0x1730] sm:$0xff] }
 0x4dc   :  { %v14694_v26 = vcombine.low %v879_v55, %v883_v62 }
 0x4dd   :  { %10779 = vmatpush1.bf16.msra.mxu0 %v14646_v11  ;;  %11295 = vmatpush1.bf16.msra.mxu1 %v14648_v33  ;;  %v14695_v11 = vcombine.high %v879_v55, %v883_v62  ;;  %v14697_v33 = vcombine.high %v880_v6, %v884_v16  ;;  %v920_v55 = vld [vmem:[#allocation5 + $0x1858] sm:$0xff]  ;;  %v14728_v16 = vcombine.low %v912_v48, %v916_v49 }
 0x4de   :  { %10780 = vmatprep.subr.bf16.mxu0 %v14655_v15  ;;  %11296 = vmatprep.subr.bf16.mxu1 %v14657_v2  ;;  %v887_v15 = vld [vmem:[#allocation5 + $0x1750] sm:$0xff]  ;;  %v924_v62 = vld [vmem:[#allocation5 + $0x1878] sm:$0xff] }
 0x4df   :  { %v891_v2 = vld [vmem:[#allocation5 + $0x1770] sm:$0xff] }
 0x4e0   :  { %v14702_v12 = vcombine.low %v887_v15, %v891_v2 }
 0x4e1   :  { %10781 = vmatpush1.bf16.msra.mxu0 %v14654_v28  ;;  %11297 = vmatpush1.bf16.msra.mxu1 %v14656_v39  ;;  %v14703_v28 = vcombine.high %v887_v15, %v891_v2  ;;  %v14705_v39 = vcombine.high %v888_v57, %v892_v34  ;;  %v928_v15 = vld [vmem:[#allocation5 + $0x1898] sm:$0xff]  ;;  %v14736_v34 = vcombine.low %v920_v55, %v924_v62 }
 0x4e2   :  { %10782 = vmatprep.subr.bf16.mxu0 %v14663_v14  ;;  %11298 = vmatprep.subr.bf16.mxu1 %v14665_v31  ;;  %v895_v14 = vld [vmem:[#allocation5 + $0x1790] sm:$0xff]  ;;  %v932_v2 = vld [vmem:[#allocation5 + $0x18b8] sm:$0xff] }
 0x4e3   :  { %v899_v31 = vld [vmem:[#allocation5 + $0x17b0] sm:$0xff] }
 0x4e4   :  { %v14710_v44 = vcombine.low %v895_v14, %v899_v31 }
 0x4e5   :  { %10783 = vmatpush1.bf16.msra.mxu0 %v14662_v18  ;;  %11299 = vmatpush1.bf16.msra.mxu1 %v14664_v41  ;;  %v14711_v18 = vcombine.high %v895_v14, %v899_v31  ;;  %v14713_v41 = vcombine.high %v896_v22, %v900_v53  ;;  %v936_v14 = vld [vmem:[#allocation5 + $0x18d8] sm:$0xff] }
 0x4e6   :  { %10784 = vmatprep.subr.bf16.mxu0 %v14671_v42  ;;  %11300 = vmatprep.subr.bf16.mxu1 %v14673_v21  ;;  %v903_v42 = vld [vmem:[#allocation5 + $0x17d0] sm:$0xff]  ;;  %v940_v31 = vld [vmem:[#allocation5 + $0x18f8] sm:$0xff] }
 0x4e7   :  { %v907_v21 = vld [vmem:[#allocation5 + $0x17f0] sm:$0xff] }
 0x4e8   :  { %v14718_v29 = vcombine.low %v903_v42, %v907_v21 }
 0x4e9   :  { %10785 = vmatpush1.bf16.msra.mxu0 %v14670_v1  ;;  %11301 = vmatpush1.bf16.msra.mxu1 %v14672_v3  ;;  %v14719_v1 = vcombine.high %v903_v42, %v907_v21  ;;  %v14721_v3 = vcombine.high %v904_v20, %v908_v40  ;;  %v948_v42 = vld [vmem:[#allocation5 + $0x1938] sm:$0xff]  ;;  %v14752_v20 = vcombine.low %v936_v14, %v940_v31 }
 0x4ea   :  { %10786 = vmatprep.subr.bf16.mxu0 %v14679_v27  ;;  %11302 = vmatprep.subr.bf16.mxu1 %v14681_v59  ;;  %v911_v27 = vld [vmem:[#allocation5 + $0x1810] sm:$0xff] }
 0x4eb   :  { %v915_v59 = vld [vmem:[#allocation5 + $0x1830] sm:$0xff] }
 0x4ec   :  { %v14726_v6 = vcombine.low %v911_v27, %v915_v59 }
 0x4ed   :  { %10787 = vmatpush1.bf16.msra.mxu0 %v14678_v61  ;;  %11303 = vmatpush1.bf16.msra.mxu1 %v14680_v0  ;;  %v14727_v61 = vcombine.high %v911_v27, %v915_v59  ;;  %v14729_v0 = vcombine.high %v912_v48, %v916_v49 }
 0x4ee   :  { %10788 = vmatprep.subr.bf16.mxu0 %v14687_v51  ;;  %11304 = vmatprep.subr.bf16.mxu1 %v14689_v46  ;;  %v919_v51 = vld [vmem:[#allocation5 + $0x1850] sm:$0xff] }
 0x4ef   :  { %v923_v46 = vld [vmem:[#allocation5 + $0x1870] sm:$0xff] }
 0x4f0   :  { %v14734_v57 = vcombine.low %v919_v51, %v923_v46 }
 0x4f1   :  { %10789 = vmatpush1.bf16.msra.mxu0 %v14686_v8  ;;  %11305 = vmatpush1.bf16.msra.mxu1 %v14688_v10  ;;  %v14735_v8 = vcombine.high %v919_v51, %v923_v46  ;;  %v14737_v10 = vcombine.high %v920_v55, %v924_v62 }
 0x4f2   :  { %10790 = vmatprep.subr.bf16.mxu0 %v14695_v11  ;;  %11306 = vmatprep.subr.bf16.mxu1 %v14697_v33  ;;  %v927_v11 = vld [vmem:[#allocation5 + $0x1890] sm:$0xff] }
 0x4f3   :  { %v931_v33 = vld [vmem:[#allocation5 + $0x18b0] sm:$0xff] }
 0x4f4   :  { %v14742_v22 = vcombine.low %v927_v11, %v931_v33 }
 0x4f5   :  { %10791 = vmatpush1.bf16.msra.mxu0 %v14694_v26  ;;  %11307 = vmatpush1.bf16.msra.mxu1 %v14696_v58  ;;  %v14743_v26 = vcombine.high %v927_v11, %v931_v33  ;;  %v14745_v58 = vcombine.high %v928_v15, %v932_v2 }
 0x4f6   :  { %10792 = vmatprep.subr.bf16.mxu0 %v14703_v28  ;;  %11308 = vmatprep.subr.bf16.mxu1 %v14705_v39  ;;  %v935_v28 = vld [vmem:[#allocation5 + $0x18d0] sm:$0xff] }
 0x4f7   :  { %v939_v39 = vld [vmem:[#allocation5 + $0x18f0] sm:$0xff] }
 0x4f8   :  { %v14751_v53 = vcombine.high %v935_v28, %v939_v39  ;;  %v14750_v21 = vcombine.low %v935_v28, %v939_v39 }
 0x4f9   :  { %10793 = vmatpush1.bf16.msra.mxu0 %v14702_v12  ;;  %11309 = vmatpush1.bf16.msra.mxu1 %v14704_v17  ;;  %v14753_v12 = vcombine.high %v936_v14, %v940_v31  ;;  %v943_v17 = vld [vmem:[#allocation5 + $0x1910] sm:$0xff] }
 0x4fa   :  { %10794 = vmatprep.subr.bf16.mxu0 %v14711_v18  ;;  %11310 = vmatprep.subr.bf16.mxu1 %v14713_v41  ;;  %v947_v18 = vld [vmem:[#allocation5 + $0x1930] sm:$0xff]  ;;  %v944_v41 = vld [vmem:[#allocation5 + $0x1918] sm:$0xff] }
 0x4fb   :  { %v14759_v40 = vcombine.high %v943_v17, %v947_v18  ;;  %v14758_v27 = vcombine.low %v943_v17, %v947_v18  ;;  %v14760_v59 = vcombine.low %v944_v41, %v948_v42 }
 0x4fd   :  { %10795 = vmatpush1.bf16.msra.mxu0 %v14710_v44  ;;  %11311 = vmatpush1.bf16.msra.mxu1 %v14712_v50  ;;  %v951_v44 = vld [vmem:[#allocation5 + $0x1950] sm:$0xff] }
 0x4fe   :  { %10796 = vmatprep.subr.bf16.mxu0 %v14719_v1  ;;  %11312 = vmatprep.subr.bf16.mxu1 %v14721_v3  ;;  %v955_v50 = vld [vmem:[#allocation5 + $0x1970] sm:$0xff]  ;;  %v952_v1 = vld [vmem:[#allocation5 + $0x1958] sm:$0xff] }
 0x4ff   :  { %v956_v3 = vld [vmem:[#allocation5 + $0x1978] sm:$0xff]  ;;  %v14767_v48 = vcombine.high %v951_v44, %v955_v50  ;;  %v14766_v51 = vcombine.low %v951_v44, %v955_v50 }
 0x500   :  { %v14769_v49 = vcombine.high %v952_v1, %v956_v3  ;;  %v14768_v46 = vcombine.low %v952_v1, %v956_v3 }
 0x501   :  { %10797 = vmatpush1.bf16.msra.mxu0 %v14718_v29  ;;  %11313 = vmatpush1.bf16.msra.mxu1 %v14720_v60  ;;  %v959_v29 = vld [vmem:[#allocation5 + $0x1990] sm:$0xff] }
 0x502   :  { %10809 = vmatprep.subr.bf16.mxu0 %v14727_v61  ;;  %11325 = vmatprep.subr.bf16.mxu1 %v14729_v0  ;;  %v963_v60 = vld [vmem:[#allocation5 + $0x19b0] sm:$0xff]  ;;  %v960_v61 = vld [vmem:[#allocation5 + $0x1998] sm:$0xff] }
 0x503   :  { %v964_v0 = vld [vmem:[#allocation5 + $0x19b8] sm:$0xff]  ;;  %v14775_v55 = vcombine.high %v959_v29, %v963_v60  ;;  %v14774_v11 = vcombine.low %v959_v29, %v963_v60 }
 0x504   :  { %10799 = vmatmul.mubr.bf16.vlgmr.msra.gmra.mrb[4].mxu0 %v16910_v63  ;;  %11315 = vmatmul.mubr.bf16.vlgmr.msra.gmra.mrb[4].mxu1 %v16910_v63  ;;  %v14744_v63 = vcombine.low %v928_v15, %v932_v2  ;;  %v14777_v62 = vcombine.high %v960_v61, %v964_v0  ;;  %v14776_v33 = vcombine.low %v960_v61, %v964_v0 }
 0x505   :  { %10810 = vmatpush1.bf16.msra.mxu0 %v14726_v6  ;;  %11326 = vmatpush1.bf16.msra.mxu1 %v14728_v16  ;;  %v967_v6 = vld [vmem:[#allocation5 + $0x19d0] sm:$0xff] }
 0x506   :  { %10811 = vmatprep.subr.bf16.mxu0 %v14735_v8  ;;  %11327 = vmatprep.subr.bf16.mxu1 %v14737_v10  ;;  %v971_v16 = vld [vmem:[#allocation5 + $0x19f0] sm:$0xff]  ;;  %v968_v8 = vld [vmem:[#allocation5 + $0x19d8] sm:$0xff] }
 0x507   :  { %10841 = vmatprep.mubr.bf16.mxu0 %v16918_v43  ;;  %11357 = vmatprep.mubr.bf16.mxu1 %v16918_v43  ;;  %v14761_v43 = vcombine.high %v944_v41, %v948_v42  ;;  %v972_v10 = vld [vmem:[#allocation5 + $0x19f8] sm:$0xff]  ;;  %v14783_v15 = vcombine.high %v967_v6, %v971_v16  ;;  %v14782_v28 = vcombine.low %v967_v6, %v971_v16 }
 0x508   :  { %v14785_v2 = vcombine.high %v968_v8, %v972_v10  ;;  %v14784_v39 = vcombine.low %v968_v8, %v972_v10 }
 0x509   :  { %10812 = vmatpush1.bf16.msra.mxu0 %v14734_v57  ;;  %11328 = vmatpush1.bf16.msra.mxu1 %v14736_v34  ;;  %v975_v57 = vld [vmem:[#allocation5 + $0x1a10] sm:$0xff] }
 0x50a   :  { %10813 = vmatprep.subr.bf16.mxu0 %v14743_v26  ;;  %11329 = vmatprep.subr.bf16.mxu1 %v14745_v58  ;;  %v979_v34 = vld [vmem:[#allocation5 + $0x1a30] sm:$0xff]  ;;  %v976_v26 = vld [vmem:[#allocation5 + $0x1a18] sm:$0xff] }
 0x50b   :  { %v980_v58 = vld [vmem:[#allocation5 + $0x1a38] sm:$0xff]  ;;  %v14791_v14 = vcombine.high %v975_v57, %v979_v34  ;;  %v14790_v17 = vcombine.low %v975_v57, %v979_v34 }
 0x50c   :  { %v14793_v31 = vcombine.high %v976_v26, %v980_v58  ;;  %v14792_v18 = vcombine.low %v976_v26, %v980_v58 }
 0x50d   :  { %10814 = vmatpush1.bf16.msra.mxu0 %v14742_v22  ;;  %11330 = vmatpush1.bf16.msra.mxu1 %v14744_v63  ;;  %v983_v22 = vld [vmem:[#allocation5 + $0x1a50] sm:$0xff] }
 0x50e   :  { %10815 = vmatprep.subr.bf16.mxu0 %v14751_v53  ;;  %11331 = vmatprep.subr.bf16.mxu1 %v14753_v12  ;;  %v987_v63 = vld [vmem:[#allocation5 + $0x1a70] sm:$0xff]  ;;  %v984_v53 = vld [vmem:[#allocation5 + $0x1a58] sm:$0xff] }
 0x50f   :  { %v988_v12 = vld [vmem:[#allocation5 + $0x1a78] sm:$0xff]  ;;  %v14799_v41 = vcombine.high %v983_v22, %v987_v63  ;;  %v14798_v44 = vcombine.low %v983_v22, %v987_v63 }
 0x510   :  { %v14801_v42 = vcombine.high %v984_v53, %v988_v12  ;;  %v14800_v50 = vcombine.low %v984_v53, %v988_v12 }
 0x511   :  { %10816 = vmatpush1.bf16.msra.mxu0 %v14750_v21  ;;  %11332 = vmatpush1.bf16.msra.mxu1 %v14752_v20  ;;  %v991_v21 = vld [vmem:[#allocation5 + $0x1a90] sm:$0xff] }
 0x512   :  { %10817 = vmatprep.subr.bf16.mxu0 %v14759_v40  ;;  %11333 = vmatprep.subr.bf16.mxu1 %v14761_v43  ;;  %v995_v20 = vld [vmem:[#allocation5 + $0x1ab0] sm:$0xff]  ;;  %v992_v40 = vld [vmem:[#allocation5 + $0x1a98] sm:$0xff] }
 0x513   :  { %v996_v43 = vld [vmem:[#allocation5 + $0x1ab8] sm:$0xff]  ;;  %v14807_v1 = vcombine.high %v991_v21, %v995_v20  ;;  %v14806_v29 = vcombine.low %v991_v21, %v995_v20 }
 0x514   :  { %v14809_v3 = vcombine.high %v992_v40, %v996_v43  ;;  %v14808_v60 = vcombine.low %v992_v40, %v996_v43 }
 0x515   :  { %10818 = vmatpush1.bf16.msra.mxu0 %v14758_v27  ;;  %11334 = vmatpush1.bf16.msra.mxu1 %v14760_v59  ;;  %v999_v27 = vld [vmem:[#allocation5 + $0x1ad0] sm:$0xff] }
 0x516   :  { %10819 = vmatprep.subr.bf16.mxu0 %v14767_v48  ;;  %11335 = vmatprep.subr.bf16.mxu1 %v14769_v49  ;;  %v1003_v59 = vld [vmem:[#allocation5 + $0x1af0] sm:$0xff]  ;;  %v1000_v48 = vld [vmem:[#allocation5 + $0x1ad8] sm:$0xff] }
 0x517   :  { %v1004_v49 = vld [vmem:[#allocation5 + $0x1af8] sm:$0xff]  ;;  %v14815_v61 = vcombine.high %v999_v27, %v1003_v59  ;;  %v14814_v6 = vcombine.low %v999_v27, %v1003_v59 }
 0x518   :  { %v14817_v0 = vcombine.high %v1000_v48, %v1004_v49  ;;  %v14816_v16 = vcombine.low %v1000_v48, %v1004_v49 }
 0x519   :  { %10820 = vmatpush1.bf16.msra.mxu0 %v14766_v51  ;;  %11336 = vmatpush1.bf16.msra.mxu1 %v14768_v46  ;;  %v1007_v51 = vld [vmem:[#allocation5 + $0x1b10] sm:$0xff] }
 0x51a   :  { %10821 = vmatprep.subr.bf16.mxu0 %v14775_v55  ;;  %11337 = vmatprep.subr.bf16.mxu1 %v14777_v62  ;;  %v1011_v46 = vld [vmem:[#allocation5 + $0x1b30] sm:$0xff]  ;;  %v1008_v55 = vld [vmem:[#allocation5 + $0x1b18] sm:$0xff] }
 0x51b   :  { %v1012_v62 = vld [vmem:[#allocation5 + $0x1b38] sm:$0xff]  ;;  %v14823_v8 = vcombine.high %v1007_v51, %v1011_v46  ;;  %v14822_v57 = vcombine.low %v1007_v51, %v1011_v46 }
 0x51c   :  { %v14825_v10 = vcombine.high %v1008_v55, %v1012_v62  ;;  %v14824_v34 = vcombine.low %v1008_v55, %v1012_v62 }
 0x51d   :  { %10822 = vmatpush1.bf16.msra.mxu0 %v14774_v11  ;;  %11338 = vmatpush1.bf16.msra.mxu1 %v14776_v33  ;;  %v1015_v11 = vld [vmem:[#allocation5 + $0x1b50] sm:$0xff] }
 0x51e   :  { %10823 = vmatprep.subr.bf16.mxu0 %v14783_v15  ;;  %11339 = vmatprep.subr.bf16.mxu1 %v14785_v2  ;;  %v1019_v33 = vld [vmem:[#allocation5 + $0x1b70] sm:$0xff]  ;;  %v1016_v15 = vld [vmem:[#allocation5 + $0x1b58] sm:$0xff] }
 0x51f   :  { %v1020_v2 = vld [vmem:[#allocation5 + $0x1b78] sm:$0xff]  ;;  %v14831_v26 = vcombine.high %v1015_v11, %v1019_v33  ;;  %v14830_v22 = vcombine.low %v1015_v11, %v1019_v33 }
 0x520   :  { %v14833_v58 = vcombine.high %v1016_v15, %v1020_v2  ;;  %v14832_v63 = vcombine.low %v1016_v15, %v1020_v2 }
 0x521   :  { %10824 = vmatpush1.bf16.msra.mxu0 %v14782_v28  ;;  %11340 = vmatpush1.bf16.msra.mxu1 %v14784_v39  ;;  %v1023_v28 = vld [vmem:[#allocation5 + $0x1b90] sm:$0xff] }
 0x522   :  { %10825 = vmatprep.subr.bf16.mxu0 %v14791_v14  ;;  %11341 = vmatprep.subr.bf16.mxu1 %v14793_v31  ;;  %v1027_v39 = vld [vmem:[#allocation5 + $0x1bb0] sm:$0xff]  ;;  %v1024_v14 = vld [vmem:[#allocation5 + $0x1b98] sm:$0xff] }
 0x523   :  { %v1028_v31 = vld [vmem:[#allocation5 + $0x1bb8] sm:$0xff]  ;;  %v14839_v53 = vcombine.high %v1023_v28, %v1027_v39  ;;  %v14838_v21 = vcombine.low %v1023_v28, %v1027_v39 }
 0x524   :  { %v14841_v12 = vcombine.high %v1024_v14, %v1028_v31  ;;  %v14840_v20 = vcombine.low %v1024_v14, %v1028_v31  ;;  %v1071_v31 = vld [vmem:[#allocation5 + $0x1d10] sm:$0xff] }
 0x525   :  { %10826 = vmatpush1.bf16.msra.mxu0 %v14790_v17  ;;  %11342 = vmatpush1.bf16.msra.mxu1 %v14792_v18  ;;  %v1031_v17 = vld [vmem:[#allocation5 + $0x1bd0] sm:$0xff] }
 0x526   :  { %10827 = vmatprep.subr.bf16.mxu0 %v14799_v41  ;;  %11343 = vmatprep.subr.bf16.mxu1 %v14801_v42  ;;  %v1035_v18 = vld [vmem:[#allocation5 + $0x1bf0] sm:$0xff]  ;;  %v1032_v41 = vld [vmem:[#allocation5 + $0x1bd8] sm:$0xff] }
 0x527   :  { %v1036_v42 = vld [vmem:[#allocation5 + $0x1bf8] sm:$0xff]  ;;  %v14847_v40 = vcombine.high %v1031_v17, %v1035_v18  ;;  %v14846_v27 = vcombine.low %v1031_v17, %v1035_v18 }
 0x528   :  { %v14849_v43 = vcombine.high %v1032_v41, %v1036_v42  ;;  %v14848_v59 = vcombine.low %v1032_v41, %v1036_v42  ;;  %v1079_v41 = vld [vmem:[#allocation5 + $0x1d50] sm:$0xff] }
 0x529   :  { %10828 = vmatpush1.bf16.msra.mxu0 %v14798_v44  ;;  %11344 = vmatpush1.bf16.msra.mxu1 %v14800_v50  ;;  %v1039_v44 = vld [vmem:[#allocation5 + $0x1c10] sm:$0xff] }
 0x52a   :  { %10829 = vmatprep.subr.bf16.mxu0 %v14807_v1  ;;  %11345 = vmatprep.subr.bf16.mxu1 %v14809_v3  ;;  %v1043_v50 = vld [vmem:[#allocation5 + $0x1c30] sm:$0xff]  ;;  %v1040_v1 = vld [vmem:[#allocation5 + $0x1c18] sm:$0xff] }
 0x52b   :  { %v1044_v3 = vld [vmem:[#allocation5 + $0x1c38] sm:$0xff]  ;;  %v14855_v48 = vcombine.high %v1039_v44, %v1043_v50  ;;  %v14854_v51 = vcombine.low %v1039_v44, %v1043_v50  ;;  %v1083_v42 = vld [vmem:[#allocation5 + $0x1d70] sm:$0xff] }
 0x52c   :  { %v14857_v49 = vcombine.high %v1040_v1, %v1044_v3  ;;  %v14856_v46 = vcombine.low %v1040_v1, %v1044_v3  ;;  %v14895_v44 = vcombine.high %v1079_v41, %v1083_v42  ;;  %v1087_v1 = vld [vmem:[#allocation5 + $0x1d90] sm:$0xff] }
 0x52d   :  { %10830 = vmatpush1.bf16.msra.mxu0 %v14806_v29  ;;  %11346 = vmatpush1.bf16.msra.mxu1 %v14808_v60  ;;  %v1047_v29 = vld [vmem:[#allocation5 + $0x1c50] sm:$0xff] }
 0x52e   :  { %10831 = vmatprep.subr.bf16.mxu0 %v14815_v61  ;;  %11347 = vmatprep.subr.bf16.mxu1 %v14817_v0  ;;  %v1051_v60 = vld [vmem:[#allocation5 + $0x1c70] sm:$0xff]  ;;  %v1048_v61 = vld [vmem:[#allocation5 + $0x1c58] sm:$0xff] }
 0x52f   :  { %v1052_v0 = vld [vmem:[#allocation5 + $0x1c78] sm:$0xff]  ;;  %v14863_v55 = vcombine.high %v1047_v29, %v1051_v60  ;;  %v14862_v11 = vcombine.low %v1047_v29, %v1051_v60  ;;  %v1091_v3 = vld [vmem:[#allocation5 + $0x1db0] sm:$0xff] }
 0x530   :  { %v14865_v62 = vcombine.high %v1048_v61, %v1052_v0  ;;  %v14864_v33 = vcombine.low %v1048_v61, %v1052_v0  ;;  %v14903_v29 = vcombine.high %v1087_v1, %v1091_v3  ;;  %v1095_v61 = vld [vmem:[#allocation5 + $0x1dd0] sm:$0xff] }
 0x531   :  { %10832 = vmatpush1.bf16.msra.mxu0 %v14814_v6  ;;  %11348 = vmatpush1.bf16.msra.mxu1 %v14816_v16  ;;  %v1055_v6 = vld [vmem:[#allocation5 + $0x1c90] sm:$0xff] }
 0x532   :  { %10833 = vmatprep.subr.bf16.mxu0 %v14823_v8  ;;  %11349 = vmatprep.subr.bf16.mxu1 %v14825_v10  ;;  %v1059_v16 = vld [vmem:[#allocation5 + $0x1cb0] sm:$0xff]  ;;  %v1056_v8 = vld [vmem:[#allocation5 + $0x1c98] sm:$0xff] }
 0x533   :  { %v1060_v10 = vld [vmem:[#allocation5 + $0x1cb8] sm:$0xff]  ;;  %v14871_v15 = vcombine.high %v1055_v6, %v1059_v16  ;;  %v14870_v28 = vcombine.low %v1055_v6, %v1059_v16  ;;  %v1099_v0 = vld [vmem:[#allocation5 + $0x1df0] sm:$0xff] }
 0x534   :  { %v14873_v2 = vcombine.high %v1056_v8, %v1060_v10  ;;  %v14911_v6 = vcombine.high %v1095_v61, %v1099_v0 }
 0x535   :  { %10834 = vmatpush1.bf16.msra.mxu0 %v14822_v57  ;;  %11350 = vmatpush1.bf16.msra.mxu1 %v14824_v34  ;;  %v1063_v57 = vld [vmem:[#allocation5 + $0x1cd0] sm:$0xff] }
 0x536   :  { %10835 = vmatprep.subr.bf16.mxu0 %v14831_v26  ;;  %11351 = vmatprep.subr.bf16.mxu1 %v14833_v58  ;;  %v1067_v34 = vld [vmem:[#allocation5 + $0x1cf0] sm:$0xff]  ;;  %v1064_v26 = vld [vmem:[#allocation5 + $0x1cd8] sm:$0xff] }
 0x537   :  { %v1068_v58 = vld [vmem:[#allocation5 + $0x1cf8] sm:$0xff]  ;;  %v14879_v39 = vcombine.high %v1063_v57, %v1067_v34 }
 0x538   :  { %v14881_v14 = vcombine.high %v1064_v26, %v1068_v58  ;;  %v14880_v17 = vcombine.low %v1064_v26, %v1068_v58  ;;  %v1111_v26 = vld [vmem:[#allocation5 + $0x1e50] sm:$0xff] }
 0x539   :  { %10836 = vmatpush1.bf16.msra.mxu0 %v14830_v22  ;;  %11352 = vmatpush1.bf16.msra.mxu1 %v14832_v63  ;;  %v1075_v22 = vld [vmem:[#allocation5 + $0x1d30] sm:$0xff]  ;;  %v1072_v63 = vld [vmem:[#allocation5 + $0x1d18] sm:$0xff] }
 0x53a   :  { %10837 = vmatprep.subr.bf16.mxu0 %v14839_v53  ;;  %11353 = vmatprep.subr.bf16.mxu1 %v14841_v12  ;;  %v1076_v53 = vld [vmem:[#allocation5 + $0x1d38] sm:$0xff]  ;;  %v14878_v12 = vcombine.low %v1063_v57, %v1067_v34  ;;  %v14887_v18 = vcombine.high %v1071_v31, %v1075_v22  ;;  %v1115_v58 = vld [vmem:[#allocation5 + $0x1e70] sm:$0xff] }
 0x53d   :  { %10838 = vmatpush1.bf16.msra.mxu0 %v14838_v21  ;;  %11354 = vmatpush1.bf16.msra.mxu1 %v14840_v20  ;;  %v1080_v21 = vld [vmem:[#allocation5 + $0x1d58] sm:$0xff] }
 0x53e   :  { %10839 = vmatprep.subr.bf16.mxu0 %v14847_v40  ;;  %11355 = vmatprep.subr.bf16.mxu1 %v14849_v43  ;;  %v1084_v20 = vld [vmem:[#allocation5 + $0x1d78] sm:$0xff]  ;;  %v14886_v40 = vcombine.low %v1071_v31, %v1075_v22  ;;  %v14888_v43 = vcombine.low %v1072_v63, %v1076_v53  ;;  %v14927_v31 = vcombine.high %v1111_v26, %v1115_v58 }
 0x53f   :  { %v14897_v50 = vcombine.high %v1080_v21, %v1084_v20 }
 0x541   :  { %10840 = vmatpush1.bf16.msra.mxu0 %v14846_v27  ;;  %11356 = vmatpush1.bf16.msra.mxu1 %v14848_v59  ;;  %v1088_v27 = vld [vmem:[#allocation5 + $0x1d98] sm:$0xff] }
 0x542   :  { %10852 = vmatprep.subr.bf16.mxu0 %v14855_v48  ;;  %11368 = vmatprep.subr.bf16.mxu1 %v14857_v49  ;;  %v1092_v59 = vld [vmem:[#allocation5 + $0x1db8] sm:$0xff]  ;;  %v14894_v48 = vcombine.low %v1079_v41, %v1083_v42  ;;  %v14896_v49 = vcombine.low %v1080_v21, %v1084_v20  ;;  %v1127_v21 = vld [vmem:[#allocation5 + $0x1ed0] sm:$0xff] }
 0x543   :  { %v14905_v60 = vcombine.high %v1088_v27, %v1092_v59  ;;  %v1131_v20 = vld [vmem:[#allocation5 + $0x1ef0] sm:$0xff] }
 0x544   :  { %10842 = vmatmul.mubr.bf16.vlgmr.msra.gmra.mrb[4].mxu0 %v16926_v4  ;;  %11358 = vmatmul.mubr.bf16.vlgmr.msra.gmra.mrb[4].mxu1 %v16926_v4  ;;  %v14872_v4 = vcombine.low %v1056_v8, %v1060_v10  ;;  %v1103_v8 = vld [vmem:[#allocation5 + $0x1e10] sm:$0xff] }
 0x545   :  { %10853 = vmatpush1.bf16.msra.mxu0 %v14854_v51  ;;  %11369 = vmatpush1.bf16.msra.mxu1 %v14856_v46  ;;  %v1096_v51 = vld [vmem:[#allocation5 + $0x1dd8] sm:$0xff]  ;;  %v1107_v10 = vld [vmem:[#allocation5 + $0x1e30] sm:$0xff] }
 0x546   :  { %10854 = vmatprep.subr.bf16.mxu0 %v14863_v55  ;;  %11370 = vmatprep.subr.bf16.mxu1 %v14865_v62  ;;  %v1100_v46 = vld [vmem:[#allocation5 + $0x1df8] sm:$0xff]  ;;  %v14902_v55 = vcombine.low %v1087_v1, %v1091_v3  ;;  %v14904_v62 = vcombine.low %v1088_v27, %v1092_v59  ;;  %v14919_v57 = vcombine.high %v1103_v8, %v1107_v10  ;;  %v1135_v27 = vld [vmem:[#allocation5 + $0x1f10] sm:$0xff] }
 0x547   :  { %10884 = vmatprep.mubr.bf16.mxu0 %v16934_v52  ;;  %11400 = vmatprep.mubr.bf16.mxu1 %v16934_v52  ;;  %v14889_v52 = vcombine.high %v1072_v63, %v1076_v53  ;;  %v14913_v16 = vcombine.high %v1096_v51, %v1100_v46  ;;  %v1119_v63 = vld [vmem:[#allocation5 + $0x1e90] sm:$0xff]  ;;  %v14943_v1 = vcombine.high %v1127_v21, %v1131_v20 }
 0x548   :  { %v1123_v53 = vld [vmem:[#allocation5 + $0x1eb0] sm:$0xff] }
 0x549   :  { %10855 = vmatpush1.bf16.msra.mxu0 %v14862_v11  ;;  %11371 = vmatpush1.bf16.msra.mxu1 %v14864_v33  ;;  %v1104_v11 = vld [vmem:[#allocation5 + $0x1e18] sm:$0xff]  ;;  %v14935_v41 = vcombine.high %v1119_v63, %v1123_v53  ;;  %v1139_v59 = vld [vmem:[#allocation5 + $0x1f30] sm:$0xff] }
 0x54a   :  { %10856 = vmatprep.subr.bf16.mxu0 %v14871_v15  ;;  %11372 = vmatprep.subr.bf16.mxu1 %v14873_v2  ;;  %v1108_v33 = vld [vmem:[#allocation5 + $0x1e38] sm:$0xff]  ;;  %v14910_v15 = vcombine.low %v1095_v61, %v1099_v0  ;;  %v14912_v2 = vcombine.low %v1096_v51, %v1100_v46  ;;  %v14951_v61 = vcombine.high %v1135_v27, %v1139_v59  ;;  %v1143_v51 = vld [vmem:[#allocation5 + $0x1f50] sm:$0xff] }
 0x54b   :  { %v14921_v34 = vcombine.high %v1104_v11, %v1108_v33  ;;  %v1147_v46 = vld [vmem:[#allocation5 + $0x1f70] sm:$0xff] }
 0x54d   :  { %10857 = vmatpush1.bf16.msra.mxu0 %v14870_v28  ;;  %11373 = vmatpush1.bf16.msra.mxu1 %v14872_v4  ;;  %v1112_v28 = vld [vmem:[#allocation5 + $0x1e58] sm:$0xff] }
 0x54e   :  { %10858 = vmatprep.subr.bf16.mxu0 %v14879_v39  ;;  %11374 = vmatprep.subr.bf16.mxu1 %v14881_v14  ;;  %v1116_v4 = vld [vmem:[#allocation5 + $0x1e78] sm:$0xff]  ;;  %v14918_v39 = vcombine.low %v1103_v8, %v1107_v10  ;;  %v14920_v14 = vcombine.low %v1104_v11, %v1108_v33  ;;  %v14959_v8 = vcombine.high %v1143_v51, %v1147_v46  ;;  %v1151_v11 = vld [vmem:[#allocation5 + $0x1f90] sm:$0xff] }
 0x54f   :  { %v14929_v22 = vcombine.high %v1112_v28, %v1116_v4  ;;  %v1155_v33 = vld [vmem:[#allocation5 + $0x1fb0] sm:$0xff] }
 0x551   :  { %10859 = vmatpush1.bf16.msra.mxu0 %v14878_v12  ;;  %11375 = vmatpush1.bf16.msra.mxu1 %v14880_v17  ;;  %v1120_v12 = vld [vmem:[#allocation5 + $0x1e98] sm:$0xff] }
 0x552   :  { %10860 = vmatprep.subr.bf16.mxu0 %v14887_v18  ;;  %11376 = vmatprep.subr.bf16.mxu1 %v14889_v52  ;;  %v1124_v17 = vld [vmem:[#allocation5 + $0x1eb8] sm:$0xff]  ;;  %v14926_v18 = vcombine.low %v1111_v26, %v1115_v58  ;;  %v14928_v52 = vcombine.low %v1112_v28, %v1116_v4  ;;  %v14967_v26 = vcombine.high %v1151_v11, %v1155_v33  ;;  %v1159_v28 = vld [vmem:[#allocation5 + $0x1fd0] sm:$0xff] }
 0x553   :  { %v14937_v42 = vcombine.high %v1120_v12, %v1124_v17  ;;  %v1163_v4 = vld [vmem:[#allocation5 + $0x1ff0] sm:$0xff] }
 0x555   :  { %10861 = vmatpush1.bf16.msra.mxu0 %v14886_v40  ;;  %11377 = vmatpush1.bf16.msra.mxu1 %v14888_v43  ;;  %v1128_v40 = vld [vmem:[#allocation5 + $0x1ed8] sm:$0xff] }
 0x556   :  { %10862 = vmatprep.subr.bf16.mxu0 %v14895_v44  ;;  %11378 = vmatprep.subr.bf16.mxu1 %v14897_v50  ;;  %v1132_v43 = vld [vmem:[#allocation5 + $0x1ef8] sm:$0xff]  ;;  %v14934_v44 = vcombine.low %v1119_v63, %v1123_v53  ;;  %v14936_v50 = vcombine.low %v1120_v12, %v1124_v17  ;;  %v14975_v63 = vcombine.high %v1159_v28, %v1163_v4  ;;  %v1167_v12 = vld [vmem:[#allocation5 + $0x2010] sm:$0xff] }
 0x557   :  { %v14945_v3 = vcombine.high %v1128_v40, %v1132_v43  ;;  %v1171_v17 = vld [vmem:[#allocation5 + $0x2030] sm:$0xff] }
 0x559   :  { %10863 = vmatpush1.bf16.msra.mxu0 %v14894_v48  ;;  %11379 = vmatpush1.bf16.msra.mxu1 %v14896_v49  ;;  %v1136_v48 = vld [vmem:[#allocation5 + $0x1f18] sm:$0xff] }
 0x55a   :  { %10864 = vmatprep.subr.bf16.mxu0 %v14903_v29  ;;  %11380 = vmatprep.subr.bf16.mxu1 %v14905_v60  ;;  %v1140_v49 = vld [vmem:[#allocation5 + $0x1f38] sm:$0xff]  ;;  %v14942_v29 = vcombine.low %v1127_v21, %v1131_v20  ;;  %v14944_v60 = vcombine.low %v1128_v40, %v1132_v43  ;;  %v14983_v21 = vcombine.high %v1167_v12, %v1171_v17  ;;  %v1175_v40 = vld [vmem:[#allocation5 + $0x2050] sm:$0xff] }
 0x55b   :  { %v14953_v0 = vcombine.high %v1136_v48, %v1140_v49  ;;  %v1179_v43 = vld [vmem:[#allocation5 + $0x2070] sm:$0xff] }
 0x55d   :  { %10865 = vmatpush1.bf16.msra.mxu0 %v14902_v55  ;;  %11381 = vmatpush1.bf16.msra.mxu1 %v14904_v62  ;;  %v1144_v55 = vld [vmem:[#allocation5 + $0x1f58] sm:$0xff] }
 0x55e   :  { %10866 = vmatprep.subr.bf16.mxu0 %v14911_v6  ;;  %11382 = vmatprep.subr.bf16.mxu1 %v14913_v16  ;;  %v1148_v62 = vld [vmem:[#allocation5 + $0x1f78] sm:$0xff]  ;;  %v14950_v6 = vcombine.low %v1135_v27, %v1139_v59  ;;  %v14952_v16 = vcombine.low %v1136_v48, %v1140_v49  ;;  %v14991_v27 = vcombine.high %v1175_v40, %v1179_v43  ;;  %v1183_v48 = vld [vmem:[#allocation5 + $0x2090] sm:$0xff] }
 0x55f   :  { %v14961_v10 = vcombine.high %v1144_v55, %v1148_v62  ;;  %v1187_v49 = vld [vmem:[#allocation5 + $0x20b0] sm:$0xff] }
 0x561   :  { %10867 = vmatpush1.bf16.msra.mxu0 %v14910_v15  ;;  %11383 = vmatpush1.bf16.msra.mxu1 %v14912_v2  ;;  %v1152_v15 = vld [vmem:[#allocation5 + $0x1f98] sm:$0xff] }
 0x562   :  { %10868 = vmatprep.subr.bf16.mxu0 %v14919_v57  ;;  %11384 = vmatprep.subr.bf16.mxu1 %v14921_v34  ;;  %v1156_v2 = vld [vmem:[#allocation5 + $0x1fb8] sm:$0xff]  ;;  %v14958_v57 = vcombine.low %v1143_v51, %v1147_v46  ;;  %v14960_v34 = vcombine.low %v1144_v55, %v1148_v62  ;;  %v14999_v51 = vcombine.high %v1183_v48, %v1187_v49  ;;  %v1191_v55 = vld [vmem:[#allocation5 + $0x20d0] sm:$0xff] }
 0x563   :  { %v14969_v58 = vcombine.high %v1152_v15, %v1156_v2  ;;  %v1195_v62 = vld [vmem:[#allocation5 + $0x20f0] sm:$0xff] }
 0x565   :  { %10869 = vmatpush1.bf16.msra.mxu0 %v14918_v39  ;;  %11385 = vmatpush1.bf16.msra.mxu1 %v14920_v14  ;;  %v1160_v39 = vld [vmem:[#allocation5 + $0x1fd8] sm:$0xff] }
 0x566   :  { %10870 = vmatprep.subr.bf16.mxu0 %v14927_v31  ;;  %11386 = vmatprep.subr.bf16.mxu1 %v14929_v22  ;;  %v1164_v14 = vld [vmem:[#allocation5 + $0x1ff8] sm:$0xff]  ;;  %v14966_v31 = vcombine.low %v1151_v11, %v1155_v33  ;;  %v14968_v22 = vcombine.low %v1152_v15, %v1156_v2  ;;  %v1199_v33 = vld [vmem:[#allocation5 + $0x2110] sm:$0xff] }
 0x567   :  { %v14977_v53 = vcombine.high %v1160_v39, %v1164_v14  ;;  %v1203_v15 = vld [vmem:[#allocation5 + $0x2130] sm:$0xff]  ;;  %v1200_v2 = vld [vmem:[#allocation5 + $0x2118] sm:$0xff] }
 0x569   :  { %10871 = vmatpush1.bf16.msra.mxu0 %v14926_v18  ;;  %11387 = vmatpush1.bf16.msra.mxu1 %v14928_v52  ;;  %v1168_v18 = vld [vmem:[#allocation5 + $0x2018] sm:$0xff] }
 0x56a   :  { %10872 = vmatprep.subr.bf16.mxu0 %v14935_v41  ;;  %11388 = vmatprep.subr.bf16.mxu1 %v14937_v42  ;;  %v1172_v52 = vld [vmem:[#allocation5 + $0x2038] sm:$0xff]  ;;  %v14974_v41 = vcombine.low %v1159_v28, %v1163_v4  ;;  %v14976_v42 = vcombine.low %v1160_v39, %v1164_v14  ;;  %v1207_v28 = vld [vmem:[#allocation5 + $0x2150] sm:$0xff] }
 0x56b   :  { %v14985_v20 = vcombine.high %v1168_v18, %v1172_v52  ;;  %v1211_v4 = vld [vmem:[#allocation5 + $0x2170] sm:$0xff]  ;;  %v1208_v39 = vld [vmem:[#allocation5 + $0x2158] sm:$0xff] }
 0x56c   :  { %v1212_v14 = vld [vmem:[#allocation5 + $0x2178] sm:$0xff] }
 0x56d   :  { %10873 = vmatpush1.bf16.msra.mxu0 %v14934_v44  ;;  %11389 = vmatpush1.bf16.msra.mxu1 %v14936_v50  ;;  %v1176_v44 = vld [vmem:[#allocation5 + $0x2058] sm:$0xff] }
 0x56e   :  { %10874 = vmatprep.subr.bf16.mxu0 %v14943_v1  ;;  %11390 = vmatprep.subr.bf16.mxu1 %v14945_v3  ;;  %v1180_v50 = vld [vmem:[#allocation5 + $0x2078] sm:$0xff]  ;;  %v14982_v1 = vcombine.low %v1167_v12, %v1171_v17  ;;  %v14984_v3 = vcombine.low %v1168_v18, %v1172_v52  ;;  %v1215_v12 = vld [vmem:[#allocation5 + $0x2190] sm:$0xff] }
 0x56f   :  { %v14993_v59 = vcombine.high %v1176_v44, %v1180_v50  ;;  %v1219_v17 = vld [vmem:[#allocation5 + $0x21b0] sm:$0xff]  ;;  %v1216_v18 = vld [vmem:[#allocation5 + $0x2198] sm:$0xff] }
 0x570   :  { %v1220_v52 = vld [vmem:[#allocation5 + $0x21b8] sm:$0xff] }
 0x571   :  { %10875 = vmatpush1.bf16.msra.mxu0 %v14942_v29  ;;  %11391 = vmatpush1.bf16.msra.mxu1 %v14944_v60  ;;  %v1184_v29 = vld [vmem:[#allocation5 + $0x2098] sm:$0xff] }
 0x572   :  { %10876 = vmatprep.subr.bf16.mxu0 %v14951_v61  ;;  %11392 = vmatprep.subr.bf16.mxu1 %v14953_v0  ;;  %v1188_v60 = vld [vmem:[#allocation5 + $0x20b8] sm:$0xff]  ;;  %v14990_v61 = vcombine.low %v1175_v40, %v1179_v43  ;;  %v14992_v0 = vcombine.low %v1176_v44, %v1180_v50  ;;  %v1223_v40 = vld [vmem:[#allocation5 + $0x21d0] sm:$0xff] }
 0x573   :  { %v15001_v46 = vcombine.high %v1184_v29, %v1188_v60  ;;  %v1227_v43 = vld [vmem:[#allocation5 + $0x21f0] sm:$0xff]  ;;  %v1224_v44 = vld [vmem:[#allocation5 + $0x21d8] sm:$0xff] }
 0x574   :  { %v1228_v50 = vld [vmem:[#allocation5 + $0x21f8] sm:$0xff] }
 0x575   :  { %10877 = vmatpush1.bf16.msra.mxu0 %v14950_v6  ;;  %11393 = vmatpush1.bf16.msra.mxu1 %v14952_v16  ;;  %v1192_v6 = vld [vmem:[#allocation5 + $0x20d8] sm:$0xff] }
 0x576   :  { %10878 = vmatprep.subr.bf16.mxu0 %v14959_v8  ;;  %11394 = vmatprep.subr.bf16.mxu1 %v14961_v10  ;;  %v1196_v16 = vld [vmem:[#allocation5 + $0x20f8] sm:$0xff]  ;;  %v14998_v8 = vcombine.low %v1183_v48, %v1187_v49  ;;  %v15007_v10 = vcombine.high %v1191_v55, %v1195_v62  ;;  %v1231_v48 = vld [vmem:[#allocation5 + $0x2210] sm:$0xff] }
 0x577   :  { %v15009_v11 = vcombine.high %v1192_v6, %v1196_v16  ;;  %v1235_v49 = vld [vmem:[#allocation5 + $0x2230] sm:$0xff] }
 0x579   :  { %10879 = vmatpush1.bf16.msra.mxu0 %v14958_v57  ;;  %11395 = vmatpush1.bf16.msra.mxu1 %v14960_v34  ;;  %v1204_v57 = vld [vmem:[#allocation5 + $0x2138] sm:$0xff]  ;;  %v15006_v34 = vcombine.low %v1191_v55, %v1195_v62  ;;  %v1239_v55 = vld [vmem:[#allocation5 + $0x2250] sm:$0xff] }
 0x57a   :  { %10880 = vmatprep.subr.bf16.mxu0 %v14967_v26  ;;  %11396 = vmatprep.subr.bf16.mxu1 %v14969_v58  ;;  %v15008_v26 = vcombine.low %v1192_v6, %v1196_v16  ;;  %v15015_v58 = vcombine.high %v1199_v33, %v1203_v15  ;;  %v1243_v62 = vld [vmem:[#allocation5 + $0x2270] sm:$0xff]  ;;  %v1240_v6 = vld [vmem:[#allocation5 + $0x2258] sm:$0xff] }
 0x57b   :  { %v1244_v16 = vld [vmem:[#allocation5 + $0x2278] sm:$0xff] }
 0x57d   :  { %10881 = vmatpush1.bf16.msra.mxu0 %v14966_v31  ;;  %11397 = vmatpush1.bf16.msra.mxu1 %v14968_v22  ;;  %v15014_v31 = vcombine.low %v1199_v33, %v1203_v15  ;;  %v15016_v22 = vcombine.low %v1200_v2, %v1204_v57  ;;  %v1247_v33 = vld [vmem:[#allocation5 + $0x2290] sm:$0xff] }
 0x57e   :  { %10882 = vmatprep.subr.bf16.mxu0 %v14975_v63  ;;  %11398 = vmatprep.subr.bf16.mxu1 %v14977_v53  ;;  %v15023_v63 = vcombine.high %v1207_v28, %v1211_v4  ;;  %v15025_v53 = vcombine.high %v1208_v39, %v1212_v14  ;;  %v1251_v15 = vld [vmem:[#allocation5 + $0x22b0] sm:$0xff] }
 0x581   :  { %10883 = vmatpush1.bf16.msra.mxu0 %v14974_v41  ;;  %11399 = vmatpush1.bf16.msra.mxu1 %v14976_v42  ;;  %v15022_v41 = vcombine.low %v1207_v28, %v1211_v4  ;;  %v15024_v42 = vcombine.low %v1208_v39, %v1212_v14  ;;  %v1255_v28 = vld [vmem:[#allocation5 + $0x22d0] sm:$0xff]  ;;  %v1256_v39 = vld [vmem:[#allocation5 + $0x22d8] sm:$0xff] }
 0x582   :  { %10895 = vmatprep.subr.bf16.mxu0 %v14983_v21  ;;  %11411 = vmatprep.subr.bf16.mxu1 %v14985_v20  ;;  %v15031_v21 = vcombine.high %v1215_v12, %v1219_v17  ;;  %v15033_v20 = vcombine.high %v1216_v18, %v1220_v52  ;;  %v1259_v4 = vld [vmem:[#allocation5 + $0x22f0] sm:$0xff]  ;;  %v1260_v14 = vld [vmem:[#allocation5 + $0x22f8] sm:$0xff] }
 0x584   :  { %10885 = vmatmul.mubr.bf16.vlgmr.msra.gmra.mrb[4].mxu0 %v16942_v23  ;;  %11401 = vmatmul.mubr.bf16.vlgmr.msra.gmra.mrb[4].mxu1 %v16942_v23  ;;  %v15000_v23 = vcombine.low %v1184_v29, %v1188_v60  ;;  %v1232_v29 = vld [vmem:[#allocation5 + $0x2218] sm:$0xff] }
 0x585   :  { %10896 = vmatpush1.bf16.msra.mxu0 %v14982_v1  ;;  %11412 = vmatpush1.bf16.msra.mxu1 %v14984_v3  ;;  %v15030_v1 = vcombine.low %v1215_v12, %v1219_v17  ;;  %v15032_v3 = vcombine.low %v1216_v18, %v1220_v52  ;;  %v1236_v60 = vld [vmem:[#allocation5 + $0x2238] sm:$0xff]  ;;  %v1263_v12 = vld [vmem:[#allocation5 + $0x2310] sm:$0xff] }
 0x586   :  { %10897 = vmatprep.subr.bf16.mxu0 %v14991_v27  ;;  %11413 = vmatprep.subr.bf16.mxu1 %v14993_v59  ;;  %v15039_v27 = vcombine.high %v1223_v40, %v1227_v43  ;;  %v15041_v59 = vcombine.high %v1224_v44, %v1228_v50  ;;  %v1267_v17 = vld [vmem:[#allocation5 + $0x2330] sm:$0xff]  ;;  %v1264_v18 = vld [vmem:[#allocation5 + $0x2318] sm:$0xff] }
 0x587   :  { %10927 = vmatprep.mubr.bf16.mxu0 %v16950_v38  ;;  %11443 = vmatprep.mubr.bf16.mxu1 %v16950_v38  ;;  %v15017_v38 = vcombine.high %v1200_v2, %v1204_v57  ;;  %v1248_v2 = vld [vmem:[#allocation5 + $0x2298] sm:$0xff] }
 0x588   :  { %v1252_v57 = vld [vmem:[#allocation5 + $0x22b8] sm:$0xff] }
 0x589   :  { %10898 = vmatpush1.bf16.msra.mxu0 %v14990_v61  ;;  %11414 = vmatpush1.bf16.msra.mxu1 %v14992_v0  ;;  %v15038_v61 = vcombine.low %v1223_v40, %v1227_v43  ;;  %v15040_v0 = vcombine.low %v1224_v44, %v1228_v50  ;;  %v1268_v52 = vld [vmem:[#allocation5 + $0x2338] sm:$0xff]  ;;  %v1271_v40 = vld [vmem:[#allocation5 + $0x2350] sm:$0xff] }
 0x58a   :  { %10899 = vmatprep.subr.bf16.mxu0 %v14999_v51  ;;  %11415 = vmatprep.subr.bf16.mxu1 %v15001_v46  ;;  %v15047_v51 = vcombine.high %v1231_v48, %v1235_v49  ;;  %v15049_v46 = vcombine.high %v1232_v29, %v1236_v60  ;;  %v1275_v43 = vld [vmem:[#allocation5 + $0x2370] sm:$0xff]  ;;  %v1272_v44 = vld [vmem:[#allocation5 + $0x2358] sm:$0xff] }
 0x58b   :  { %v1276_v50 = vld [vmem:[#allocation5 + $0x2378] sm:$0xff] }
 0x58d   :  { %10900 = vmatpush1.bf16.msra.mxu0 %v14998_v8  ;;  %11416 = vmatpush1.bf16.msra.mxu1 %v15000_v23  ;;  %v15046_v8 = vcombine.low %v1231_v48, %v1235_v49  ;;  %v15048_v23 = vcombine.low %v1232_v29, %v1236_v60  ;;  %v1279_v48 = vld [vmem:[#allocation5 + $0x2390] sm:$0xff]  ;;  %v1280_v29 = vld [vmem:[#allocation5 + $0x2398] sm:$0xff] }
 0x58e   :  { %10901 = vmatprep.subr.bf16.mxu0 %v15007_v10  ;;  %11417 = vmatprep.subr.bf16.mxu1 %v15009_v11  ;;  %v15055_v10 = vcombine.high %v1239_v55, %v1243_v62  ;;  %v15057_v11 = vcombine.high %v1240_v6, %v1244_v16  ;;  %v1283_v49 = vld [vmem:[#allocation5 + $0x23b0] sm:$0xff]  ;;  %v1284_v60 = vld [vmem:[#allocation5 + $0x23b8] sm:$0xff] }
 0x591   :  { %10902 = vmatpush1.bf16.msra.mxu0 %v15006_v34  ;;  %11418 = vmatpush1.bf16.msra.mxu1 %v15008_v26  ;;  %v15054_v34 = vcombine.low %v1239_v55, %v1243_v62  ;;  %v15056_v26 = vcombine.low %v1240_v6, %v1244_v16  ;;  %v1287_v55 = vld [vmem:[#allocation5 + $0x23d0] sm:$0xff]  ;;  %v1288_v6 = vld [vmem:[#allocation5 + $0x23d8] sm:$0xff] }
 0x592   :  { %10903 = vmatprep.subr.bf16.mxu0 %v15015_v58  ;;  %11419 = vmatprep.subr.bf16.mxu1 %v15017_v38  ;;  %v15063_v58 = vcombine.high %v1247_v33, %v1251_v15  ;;  %v15065_v38 = vcombine.high %v1248_v2, %v1252_v57  ;;  %v1291_v62 = vld [vmem:[#allocation5 + $0x23f0] sm:$0xff]  ;;  %v1292_v16 = vld [vmem:[#allocation5 + $0x23f8] sm:$0xff] }
 0x595   :  { %10904 = vmatpush1.bf16.msra.mxu0 %v15014_v31  ;;  %11420 = vmatpush1.bf16.msra.mxu1 %v15016_v22  ;;  %v15062_v31 = vcombine.low %v1247_v33, %v1251_v15  ;;  %v15064_v22 = vcombine.low %v1248_v2, %v1252_v57  ;;  %v1295_v33 = vld [vmem:[#allocation5 + $0x2410] sm:$0xff]  ;;  %v1296_v2 = vld [vmem:[#allocation5 + $0x2418] sm:$0xff] }
 0x596   :  { %10905 = vmatprep.subr.bf16.mxu0 %v15023_v63  ;;  %11421 = vmatprep.subr.bf16.mxu1 %v15025_v53  ;;  %v15071_v63 = vcombine.high %v1255_v28, %v1259_v4  ;;  %v15073_v53 = vcombine.high %v1256_v39, %v1260_v14  ;;  %v1299_v15 = vld [vmem:[#allocation5 + $0x2430] sm:$0xff]  ;;  %v1300_v57 = vld [vmem:[#allocation5 + $0x2438] sm:$0xff] }
 0x599   :  { %10906 = vmatpush1.bf16.msra.mxu0 %v15022_v41  ;;  %11422 = vmatpush1.bf16.msra.mxu1 %v15024_v42  ;;  %v15070_v41 = vcombine.low %v1255_v28, %v1259_v4  ;;  %v15072_v42 = vcombine.low %v1256_v39, %v1260_v14  ;;  %v1303_v28 = vld [vmem:[#allocation5 + $0x2450] sm:$0xff]  ;;  %v1304_v39 = vld [vmem:[#allocation5 + $0x2458] sm:$0xff] }
 0x59a   :  { %10907 = vmatprep.subr.bf16.mxu0 %v15031_v21  ;;  %11423 = vmatprep.subr.bf16.mxu1 %v15033_v20  ;;  %v15079_v21 = vcombine.high %v1263_v12, %v1267_v17  ;;  %v15081_v20 = vcombine.high %v1264_v18, %v1268_v52  ;;  %v1307_v4 = vld [vmem:[#allocation5 + $0x2470] sm:$0xff]  ;;  %v1308_v14 = vld [vmem:[#allocation5 + $0x2478] sm:$0xff] }
 0x59d   :  { %10908 = vmatpush1.bf16.msra.mxu0 %v15030_v1  ;;  %11424 = vmatpush1.bf16.msra.mxu1 %v15032_v3  ;;  %v15078_v1 = vcombine.low %v1263_v12, %v1267_v17  ;;  %v15080_v3 = vcombine.low %v1264_v18, %v1268_v52  ;;  %v1311_v12 = vld [vmem:[#allocation5 + $0x2490] sm:$0xff]  ;;  %v1312_v18 = vld [vmem:[#allocation5 + $0x2498] sm:$0xff] }
 0x59e   :  { %10909 = vmatprep.subr.bf16.mxu0 %v15039_v27  ;;  %11425 = vmatprep.subr.bf16.mxu1 %v15041_v59  ;;  %v15087_v27 = vcombine.high %v1271_v40, %v1275_v43  ;;  %v15089_v59 = vcombine.high %v1272_v44, %v1276_v50  ;;  %v1315_v17 = vld [vmem:[#allocation5 + $0x24b0] sm:$0xff]  ;;  %v1316_v52 = vld [vmem:[#allocation5 + $0x24b8] sm:$0xff] }
 0x5a1   :  { %10910 = vmatpush1.bf16.msra.mxu0 %v15038_v61  ;;  %11426 = vmatpush1.bf16.msra.mxu1 %v15040_v0  ;;  %v15086_v61 = vcombine.low %v1271_v40, %v1275_v43  ;;  %v15088_v0 = vcombine.low %v1272_v44, %v1276_v50  ;;  %v1319_v40 = vld [vmem:[#allocation5 + $0x24d0] sm:$0xff]  ;;  %v1320_v44 = vld [vmem:[#allocation5 + $0x24d8] sm:$0xff] }
 0x5a2   :  { %10911 = vmatprep.subr.bf16.mxu0 %v15047_v51  ;;  %11427 = vmatprep.subr.bf16.mxu1 %v15049_v46  ;;  %v15095_v51 = vcombine.high %v1279_v48, %v1283_v49  ;;  %v15097_v46 = vcombine.high %v1280_v29, %v1284_v60  ;;  %v1323_v43 = vld [vmem:[#allocation5 + $0x24f0] sm:$0xff]  ;;  %v1324_v50 = vld [vmem:[#allocation5 + $0x24f8] sm:$0xff] }
 0x5a5   :  { %10912 = vmatpush1.bf16.msra.mxu0 %v15046_v8  ;;  %11428 = vmatpush1.bf16.msra.mxu1 %v15048_v23  ;;  %v15094_v8 = vcombine.low %v1279_v48, %v1283_v49  ;;  %v15096_v23 = vcombine.low %v1280_v29, %v1284_v60  ;;  %v1331_v48 = vld [vmem:[#allocation5 + $0x2530] sm:$0xff]  ;;  %v1328_v49 = vld [vmem:[#allocation5 + $0x2518] sm:$0xff]  ;;  %v15134_v60 = vcombine.low %v1319_v40, %v1323_v43 }
 0x5a6   :  { %10913 = vmatprep.subr.bf16.mxu0 %v15055_v10  ;;  %11429 = vmatprep.subr.bf16.mxu1 %v15057_v11  ;;  %v15103_v10 = vcombine.high %v1287_v55, %v1291_v62  ;;  %v15105_v11 = vcombine.high %v1288_v6, %v1292_v16  ;;  %v1332_v29 = vld [vmem:[#allocation5 + $0x2538] sm:$0xff] }
 0x5a9   :  { %10914 = vmatpush1.bf16.msra.mxu0 %v15054_v34  ;;  %11430 = vmatpush1.bf16.msra.mxu1 %v15056_v26  ;;  %v15102_v34 = vcombine.low %v1287_v55, %v1291_v62  ;;  %v15104_v26 = vcombine.low %v1288_v6, %v1292_v16  ;;  %v1336_v55 = vld [vmem:[#allocation5 + $0x2558] sm:$0xff]  ;;  %v15144_v16 = vcombine.low %v1328_v49, %v1332_v29 }
 0x5aa   :  { %10915 = vmatprep.subr.bf16.mxu0 %v15063_v58  ;;  %11431 = vmatprep.subr.bf16.mxu1 %v15065_v38  ;;  %v15111_v58 = vcombine.high %v1295_v33, %v1299_v15  ;;  %v15113_v38 = vcombine.high %v1296_v2, %v1300_v57  ;;  %v1340_v62 = vld [vmem:[#allocation5 + $0x2578] sm:$0xff] }
 0x5ad   :  { %10916 = vmatpush1.bf16.msra.mxu0 %v15062_v31  ;;  %11432 = vmatpush1.bf16.msra.mxu1 %v15064_v22  ;;  %v15110_v31 = vcombine.low %v1295_v33, %v1299_v15  ;;  %v15112_v22 = vcombine.low %v1296_v2, %v1300_v57  ;;  %v1344_v33 = vld [vmem:[#allocation5 + $0x2598] sm:$0xff]  ;;  %v15152_v57 = vcombine.low %v1336_v55, %v1340_v62 }
 0x5ae   :  { %10917 = vmatprep.subr.bf16.mxu0 %v15071_v63  ;;  %11433 = vmatprep.subr.bf16.mxu1 %v15073_v53  ;;  %v15119_v63 = vcombine.high %v1303_v28, %v1307_v4  ;;  %v15121_v53 = vcombine.high %v1304_v39, %v1308_v14  ;;  %v1348_v15 = vld [vmem:[#allocation5 + $0x25b8] sm:$0xff] }
 0x5b1   :  { %10918 = vmatpush1.bf16.msra.mxu0 %v15070_v41  ;;  %11434 = vmatpush1.bf16.msra.mxu1 %v15072_v42  ;;  %v15118_v41 = vcombine.low %v1303_v28, %v1307_v4  ;;  %v15120_v42 = vcombine.low %v1304_v39, %v1308_v14  ;;  %v1352_v28 = vld [vmem:[#allocation5 + $0x25d8] sm:$0xff]  ;;  %v15160_v14 = vcombine.low %v1344_v33, %v1348_v15 }
 0x5b2   :  { %10919 = vmatprep.subr.bf16.mxu0 %v15079_v21  ;;  %11435 = vmatprep.subr.bf16.mxu1 %v15081_v20  ;;  %v15127_v21 = vcombine.high %v1311_v12, %v1315_v17  ;;  %v15129_v20 = vcombine.high %v1312_v18, %v1316_v52  ;;  %v1356_v4 = vld [vmem:[#allocation5 + $0x25f8] sm:$0xff] }
 0x5b5   :  { %10920 = vmatpush1.bf16.msra.mxu0 %v15078_v1  ;;  %11436 = vmatpush1.bf16.msra.mxu1 %v15080_v3  ;;  %v15126_v1 = vcombine.low %v1311_v12, %v1315_v17  ;;  %v15135_v3 = vcombine.high %v1319_v40, %v1323_v43  ;;  %v1360_v12 = vld [vmem:[#allocation5 + $0x2618] sm:$0xff] }
 0x5b6   :  { %10921 = vmatprep.subr.bf16.mxu0 %v15087_v27  ;;  %11437 = vmatprep.subr.bf16.mxu1 %v15089_v59  ;;  %v15137_v27 = vcombine.high %v1320_v44, %v1324_v50  ;;  %v1327_v59 = vld [vmem:[#allocation5 + $0x2510] sm:$0xff]  ;;  %v1364_v17 = vld [vmem:[#allocation5 + $0x2638] sm:$0xff] }
 0x5b7   :  { %v15142_v6 = vcombine.low %v1327_v59, %v1331_v48  ;;  %v1368_v40 = vld [vmem:[#allocation5 + $0x2658] sm:$0xff] }
 0x5b8   :  { %v1372_v43 = vld [vmem:[#allocation5 + $0x2678] sm:$0xff] }
 0x5b9   :  { %10922 = vmatpush1.bf16.msra.mxu0 %v15086_v61  ;;  %11438 = vmatpush1.bf16.msra.mxu1 %v15088_v0  ;;  %v15136_v61 = vcombine.low %v1320_v44, %v1324_v50  ;;  %v15143_v0 = vcombine.high %v1327_v59, %v1331_v48  ;;  %v15176_v50 = vcombine.low %v1360_v12, %v1364_v17  ;;  %v1376_v59 = vld [vmem:[#allocation5 + $0x2698] sm:$0xff] }
 0x5ba   :  { %10923 = vmatprep.subr.bf16.mxu0 %v15095_v51  ;;  %11439 = vmatprep.subr.bf16.mxu1 %v15097_v46  ;;  %v1335_v51 = vld [vmem:[#allocation5 + $0x2550] sm:$0xff]  ;;  %v1380_v48 = vld [vmem:[#allocation5 + $0x26b8] sm:$0xff] }
 0x5bb   :  { %v1339_v46 = vld [vmem:[#allocation5 + $0x2570] sm:$0xff] }
 0x5bc   :  { %v15150_v2 = vcombine.low %v1335_v51, %v1339_v46 }
 0x5bd   :  { %10924 = vmatpush1.bf16.msra.mxu0 %v15094_v8  ;;  %11440 = vmatpush1.bf16.msra.mxu1 %v15096_v23  ;;  %v15151_v8 = vcombine.high %v1335_v51, %v1339_v46  ;;  %v15153_v23 = vcombine.high %v1336_v55, %v1340_v62  ;;  %v1384_v51 = vld [vmem:[#allocation5 + $0x26d8] sm:$0xff]  ;;  %v15192_v62 = vcombine.low %v1376_v59, %v1380_v48 }
 0x5be   :  { %10925 = vmatprep.subr.bf16.mxu0 %v15103_v10  ;;  %11441 = vmatprep.subr.bf16.mxu1 %v15105_v11  ;;  %v1343_v10 = vld [vmem:[#allocation5 + $0x2590] sm:$0xff]  ;;  %v1388_v46 = vld [vmem:[#allocation5 + $0x26f8] sm:$0xff] }
 0x5bf   :  { %v1347_v11 = vld [vmem:[#allocation5 + $0x25b0] sm:$0xff] }
 0x5c0   :  { %v15158_v39 = vcombine.low %v1343_v10, %v1347_v11 }
 0x5c1   :  { %10926 = vmatpush1.bf16.msra.mxu0 %v15102_v34  ;;  %11442 = vmatpush1.bf16.msra.mxu1 %v15104_v26  ;;  %v15159_v34 = vcombine.high %v1343_v10, %v1347_v11  ;;  %v15161_v26 = vcombine.high %v1344_v33, %v1348_v15  ;;  %v1392_v10 = vld [vmem:[#allocation5 + $0x2718] sm:$0xff]  ;;  %v15200_v15 = vcombine.low %v1384_v51, %v1388_v46 }
 0x5c2   :  { %10938 = vmatprep.subr.bf16.mxu0 %v15111_v58  ;;  %11454 = vmatprep.subr.bf16.mxu1 %v15113_v38  ;;  %v1351_v58 = vld [vmem:[#allocation5 + $0x25d0] sm:$0xff]  ;;  %v1396_v11 = vld [vmem:[#allocation5 + $0x2738] sm:$0xff] }
 0x5c3   :  { %v1355_v38 = vld [vmem:[#allocation5 + $0x25f0] sm:$0xff] }
 0x5c4   :  { %10928 = vmatmul.mubr.bf16.vlgmr.msra.gmra.mrb[4].mxu0 %v16958_v13  ;;  %11444 = vmatmul.mubr.bf16.vlgmr.msra.gmra.mrb[4].mxu1 %v16958_v13  ;;  %v15128_v13 = vcombine.low %v1312_v18, %v1316_v52  ;;  %v15166_v18 = vcombine.low %v1351_v58, %v1355_v38  ;;  %v15168_v52 = vcombine.low %v1352_v28, %v1356_v4 }
 0x5c5   :  { %10939 = vmatpush1.bf16.msra.mxu0 %v15110_v31  ;;  %11455 = vmatpush1.bf16.msra.mxu1 %v15112_v22  ;;  %v15167_v31 = vcombine.high %v1351_v58, %v1355_v38  ;;  %v15169_v22 = vcombine.high %v1352_v28, %v1356_v4  ;;  %v1400_v58 = vld [vmem:[#allocation5 + $0x2758] sm:$0xff]  ;;  %v15208_v4 = vcombine.low %v1392_v10, %v1396_v11 }
 0x5c6   :  { %10940 = vmatprep.subr.bf16.mxu0 %v15119_v63  ;;  %11456 = vmatprep.subr.bf16.mxu1 %v15121_v53  ;;  %v1359_v63 = vld [vmem:[#allocation5 + $0x2610] sm:$0xff]  ;;  %v1404_v38 = vld [vmem:[#allocation5 + $0x2778] sm:$0xff] }
 0x5c7   :  { %10970 = vmatprep.mubr.bf16.mxu0 %v16966_v32  ;;  %11486 = vmatprep.mubr.bf16.mxu1 %v16966_v32  ;;  %v15145_v32 = vcombine.high %v1328_v49, %v1332_v29  ;;  %v1363_v53 = vld [vmem:[#allocation5 + $0x2630] sm:$0xff]  ;;  %v15184_v29 = vcombine.low %v1368_v40, %v1372_v43 }
 0x5c8   :  { %v15174_v44 = vcombine.low %v1359_v63, %v1363_v53 }
 0x5c9   :  { %10941 = vmatpush1.bf16.msra.mxu0 %v15118_v41  ;;  %11457 = vmatpush1.bf16.msra.mxu1 %v15120_v42  ;;  %v15175_v41 = vcombine.high %v1359_v63, %v1363_v53  ;;  %v15177_v42 = vcombine.high %v1360_v12, %v1364_v17  ;;  %v1408_v63 = vld [vmem:[#allocation5 + $0x2798] sm:$0xff]  ;;  %v15216_v17 = vcombine.low %v1400_v58, %v1404_v38 }
 0x5ca   :  { %10942 = vmatprep.subr.bf16.mxu0 %v15127_v21  ;;  %11458 = vmatprep.subr.bf16.mxu1 %v15129_v20  ;;  %v1367_v21 = vld [vmem:[#allocation5 + $0x2650] sm:$0xff]  ;;  %v1412_v53 = vld [vmem:[#allocation5 + $0x27b8] sm:$0xff] }
 0x5cb   :  { %v1371_v20 = vld [vmem:[#allocation5 + $0x2670] sm:$0xff] }
 0x5cc   :  { %v15182_v49 = vcombine.low %v1367_v21, %v1371_v20 }
 0x5cd   :  { %10943 = vmatpush1.bf16.msra.mxu0 %v15126_v1  ;;  %11459 = vmatpush1.bf16.msra.mxu1 %v15128_v13  ;;  %v15183_v1 = vcombine.high %v1367_v21, %v1371_v20  ;;  %v15185_v13 = vcombine.high %v1368_v40, %v1372_v43  ;;  %v1416_v21 = vld [vmem:[#allocation5 + $0x27d8] sm:$0xff]  ;;  %v15224_v43 = vcombine.low %v1408_v63, %v1412_v53 }
 0x5ce   :  { %10944 = vmatprep.subr.bf16.mxu0 %v15135_v3  ;;  %11460 = vmatprep.subr.bf16.mxu1 %v15137_v27  ;;  %v1375_v3 = vld [vmem:[#allocation5 + $0x2690] sm:$0xff]  ;;  %v1420_v20 = vld [vmem:[#allocation5 + $0x27f8] sm:$0xff] }
 0x5cf   :  { %v1379_v27 = vld [vmem:[#allocation5 + $0x26b0] sm:$0xff] }
 0x5d0   :  { %v15190_v55 = vcombine.low %v1375_v3, %v1379_v27 }
 0x5d1   :  { %10945 = vmatpush1.bf16.msra.mxu0 %v15134_v60  ;;  %11461 = vmatpush1.bf16.msra.mxu1 %v15136_v61  ;;  %v15191_v60 = vcombine.high %v1375_v3, %v1379_v27  ;;  %v15193_v61 = vcombine.high %v1376_v59, %v1380_v48  ;;  %v1424_v3 = vld [vmem:[#allocation5 + $0x2818] sm:$0xff]  ;;  %v15232_v48 = vcombine.low %v1416_v21, %v1420_v20 }
 0x5d2   :  { %10946 = vmatprep.subr.bf16.mxu0 %v15143_v0  ;;  %11462 = vmatprep.subr.bf16.mxu1 %v15145_v32  ;;  %v1383_v0 = vld [vmem:[#allocation5 + $0x26d0] sm:$0xff]  ;;  %v1428_v27 = vld [vmem:[#allocation5 + $0x2838] sm:$0xff] }
 0x5d3   :  { %v1387_v32 = vld [vmem:[#allocation5 + $0x26f0] sm:$0xff] }
 0x5d4   :  { %v15198_v33 = vcombine.low %v1383_v0, %v1387_v32 }
 0x5d5   :  { %10947 = vmatpush1.bf16.msra.mxu0 %v15142_v6  ;;  %11463 = vmatpush1.bf16.msra.mxu1 %v15144_v16  ;;  %v15199_v6 = vcombine.high %v1383_v0, %v1387_v32  ;;  %v15201_v16 = vcombine.high %v1384_v51, %v1388_v46  ;;  %v1432_v0 = vld [vmem:[#allocation5 + $0x2858] sm:$0xff]  ;;  %v15240_v46 = vcombine.low %v1424_v3, %v1428_v27 }
 0x5d6   :  { %10948 = vmatprep.subr.bf16.mxu0 %v15151_v8  ;;  %11464 = vmatprep.subr.bf16.mxu1 %v15153_v23  ;;  %v1391_v8 = vld [vmem:[#allocation5 + $0x2710] sm:$0xff]  ;;  %v1436_v32 = vld [vmem:[#allocation5 + $0x2878] sm:$0xff] }
 0x5d7   :  { %v1395_v23 = vld [vmem:[#allocation5 + $0x2730] sm:$0xff] }
 0x5d8   :  { %v15206_v28 = vcombine.low %v1391_v8, %v1395_v23 }
 0x5d9   :  { %10949 = vmatpush1.bf16.msra.mxu0 %v15150_v2  ;;  %11465 = vmatpush1.bf16.msra.mxu1 %v15152_v57  ;;  %v15207_v2 = vcombine.high %v1391_v8, %v1395_v23  ;;  %v15209_v57 = vcombine.high %v1392_v10, %v1396_v11  ;;  %v1440_v8 = vld [vmem:[#allocation5 + $0x2898] sm:$0xff]  ;;  %v15248_v11 = vcombine.low %v1432_v0, %v1436_v32 }
 0x5da   :  { %10950 = vmatprep.subr.bf16.mxu0 %v15159_v34  ;;  %11466 = vmatprep.subr.bf16.mxu1 %v15161_v26  ;;  %v1399_v34 = vld [vmem:[#allocation5 + $0x2750] sm:$0xff]  ;;  %v1444_v23 = vld [vmem:[#allocation5 + $0x28b8] sm:$0xff] }
 0x5db   :  { %v1403_v26 = vld [vmem:[#allocation5 + $0x2770] sm:$0xff] }
 0x5dc   :  { %v15214_v12 = vcombine.low %v1399_v34, %v1403_v26 }
 0x5dd   :  { %10951 = vmatpush1.bf16.msra.mxu0 %v15158_v39  ;;  %11467 = vmatpush1.bf16.msra.mxu1 %v15160_v14  ;;  %v15215_v39 = vcombine.high %v1399_v34, %v1403_v26  ;;  %v15217_v14 = vcombine.high %v1400_v58, %v1404_v38  ;;  %v1448_v34 = vld [vmem:[#allocation5 + $0x28d8] sm:$0xff] }
 0x5de   :  { %10952 = vmatprep.subr.bf16.mxu0 %v15167_v31  ;;  %11468 = vmatprep.subr.bf16.mxu1 %v15169_v22  ;;  %v1407_v31 = vld [vmem:[#allocation5 + $0x2790] sm:$0xff]  ;;  %v1452_v26 = vld [vmem:[#allocation5 + $0x28f8] sm:$0xff] }
 0x5df   :  { %v1411_v22 = vld [vmem:[#allocation5 + $0x27b0] sm:$0xff] }
 0x5e0   :  { %v15222_v40 = vcombine.low %v1407_v31, %v1411_v22 }
 0x5e1   :  { %10953 = vmatpush1.bf16.msra.mxu0 %v15166_v18  ;;  %11469 = vmatpush1.bf16.msra.mxu1 %v15168_v52  ;;  %v15223_v18 = vcombine.high %v1407_v31, %v1411_v22  ;;  %v15225_v52 = vcombine.high %v1408_v63, %v1412_v53  ;;  %v1460_v31 = vld [vmem:[#allocation5 + $0x2938] sm:$0xff]  ;;  %v15264_v63 = vcombine.low %v1448_v34, %v1452_v26 }
 0x5e2   :  { %10954 = vmatprep.subr.bf16.mxu0 %v15175_v41  ;;  %11470 = vmatprep.subr.bf16.mxu1 %v15177_v42  ;;  %v1415_v41 = vld [vmem:[#allocation5 + $0x27d0] sm:$0xff] }
 0x5e3   :  { %v1419_v42 = vld [vmem:[#allocation5 + $0x27f0] sm:$0xff] }
 0x5e4   :  { %v15230_v59 = vcombine.low %v1415_v41, %v1419_v42 }
 0x5e5   :  { %10955 = vmatpush1.bf16.msra.mxu0 %v15174_v44  ;;  %11471 = vmatpush1.bf16.msra.mxu1 %v15176_v50  ;;  %v15231_v44 = vcombine.high %v1415_v41, %v1419_v42  ;;  %v15233_v50 = vcombine.high %v1416_v21, %v1420_v20 }
 0x5e6   :  { %10956 = vmatprep.subr.bf16.mxu0 %v15183_v1  ;;  %11472 = vmatprep.subr.bf16.mxu1 %v15185_v13  ;;  %v1423_v1 = vld [vmem:[#allocation5 + $0x2810] sm:$0xff] }
 0x5e7   :  { %v1427_v13 = vld [vmem:[#allocation5 + $0x2830] sm:$0xff] }
 0x5e8   :  { %v15238_v51 = vcombine.low %v1423_v1, %v1427_v13 }
 0x5e9   :  { %10957 = vmatpush1.bf16.msra.mxu0 %v15182_v49  ;;  %11473 = vmatpush1.bf16.msra.mxu1 %v15184_v29  ;;  %v15239_v49 = vcombine.high %v1423_v1, %v1427_v13  ;;  %v15241_v29 = vcombine.high %v1424_v3, %v1428_v27 }
 0x5ea   :  { %10958 = vmatprep.subr.bf16.mxu0 %v15191_v60  ;;  %11474 = vmatprep.subr.bf16.mxu1 %v15193_v61  ;;  %v1431_v60 = vld [vmem:[#allocation5 + $0x2850] sm:$0xff] }
 0x5eb   :  { %v1435_v61 = vld [vmem:[#allocation5 + $0x2870] sm:$0xff] }
 0x5ec   :  { %v15246_v10 = vcombine.low %v1431_v60, %v1435_v61 }
 0x5ed   :  { %10959 = vmatpush1.bf16.msra.mxu0 %v15190_v55  ;;  %11475 = vmatpush1.bf16.msra.mxu1 %v15192_v62  ;;  %v15247_v55 = vcombine.high %v1431_v60, %v1435_v61  ;;  %v15249_v62 = vcombine.high %v1432_v0, %v1436_v32 }
 0x5ee   :  { %10960 = vmatprep.subr.bf16.mxu0 %v15199_v6  ;;  %11476 = vmatprep.subr.bf16.mxu1 %v15201_v16  ;;  %v1439_v6 = vld [vmem:[#allocation5 + $0x2890] sm:$0xff] }
 0x5ef   :  { %v1443_v16 = vld [vmem:[#allocation5 + $0x28b0] sm:$0xff] }
 0x5f0   :  { %v15254_v58 = vcombine.low %v1439_v6, %v1443_v16 }
 0x5f1   :  { %10961 = vmatpush1.bf16.msra.mxu0 %v15198_v33  ;;  %11477 = vmatpush1.bf16.msra.mxu1 %v15200_v15  ;;  %v15255_v33 = vcombine.high %v1439_v6, %v1443_v16  ;;  %v15257_v15 = vcombine.high %v1440_v8, %v1444_v23 }
 0x5f2   :  { %10962 = vmatprep.subr.bf16.mxu0 %v15207_v2  ;;  %11478 = vmatprep.subr.bf16.mxu1 %v15209_v57  ;;  %v1447_v2 = vld [vmem:[#allocation5 + $0x28d0] sm:$0xff] }
 0x5f3   :  { %v1451_v57 = vld [vmem:[#allocation5 + $0x28f0] sm:$0xff] }
 0x5f4   :  { %v15263_v38 = vcombine.high %v1447_v2, %v1451_v57  ;;  %v15262_v22 = vcombine.low %v1447_v2, %v1451_v57 }
 0x5f5   :  { %10963 = vmatpush1.bf16.msra.mxu0 %v15206_v28  ;;  %11479 = vmatpush1.bf16.msra.mxu1 %v15208_v4  ;;  %v15265_v28 = vcombine.high %v1448_v34, %v1452_v26  ;;  %v1455_v4 = vld [vmem:[#allocation5 + $0x2910] sm:$0xff] }
 0x5f6   :  { %10964 = vmatprep.subr.bf16.mxu0 %v15215_v39  ;;  %11480 = vmatprep.subr.bf16.mxu1 %v15217_v14  ;;  %v1459_v39 = vld [vmem:[#allocation5 + $0x2930] sm:$0xff]  ;;  %v1456_v14 = vld [vmem:[#allocation5 + $0x2918] sm:$0xff] }
 0x5f7   :  { %v15271_v53 = vcombine.high %v1455_v4, %v1459_v39  ;;  %v15270_v41 = vcombine.low %v1455_v4, %v1459_v39  ;;  %v15272_v42 = vcombine.low %v1456_v14, %v1460_v31 }
 0x5f9   :  { %10965 = vmatpush1.bf16.msra.mxu0 %v15214_v12  ;;  %11481 = vmatpush1.bf16.msra.mxu1 %v15216_v17  ;;  %v1463_v12 = vld [vmem:[#allocation5 + $0x2950] sm:$0xff] }
 0x5fa   :  { %10966 = vmatprep.subr.bf16.mxu0 %v15223_v18  ;;  %11482 = vmatprep.subr.bf16.mxu1 %v15225_v52  ;;  %v1467_v17 = vld [vmem:[#allocation5 + $0x2970] sm:$0xff]  ;;  %v1464_v18 = vld [vmem:[#allocation5 + $0x2958] sm:$0xff] }
 0x5fb   :  { %v1468_v52 = vld [vmem:[#allocation5 + $0x2978] sm:$0xff]  ;;  %v15279_v21 = vcombine.high %v1463_v12, %v1467_v17  ;;  %v15278_v1 = vcombine.low %v1463_v12, %v1467_v17 }
 0x5fc   :  { %v15281_v20 = vcombine.high %v1464_v18, %v1468_v52  ;;  %v15280_v13 = vcombine.low %v1464_v18, %v1468_v52 }
 0x5fd   :  { %10967 = vmatpush1.bf16.msra.mxu0 %v15222_v40  ;;  %11483 = vmatpush1.bf16.msra.mxu1 %v15224_v43  ;;  %v1471_v40 = vld [vmem:[#allocation5 + $0x2990] sm:$0xff] }
 0x5fe   :  { %10968 = vmatprep.subr.bf16.mxu0 %v15231_v44  ;;  %11484 = vmatprep.subr.bf16.mxu1 %v15233_v50  ;;  %v1475_v43 = vld [vmem:[#allocation5 + $0x29b0] sm:$0xff]  ;;  %v1472_v44 = vld [vmem:[#allocation5 + $0x2998] sm:$0xff] }
 0x5ff   :  { %v1476_v50 = vld [vmem:[#allocation5 + $0x29b8] sm:$0xff]  ;;  %v15287_v3 = vcombine.high %v1471_v40, %v1475_v43  ;;  %v15286_v60 = vcombine.low %v1471_v40, %v1475_v43 }
 0x600   :  { %v15289_v27 = vcombine.high %v1472_v44, %v1476_v50  ;;  %v15288_v61 = vcombine.low %v1472_v44, %v1476_v50 }
 0x601   :  { %10969 = vmatpush1.bf16.msra.mxu0 %v15230_v59  ;;  %11485 = vmatpush1.bf16.msra.mxu1 %v15232_v48  ;;  %v1479_v59 = vld [vmem:[#allocation5 + $0x29d0] sm:$0xff] }
 0x602   :  { %10981 = vmatprep.subr.bf16.mxu0 %v15239_v49  ;;  %11497 = vmatprep.subr.bf16.mxu1 %v15241_v29  ;;  %v1483_v48 = vld [vmem:[#allocation5 + $0x29f0] sm:$0xff]  ;;  %v1480_v49 = vld [vmem:[#allocation5 + $0x29d8] sm:$0xff] }
 0x603   :  { %v1484_v29 = vld [vmem:[#allocation5 + $0x29f8] sm:$0xff]  ;;  %v15295_v0 = vcombine.high %v1479_v59, %v1483_v48  ;;  %v15294_v6 = vcombine.low %v1479_v59, %v1483_v48 }
 0x604   :  { %10971 = vmatmul.mubr.bf16.vlgmr.msra.gmra.mrb[4].mxu0 %v16974_v45  ;;  %11487 = vmatmul.mubr.bf16.vlgmr.msra.gmra.mrb[4].mxu1 %v16974_v45  ;;  %v15256_v45 = vcombine.low %v1440_v8, %v1444_v23  ;;  %v15297_v32 = vcombine.high %v1480_v49, %v1484_v29  ;;  %v15296_v16 = vcombine.low %v1480_v49, %v1484_v29 }
 0x605   :  { %10982 = vmatpush1.bf16.msra.mxu0 %v15238_v51  ;;  %11498 = vmatpush1.bf16.msra.mxu1 %v15240_v46  ;;  %v1487_v51 = vld [vmem:[#allocation5 + $0x2a10] sm:$0xff] }
 0x606   :  { %10983 = vmatprep.subr.bf16.mxu0 %v15247_v55  ;;  %11499 = vmatprep.subr.bf16.mxu1 %v15249_v62  ;;  %v1491_v46 = vld [vmem:[#allocation5 + $0x2a30] sm:$0xff]  ;;  %v1488_v55 = vld [vmem:[#allocation5 + $0x2a18] sm:$0xff] }
 0x607   :  { %11013 = vmatprep.mubr.bf16.mxu0 %v16982_v35  ;;  %11529 = vmatprep.mubr.bf16.mxu1 %v16982_v35  ;;  %v15273_v35 = vcombine.high %v1456_v14, %v1460_v31  ;;  %v1492_v62 = vld [vmem:[#allocation5 + $0x2a38] sm:$0xff]  ;;  %v15303_v8 = vcombine.high %v1487_v51, %v1491_v46  ;;  %v15302_v2 = vcombine.low %v1487_v51, %v1491_v46 }
 0x608   :  { %v15305_v23 = vcombine.high %v1488_v55, %v1492_v62  ;;  %v15304_v57 = vcombine.low %v1488_v55, %v1492_v62 }
 0x609   :  { %10984 = vmatpush1.bf16.msra.mxu0 %v15246_v10  ;;  %11500 = vmatpush1.bf16.msra.mxu1 %v15248_v11  ;;  %v1495_v10 = vld [vmem:[#allocation5 + $0x2a50] sm:$0xff] }
 0x60a   :  { %10985 = vmatprep.subr.bf16.mxu0 %v15255_v33  ;;  %11501 = vmatprep.subr.bf16.mxu1 %v15257_v15  ;;  %v1499_v11 = vld [vmem:[#allocation5 + $0x2a70] sm:$0xff]  ;;  %v1496_v33 = vld [vmem:[#allocation5 + $0x2a58] sm:$0xff] }
 0x60b   :  { %v1500_v15 = vld [vmem:[#allocation5 + $0x2a78] sm:$0xff]  ;;  %v15311_v34 = vcombine.high %v1495_v10, %v1499_v11  ;;  %v15310_v4 = vcombine.low %v1495_v10, %v1499_v11 }
 0x60c   :  { %v15313_v26 = vcombine.high %v1496_v33, %v1500_v15  ;;  %v15312_v39 = vcombine.low %v1496_v33, %v1500_v15 }
 0x60d   :  { %10986 = vmatpush1.bf16.msra.mxu0 %v15254_v58  ;;  %11502 = vmatpush1.bf16.msra.mxu1 %v15256_v45  ;;  %v1503_v58 = vld [vmem:[#allocation5 + $0x2a90] sm:$0xff] }
 0x60e   :  { %10987 = vmatprep.subr.bf16.mxu0 %v15263_v38  ;;  %11503 = vmatprep.subr.bf16.mxu1 %v15265_v28  ;;  %v1507_v45 = vld [vmem:[#allocation5 + $0x2ab0] sm:$0xff]  ;;  %v1504_v38 = vld [vmem:[#allocation5 + $0x2a98] sm:$0xff] }
 0x60f   :  { %v1508_v28 = vld [vmem:[#allocation5 + $0x2ab8] sm:$0xff]  ;;  %v15319_v14 = vcombine.high %v1503_v58, %v1507_v45  ;;  %v15318_v12 = vcombine.low %v1503_v58, %v1507_v45 }
 0x610   :  { %v15321_v31 = vcombine.high %v1504_v38, %v1508_v28  ;;  %v15320_v17 = vcombine.low %v1504_v38, %v1508_v28 }
 0x611   :  { %10988 = vmatpush1.bf16.msra.mxu0 %v15262_v22  ;;  %11504 = vmatpush1.bf16.msra.mxu1 %v15264_v63  ;;  %v1511_v22 = vld [vmem:[#allocation5 + $0x2ad0] sm:$0xff] }
 0x612   :  { %10989 = vmatprep.subr.bf16.mxu0 %v15271_v53  ;;  %11505 = vmatprep.subr.bf16.mxu1 %v15273_v35  ;;  %v1515_v63 = vld [vmem:[#allocation5 + $0x2af0] sm:$0xff]  ;;  %v1512_v53 = vld [vmem:[#allocation5 + $0x2ad8] sm:$0xff] }
 0x613   :  { %v1516_v35 = vld [vmem:[#allocation5 + $0x2af8] sm:$0xff]  ;;  %v15327_v18 = vcombine.high %v1511_v22, %v1515_v63  ;;  %v15326_v40 = vcombine.low %v1511_v22, %v1515_v63 }
 0x614   :  { %v15329_v52 = vcombine.high %v1512_v53, %v1516_v35  ;;  %v15328_v43 = vcombine.low %v1512_v53, %v1516_v35 }
 0x615   :  { %10990 = vmatpush1.bf16.msra.mxu0 %v15270_v41  ;;  %11506 = vmatpush1.bf16.msra.mxu1 %v15272_v42  ;;  %v1519_v41 = vld [vmem:[#allocation5 + $0x2b10] sm:$0xff] }
 0x616   :  { %10991 = vmatprep.subr.bf16.mxu0 %v15279_v21  ;;  %11507 = vmatprep.subr.bf16.mxu1 %v15281_v20  ;;  %v1523_v42 = vld [vmem:[#allocation5 + $0x2b30] sm:$0xff]  ;;  %v1520_v21 = vld [vmem:[#allocation5 + $0x2b18] sm:$0xff] }
 0x617   :  { %v1524_v20 = vld [vmem:[#allocation5 + $0x2b38] sm:$0xff]  ;;  %v15335_v44 = vcombine.high %v1519_v41, %v1523_v42  ;;  %v15334_v59 = vcombine.low %v1519_v41, %v1523_v42 }
 0x618   :  { %v15337_v50 = vcombine.high %v1520_v21, %v1524_v20  ;;  %v15336_v48 = vcombine.low %v1520_v21, %v1524_v20 }
 0x619   :  { %10992 = vmatpush1.bf16.msra.mxu0 %v15278_v1  ;;  %11508 = vmatpush1.bf16.msra.mxu1 %v15280_v13  ;;  %v1527_v1 = vld [vmem:[#allocation5 + $0x2b50] sm:$0xff] }
 0x61a   :  { %10993 = vmatprep.subr.bf16.mxu0 %v15287_v3  ;;  %11509 = vmatprep.subr.bf16.mxu1 %v15289_v27  ;;  %v1531_v13 = vld [vmem:[#allocation5 + $0x2b70] sm:$0xff]  ;;  %v1528_v3 = vld [vmem:[#allocation5 + $0x2b58] sm:$0xff] }
 0x61b   :  { %v1532_v27 = vld [vmem:[#allocation5 + $0x2b78] sm:$0xff]  ;;  %v15343_v49 = vcombine.high %v1527_v1, %v1531_v13  ;;  %v15342_v51 = vcombine.low %v1527_v1, %v1531_v13 }
 0x61c   :  { %v15345_v29 = vcombine.high %v1528_v3, %v1532_v27  ;;  %v15344_v46 = vcombine.low %v1528_v3, %v1532_v27  ;;  %v1583_v27 = vld [vmem:[#allocation5 + $0x2d10] sm:$0xff] }
 0x61d   :  { %10994 = vmatpush1.bf16.msra.mxu0 %v15286_v60  ;;  %11510 = vmatpush1.bf16.msra.mxu1 %v15288_v61  ;;  %v1535_v60 = vld [vmem:[#allocation5 + $0x2b90] sm:$0xff] }
 0x61e   :  { %10995 = vmatprep.subr.bf16.mxu0 %v15295_v0  ;;  %11511 = vmatprep.subr.bf16.mxu1 %v15297_v32  ;;  %v1539_v61 = vld [vmem:[#allocation5 + $0x2bb0] sm:$0xff]  ;;  %v1536_v0 = vld [vmem:[#allocation5 + $0x2b98] sm:$0xff] }
 0x61f   :  { %v1540_v32 = vld [vmem:[#allocation5 + $0x2bb8] sm:$0xff]  ;;  %v15351_v55 = vcombine.high %v1535_v60, %v1539_v61  ;;  %v15350_v10 = vcombine.low %v1535_v60, %v1539_v61 }
 0x620   :  { %v15353_v62 = vcombine.high %v1536_v0, %v1540_v32  ;;  %v15352_v11 = vcombine.low %v1536_v0, %v1540_v32  ;;  %v1591_v0 = vld [vmem:[#allocation5 + $0x2d50] sm:$0xff] }
 0x621   :  { %10996 = vmatpush1.bf16.msra.mxu0 %v15294_v6  ;;  %11512 = vmatpush1.bf16.msra.mxu1 %v15296_v16  ;;  %v1543_v6 = vld [vmem:[#allocation5 + $0x2bd0] sm:$0xff] }
 0x622   :  { %10997 = vmatprep.subr.bf16.mxu0 %v15303_v8  ;;  %11513 = vmatprep.subr.bf16.mxu1 %v15305_v23  ;;  %v1547_v16 = vld [vmem:[#allocation5 + $0x2bf0] sm:$0xff]  ;;  %v1544_v8 = vld [vmem:[#allocation5 + $0x2bd8] sm:$0xff] }
 0x623   :  { %v1548_v23 = vld [vmem:[#allocation5 + $0x2bf8] sm:$0xff]  ;;  %v15359_v33 = vcombine.high %v1543_v6, %v1547_v16  ;;  %v15358_v58 = vcombine.low %v1543_v6, %v1547_v16  ;;  %v1595_v32 = vld [vmem:[#allocation5 + $0x2d70] sm:$0xff] }
 0x624   :  { %v15361_v15 = vcombine.high %v1544_v8, %v1548_v23  ;;  %v15360_v45 = vcombine.low %v1544_v8, %v1548_v23  ;;  %v15407_v6 = vcombine.high %v1591_v0, %v1595_v32  ;;  %v1599_v8 = vld [vmem:[#allocation5 + $0x2d90] sm:$0xff] }
 0x625   :  { %10998 = vmatpush1.bf16.msra.mxu0 %v15302_v2  ;;  %11514 = vmatpush1.bf16.msra.mxu1 %v15304_v57  ;;  %v1551_v2 = vld [vmem:[#allocation5 + $0x2c10] sm:$0xff] }
 0x626   :  { %10999 = vmatprep.subr.bf16.mxu0 %v15311_v34  ;;  %11515 = vmatprep.subr.bf16.mxu1 %v15313_v26  ;;  %v1555_v57 = vld [vmem:[#allocation5 + $0x2c30] sm:$0xff]  ;;  %v1552_v34 = vld [vmem:[#allocation5 + $0x2c18] sm:$0xff] }
 0x627   :  { %v1556_v26 = vld [vmem:[#allocation5 + $0x2c38] sm:$0xff]  ;;  %v15367_v38 = vcombine.high %v1551_v2, %v1555_v57  ;;  %v15366_v22 = vcombine.low %v1551_v2, %v1555_v57  ;;  %v1603_v23 = vld [vmem:[#allocation5 + $0x2db0] sm:$0xff] }
 0x628   :  { %v15369_v28 = vcombine.high %v1552_v34, %v1556_v26  ;;  %v15368_v63 = vcombine.low %v1552_v34, %v1556_v26  ;;  %v15415_v2 = vcombine.high %v1599_v8, %v1603_v23  ;;  %v1607_v34 = vld [vmem:[#allocation5 + $0x2dd0] sm:$0xff] }
 0x629   :  { %11000 = vmatpush1.bf16.msra.mxu0 %v15310_v4  ;;  %11516 = vmatpush1.bf16.msra.mxu1 %v15312_v39  ;;  %v1559_v4 = vld [vmem:[#allocation5 + $0x2c50] sm:$0xff] }
 0x62a   :  { %11001 = vmatprep.subr.bf16.mxu0 %v15319_v14  ;;  %11517 = vmatprep.subr.bf16.mxu1 %v15321_v31  ;;  %v1563_v39 = vld [vmem:[#allocation5 + $0x2c70] sm:$0xff]  ;;  %v1560_v14 = vld [vmem:[#allocation5 + $0x2c58] sm:$0xff] }
 0x62b   :  { %v1564_v31 = vld [vmem:[#allocation5 + $0x2c78] sm:$0xff]  ;;  %v15375_v53 = vcombine.high %v1559_v4, %v1563_v39  ;;  %v15374_v41 = vcombine.low %v1559_v4, %v1563_v39  ;;  %v1611_v26 = vld [vmem:[#allocation5 + $0x2df0] sm:$0xff] }
 0x62c   :  { %v15377_v35 = vcombine.high %v1560_v14, %v1564_v31  ;;  %v15376_v42 = vcombine.low %v1560_v14, %v1564_v31  ;;  %v15423_v4 = vcombine.high %v1607_v34, %v1611_v26  ;;  %v1615_v14 = vld [vmem:[#allocation5 + $0x2e10] sm:$0xff] }
 0x62d   :  { %11002 = vmatpush1.bf16.msra.mxu0 %v15318_v12  ;;  %11518 = vmatpush1.bf16.msra.mxu1 %v15320_v17  ;;  %v1567_v12 = vld [vmem:[#allocation5 + $0x2c90] sm:$0xff] }
 0x62e   :  { %11003 = vmatprep.subr.bf16.mxu0 %v15327_v18  ;;  %11519 = vmatprep.subr.bf16.mxu1 %v15329_v52  ;;  %v1571_v17 = vld [vmem:[#allocation5 + $0x2cb0] sm:$0xff]  ;;  %v1568_v18 = vld [vmem:[#allocation5 + $0x2c98] sm:$0xff] }
 0x62f   :  { %v1572_v52 = vld [vmem:[#allocation5 + $0x2cb8] sm:$0xff]  ;;  %v15383_v21 = vcombine.high %v1567_v12, %v1571_v17  ;;  %v15382_v1 = vcombine.low %v1567_v12, %v1571_v17  ;;  %v1619_v31 = vld [vmem:[#allocation5 + $0x2e30] sm:$0xff] }
 0x630   :  { %v15385_v20 = vcombine.high %v1568_v18, %v1572_v52  ;;  %v15431_v12 = vcombine.high %v1615_v14, %v1619_v31 }
 0x631   :  { %11004 = vmatpush1.bf16.msra.mxu0 %v15326_v40  ;;  %11520 = vmatpush1.bf16.msra.mxu1 %v15328_v43  ;;  %v1575_v40 = vld [vmem:[#allocation5 + $0x2cd0] sm:$0xff] }
 0x632   :  { %11005 = vmatprep.subr.bf16.mxu0 %v15335_v44  ;;  %11521 = vmatprep.subr.bf16.mxu1 %v15337_v50  ;;  %v1579_v43 = vld [vmem:[#allocation5 + $0x2cf0] sm:$0xff]  ;;  %v1576_v44 = vld [vmem:[#allocation5 + $0x2cd8] sm:$0xff] }
 0x633   :  { %v1580_v50 = vld [vmem:[#allocation5 + $0x2cf8] sm:$0xff]  ;;  %v15391_v13 = vcombine.high %v1575_v40, %v1579_v43 }
 0x634   :  { %v15393_v3 = vcombine.high %v1576_v44, %v1580_v50  ;;  %v15392_v60 = vcombine.low %v1576_v44, %v1580_v50  ;;  %v1631_v44 = vld [vmem:[#allocation5 + $0x2e90] sm:$0xff] }
 0x635   :  { %11006 = vmatpush1.bf16.msra.mxu0 %v15334_v59  ;;  %11522 = vmatpush1.bf16.msra.mxu1 %v15336_v48  ;;  %v1587_v59 = vld [vmem:[#allocation5 + $0x2d30] sm:$0xff]  ;;  %v1584_v48 = vld [vmem:[#allocation5 + $0x2d18] sm:$0xff] }
 0x636   :  { %11007 = vmatprep.subr.bf16.mxu0 %v15343_v49  ;;  %11523 = vmatprep.subr.bf16.mxu1 %v15345_v29  ;;  %v1588_v49 = vld [vmem:[#allocation5 + $0x2d38] sm:$0xff]  ;;  %v15390_v29 = vcombine.low %v1575_v40, %v1579_v43  ;;  %v15399_v61 = vcombine.high %v1583_v27, %v1587_v59  ;;  %v1635_v50 = vld [vmem:[#allocation5 + $0x2eb0] sm:$0xff] }
 0x639   :  { %11008 = vmatpush1.bf16.msra.mxu0 %v15342_v51  ;;  %11524 = vmatpush1.bf16.msra.mxu1 %v15344_v46  ;;  %v1592_v51 = vld [vmem:[#allocation5 + $0x2d58] sm:$0xff] }
 0x63a   :  { %11009 = vmatprep.subr.bf16.mxu0 %v15351_v55  ;;  %11525 = vmatprep.subr.bf16.mxu1 %v15353_v62  ;;  %v1596_v46 = vld [vmem:[#allocation5 + $0x2d78] sm:$0xff]  ;;  %v15398_v55 = vcombine.low %v1583_v27, %v1587_v59  ;;  %v15400_v62 = vcombine.low %v1584_v48, %v1588_v49  ;;  %v15447_v27 = vcombine.high %v1631_v44, %v1635_v50 }
 0x63b   :  { %v15409_v16 = vcombine.high %v1592_v51, %v1596_v46 }
 0x63d   :  { %11010 = vmatpush1.bf16.msra.mxu0 %v15350_v10  ;;  %11526 = vmatpush1.bf16.msra.mxu1 %v15352_v11  ;;  %v1600_v10 = vld [vmem:[#allocation5 + $0x2d98] sm:$0xff] }
 0x63e   :  { %11011 = vmatprep.subr.bf16.mxu0 %v15359_v33  ;;  %11527 = vmatprep.subr.bf16.mxu1 %v15361_v15  ;;  %v1604_v11 = vld [vmem:[#allocation5 + $0x2db8] sm:$0xff]  ;;  %v15406_v33 = vcombine.low %v1591_v0, %v1595_v32  ;;  %v15408_v15 = vcombine.low %v1592_v51, %v1596_v46  ;;  %v1647_v51 = vld [vmem:[#allocation5 + $0x2f10] sm:$0xff] }
 0x63f   :  { %v15417_v57 = vcombine.high %v1600_v10, %v1604_v11  ;;  %v1651_v46 = vld [vmem:[#allocation5 + $0x2f30] sm:$0xff] }
 0x641   :  { %11012 = vmatpush1.bf16.msra.mxu0 %v15358_v58  ;;  %11528 = vmatpush1.bf16.msra.mxu1 %v15360_v45  ;;  %v1608_v58 = vld [vmem:[#allocation5 + $0x2dd8] sm:$0xff] }
 0x642   :  { %11024 = vmatprep.subr.bf16.mxu0 %v15367_v38  ;;  %11540 = vmatprep.subr.bf16.mxu1 %v15369_v28  ;;  %v1612_v45 = vld [vmem:[#allocation5 + $0x2df8] sm:$0xff]  ;;  %v15414_v38 = vcombine.low %v1599_v8, %v1603_v23  ;;  %v15416_v28 = vcombine.low %v1600_v10, %v1604_v11  ;;  %v15463_v8 = vcombine.high %v1647_v51, %v1651_v46  ;;  %v1655_v10 = vld [vmem:[#allocation5 + $0x2f50] sm:$0xff] }
 0x643   :  { %v15425_v39 = vcombine.high %v1608_v58, %v1612_v45  ;;  %v1659_v11 = vld [vmem:[#allocation5 + $0x2f70] sm:$0xff] }
 0x644   :  { %11014 = vmatmul.mubr.bf16.vlgmr.msra.gmra.mrb[4].mxu0 %v16990_v25  ;;  %11530 = vmatmul.mubr.bf16.vlgmr.msra.gmra.mrb[4].mxu1 %v16990_v25  ;;  %v15384_v25 = vcombine.low %v1568_v18, %v1572_v52  ;;  %v1623_v18 = vld [vmem:[#allocation5 + $0x2e50] sm:$0xff] }
 0x645   :  { %11025 = vmatpush1.bf16.msra.mxu0 %v15366_v22  ;;  %11541 = vmatpush1.bf16.msra.mxu1 %v15368_v63  ;;  %v1616_v22 = vld [vmem:[#allocation5 + $0x2e18] sm:$0xff]  ;;  %v1627_v52 = vld [vmem:[#allocation5 + $0x2e70] sm:$0xff] }
 0x646   :  { %11026 = vmatprep.subr.bf16.mxu0 %v15375_v53  ;;  %11542 = vmatprep.subr.bf16.mxu1 %v15377_v35  ;;  %v1620_v63 = vld [vmem:[#allocation5 + $0x2e38] sm:$0xff]  ;;  %v15422_v53 = vcombine.low %v1607_v34, %v1611_v26  ;;  %v15424_v35 = vcombine.low %v1608_v58, %v1612_v45  ;;  %v15439_v40 = vcombine.high %v1623_v18, %v1627_v52  ;;  %v1663_v58 = vld [vmem:[#allocation5 + $0x2f90] sm:$0xff] }
 0x647   :  { %11056 = vmatprep.mubr.bf16.mxu0 %v16998_v5  ;;  %11572 = vmatprep.mubr.bf16.mxu1 %v16998_v5  ;;  %v15401_v5 = vcombine.high %v1584_v48, %v1588_v49  ;;  %v15433_v17 = vcombine.high %v1616_v22, %v1620_v63  ;;  %v1639_v48 = vld [vmem:[#allocation5 + $0x2ed0] sm:$0xff]  ;;  %v15471_v34 = vcombine.high %v1655_v10, %v1659_v11 }
 0x648   :  { %v1643_v49 = vld [vmem:[#allocation5 + $0x2ef0] sm:$0xff] }
 0x649   :  { %11027 = vmatpush1.bf16.msra.mxu0 %v15374_v41  ;;  %11543 = vmatpush1.bf16.msra.mxu1 %v15376_v42  ;;  %v1624_v41 = vld [vmem:[#allocation5 + $0x2e58] sm:$0xff]  ;;  %v15455_v0 = vcombine.high %v1639_v48, %v1643_v49  ;;  %v1667_v45 = vld [vmem:[#allocation5 + $0x2fb0] sm:$0xff] }
 0x64a   :  { %11028 = vmatprep.subr.bf16.mxu0 %v15383_v21  ;;  %11544 = vmatprep.subr.bf16.mxu1 %v15385_v20  ;;  %v1628_v42 = vld [vmem:[#allocation5 + $0x2e78] sm:$0xff]  ;;  %v15430_v21 = vcombine.low %v1615_v14, %v1619_v31  ;;  %v15432_v20 = vcombine.low %v1616_v22, %v1620_v63  ;;  %v15479_v14 = vcombine.high %v1663_v58, %v1667_v45  ;;  %v1671_v22 = vld [vmem:[#allocation5 + $0x2fd0] sm:$0xff] }
 0x64b   :  { %v15441_v43 = vcombine.high %v1624_v41, %v1628_v42  ;;  %v1675_v63 = vld [vmem:[#allocation5 + $0x2ff0] sm:$0xff] }
 0x64d   :  { %11029 = vmatpush1.bf16.msra.mxu0 %v15382_v1  ;;  %11545 = vmatpush1.bf16.msra.mxu1 %v15384_v25  ;;  %v1632_v1 = vld [vmem:[#allocation5 + $0x2e98] sm:$0xff] }
 0x64e   :  { %11030 = vmatprep.subr.bf16.mxu0 %v15391_v13  ;;  %11546 = vmatprep.subr.bf16.mxu1 %v15393_v3  ;;  %v1636_v25 = vld [vmem:[#allocation5 + $0x2eb8] sm:$0xff]  ;;  %v15438_v13 = vcombine.low %v1623_v18, %v1627_v52  ;;  %v15440_v3 = vcombine.low %v1624_v41, %v1628_v42  ;;  %v15487_v18 = vcombine.high %v1671_v22, %v1675_v63 }
 0x64f   :  { %v15449_v59 = vcombine.high %v1632_v1, %v1636_v25  ;;  %v15486_v41 = vcombine.low %v1671_v22, %v1675_v63  ;;  %v16131_v22 = vld [vmem:[#allocation8 + $0x160] ss:$16 sps:$4 sm:$0xff]   ;;  %v16134_v63 = vld [vmem:[#allocation8 + $0x168] ss:$16 sps:$4 sm:$0xff]  }
 0x651   :  { %11031 = vmatpush1.bf16.msra.mxu0 %v15390_v29  ;;  %11547 = vmatpush1.bf16.msra.mxu1 %v15392_v60  ;;  %v1640_v29 = vld [vmem:[#allocation5 + $0x2ed8] sm:$0xff] }
 0x652   :  { %11032 = vmatprep.subr.bf16.mxu0 %v15399_v61  ;;  %11548 = vmatprep.subr.bf16.mxu1 %v15401_v5  ;;  %v1644_v60 = vld [vmem:[#allocation5 + $0x2ef8] sm:$0xff]  ;;  %v15446_v61 = vcombine.low %v1631_v44, %v1635_v50  ;;  %v15448_v5 = vcombine.low %v1632_v1, %v1636_v25  ;;  %v16076_v50 = vld [vmem:[#allocation8 + $0x2c] ss:$16 sps:$4 sm:$0xff]   ;;  %v16074_v25 = vld [vmem:[#allocation8 + $0x28] ss:$16 sps:$4 sm:$0xff]  }
 0x653   :  { %v15457_v32 = vcombine.high %v1640_v29, %v1644_v60  ;;  %v16073_v44 = vld [vmem:[#allocation8 + $0x24] ss:$16 sps:$4 sm:$0xff]   ;;  %v16071_v1 = vld [vmem:[#allocation8 + $0x20] ss:$16 sps:$4 sm:$0xff]  }
 0x655   :  { %11033 = vmatpush1.bf16.msra.mxu0 %v15398_v55  ;;  %11549 = vmatpush1.bf16.msra.mxu1 %v15400_v62  ;;  %v1648_v55 = vld [vmem:[#allocation5 + $0x2f18] sm:$0xff] }
 0x656   :  { %11034 = vmatprep.subr.bf16.mxu0 %v15407_v6  ;;  %11550 = vmatprep.subr.bf16.mxu1 %v15409_v16  ;;  %v1652_v62 = vld [vmem:[#allocation5 + $0x2f38] sm:$0xff]  ;;  %v15454_v6 = vcombine.low %v1639_v48, %v1643_v49  ;;  %v15456_v16 = vcombine.low %v1640_v29, %v1644_v60  ;;  %v16086_v29 = vld [vmem:[#allocation8 + $0x68] ss:$16 sps:$4 sm:$0xff]  }
 0x657   :  { %v15465_v23 = vcombine.high %v1648_v55, %v1652_v62  ;;  %v16085_v48 = vld [vmem:[#allocation8 + $0x64] ss:$16 sps:$4 sm:$0xff]   ;;  %v16083_v49 = vld [vmem:[#allocation8 + $0x60] ss:$16 sps:$4 sm:$0xff]  }
 0x658   :  { %v16091_v60 = vld [vmem:[#allocation8 + $0x84] ss:$16 sps:$4 sm:$0xff]  }
 0x659   :  { %11035 = vmatpush1.bf16.msra.mxu0 %v15406_v33  ;;  %11551 = vmatpush1.bf16.msra.mxu1 %v15408_v15  ;;  %v1656_v33 = vld [vmem:[#allocation5 + $0x2f58] sm:$0xff] }
 0x65a   :  { %11036 = vmatprep.subr.bf16.mxu0 %v15415_v2  ;;  %11552 = vmatprep.subr.bf16.mxu1 %v15417_v57  ;;  %v1660_v15 = vld [vmem:[#allocation5 + $0x2f78] sm:$0xff]  ;;  %v15462_v2 = vcombine.low %v1647_v51, %v1651_v46  ;;  %v15464_v57 = vcombine.low %v1648_v55, %v1652_v62  ;;  %v16098_v46 = vld [vmem:[#allocation8 + $0xa8] ss:$16 sps:$4 sm:$0xff]   ;;  %v16106_v62 = vld [vmem:[#allocation8 + $0xcc] ss:$16 sps:$4 sm:$0xff]  }
 0x65b   :  { %v15473_v26 = vcombine.high %v1656_v33, %v1660_v15  ;;  %v16095_v51 = vld [vmem:[#allocation8 + $0xa0] ss:$16 sps:$4 sm:$0xff]   ;;  %v16103_v55 = vld [vmem:[#allocation8 + $0xc4] ss:$16 sps:$4 sm:$0xff]  }
 0x65d   :  { %11037 = vmatpush1.bf16.msra.mxu0 %v15414_v38  ;;  %11553 = vmatpush1.bf16.msra.mxu1 %v15416_v28  ;;  %v1664_v38 = vld [vmem:[#allocation5 + $0x2f98] sm:$0xff] }
 0x65e   :  { %11038 = vmatprep.subr.bf16.mxu0 %v15423_v4  ;;  %11554 = vmatprep.subr.bf16.mxu1 %v15425_v39  ;;  %v1668_v28 = vld [vmem:[#allocation5 + $0x2fb8] sm:$0xff]  ;;  %v15470_v4 = vcombine.low %v1655_v10, %v1659_v11  ;;  %v15472_v39 = vcombine.low %v1656_v33, %v1660_v15  ;;  %v16110_v11 = vld [vmem:[#allocation8 + $0xe8] ss:$16 sps:$4 sm:$0xff]   ;;  %v16118_v15 = vld [vmem:[#allocation8 + $0x10c] ss:$16 sps:$4 sm:$0xff]  }
 0x65f   :  { %v15481_v31 = vcombine.high %v1664_v38, %v1668_v28  ;;  %v16107_v10 = vld [vmem:[#allocation8 + $0xe0] ss:$16 sps:$4 sm:$0xff]   ;;  %v16115_v33 = vld [vmem:[#allocation8 + $0x104] ss:$16 sps:$4 sm:$0xff]  }
 0x661   :  { %11039 = vmatpush1.bf16.msra.mxu0 %v15422_v53  ;;  %11555 = vmatpush1.bf16.msra.mxu1 %v15424_v35  ;;  %v1672_v53 = vld [vmem:[#allocation5 + $0x2fd8] sm:$0xff] }
 0x662   :  { %11040 = vmatprep.subr.bf16.mxu0 %v15431_v12  ;;  %11556 = vmatprep.subr.bf16.mxu1 %v15433_v17  ;;  %v1676_v35 = vld [vmem:[#allocation5 + $0x2ff8] sm:$0xff]  ;;  %v15478_v12 = vcombine.low %v1663_v58, %v1667_v45  ;;  %v15480_v17 = vcombine.low %v1664_v38, %v1668_v28  ;;  %v16122_v45 = vld [vmem:[#allocation8 + $0x128] ss:$16 sps:$4 sm:$0xff]   ;;  %v16130_v28 = vld [vmem:[#allocation8 + $0x14c] ss:$16 sps:$4 sm:$0xff]  }
 0x663   :  { %v15489_v52 = vcombine.high %v1672_v53, %v1676_v35  ;;  %v15488_v42 = vcombine.low %v1672_v53, %v1676_v35  ;;  %v16119_v58 = vld [vmem:[#allocation8 + $0x120] ss:$16 sps:$4 sm:$0xff]   ;;  %v16127_v38 = vld [vmem:[#allocation8 + $0x144] ss:$16 sps:$4 sm:$0xff]   ;;  %v16142_v35 = vld [vmem:[#allocation8 + $0x18c] ss:$16 sps:$4 sm:$0xff]  }
 0x664   :  { %v16139_v53 = vld [vmem:[#allocation8 + $0x184] ss:$16 sps:$4 sm:$0xff]  }
 0x665   :  { %11041 = vmatpush1.bf16.msra.mxu0 %v15430_v21  ;;  %11557 = vmatpush1.bf16.msra.mxu1 %v15432_v20  ;;  %v16067_v21 = vld [vmem:[#allocation8 + $0x4] ss:$16 sps:$4 sm:$0xff]   ;;  %v16070_v20 = vld [vmem:[#allocation8 + $0xc] ss:$16 sps:$4 sm:$0xff]  }
 0x666   :  { %11042 = vmatprep.subr.bf16.mxu0 %v15439_v40  ;;  %11558 = vmatprep.subr.bf16.mxu1 %v15441_v43  ;;  %v16065_v40 = vld [vmem:[#allocation8] ss:$16 sps:$4 sm:$0xff]   ;;  %v16068_v43 = vld [vmem:[#allocation8 + $0x8] ss:$16 sps:$4 sm:$0xff]  }
 0x669   :  { %11043 = vmatpush1.bf16.msra.mxu0 %v15438_v13  ;;  %11559 = vmatpush1.bf16.msra.mxu1 %v15440_v3  ;;  %v16079_v13 = vld [vmem:[#allocation8 + $0x44] ss:$16 sps:$4 sm:$0xff]   ;;  %v16082_v3 = vld [vmem:[#allocation8 + $0x4c] ss:$16 sps:$4 sm:$0xff]  }
 0x66a   :  { %11044 = vmatprep.subr.bf16.mxu0 %v15447_v27  ;;  %11560 = vmatprep.subr.bf16.mxu1 %v15449_v59  ;;  %v16077_v27 = vld [vmem:[#allocation8 + $0x40] ss:$16 sps:$4 sm:$0xff]   ;;  %v16080_v59 = vld [vmem:[#allocation8 + $0x48] ss:$16 sps:$4 sm:$0xff]  }
 0x66d   :  { %11045 = vmatpush1.bf16.msra.mxu0 %v15446_v61  ;;  %11561 = vmatpush1.bf16.msra.mxu1 %v15448_v5  ;;  %v16094_v61 = vld [vmem:[#allocation8 + $0x8c] ss:$16 sps:$4 sm:$0xff]   ;;  %v16092_v5 = vld [vmem:[#allocation8 + $0x88] ss:$16 sps:$4 sm:$0xff]  }
 0x66e   :  { %11046 = vmatprep.subr.bf16.mxu0 %v15455_v0  ;;  %11562 = vmatprep.subr.bf16.mxu1 %v15457_v32  ;;  %v16097_v0 = vld [vmem:[#allocation8 + $0xa4] ss:$16 sps:$4 sm:$0xff]   ;;  %v16100_v32 = vld [vmem:[#allocation8 + $0xac] ss:$16 sps:$4 sm:$0xff]  }
 0x671   :  { %11047 = vmatpush1.bf16.msra.mxu0 %v15454_v6  ;;  %11563 = vmatpush1.bf16.msra.mxu1 %v15456_v16  ;;  %v16101_v6 = vld [vmem:[#allocation8 + $0xc0] ss:$16 sps:$4 sm:$0xff]   ;;  %v16104_v16 = vld [vmem:[#allocation8 + $0xc8] ss:$16 sps:$4 sm:$0xff]  }
 0x672   :  { %11048 = vmatprep.subr.bf16.mxu0 %v15463_v8  ;;  %11564 = vmatprep.subr.bf16.mxu1 %v15465_v23  ;;  %v16109_v8 = vld [vmem:[#allocation8 + $0xe4] ss:$16 sps:$4 sm:$0xff]   ;;  %v16112_v23 = vld [vmem:[#allocation8 + $0xec] ss:$16 sps:$4 sm:$0xff]  }
 0x675   :  { %11049 = vmatpush1.bf16.msra.mxu0 %v15462_v2  ;;  %11565 = vmatpush1.bf16.msra.mxu1 %v15464_v57  ;;  %v16113_v2 = vld [vmem:[#allocation8 + $0x100] ss:$16 sps:$4 sm:$0xff]   ;;  %v16116_v57 = vld [vmem:[#allocation8 + $0x108] ss:$16 sps:$4 sm:$0xff]  }
 0x676   :  { %11050 = vmatprep.subr.bf16.mxu0 %v15471_v34  ;;  %11566 = vmatprep.subr.bf16.mxu1 %v15473_v26  ;;  %v16121_v34 = vld [vmem:[#allocation8 + $0x124] ss:$16 sps:$4 sm:$0xff]   ;;  %v16124_v26 = vld [vmem:[#allocation8 + $0x12c] ss:$16 sps:$4 sm:$0xff]  }
 0x679   :  { %11051 = vmatpush1.bf16.msra.mxu0 %v15470_v4  ;;  %11567 = vmatpush1.bf16.msra.mxu1 %v15472_v39  ;;  %v16125_v4 = vld [vmem:[#allocation8 + $0x140] ss:$16 sps:$4 sm:$0xff]   ;;  %v16128_v39 = vld [vmem:[#allocation8 + $0x148] ss:$16 sps:$4 sm:$0xff]  }
 0x67a   :  { %11052 = vmatprep.subr.bf16.mxu0 %v15479_v14  ;;  %11568 = vmatprep.subr.bf16.mxu1 %v15481_v31  ;;  %v16133_v14 = vld [vmem:[#allocation8 + $0x164] ss:$16 sps:$4 sm:$0xff]   ;;  %v16136_v31 = vld [vmem:[#allocation8 + $0x16c] ss:$16 sps:$4 sm:$0xff]  }
 0x67d   :  { %11053 = vmatpush1.bf16.msra.mxu0 %v15478_v12  ;;  %11569 = vmatpush1.bf16.msra.mxu1 %v15480_v17  ;;  %v16137_v12 = vld [vmem:[#allocation8 + $0x180] ss:$16 sps:$4 sm:$0xff]   ;;  %v16140_v17 = vld [vmem:[#allocation8 + $0x188] ss:$16 sps:$4 sm:$0xff]  }
 0x67e   :  { %11054 = vmatprep.subr.bf16.mxu0 %v15487_v18  ;;  %11570 = vmatprep.subr.bf16.mxu1 %v15489_v52  ;;  %v16145_v18 = vld [vmem:[#allocation8 + $0x1a4] ss:$16 sps:$4 sm:$0xff]   ;;  %v16148_v52 = vld [vmem:[#allocation8 + $0x1ac] ss:$16 sps:$4 sm:$0xff]  }
 0x681   :  { %11055 = vmatpush1.bf16.msra.mxu0 %v15486_v41  ;;  %11571 = vmatpush1.bf16.msra.mxu1 %v15488_v42  ;;  %v16143_v41 = vld [vmem:[#allocation8 + $0x1a0] ss:$16 sps:$4 sm:$0xff]   ;;  %v16146_v42 = vld [vmem:[#allocation8 + $0x1a8] ss:$16 sps:$4 sm:$0xff]  }
 0x682   :  { %13181 = vmatprep.subr.bf16.mxu0 %v16067_v21  ;;  %13353 = vmatprep.subr.bf16.mxu1 %v16070_v20  ;;  %v16151_v21 = vld [vmem:[#allocation8 + $0x1c4] ss:$16 sps:$4 sm:$0xff]   ;;  %v16154_v20 = vld [vmem:[#allocation8 + $0x1cc] ss:$16 sps:$4 sm:$0xff]  }
 0x684   :  { %11057 = vmatmul.mubr.bf16.vlgmr.msra.gmra.mrb[4].mxu0 %v17006_v47  ;;  %11573 = vmatmul.mubr.bf16.vlgmr.msra.gmra.mrb[4].mxu1 %v17006_v47  ;;  %v16088_v47 = vld [vmem:[#allocation8 + $0x6c] ss:$16 sps:$4 sm:$0xff]  }
 0x685   :  { %13182 = vmatpush1.bf16.msra.mxu0 %v16065_v40  ;;  %13213 = vmatprep.mubr.bf16.mxu0 %v17054_v7  ;;  %v16149_v40 = vld [vmem:[#allocation8 + $0x1c0] ss:$16 sps:$4 sm:$0xff]  }
 0x686   :  { %13354 = vmatpush1.bf16.msra.mxu1 %v16068_v43  ;;  %13385 = vmatprep.mubr.bf16.mxu1 %v17054_v7  ;;  %v16089_v7 = vld [vmem:[#allocation8 + $0x80] ss:$16 sps:$4 sm:$0xff]   ;;  %v16152_v43 = vld [vmem:[#allocation8 + $0x1c8] ss:$16 sps:$4 sm:$0xff]  }
 0x687   :  { %13183 = vmatprep.subr.bf16.mxu0 %v16073_v44  ;;  %13355 = vmatprep.subr.bf16.mxu1 %v16076_v50  ;;  %v16157_v44 = vld [vmem:[#allocation8 + $0x1e4] ss:$16 sps:$4 sm:$0xff]   ;;  %v16160_v50 = vld [vmem:[#allocation8 + $0x1ec] ss:$16 sps:$4 sm:$0xff]  }
 0x689   :  { %13184 = vmatpush1.bf16.msra.mxu0 %v16071_v1  ;;  %v16155_v1 = vld [vmem:[#allocation8 + $0x1e0] ss:$16 sps:$4 sm:$0xff]  }
 0x68a   :  { %13356 = vmatpush1.bf16.msra.mxu1 %v16074_v25  ;;  %13185 = vmatprep.subr.bf16.mxu0 %v16079_v13  ;;  %v16158_v25 = vld [vmem:[#allocation8 + $0x1e8] ss:$16 sps:$4 sm:$0xff]   ;;  %v16163_v13 = vld [vmem:[#allocation8 + $0x204] ss:$16 sps:$4 sm:$0xff]  }
 0x68b   :  { %13357 = vmatprep.subr.bf16.mxu1 %v16082_v3  ;;  %v16166_v3 = vld [vmem:[#allocation8 + $0x20c] ss:$16 sps:$4 sm:$0xff]  }
 0x68d   :  { %13186 = vmatpush1.bf16.msra.mxu0 %v16077_v27  ;;  %v16161_v27 = vld [vmem:[#allocation8 + $0x200] ss:$16 sps:$4 sm:$0xff]  }
 0x68e   :  { %13358 = vmatpush1.bf16.msra.mxu1 %v16080_v59  ;;  %13187 = vmatprep.subr.bf16.mxu0 %v16085_v48  ;;  %v16164_v59 = vld [vmem:[#allocation8 + $0x208] ss:$16 sps:$4 sm:$0xff]   ;;  %v16169_v48 = vld [vmem:[#allocation8 + $0x224] ss:$16 sps:$4 sm:$0xff]  }
 0x68f   :  { %13359 = vmatprep.subr.bf16.mxu1 %v16088_v47  ;;  %v16172_v47 = vld [vmem:[#allocation8 + $0x22c] ss:$16 sps:$4 sm:$0xff]  }
 0x691   :  { %13188 = vmatpush1.bf16.msra.mxu0 %v16083_v49  ;;  %v16167_v49 = vld [vmem:[#allocation8 + $0x220] ss:$16 sps:$4 sm:$0xff]  }
 0x692   :  { %13360 = vmatpush1.bf16.msra.mxu1 %v16086_v29  ;;  %13189 = vmatprep.subr.bf16.mxu0 %v16091_v60  ;;  %v16170_v29 = vld [vmem:[#allocation8 + $0x228] ss:$16 sps:$4 sm:$0xff]   ;;  %v16175_v60 = vld [vmem:[#allocation8 + $0x244] ss:$16 sps:$4 sm:$0xff]  }
 0x693   :  { %13361 = vmatprep.subr.bf16.mxu1 %v16094_v61  ;;  %v16178_v61 = vld [vmem:[#allocation8 + $0x24c] ss:$16 sps:$4 sm:$0xff]  }
 0x695   :  { %13190 = vmatpush1.bf16.msra.mxu0 %v16089_v7  ;;  %v16173_v7 = vld [vmem:[#allocation8 + $0x240] ss:$16 sps:$4 sm:$0xff]  }
 0x696   :  { %13362 = vmatpush1.bf16.msra.mxu1 %v16092_v5  ;;  %13191 = vmatprep.subr.bf16.mxu0 %v16097_v0  ;;  %v16176_v5 = vld [vmem:[#allocation8 + $0x248] ss:$16 sps:$4 sm:$0xff]   ;;  %v16181_v0 = vld [vmem:[#allocation8 + $0x264] ss:$16 sps:$4 sm:$0xff]  }
 0x697   :  { %13363 = vmatprep.subr.bf16.mxu1 %v16100_v32  ;;  %v16179_v32 = vld [vmem:[#allocation8 + $0x260] ss:$16 sps:$4 sm:$0xff]  }
 0x699   :  { %13192 = vmatpush1.bf16.msra.mxu0 %v16095_v51  ;;  %v16182_v51 = vld [vmem:[#allocation8 + $0x268] ss:$16 sps:$4 sm:$0xff]  }
 0x69a   :  { %13364 = vmatpush1.bf16.msra.mxu1 %v16098_v46  ;;  %13193 = vmatprep.subr.bf16.mxu0 %v16103_v55  ;;  %v16187_v46 = vld [vmem:[#allocation8 + $0x284] ss:$16 sps:$4 sm:$0xff]   ;;  %v16190_v55 = vld [vmem:[#allocation8 + $0x28c] ss:$16 sps:$4 sm:$0xff]  }
 0x69b   :  { %13365 = vmatprep.subr.bf16.mxu1 %v16106_v62  ;;  %v16188_v62 = vld [vmem:[#allocation8 + $0x288] ss:$16 sps:$4 sm:$0xff]  }
 0x69d   :  { %13194 = vmatpush1.bf16.msra.mxu0 %v16101_v6  ;;  %v16193_v6 = vld [vmem:[#allocation8 + $0x2a4] ss:$16 sps:$4 sm:$0xff]  }
 0x69e   :  { %13366 = vmatpush1.bf16.msra.mxu1 %v16104_v16  ;;  %13195 = vmatprep.subr.bf16.mxu0 %v16109_v8  ;;  %v16196_v16 = vld [vmem:[#allocation8 + $0x2ac] ss:$16 sps:$4 sm:$0xff]   ;;  %v16191_v8 = vld [vmem:[#allocation8 + $0x2a0] ss:$16 sps:$4 sm:$0xff]  }
 0x69f   :  { %13367 = vmatprep.subr.bf16.mxu1 %v16112_v23  ;;  %v16194_v23 = vld [vmem:[#allocation8 + $0x2a8] ss:$16 sps:$4 sm:$0xff]  }
 0x6a1   :  { %13196 = vmatpush1.bf16.msra.mxu0 %v16107_v10  ;;  %v16199_v10 = vld [vmem:[#allocation8 + $0x2c4] ss:$16 sps:$4 sm:$0xff]  }
 0x6a2   :  { %13368 = vmatpush1.bf16.msra.mxu1 %v16110_v11  ;;  %13197 = vmatprep.subr.bf16.mxu0 %v16115_v33  ;;  %v16202_v11 = vld [vmem:[#allocation8 + $0x2cc] ss:$16 sps:$4 sm:$0xff]   ;;  %v16197_v33 = vld [vmem:[#allocation8 + $0x2c0] ss:$16 sps:$4 sm:$0xff]  }
 0x6a3   :  { %13369 = vmatprep.subr.bf16.mxu1 %v16118_v15  ;;  %v16200_v15 = vld [vmem:[#allocation8 + $0x2c8] ss:$16 sps:$4 sm:$0xff]  }
 0x6a5   :  { %13198 = vmatpush1.bf16.msra.mxu0 %v16113_v2  ;;  %v16205_v2 = vld [vmem:[#allocation8 + $0x2e4] ss:$16 sps:$4 sm:$0xff]  }
 0x6a6   :  { %13370 = vmatpush1.bf16.msra.mxu1 %v16116_v57  ;;  %13199 = vmatprep.subr.bf16.mxu0 %v16121_v34  ;;  %v16208_v57 = vld [vmem:[#allocation8 + $0x2ec] ss:$16 sps:$4 sm:$0xff]   ;;  %v16203_v34 = vld [vmem:[#allocation8 + $0x2e0] ss:$16 sps:$4 sm:$0xff]  }
 0x6a7   :  { %13371 = vmatprep.subr.bf16.mxu1 %v16124_v26  ;;  %v16206_v26 = vld [vmem:[#allocation8 + $0x2e8] ss:$16 sps:$4 sm:$0xff]  }
 0x6a9   :  { %13200 = vmatpush1.bf16.msra.mxu0 %v16119_v58  ;;  %v16211_v58 = vld [vmem:[#allocation8 + $0x304] ss:$16 sps:$4 sm:$0xff]  }
 0x6aa   :  { %13372 = vmatpush1.bf16.msra.mxu1 %v16122_v45  ;;  %13201 = vmatprep.subr.bf16.mxu0 %v16127_v38  ;;  %v16214_v45 = vld [vmem:[#allocation8 + $0x30c] ss:$16 sps:$4 sm:$0xff]   ;;  %v16209_v38 = vld [vmem:[#allocation8 + $0x300] ss:$16 sps:$4 sm:$0xff]  }
 0x6ab   :  { %13373 = vmatprep.subr.bf16.mxu1 %v16130_v28  ;;  %v16212_v28 = vld [vmem:[#allocation8 + $0x308] ss:$16 sps:$4 sm:$0xff]  }
 0x6ad   :  { %13202 = vmatpush1.bf16.msra.mxu0 %v16125_v4  ;;  %v16217_v4 = vld [vmem:[#allocation8 + $0x324] ss:$16 sps:$4 sm:$0xff]  }
 0x6ae   :  { %13374 = vmatpush1.bf16.msra.mxu1 %v16128_v39  ;;  %13203 = vmatprep.subr.bf16.mxu0 %v16133_v14  ;;  %v16220_v39 = vld [vmem:[#allocation8 + $0x32c] ss:$16 sps:$4 sm:$0xff]   ;;  %v16215_v14 = vld [vmem:[#allocation8 + $0x320] ss:$16 sps:$4 sm:$0xff]  }
 0x6af   :  { %13375 = vmatprep.subr.bf16.mxu1 %v16136_v31  ;;  %v16218_v31 = vld [vmem:[#allocation8 + $0x328] ss:$16 sps:$4 sm:$0xff]  }
 0x6b1   :  { %13204 = vmatpush1.bf16.msra.mxu0 %v16131_v22  ;;  %v16223_v22 = vld [vmem:[#allocation8 + $0x344] ss:$16 sps:$4 sm:$0xff]  }
 0x6b2   :  { %13376 = vmatpush1.bf16.msra.mxu1 %v16134_v63  ;;  %13205 = vmatprep.subr.bf16.mxu0 %v16139_v53  ;;  %v16226_v63 = vld [vmem:[#allocation8 + $0x34c] ss:$16 sps:$4 sm:$0xff]   ;;  %v16221_v53 = vld [vmem:[#allocation8 + $0x340] ss:$16 sps:$4 sm:$0xff]  }
 0x6b3   :  { %13377 = vmatprep.subr.bf16.mxu1 %v16142_v35  ;;  %v16224_v35 = vld [vmem:[#allocation8 + $0x348] ss:$16 sps:$4 sm:$0xff]  }
 0x6b5   :  { %13206 = vmatpush1.bf16.msra.mxu0 %v16137_v12  ;;  %v16229_v12 = vld [vmem:[#allocation8 + $0x364] ss:$16 sps:$4 sm:$0xff]  }
 0x6b6   :  { %13378 = vmatpush1.bf16.msra.mxu1 %v16140_v17  ;;  %13207 = vmatprep.subr.bf16.mxu0 %v16145_v18  ;;  %v16232_v17 = vld [vmem:[#allocation8 + $0x36c] ss:$16 sps:$4 sm:$0xff]   ;;  %v16227_v18 = vld [vmem:[#allocation8 + $0x360] ss:$16 sps:$4 sm:$0xff]  }
 0x6b7   :  { %13379 = vmatprep.subr.bf16.mxu1 %v16148_v52  ;;  %v16230_v52 = vld [vmem:[#allocation8 + $0x368] ss:$16 sps:$4 sm:$0xff]  }
 0x6b9   :  { %13208 = vmatpush1.bf16.msra.mxu0 %v16143_v41  ;;  %v16235_v41 = vld [vmem:[#allocation8 + $0x384] ss:$16 sps:$4 sm:$0xff]  }
 0x6ba   :  { %13380 = vmatpush1.bf16.msra.mxu1 %v16146_v42  ;;  %13209 = vmatprep.subr.bf16.mxu0 %v16151_v21  ;;  %v16238_v42 = vld [vmem:[#allocation8 + $0x38c] ss:$16 sps:$4 sm:$0xff]   ;;  %v16233_v21 = vld [vmem:[#allocation8 + $0x380] ss:$16 sps:$4 sm:$0xff]  }
 0x6bb   :  { %13381 = vmatprep.subr.bf16.mxu1 %v16154_v20  ;;  %v16236_v20 = vld [vmem:[#allocation8 + $0x388] ss:$16 sps:$4 sm:$0xff]  }
 0x6bd   :  { %13210 = vmatpush1.bf16.msra.mxu0 %v16149_v40  ;;  %v16241_v40 = vld [vmem:[#allocation8 + $0x3a4] ss:$16 sps:$4 sm:$0xff]  }
 0x6be   :  { %13382 = vmatpush1.bf16.msra.mxu1 %v16152_v43  ;;  %13211 = vmatprep.subr.bf16.mxu0 %v16157_v44  ;;  %v16244_v43 = vld [vmem:[#allocation8 + $0x3ac] ss:$16 sps:$4 sm:$0xff]   ;;  %v16239_v44 = vld [vmem:[#allocation8 + $0x3a0] ss:$16 sps:$4 sm:$0xff]  }
 0x6bf   :  { %13383 = vmatprep.subr.bf16.mxu1 %v16160_v50  ;;  %v16242_v50 = vld [vmem:[#allocation8 + $0x3a8] ss:$16 sps:$4 sm:$0xff]  }
 0x6c1   :  { %13212 = vmatpush1.bf16.msra.mxu0 %v16155_v1  ;;  %v16247_v1 = vld [vmem:[#allocation8 + $0x3c4] ss:$16 sps:$4 sm:$0xff]  }
 0x6c2   :  { %13384 = vmatpush1.bf16.msra.mxu1 %v16158_v25  ;;  %13224 = vmatprep.subr.bf16.mxu0 %v16163_v13  ;;  %v16250_v25 = vld [vmem:[#allocation8 + $0x3cc] ss:$16 sps:$4 sm:$0xff]   ;;  %v16245_v13 = vld [vmem:[#allocation8 + $0x3c0] ss:$16 sps:$4 sm:$0xff]  }
 0x6c3   :  { %13396 = vmatprep.subr.bf16.mxu1 %v16166_v3  ;;  %v16248_v3 = vld [vmem:[#allocation8 + $0x3c8] ss:$16 sps:$4 sm:$0xff]  }
 0x6c4   :  { %13214 = vmatmul.mubr.bf16.vlgmr.msra.gmra.mrb[8].mxu0 %v17050_v56 }
 0x6c5   :  { %13386 = vmatmul.mubr.bf16.vlgmr.msra.gmra.mrb[8].mxu1 %v17050_v56  ;;  %13225 = vmatpush1.bf16.msra.mxu0 %v16161_v27  ;;  %v16184_v56 = vld [vmem:[#allocation8 + $0x26c] ss:$16 sps:$4 sm:$0xff]   ;;  %v16253_v27 = vld [vmem:[#allocation8 + $0x3e4] ss:$16 sps:$4 sm:$0xff]  }
 0x6c6   :  { %13256 = vmatprep.mubr.bf16.mxu0 %v17056_v9  ;;  %13397 = vmatpush1.bf16.msra.mxu1 %v16164_v59  ;;  %v16256_v59 = vld [vmem:[#allocation8 + $0x3ec] ss:$16 sps:$4 sm:$0xff]  }
 0x6c7   :  { %13428 = vmatprep.mubr.bf16.mxu1 %v17056_v9  ;;  %13226 = vmatprep.subr.bf16.mxu0 %v16169_v48  ;;  %v16185_v9 = vld [vmem:[#allocation8 + $0x280] ss:$16 sps:$4 sm:$0xff]  }
 0x6c8   :  { %13398 = vmatprep.subr.bf16.mxu1 %v16172_v47  ;;  %v16251_v48 = vld [vmem:[#allocation8 + $0x3e0] ss:$16 sps:$4 sm:$0xff]   ;;  %v16254_v47 = vld [vmem:[#allocation8 + $0x3e8] ss:$16 sps:$4 sm:$0xff]  }
 0x6c9   :  { %13227 = vmatpush1.bf16.msra.mxu0 %v16167_v49  ;;  %v16259_v49 = vld [vmem:[#allocation8 + $0x404] ss:$16 sps:$4 sm:$0xff]  }
 0x6ca   :  { %13399 = vmatpush1.bf16.msra.mxu1 %v16170_v29  ;;  %13228 = vmatprep.subr.bf16.mxu0 %v16175_v60  ;;  %v16262_v29 = vld [vmem:[#allocation8 + $0x40c] ss:$16 sps:$4 sm:$0xff]   ;;  %v16257_v60 = vld [vmem:[#allocation8 + $0x400] ss:$16 sps:$4 sm:$0xff]  }
 0x6cb   :  { %13400 = vmatprep.subr.bf16.mxu1 %v16178_v61  ;;  %v16260_v61 = vld [vmem:[#allocation8 + $0x408] ss:$16 sps:$4 sm:$0xff]  }
 0x6cd   :  { %13229 = vmatpush1.bf16.msra.mxu0 %v16173_v7  ;;  %v16265_v7 = vld [vmem:[#allocation8 + $0x424] ss:$16 sps:$4 sm:$0xff]  }
 0x6ce   :  { %13401 = vmatpush1.bf16.msra.mxu1 %v16176_v5  ;;  %13230 = vmatprep.subr.bf16.mxu0 %v16181_v0  ;;  %v16268_v5 = vld [vmem:[#allocation8 + $0x42c] ss:$16 sps:$4 sm:$0xff]   ;;  %v16263_v0 = vld [vmem:[#allocation8 + $0x420] ss:$16 sps:$4 sm:$0xff]  }
 0x6cf   :  { %13402 = vmatprep.subr.bf16.mxu1 %v16184_v56  ;;  %v16266_v56 = vld [vmem:[#allocation8 + $0x428] ss:$16 sps:$4 sm:$0xff]  }
 0x6d1   :  { %13231 = vmatpush1.bf16.msra.mxu0 %v16179_v32  ;;  %v16271_v32 = vld [vmem:[#allocation8 + $0x444] ss:$16 sps:$4 sm:$0xff]  }
 0x6d2   :  { %13403 = vmatpush1.bf16.msra.mxu1 %v16182_v51  ;;  %13232 = vmatprep.subr.bf16.mxu0 %v16187_v46  ;;  %v16274_v51 = vld [vmem:[#allocation8 + $0x44c] ss:$16 sps:$4 sm:$0xff]   ;;  %v16269_v46 = vld [vmem:[#allocation8 + $0x440] ss:$16 sps:$4 sm:$0xff]  }
 0x6d3   :  { %13404 = vmatprep.subr.bf16.mxu1 %v16190_v55  ;;  %v16272_v55 = vld [vmem:[#allocation8 + $0x448] ss:$16 sps:$4 sm:$0xff]  }
 0x6d5   :  { %13233 = vmatpush1.bf16.msra.mxu0 %v16185_v9  ;;  %v16277_v9 = vld [vmem:[#allocation8 + $0x464] ss:$16 sps:$4 sm:$0xff]  }
 0x6d6   :  { %13405 = vmatpush1.bf16.msra.mxu1 %v16188_v62  ;;  %13234 = vmatprep.subr.bf16.mxu0 %v16193_v6  ;;  %v16280_v62 = vld [vmem:[#allocation8 + $0x46c] ss:$16 sps:$4 sm:$0xff]   ;;  %v16275_v6 = vld [vmem:[#allocation8 + $0x460] ss:$16 sps:$4 sm:$0xff]  }
 0x6d7   :  { %13406 = vmatprep.subr.bf16.mxu1 %v16196_v16  ;;  %v16283_v16 = vld [vmem:[#allocation8 + $0x484] ss:$16 sps:$4 sm:$0xff]  }
 0x6d9   :  { %13235 = vmatpush1.bf16.msra.mxu0 %v16191_v8  ;;  %v16286_v8 = vld [vmem:[#allocation8 + $0x48c] ss:$16 sps:$4 sm:$0xff]  }
 0x6da   :  { %13407 = vmatpush1.bf16.msra.mxu1 %v16194_v23  ;;  %13236 = vmatprep.subr.bf16.mxu0 %v16199_v10  ;;  %v16281_v23 = vld [vmem:[#allocation8 + $0x480] ss:$16 sps:$4 sm:$0xff]   ;;  %v16284_v10 = vld [vmem:[#allocation8 + $0x488] ss:$16 sps:$4 sm:$0xff]  }
 0x6db   :  { %13408 = vmatprep.subr.bf16.mxu1 %v16202_v11  ;;  %v16289_v11 = vld [vmem:[#allocation8 + $0x4a4] ss:$16 sps:$4 sm:$0xff]  }
 0x6dd   :  { %13237 = vmatpush1.bf16.msra.mxu0 %v16197_v33  ;;  %v16292_v33 = vld [vmem:[#allocation8 + $0x4ac] ss:$16 sps:$4 sm:$0xff]  }
 0x6de   :  { %13409 = vmatpush1.bf16.msra.mxu1 %v16200_v15  ;;  %13238 = vmatprep.subr.bf16.mxu0 %v16205_v2  ;;  %v16287_v15 = vld [vmem:[#allocation8 + $0x4a0] ss:$16 sps:$4 sm:$0xff]   ;;  %v16290_v2 = vld [vmem:[#allocation8 + $0x4a8] ss:$16 sps:$4 sm:$0xff]  }
 0x6df   :  { %13410 = vmatprep.subr.bf16.mxu1 %v16208_v57  ;;  %v16295_v57 = vld [vmem:[#allocation8 + $0x4c4] ss:$16 sps:$4 sm:$0xff]  }
 0x6e1   :  { %13239 = vmatpush1.bf16.msra.mxu0 %v16203_v34  ;;  %v16298_v34 = vld [vmem:[#allocation8 + $0x4cc] ss:$16 sps:$4 sm:$0xff]  }
 0x6e2   :  { %13411 = vmatpush1.bf16.msra.mxu1 %v16206_v26  ;;  %13240 = vmatprep.subr.bf16.mxu0 %v16211_v58  ;;  %v16293_v26 = vld [vmem:[#allocation8 + $0x4c0] ss:$16 sps:$4 sm:$0xff]   ;;  %v16296_v58 = vld [vmem:[#allocation8 + $0x4c8] ss:$16 sps:$4 sm:$0xff]  }
 0x6e3   :  { %13412 = vmatprep.subr.bf16.mxu1 %v16214_v45  ;;  %v16301_v45 = vld [vmem:[#allocation8 + $0x4e4] ss:$16 sps:$4 sm:$0xff]  }
 0x6e5   :  { %13241 = vmatpush1.bf16.msra.mxu0 %v16209_v38  ;;  %v16304_v38 = vld [vmem:[#allocation8 + $0x4ec] ss:$16 sps:$4 sm:$0xff]  }
 0x6e6   :  { %13413 = vmatpush1.bf16.msra.mxu1 %v16212_v28  ;;  %13242 = vmatprep.subr.bf16.mxu0 %v16217_v4  ;;  %v16299_v28 = vld [vmem:[#allocation8 + $0x4e0] ss:$16 sps:$4 sm:$0xff]   ;;  %v16302_v4 = vld [vmem:[#allocation8 + $0x4e8] ss:$16 sps:$4 sm:$0xff]  }
 0x6e7   :  { %13414 = vmatprep.subr.bf16.mxu1 %v16220_v39  ;;  %v16307_v39 = vld [vmem:[#allocation8 + $0x504] ss:$16 sps:$4 sm:$0xff]  }
 0x6e9   :  { %13243 = vmatpush1.bf16.msra.mxu0 %v16215_v14  ;;  %v16310_v14 = vld [vmem:[#allocation8 + $0x50c] ss:$16 sps:$4 sm:$0xff]  }
 0x6ea   :  { %13415 = vmatpush1.bf16.msra.mxu1 %v16218_v31  ;;  %13244 = vmatprep.subr.bf16.mxu0 %v16223_v22  ;;  %v16305_v31 = vld [vmem:[#allocation8 + $0x500] ss:$16 sps:$4 sm:$0xff]   ;;  %v16308_v22 = vld [vmem:[#allocation8 + $0x508] ss:$16 sps:$4 sm:$0xff]  }
 0x6eb   :  { %13416 = vmatprep.subr.bf16.mxu1 %v16226_v63  ;;  %v16313_v63 = vld [vmem:[#allocation8 + $0x524] ss:$16 sps:$4 sm:$0xff]  }
 0x6ed   :  { %13245 = vmatpush1.bf16.msra.mxu0 %v16221_v53  ;;  %v16316_v53 = vld [vmem:[#allocation8 + $0x52c] ss:$16 sps:$4 sm:$0xff]  }
 0x6ee   :  { %13417 = vmatpush1.bf16.msra.mxu1 %v16224_v35  ;;  %13246 = vmatprep.subr.bf16.mxu0 %v16229_v12  ;;  %v16311_v35 = vld [vmem:[#allocation8 + $0x520] ss:$16 sps:$4 sm:$0xff]   ;;  %v16314_v12 = vld [vmem:[#allocation8 + $0x528] ss:$16 sps:$4 sm:$0xff]  }
 0x6ef   :  { %13418 = vmatprep.subr.bf16.mxu1 %v16232_v17  ;;  %v16319_v17 = vld [vmem:[#allocation8 + $0x544] ss:$16 sps:$4 sm:$0xff]  }
 0x6f1   :  { %13247 = vmatpush1.bf16.msra.mxu0 %v16227_v18  ;;  %v16322_v18 = vld [vmem:[#allocation8 + $0x54c] ss:$16 sps:$4 sm:$0xff]  }
 0x6f2   :  { %13419 = vmatpush1.bf16.msra.mxu1 %v16230_v52  ;;  %13248 = vmatprep.subr.bf16.mxu0 %v16235_v41  ;;  %v16317_v52 = vld [vmem:[#allocation8 + $0x540] ss:$16 sps:$4 sm:$0xff]   ;;  %v16320_v41 = vld [vmem:[#allocation8 + $0x548] ss:$16 sps:$4 sm:$0xff]  }
 0x6f3   :  { %13420 = vmatprep.subr.bf16.mxu1 %v16238_v42  ;;  %v16325_v42 = vld [vmem:[#allocation8 + $0x564] ss:$16 sps:$4 sm:$0xff]  }
 0x6f5   :  { %13249 = vmatpush1.bf16.msra.mxu0 %v16233_v21  ;;  %v16328_v21 = vld [vmem:[#allocation8 + $0x56c] ss:$16 sps:$4 sm:$0xff]  }
 0x6f6   :  { %13421 = vmatpush1.bf16.msra.mxu1 %v16236_v20  ;;  %13250 = vmatprep.subr.bf16.mxu0 %v16241_v40  ;;  %v16323_v20 = vld [vmem:[#allocation8 + $0x560] ss:$16 sps:$4 sm:$0xff]   ;;  %v16326_v40 = vld [vmem:[#allocation8 + $0x568] ss:$16 sps:$4 sm:$0xff]  }
 0x6f7   :  { %13422 = vmatprep.subr.bf16.mxu1 %v16244_v43  ;;  %v16331_v43 = vld [vmem:[#allocation8 + $0x584] ss:$16 sps:$4 sm:$0xff]  }
 0x6f9   :  { %13251 = vmatpush1.bf16.msra.mxu0 %v16239_v44  ;;  %v16334_v44 = vld [vmem:[#allocation8 + $0x58c] ss:$16 sps:$4 sm:$0xff]  }
 0x6fa   :  { %13423 = vmatpush1.bf16.msra.mxu1 %v16242_v50  ;;  %13252 = vmatprep.subr.bf16.mxu0 %v16247_v1  ;;  %v16329_v50 = vld [vmem:[#allocation8 + $0x580] ss:$16 sps:$4 sm:$0xff]   ;;  %v16332_v1 = vld [vmem:[#allocation8 + $0x588] ss:$16 sps:$4 sm:$0xff]  }
 0x6fb   :  { %13424 = vmatprep.subr.bf16.mxu1 %v16250_v25  ;;  %v16337_v25 = vld [vmem:[#allocation8 + $0x5a4] ss:$16 sps:$4 sm:$0xff]  }
 0x6fd   :  { %13253 = vmatpush1.bf16.msra.mxu0 %v16245_v13  ;;  %v16340_v13 = vld [vmem:[#allocation8 + $0x5ac] ss:$16 sps:$4 sm:$0xff]  }
 0x6fe   :  { %13425 = vmatpush1.bf16.msra.mxu1 %v16248_v3  ;;  %13254 = vmatprep.subr.bf16.mxu0 %v16253_v27  ;;  %v16335_v3 = vld [vmem:[#allocation8 + $0x5a0] ss:$16 sps:$4 sm:$0xff]   ;;  %v16338_v27 = vld [vmem:[#allocation8 + $0x5a8] ss:$16 sps:$4 sm:$0xff]  }
 0x6ff   :  { %13426 = vmatprep.subr.bf16.mxu1 %v16256_v59  ;;  %v16343_v59 = vld [vmem:[#allocation8 + $0x5c4] ss:$16 sps:$4 sm:$0xff]  }
 0x701   :  { %13255 = vmatpush1.bf16.msra.mxu0 %v16251_v48  ;;  %v16346_v48 = vld [vmem:[#allocation8 + $0x5cc] ss:$16 sps:$4 sm:$0xff]  }
 0x702   :  { %13427 = vmatpush1.bf16.msra.mxu1 %v16254_v47  ;;  %13267 = vmatprep.subr.bf16.mxu0 %v16259_v49  ;;  %v16341_v47 = vld [vmem:[#allocation8 + $0x5c0] ss:$16 sps:$4 sm:$0xff]   ;;  %v16344_v49 = vld [vmem:[#allocation8 + $0x5c8] ss:$16 sps:$4 sm:$0xff]  }
 0x703   :  { %13439 = vmatprep.subr.bf16.mxu1 %v16262_v29  ;;  %v16349_v29 = vld [vmem:[#allocation8 + $0x5e4] ss:$16 sps:$4 sm:$0xff]  }
 0x704   :  { %13257 = vmatmul.mubr.bf16.vlgmr.msra.gmra.mrb[8].mxu0 %v17052_v19 }
 0x705   :  { %13429 = vmatmul.mubr.bf16.vlgmr.msra.gmra.mrb[8].mxu1 %v17052_v19  ;;  %13268 = vmatpush1.bf16.msra.mxu0 %v16257_v60  ;;  %v16278_v19 = vld [vmem:[#allocation8 + $0x468] ss:$16 sps:$4 sm:$0xff]   ;;  %v16352_v60 = vld [vmem:[#allocation8 + $0x5ec] ss:$16 sps:$4 sm:$0xff]  }
 0x706   :  { %13440 = vmatpush1.bf16.msra.mxu1 %v16260_v61  ;;  %13269 = vmatprep.subr.bf16.mxu0 %v16265_v7  ;;  %v16347_v61 = vld [vmem:[#allocation8 + $0x5e0] ss:$16 sps:$4 sm:$0xff]   ;;  %v16350_v7 = vld [vmem:[#allocation8 + $0x5e8] ss:$16 sps:$4 sm:$0xff]  }
 0x707   :  { %13441 = vmatprep.subr.bf16.mxu1 %v16268_v5  ;;  %v16355_v5 = vld [vmem:[#allocation8 + $0x604] ss:$16 sps:$4 sm:$0xff]  }
 0x709   :  { %13270 = vmatpush1.bf16.msra.mxu0 %v16263_v0  ;;  %v16358_v0 = vld [vmem:[#allocation8 + $0x60c] ss:$16 sps:$4 sm:$0xff]  }
 0x70a   :  { %13442 = vmatpush1.bf16.msra.mxu1 %v16266_v56  ;;  %13271 = vmatprep.subr.bf16.mxu0 %v16271_v32  ;;  %v1697_v56 = vsub.s32 4, %v17024_v30  ;;  %v1705_v32 = vsub.s32 6, %v17024_v30 }
 0x70b   :  { %13443 = vmatprep.subr.bf16.mxu1 %v16274_v51  ;;  %v1701_v51 = vsub.s32 5, %v17024_v30 }
 0x70d   :  { %13272 = vmatpush1.bf16.msra.mxu0 %v16269_v46  ;;  %v1709_v46 = vsub.s32 7, %v17024_v30 }
 0x70e   :  { %13444 = vmatpush1.bf16.msra.mxu1 %v16272_v55  ;;  %13273 = vmatprep.subr.bf16.mxu0 %v16277_v9  ;;  %v16489_v55 = vld [vmem:[#allocation7] sm:$0xff] }
 0x70f   :  { %13445 = vmatprep.subr.bf16.mxu1 %v16280_v62  ;;  %v1698_v9 = vrot.slane %v16489_v55, %v1697_v56  ;;  %v1706_v62 = vrot.slane %v16489_v55, %v1705_v32  ;;  %v16379_v56 = vld [vmem:[#allocation8 + $0x684] ss:$16 sps:$4 sm:$0xff]   ;;  %v16382_v32 = vld [vmem:[#allocation8 + $0x68c] ss:$16 sps:$4 sm:$0xff]  }
 0x711   :  { %13274 = vmatpush1.bf16.msra.mxu0 %v16275_v6  ;;  %v1702_v6 = vrot.slane %v16489_v55, %v1701_v51  ;;  %v16377_v51 = vld [vmem:[#allocation8 + $0x680] ss:$16 sps:$4 sm:$0xff]  }
 0x712   :  { %13446 = vmatpush1.bf16.msra.mxu1 %v16278_v19  ;;  %13275 = vmatprep.subr.bf16.mxu0 %v16283_v16  ;;  %v1710_v19 = vrot.slane %v16489_v55, %v1709_v46  ;;  %v16380_v46 = vld [vmem:[#allocation8 + $0x688] ss:$16 sps:$4 sm:$0xff]   ;;  %v16385_v55 = vld [vmem:[#allocation8 + $0x6a4] ss:$16 sps:$4 sm:$0xff]  }
 0x713   :  { %13447 = vmatprep.subr.bf16.mxu1 %v16286_v8 }
 0x715   :  { %13276 = vmatpush1.bf16.msra.mxu0 %v16281_v23 }
 0x716   :  { %13448 = vmatpush1.bf16.msra.mxu1 %v16284_v10  ;;  %13277 = vmatprep.subr.bf16.mxu0 %v16289_v11 }
 0x717   :  { %13449 = vmatprep.subr.bf16.mxu1 %v16292_v33 }
 0x719   :  { %13278 = vmatpush1.bf16.msra.mxu0 %v16287_v15 }
 0x71a   :  { %13450 = vmatpush1.bf16.msra.mxu1 %v16290_v2  ;;  %13279 = vmatprep.subr.bf16.mxu0 %v16295_v57 }
 0x71b   :  { %13451 = vmatprep.subr.bf16.mxu1 %v16298_v34 }
 0x71d   :  { %13280 = vmatpush1.bf16.msra.mxu0 %v16293_v26 }
 0x71e   :  { %13452 = vmatpush1.bf16.msra.mxu1 %v16296_v58  ;;  %13281 = vmatprep.subr.bf16.mxu0 %v16301_v45 }
 0x71f   :  { %13453 = vmatprep.subr.bf16.mxu1 %v16304_v38 }
 0x721   :  { %13282 = vmatpush1.bf16.msra.mxu0 %v16299_v28 }
 0x722   :  { %13454 = vmatpush1.bf16.msra.mxu1 %v16302_v4  ;;  %13283 = vmatprep.subr.bf16.mxu0 %v16307_v39 }
 0x723   :  { %13455 = vmatprep.subr.bf16.mxu1 %v16310_v14 }
 0x725   :  { %13284 = vmatpush1.bf16.msra.mxu0 %v16305_v31 }
 0x726   :  { %13456 = vmatpush1.bf16.msra.mxu1 %v16308_v22  ;;  %13285 = vmatprep.subr.bf16.mxu0 %v16313_v63 }
 0x727   :  { %13457 = vmatprep.subr.bf16.mxu1 %v16316_v53 }
 0x729   :  { %13286 = vmatpush1.bf16.msra.mxu0 %v16311_v35 }
 0x72a   :  { %13458 = vmatpush1.bf16.msra.mxu1 %v16314_v12  ;;  %13287 = vmatprep.subr.bf16.mxu0 %v16319_v17 }
 0x72b   :  { %13459 = vmatprep.subr.bf16.mxu1 %v16322_v18 }
 0x72d   :  { %13288 = vmatpush1.bf16.msra.mxu0 %v16317_v52 }
 0x72e   :  { %13460 = vmatpush1.bf16.msra.mxu1 %v16320_v41  ;;  %13289 = vmatprep.subr.bf16.mxu0 %v16325_v42 }
 0x72f   :  { %13461 = vmatprep.subr.bf16.mxu1 %v16328_v21 }
 0x731   :  { %13290 = vmatpush1.bf16.msra.mxu0 %v16323_v20 }
 0x732   :  { %13462 = vmatpush1.bf16.msra.mxu1 %v16326_v40  ;;  %13291 = vmatprep.subr.bf16.mxu0 %v16331_v43 }
 0x733   :  { %13463 = vmatprep.subr.bf16.mxu1 %v16334_v44 }
 0x735   :  { %13292 = vmatpush1.bf16.msra.mxu0 %v16329_v50 }
 0x736   :  { %13464 = vmatpush1.bf16.msra.mxu1 %v16332_v1  ;;  %13293 = vmatprep.subr.bf16.mxu0 %v16337_v25  ;;  %v16353_v1 = vld [vmem:[#allocation8 + $0x600] ss:$16 sps:$4 sm:$0xff]   ;;  %v16356_v25 = vld [vmem:[#allocation8 + $0x608] ss:$16 sps:$4 sm:$0xff]  }
 0x737   :  { %13465 = vmatprep.subr.bf16.mxu1 %v16340_v13 }
 0x739   :  { %13294 = vmatpush1.bf16.msra.mxu0 %v16335_v3  ;;  %v16361_v3 = vld [vmem:[#allocation8 + $0x624] ss:$16 sps:$4 sm:$0xff]  }
 0x73a   :  { %13466 = vmatpush1.bf16.msra.mxu1 %v16338_v27  ;;  %13295 = vmatprep.subr.bf16.mxu0 %v16343_v59  ;;  %v16364_v27 = vld [vmem:[#allocation8 + $0x62c] ss:$16 sps:$4 sm:$0xff]   ;;  %v16359_v59 = vld [vmem:[#allocation8 + $0x620] ss:$16 sps:$4 sm:$0xff]  }
 0x73b   :  { %13467 = vmatprep.subr.bf16.mxu1 %v16346_v48  ;;  %v16362_v48 = vld [vmem:[#allocation8 + $0x628] ss:$16 sps:$4 sm:$0xff]  }
 0x73d   :  { %13296 = vmatpush1.bf16.msra.mxu0 %v16341_v47  ;;  %v16367_v47 = vld [vmem:[#allocation8 + $0x644] ss:$16 sps:$4 sm:$0xff]  }
 0x73e   :  { %13468 = vmatpush1.bf16.msra.mxu1 %v16344_v49  ;;  %13297 = vmatprep.subr.bf16.mxu0 %v16349_v29  ;;  %v16370_v49 = vld [vmem:[#allocation8 + $0x64c] ss:$16 sps:$4 sm:$0xff]   ;;  %v16365_v29 = vld [vmem:[#allocation8 + $0x640] ss:$16 sps:$4 sm:$0xff]  }
 0x73f   :  { %13469 = vmatprep.subr.bf16.mxu1 %v16352_v60  ;;  %v16368_v60 = vld [vmem:[#allocation8 + $0x648] ss:$16 sps:$4 sm:$0xff]  }
 0x741   :  { %13298 = vmatpush1.bf16.msra.mxu0 %v16347_v61  ;;  %v16373_v61 = vld [vmem:[#allocation8 + $0x664] ss:$16 sps:$4 sm:$0xff]  }
 0x742   :  { %13470 = vmatpush1.bf16.msra.mxu1 %v16350_v7  ;;  %13310 = vmatprep.subr.bf16.mxu0 %v16355_v5  ;;  %v16376_v7 = vld [vmem:[#allocation8 + $0x66c] ss:$16 sps:$4 sm:$0xff]   ;;  %v16371_v5 = vld [vmem:[#allocation8 + $0x660] ss:$16 sps:$4 sm:$0xff]  }
 0x743   :  { %13482 = vmatprep.subr.bf16.mxu1 %v16358_v0  ;;  %v16374_v0 = vld [vmem:[#allocation8 + $0x668] ss:$16 sps:$4 sm:$0xff]  }
 0x757   :  { %v11058_v16 = vpop.f32.mrb[4].mxu0  ;;  %v11574_v23 = vpop.f32.mrb[4].mxu1 }
 0x758   :  { %v15831_v8 = vadd.f32 %v11058_v16, %v1698_v9  ;;  %v11060_v10 = vpop.f32.mrb[5].mxu0  ;;  %v15835_v11 = vadd.f32 %v11574_v23, %v1706_v62  ;;  %v11576_v15 = vpop.f32.mrb[5].mxu1  ;;  %v16394_v16 = vld [vmem:[#allocation8 + $0x6cc] ss:$16 sps:$4 sm:$0xff]   ;;  %v16392_v23 = vld [vmem:[#allocation8 + $0x6c8] ss:$16 sps:$4 sm:$0xff]  }
 0x759   :  { %v15832_v33 = vadd.f32 %v11060_v10, %v1702_v6  ;;  %v11062_v2 = vpop.f32.mrb[6].mxu0  ;;  %v15836_v34 = vadd.f32 %v11576_v15, %v1710_v19  ;;  %v11578_v58 = vpop.f32.mrb[6].mxu1  ;;  %v16397_v10 = vld [vmem:[#allocation8 + $0x6e4] ss:$16 sps:$4 sm:$0xff]   ;;  %v16398_v15 = vld [vmem:[#allocation8 + $0x6e8] ss:$16 sps:$4 sm:$0xff]  }
 0x75a   :  { %v11587_v57 = vmax.f32 %v15831_v8, 0.0  ;;  %v15833_v26 = vadd.f32 %v11062_v2, %v1698_v9  ;;  %v11064_v45 = vpop.f32.mrb[7].mxu0  ;;  %v11589_v38 = vmax.f32 %v15835_v11, 0.0  ;;  %v15837_v4 = vadd.f32 %v11578_v58, %v1706_v62  ;;  %v11580_v14 = vpop.f32.mrb[7].mxu1  ;;  %v16388_v9 = vld [vmem:[#allocation8 + $0x6ac] ss:$16 sps:$4 sm:$0xff]  }
 0x75b   :  { %v11588_v28 = vmax.f32 %v15832_v33, 0.0  ;;  %v15834_v39 = vadd.f32 %v11064_v45, %v1702_v6  ;;  %v11590_v31 = vmax.f32 %v15836_v34, 0.0  ;;  %v15838_v63 = vadd.f32 %v11580_v14, %v1710_v19  ;;  %v16383_v62 = vld [vmem:[#allocation8 + $0x6a0] ss:$16 sps:$4 sm:$0xff]   ;;  %v16386_v6 = vld [vmem:[#allocation8 + $0x6a8] ss:$16 sps:$4 sm:$0xff]  }
 0x75c   :  { %v11595_v22 = vmax.f32 %v15833_v26, 0.0  ;;  %v11597_v53 = vmax.f32 %v15837_v4, 0.0  ;;  %v11603_v12 = vmin.f32 %v11587_v57, 6.0  ;;  %v11605_v52 = vmin.f32 %v11589_v38, 6.0  ;;  %v16391_v19 = vld [vmem:[#allocation8 + $0x6c4] ss:$16 sps:$4 sm:$0xff]  }
 0x75d   :  { %v11596_v35 = vmax.f32 %v15834_v39, 0.0  ;;  %v11598_v18 = vmax.f32 %v15838_v63, 0.0  ;;  %v11604_v41 = vmin.f32 %v11588_v28, 6.0  ;;  %v11606_v20 = vmin.f32 %v11590_v31, 6.0  ;;  %v16389_v8 = vld [vmem:[#allocation8 + $0x6c0] ss:$16 sps:$4 sm:$0xff]  }
 0x75e   :  { %v11611_v17 = vmin.f32 %v11595_v22, 6.0  ;;  %v11613_v42 = vmin.f32 %v11597_v53, 6.0  ;;  %v16400_v11 = vld [vmem:[#allocation8 + $0x6ec] ss:$16 sps:$4 sm:$0xff]   ;;  %v16395_v33 = vld [vmem:[#allocation8 + $0x6e0] ss:$16 sps:$4 sm:$0xff]  }
 0x75f   :  { %v11612_v21 = vmin.f32 %v11596_v35, 6.0  ;;  %v11614_v43 = vmin.f32 %v11598_v18, 6.0  ;;  %v16403_v2 = vld [vmem:[#allocation8 + $0x704] ss:$16 sps:$4 sm:$0xff]   ;;  %v16406_v57 = vld [vmem:[#allocation8 + $0x70c] ss:$16 sps:$4 sm:$0xff]  }
 0x760   :  { %v11619_v40 = vpack.c.bf16 %v11611_v17, %v11603_v12  ;;  %v17104_v44 = vpack.c.bf16 %v11613_v42, %v11605_v52  ;;  %v16401_v34 = vld [vmem:[#allocation8 + $0x700] ss:$16 sps:$4 sm:$0xff]   ;;  %v16404_v26 = vld [vmem:[#allocation8 + $0x708] ss:$16 sps:$4 sm:$0xff]   ;;  %v16409_v58 = vld [vmem:[#allocation8 + $0x724] ss:$16 sps:$4 sm:$0xff]  }
 0x761   :  { %v11620_v50 = vpack.c.bf16 %v11612_v21, %v11604_v41  ;;  %v11622_v13 = vpack.c.bf16 %v11614_v43, %v11606_v20  ;;  %v16412_v45 = vld [vmem:[#allocation8 + $0x72c] ss:$16 sps:$4 sm:$0xff]   ;;  %v16407_v38 = vld [vmem:[#allocation8 + $0x720] ss:$16 sps:$4 sm:$0xff]   ;;  %v16410_v28 = vld [vmem:[#allocation8 + $0x728] ss:$16 sps:$4 sm:$0xff]  }
 0x762   :  { %v16415_v4 = vld [vmem:[#allocation8 + $0x744] ss:$16 sps:$4 sm:$0xff]   ;;  %v16418_v39 = vld [vmem:[#allocation8 + $0x74c] ss:$16 sps:$4 sm:$0xff]   ;;  %v16413_v14 = vld [vmem:[#allocation8 + $0x740] ss:$16 sps:$4 sm:$0xff]  }
 0x763   :  { %13299 = vmatprep.mubr.bf16.mxu0 %v11620_v50  ;;  %13471 = vmatprep.mubr.bf16.mxu1 %v11620_v50  ;;  %v16416_v31 = vld [vmem:[#allocation8 + $0x748] ss:$16 sps:$4 sm:$0xff]   ;;  %v16421_v22 = vld [vmem:[#allocation8 + $0x764] ss:$16 sps:$4 sm:$0xff]   ;;  %v16424_v63 = vld [vmem:[#allocation8 + $0x76c] ss:$16 sps:$4 sm:$0xff]  }
 0x764   :  { %13300 = vmatmul.mubr.bf16.vlgmr.msra.gmra.mrb[8].mxu0 %v11619_v40  ;;  %13472 = vmatmul.mubr.bf16.vlgmr.msra.gmra.mrb[8].mxu1 %v11619_v40  ;;  %v16419_v53 = vld [vmem:[#allocation8 + $0x760] ss:$16 sps:$4 sm:$0xff]   ;;  %v16422_v35 = vld [vmem:[#allocation8 + $0x768] ss:$16 sps:$4 sm:$0xff]   ;;  %v16427_v12 = vld [vmem:[#allocation8 + $0x784] ss:$16 sps:$4 sm:$0xff]  }
 0x765   :  { %13311 = vmatpush1.bf16.msra.mxu0 %v16353_v1  ;;  %13483 = vmatpush1.bf16.msra.mxu1 %v16356_v25  ;;  %v16430_v17 = vld [vmem:[#allocation8 + $0x78c] ss:$16 sps:$4 sm:$0xff]   ;;  %v16425_v18 = vld [vmem:[#allocation8 + $0x780] ss:$16 sps:$4 sm:$0xff]   ;;  %v16428_v52 = vld [vmem:[#allocation8 + $0x788] ss:$16 sps:$4 sm:$0xff]  }
 0x766   :  { %13342 = vmatprep.mubr.bf16.mxu0 %v11622_v13  ;;  %13514 = vmatprep.mubr.bf16.mxu1 %v11622_v13  ;;  %v16433_v41 = vld [vmem:[#allocation8 + $0x7a4] ss:$16 sps:$4 sm:$0xff]   ;;  %v16436_v42 = vld [vmem:[#allocation8 + $0x7ac] ss:$16 sps:$4 sm:$0xff]   ;;  %v16431_v21 = vld [vmem:[#allocation8 + $0x7a0] ss:$16 sps:$4 sm:$0xff]  }
 0x767   :  { %13312 = vmatprep.subr.bf16.mxu0 %v16361_v3  ;;  %13484 = vmatprep.subr.bf16.mxu1 %v16364_v27  ;;  %v16434_v20 = vld [vmem:[#allocation8 + $0x7a8] ss:$16 sps:$4 sm:$0xff]   ;;  %v16439_v40 = vld [vmem:[#allocation8 + $0x7c4] ss:$16 sps:$4 sm:$0xff]   ;;  %v16442_v43 = vld [vmem:[#allocation8 + $0x7cc] ss:$16 sps:$4 sm:$0xff]  }
 0x768   :  { %v16437_v50 = vld [vmem:[#allocation8 + $0x7c0] ss:$16 sps:$4 sm:$0xff]   ;;  %v16440_v1 = vld [vmem:[#allocation8 + $0x7c8] ss:$16 sps:$4 sm:$0xff]   ;;  %v16445_v25 = vld [vmem:[#allocation8 + $0x7e4] ss:$16 sps:$4 sm:$0xff]  }
 0x769   :  { %13313 = vmatpush1.bf16.msra.mxu0 %v16359_v59  ;;  %13485 = vmatpush1.bf16.msra.mxu1 %v16362_v48  ;;  %v16448_v13 = vld [vmem:[#allocation8 + $0x7ec] ss:$16 sps:$4 sm:$0xff]   ;;  %v16443_v3 = vld [vmem:[#allocation8 + $0x7e0] ss:$16 sps:$4 sm:$0xff]   ;;  %v16446_v27 = vld [vmem:[#allocation8 + $0x7e8] ss:$16 sps:$4 sm:$0xff]  }
 0x76a   :  { %13314 = vmatprep.subr.bf16.mxu0 %v16367_v47  ;;  %13486 = vmatprep.subr.bf16.mxu1 %v16370_v49  ;;  %v16449_v59 = vld [vmem:[#allocation11 + $0x40] sm:$0xff]  }
 0x76b   :  { %v16450_v48 = vld [vmem:[#allocation11 + $0xc0] sm:$0xff]  }
 0x76c   :  { %v16451_v47 = vld [vmem:[#allocation11] sm:$0xff]  }
 0x76d   :  { %13315 = vmatpush1.bf16.msra.mxu0 %v16365_v29  ;;  %13487 = vmatpush1.bf16.msra.mxu1 %v16368_v60  ;;  %v16452_v49 = vld [vmem:[#allocation11 + $0x80] sm:$0xff]   ;;  %v16453_v29 = vld [vmem:[#allocation11 + $0x48] sm:$0xff]  }
 0x76e   :  { %13316 = vmatprep.subr.bf16.mxu0 %v16373_v61  ;;  %13488 = vmatprep.subr.bf16.mxu1 %v16376_v7  ;;  %v16454_v60 = vld [vmem:[#allocation11 + $0xc8] sm:$0xff]  }
 0x76f   :  { %v16455_v61 = vld [vmem:[#allocation11 + $0x8] sm:$0xff]  }
 0x770   :  { %v16456_v7 = vld [vmem:[#allocation11 + $0x88] sm:$0xff]  }
 0x771   :  { %13317 = vmatpush1.bf16.msra.mxu0 %v16371_v5  ;;  %13489 = vmatpush1.bf16.msra.mxu1 %v16374_v0  ;;  %v16457_v5 = vld [vmem:[#allocation11 + $0x50] sm:$0xff]  }
 0x772   :  { %13318 = vmatprep.subr.bf16.mxu0 %v16379_v56  ;;  %13490 = vmatprep.subr.bf16.mxu1 %v16382_v32  ;;  %v16458_v0 = vld [vmem:[#allocation11 + $0xd0] sm:$0xff]  }
 0x773   :  { %v16459_v56 = vld [vmem:[#allocation11 + $0x10] sm:$0xff]  }
 0x774   :  { %v16460_v32 = vld [vmem:[#allocation11 + $0x90] sm:$0xff]  }
 0x775   :  { %13319 = vmatpush1.bf16.msra.mxu0 %v16377_v51  ;;  %13491 = vmatpush1.bf16.msra.mxu1 %v16380_v46  ;;  %v16461_v51 = vld [vmem:[#allocation11 + $0x58] sm:$0xff]  }
 0x776   :  { %13320 = vmatprep.subr.bf16.mxu0 %v16385_v55  ;;  %13492 = vmatprep.subr.bf16.mxu1 %v16388_v9  ;;  %v16462_v46 = vld [vmem:[#allocation11 + $0xd8] sm:$0xff]   ;;  %v16465_v9 = vld [vmem:[#allocation11 + $0x60] sm:$0xff]  }
 0x777   :  { %v16463_v55 = vld [vmem:[#allocation11 + $0x18] sm:$0xff]  }
 0x779   :  { %13321 = vmatpush1.bf16.msra.mxu0 %v16383_v62  ;;  %13493 = vmatpush1.bf16.msra.mxu1 %v16386_v6  ;;  %v16466_v62 = vld [vmem:[#allocation11 + $0xe0] sm:$0xff]  }
 0x77a   :  { %13322 = vmatprep.subr.bf16.mxu0 %v16391_v19  ;;  %13494 = vmatprep.subr.bf16.mxu1 %v16394_v16  ;;  %v16467_v6 = vld [vmem:[#allocation11 + $0x20] sm:$0xff]   ;;  %v16469_v16 = vld [vmem:[#allocation11 + $0x68] sm:$0xff]  }
 0x77b   :  { %v16468_v19 = vld [vmem:[#allocation11 + $0xa0] sm:$0xff]  }
 0x77d   :  { %13323 = vmatpush1.bf16.msra.mxu0 %v16389_v8  ;;  %13495 = vmatpush1.bf16.msra.mxu1 %v16392_v23  ;;  %v16470_v8 = vld [vmem:[#allocation11 + $0xe8] sm:$0xff]  }
 0x77e   :  { %13324 = vmatprep.subr.bf16.mxu0 %v16397_v10  ;;  %13496 = vmatprep.subr.bf16.mxu1 %v16400_v11  ;;  %v16471_v23 = vld [vmem:[#allocation11 + $0x28] sm:$0xff]   ;;  %v16473_v11 = vld [vmem:[#allocation11 + $0x70] sm:$0xff]  }
 0x77f   :  { %v16472_v10 = vld [vmem:[#allocation11 + $0xa8] sm:$0xff]  }
 0x781   :  { %13325 = vmatpush1.bf16.msra.mxu0 %v16395_v33  ;;  %13497 = vmatpush1.bf16.msra.mxu1 %v16398_v15  ;;  %v16474_v33 = vld [vmem:[#allocation11 + $0xf0] sm:$0xff]  }
 0x782   :  { %13326 = vmatprep.subr.bf16.mxu0 %v16403_v2  ;;  %13498 = vmatprep.subr.bf16.mxu1 %v16406_v57  ;;  %v16475_v15 = vld [vmem:[#allocation11 + $0x30] sm:$0xff]   ;;  %v16477_v57 = vld [vmem:[#allocation11 + $0x78] sm:$0xff]  }
 0x783   :  { %v16476_v2 = vld [vmem:[#allocation11 + $0xb0] sm:$0xff]  }
 0x785   :  { %13327 = vmatpush1.bf16.msra.mxu0 %v16401_v34  ;;  %13499 = vmatpush1.bf16.msra.mxu1 %v16404_v26  ;;  %v16478_v34 = vld [vmem:[#allocation11 + $0xf8] sm:$0xff]  }
 0x786   :  { %13328 = vmatprep.subr.bf16.mxu0 %v16409_v58  ;;  %13500 = vmatprep.subr.bf16.mxu1 %v16412_v45  ;;  %v16479_v26 = vld [vmem:[#allocation11 + $0x38] sm:$0xff]  }
 0x787   :  { %v16480_v58 = vld [vmem:[#allocation11 + $0xb8] sm:$0xff]  }
 0x788   :  { %v11879_v45 = vld [vmem:[#allocation10] sm:$0xf] }
 0x789   :  { %13329 = vmatpush1.bf16.msra.mxu0 %v16407_v38  ;;  %13501 = vmatpush1.bf16.msra.mxu1 %v16410_v28  ;;  %v11884_v38 = vrot.slane %v11879_v45, %v1681_v24  ;;  %v11892_v28 = vrot.slane %v11879_v45, %v1689_v54 }
 0x78a   :  { %13330 = vmatprep.subr.bf16.mxu0 %v16415_v4  ;;  %13502 = vmatprep.subr.bf16.mxu1 %v16418_v39  ;;  %v11888_v4 = vrot.slane %v11879_v45, %v1685_v36  ;;  %v11896_v39 = vrot.slane %v11879_v45, %v1693_v37 }
 0x78d   :  { %13331 = vmatpush1.bf16.msra.mxu0 %v16413_v14  ;;  %13503 = vmatpush1.bf16.msra.mxu1 %v16416_v31 }
 0x78e   :  { %13332 = vmatprep.subr.bf16.mxu0 %v16421_v22  ;;  %13504 = vmatprep.subr.bf16.mxu1 %v16424_v63 }
 0x791   :  { %13333 = vmatpush1.bf16.msra.mxu0 %v16419_v53  ;;  %13505 = vmatpush1.bf16.msra.mxu1 %v16422_v35 }
 0x792   :  { %13334 = vmatprep.subr.bf16.mxu0 %v16427_v12  ;;  %13506 = vmatprep.subr.bf16.mxu1 %v16430_v17 }
 0x795   :  { %13335 = vmatpush1.bf16.msra.mxu0 %v16425_v18  ;;  %13507 = vmatpush1.bf16.msra.mxu1 %v16428_v52 }
 0x796   :  { %13336 = vmatprep.subr.bf16.mxu0 %v16433_v41  ;;  %13508 = vmatprep.subr.bf16.mxu1 %v16436_v42 }
 0x799   :  { %13337 = vmatpush1.bf16.msra.mxu0 %v16431_v21  ;;  %13509 = vmatpush1.bf16.msra.mxu1 %v16434_v20 }
 0x79a   :  { %13338 = vmatprep.subr.bf16.mxu0 %v16439_v40  ;;  %13510 = vmatprep.subr.bf16.mxu1 %v16442_v43 }
 0x79d   :  { %13339 = vmatpush1.bf16.msra.mxu0 %v16437_v50  ;;  %13511 = vmatpush1.bf16.msra.mxu1 %v16440_v1 }
 0x79e   :  { %13340 = vmatprep.subr.bf16.mxu0 %v16445_v25  ;;  %13512 = vmatprep.subr.bf16.mxu1 %v16448_v13 }
 0x7a1   :  { %13341 = vmatpush1.bf16.msra.mxu0 %v16443_v3  ;;  %13513 = vmatpush1.bf16.msra.mxu1 %v16446_v27 }
 0x7a2   :  { %15779 = vmatprep.subr.bf16.mxu0 %v16449_v59  ;;  %15801 = vmatprep.subr.bf16.mxu1 %v16450_v48 }
 0x7a4   :  { %13343 = vmatmul.mubr.bf16.vlgmr.msra.gmra.mrb[8].mxu0 %v17104_v44  ;;  %13515 = vmatmul.mubr.bf16.vlgmr.msra.gmra.mrb[8].mxu1 %v17104_v44  ;;  %v16464_v44 = vld [vmem:[#allocation11 + $0x98] sm:$0xff]  }
 0x7a5   :  { %15780 = vmatpush3.bf16.msra.mxu0 %v16451_v47  ;;  %15802 = vmatpush3.bf16.msra.mxu1 %v16452_v49 }
 0x7a6   :  { %15781 = vmatprep.subr.bf16.mxu0 %v16453_v29  ;;  %15803 = vmatprep.subr.bf16.mxu1 %v16454_v60 }
 0x7a9   :  { %15782 = vmatpush3.bf16.msra.mxu0 %v16455_v61  ;;  %15804 = vmatpush3.bf16.msra.mxu1 %v16456_v7 }
 0x7aa   :  { %15783 = vmatprep.subr.bf16.mxu0 %v16457_v5  ;;  %15805 = vmatprep.subr.bf16.mxu1 %v16458_v0 }
 0x7ad   :  { %15784 = vmatpush3.bf16.msra.mxu0 %v16459_v56  ;;  %15806 = vmatpush3.bf16.msra.mxu1 %v16460_v32  ;;  %v15746_v32 = vld [vmem:[#allocation13] ss:$0 sm:$0xff] }
 0x7ae   :  { %15785 = vmatprep.subr.bf16.mxu0 %v16461_v51  ;;  %15807 = vmatprep.subr.bf16.mxu1 %v16462_v46 }
 0x7b1   :  { %15786 = vmatpush3.bf16.msra.mxu0 %v16463_v55  ;;  %15808 = vmatpush3.bf16.msra.mxu1 %v16464_v44 }
 0x7b2   :  { %15787 = vmatprep.subr.bf16.mxu0 %v16465_v9  ;;  %15809 = vmatprep.subr.bf16.mxu1 %v16466_v62 }
 0x7b5   :  { %15788 = vmatpush3.bf16.msra.mxu0 %v16467_v6  ;;  %15810 = vmatpush3.bf16.msra.mxu1 %v16468_v19 }
 0x7b6   :  { %15789 = vmatprep.subr.bf16.mxu0 %v16469_v16  ;;  %15811 = vmatprep.subr.bf16.mxu1 %v16470_v8 }
 0x7b9   :  { %15790 = vmatpush3.bf16.msra.mxu0 %v16471_v23  ;;  %15812 = vmatpush3.bf16.msra.mxu1 %v16472_v10 }
 0x7ba   :  { %15791 = vmatprep.subr.bf16.mxu0 %v16473_v11  ;;  %15813 = vmatprep.subr.bf16.mxu1 %v16474_v33 }
 0x7bd   :  { %15792 = vmatpush3.bf16.msra.mxu0 %v16475_v15  ;;  %15814 = vmatpush3.bf16.msra.mxu1 %v16476_v2 }
 0x7be   :  { %15793 = vmatprep.subr.bf16.mxu0 %v16477_v57  ;;  %15815 = vmatprep.subr.bf16.mxu1 %v16478_v34 }
 0x7c1   :  { %15794 = vmatpush3.bf16.msra.mxu0 %v16479_v26  ;;  %15816 = vmatpush3.bf16.msra.mxu1 %v16480_v58 }
 0x877   :  { %v13344_v14 = vpop.f32.mrb[8].mxu0  ;;  %v13516_v31 = vpop.f32.mrb[8].mxu1 }
 0x878   :  { %v15839_v22 = vadd.f32 %v13344_v14, %v11884_v38  ;;  %v15843_v63 = vadd.f32 %v13516_v31, %v11892_v28  ;;  %v13346_v53 = vpop.f32.mrb[9].mxu0  ;;  %v13518_v35 = vpop.f32.mrb[9].mxu1 }
 0x879   :  { %v15840_v12 = vadd.f32 %v13346_v53, %v11888_v4  ;;  %v15844_v17 = vadd.f32 %v13518_v35, %v11896_v39  ;;  %v13348_v18 = vpop.f32.mrb[10].mxu0  ;;  %v13520_v52 = vpop.f32.mrb[10].mxu1 }
 0x87a   :  { %v13525_v24 = vmax.f32 %v15839_v22, 0.0  ;;  %v13527_v41 = vmax.f32 %v15843_v63, 0.0  ;;  %v15841_v42 = vadd.f32 %v13348_v18, %v11884_v38  ;;  %v15845_v54 = vadd.f32 %v13520_v52, %v11892_v28  ;;  %v13350_v21 = vpop.f32.mrb[11].mxu0  ;;  %v13522_v20 = vpop.f32.mrb[11].mxu1 }
 0x87b   :  { %v13526_v36 = vmax.f32 %v15840_v12, 0.0  ;;  %v13528_v40 = vmax.f32 %v15844_v17, 0.0  ;;  %v15842_v30 = vadd.f32 %v13350_v21, %v11888_v4  ;;  %v15846_v37 = vadd.f32 %v13522_v20, %v11896_v39 }
 0x87c   :  { %v13529_v43 = vmax.f32 %v15841_v42, 0.0  ;;  %v13531_v50 = vmax.f32 %v15845_v54, 0.0  ;;  %v13533_v13 = vmin.f32 %v13525_v24, 6.0  ;;  %v13535_v3 = vmin.f32 %v13527_v41, 6.0 }
 0x87d   :  { %v13530_v1 = vmax.f32 %v15842_v30, 0.0  ;;  %v13532_v25 = vmax.f32 %v15846_v37, 0.0  ;;  %v13534_v48 = vmin.f32 %v13526_v36, 6.0  ;;  %v13536_v47 = vmin.f32 %v13528_v40, 6.0 }
 0x87e   :  { %v13537_v27 = vmin.f32 %v13529_v43, 6.0  ;;  %v13539_v59 = vmin.f32 %v13531_v50, 6.0 }
 0x87f   :  { %v13538_v49 = vmin.f32 %v13530_v1, 6.0  ;;  %v13540_v29 = vmin.f32 %v13532_v25, 6.0 }
 0x880   :  { %v13541_v60 = vpack.c.bf16 %v13537_v27, %v13533_v13  ;;  %v13543_v61 = vpack.c.bf16 %v13539_v59, %v13535_v3 }
 0x881   :  { %v13542_v7 = vpack.c.bf16 %v13538_v49, %v13534_v48  ;;  %v13544_v5 = vpack.c.bf16 %v13540_v29, %v13536_v47 }
 0x883   :  { %13840 = vmatprep.mubr.bf16.mxu0 %v13542_v7  ;;  %13881 = vmatprep.mubr.bf16.mxu1 %v13544_v5 }
 0x884   :  { %13841 = vmatmul.mubr.bf16.vlgmr.msra.gmra.mrb[12].mxu0 %v13541_v60  ;;  %13882 = vmatmul.mubr.bf16.vlgmr.msra.gmra.mrb[12].mxu1 %v13543_v61 }
 0x957   :  { %v15795_v0 = vpop.f32.mrb[12].mxu0  ;;  %v15817_v56 = vpop.f32.mrb[12].mxu1 }
 0x958   :  { %v15796_v51 = vpop.f32.mrb[13].mxu0  ;;  %v15818_v46 = vpop.f32.mrb[13].mxu1 }
 0x959   :  { %v15797_v55 = vadd.f32 %v15796_v51, %v15795_v0  ;;  %v15819_v44 = vadd.f32 %v15818_v46, %v15817_v56  ;;  %v15798_v9 = vpop.f32.mrb[14].mxu0  ;;  %v15820_v62 = vpop.f32.mrb[14].mxu1 }
 0x95a   :  { %v15799_v6 = vpop.f32.mrb[15].mxu0  ;;  %v15821_v19 = vpop.f32.mrb[15].mxu1 }
 0x95b   :  { %v13843_v16 = vadd.f32 %v15797_v55, %v15746_v32  ;;  %v15800_v8 = vadd.f32 %v15799_v6, %v15798_v9  ;;  %v15822_v23 = vadd.f32 %v15821_v19, %v15820_v62 }
 0x95d   :  { %v13846_v10 = vadd.f32 %v15800_v8, %v15746_v32  ;;  %v13884_v11 = vadd.f32 %v15819_v44, %v13843_v16 }
 0x95f   :  { %13890 = vmax.xlane.f32.xlu0 %v13884_v11  ;;  %v13887_v33 = vadd.f32 %v15822_v23, %v13846_v10 }
 0x963   :  { %13892 = vmax.xlane.f32.xlu0 %v13887_v33 }
 0x9ec   :  { %v13891_v15 = vpop.xlane.xlu0 %13890 }
 0x9ed   :  { %v13894_v2 = vsub.f32 %v13884_v11, %v13891_v15 }
 0x9ef   :  { %v13896_v57 = vmul.f32 1.442695, %v13894_v2 }
 0x9f0   :  { %v13893_v34 = vpop.xlane.xlu0 %13892 }
 0x9f1   :  { %16481 = vpow2.f32 %v13896_v57  ;;  %v13895_v26 = vsub.f32 %v13887_v33, %v13893_v34 }
 0x9f3   :  { %v13898_v58 = vmul.f32 1.442695, %v13895_v26 }
 0x9f5   :  { %16483 = vpow2.f32 %v13898_v58 }
 0x9fb   :  { %v16482_v45 = vpop.eup %16481 }
 0x9fc   :  { %13900 = vadd.xlane.f32.xlu1 %v16482_v45 }
 0x9ff   :  { %v16484_v38 = vpop.eup %16483 }
 0xa00   :  { %13902 = vadd.xlane.f32.xlu1 %v16484_v38 }
 0xa89   :  { %v13901_v28 = vpop.xlane.xlu1 %13900 }
 0xa8a   :  { %16485 = vrcp.f32 %v13901_v28 }
 0xa8d   :  { %v13903_v4 = vpop.xlane.xlu1 %13902 }
 0xa8e   :  { %16487 = vrcp.f32 %v13903_v4 }
 0xa94   :  { %v16486_v39 = vpop.eup %16485 }
 0xa95   :  { %v13905_v14 = vmul.f32 %v16486_v39, %v16482_v45 }
 0xa97   :  { %13908 = vst [vmem:[#allocation14] sm:$0xff] %v13905_v14 }
 0xa98   :  { %v16488_v31 = vpop.eup %16487 }
 0xa99   :  { %v13907_v22 = vmul.f32 %v16488_v31, %v16484_v38 }
 0xa9b   :  { %13909 = vst [vmem:[#allocation14 + $0x8] sm:$0xff] %v13907_v22 }
 0xa9c   :  { %16655 = shalt.err (!%p16652_p4)
}
 0xa9d   :  { %s16656_s17 = scalar_lea.hbm %s17135_s7, 256 }
 0xa9e   :  { %p16657_p5 = scmp.ne.s32.totalorder %s17135_s7, %s16656_s17  ;;  %p16660_p6 = scmp.lt.u32.totalorder %s16656_s17, %s17135_s7 }
 0xaa0   :  { %p16662_p7 = pnand %p16660_p6, %p16657_p5 }
 0xaa2   :  { %16665 = shalt.err (!%p16662_p7)
}
 0xaa3   :  { %s16692_s22 = smov 128   ;;  %s16693_s23 = smov 8  }
 0xaa4   :  { %13921 = dma.vmem_to_hbm [thread:$0]  %s13916_s3, 256, %s17135_s7, [#allocation4], %s16692_s22, %s16692_s22, %s16693_s23  }
 0xaa5   :  { %16674 = dma.done.wait [#allocation4], 256  }
 0xaa6   :  { %16675 = vsyncadd [#allocation4], 4294967040 }
 0xaa7   :  { %13925 = vsyncpa [#allocation3], 1 }
 0xaa8   :  { %13926 = vsyncpa [#allocation6], 1 }
 0xaa9   :  { %13927 = vsyncpa [#allocation9], 1 }
 0xaaa   :  { %13928 = vsyncpa [#allocation12], 1 }
 0xaab   :  { %13929 = vsyncpa [#allocation4], 1 }

</bundles_post_ra>
